<compile_context>
chip_gen: v7x
topology: tpu7x:2x2x1
jax: 0.10.0
libtpu: 0.0.40
codegen_flags: <defaults>
</compile_context>

<pallas_src>
import functools

import jax
import jax.numpy as jnp
from jax.experimental import pallas as pl
from jax.experimental.pallas import tpu as pltpu

EPS = 1e-5

_VMEM = pl.BlockSpec(memory_space=pltpu.MemorySpace.VMEM)


# ----------------------------- fused Pallas kernel -----------------------------

def _fused_model_kernel(p1_ref, w1_ref, b1_ref, g1_ref, be1_ref,
                        w2_ref, b2_ref, g2_ref, be2_ref,
                        w3_ref, b3_ref, g3_ref, be3_ref,
                        mask_ref, sel_ref, out_ref,
                        a1_ref, a2_ref,
                        *, wp, m_rows, guard, count, eps):
    """Whole forward pass. Shapes (rows = N*(Ho+2)*(Wo+2) padded to mult of 8):
       p1_ref  [M, k*k*Cin]   layer-1 im2col patches on the padded output grid
       w*_ref  layer-1 GEMM matrix / per-tap weights [9, Cin, Cout]
       mask    [M, 1]  1.0 on interior (valid) rows, 0.0 on border/pad rows
       sel     [N, M]  per-image average-pool matrix (mask * 1/(Ho*Wo))
       a1/a2   VMEM scratch [guard + M + guard, C] with zero guard rows."""
    mask = mask_ref[...]
    inv_count = 1.0 / count

    def act_bn(z, b, g, be, neg_slope):
        a = z + b
        a = jnp.where(a >= 0.0, a, neg_slope * a)          # LeakyReLU / ReLU
        am = a * mask                                       # exclude border/pad rows
        mean = jnp.sum(am, axis=0, keepdims=True) * inv_count
        ex2 = jnp.sum(am * a, axis=0, keepdims=True) * inv_count
        var = ex2 - mean * mean                             # biased (training-mode) var
        # mask again so border rows are exact zeros -> next layer's padding
        return ((a - mean) * jax.lax.rsqrt(var + eps) * g + be) * mask

    # ---- Layer 1: Conv(3->8, k5, s2, p1) as one GEMM on precomputed patches ----
    z1 = jnp.dot(p1_ref[...], w1_ref[...], preferred_element_type=jnp.float32)
    y1 = act_bn(z1, b1_ref[...], g1_ref[...], be1_ref[...], 0.01)
    a1_ref[...] = jnp.zeros_like(a1_ref)                    # zero guard rows
    a1_ref[pl.ds(guard, m_rows), :] = y1

    def conv3x3(src_ref, w_ref):
        # 3x3 / stride-1 / pad-1 conv on the padded-grid layout:
        # tap (di, dj) is a row-shift of (di-1)*Wp + (dj-1); accumulate 9 GEMMs.
        z = None
        for t in range(9):
            di, dj = t // 3, t % 3
            off = (di - 1) * wp + (dj - 1)
            slab = src_ref[pl.ds(guard + off, m_rows), :]
            c = jnp.dot(slab, w_ref[t], preferred_element_type=jnp.float32)
            z = c if z is None else z + c
        return z

    # ---- Layer 2: Conv(8->16, k3, s1, p1) ----
    z2 = conv3x3(a1_ref, w2_ref)
    y2 = act_bn(z2, b2_ref[...], g2_ref[...], be2_ref[...], 0.0)
    a2_ref[...] = jnp.zeros_like(a2_ref)
    a2_ref[pl.ds(guard, m_rows), :] = y2

    # ---- Layer 3: Conv(16->5, k3, s1, p1) ----
    z3 = conv3x3(a2_ref, w3_ref)
    y3 = act_bn(z3, b3_ref[...], g3_ref[...], be3_ref[...], 0.0)   # [M, 5]

    # ---- Head: adaptive_avg_pool2d((1,1)) as a GEMM, then softmax ----
    pooled = jnp.dot(sel_ref[...], y3, preferred_element_type=jnp.float32)  # [N, 5]
    mx = jnp.max(pooled, axis=1, keepdims=True)
    e = jnp.exp(pooled - mx)
    out_ref[...] = e / jnp.sum(e, axis=1, keepdims=True)


# ------------------------------- JAX glue (jitted) ---------------------------------

def weight_to_mat(w_oihw):
    """PyTorch [Cout, Cin, kH, kW] -> GEMM matrix [kH*kW*Cin, Cout] (im2col order)."""
    cout, cin, kh, kw = w_oihw.shape
    return jnp.transpose(w_oihw, (2, 3, 1, 0)).reshape(kh * kw * cin, cout)


def _layer1_patches_padded(x_nhwc, k, stride, pad):
    """im2col for the stride-2 first conv, laid out on the (Ho+2, Wo+2) padded
    output grid (border patch rows are zero). Returns ([N, Ho+2, Wo+2, k*k*C], Ho, Wo)."""
    n, h, w, c = x_nhwc.shape
    xp = jnp.pad(x_nhwc, ((0, 0), (pad, pad), (pad, pad), (0, 0)))
    ho = (h + 2 * pad - k) // stride + 1
    wo = (w + 2 * pad - k) // stride + 1
    cols = []
    for i in range(k):
        for j in range(k):
            cols.append(xp[:, i:i + stride * ho:stride, j:j + stride * wo:stride, :])
    patches = jnp.stack(cols, axis=3).reshape(n, ho, wo, k * k * c)
    patches = jnp.pad(patches, ((0, 0), (1, 1), (1, 1), (0, 0)))
    return patches, ho, wo


@jax.jit
def model_forward(x_nchw, params):
    n = x_nchw.shape[0]
    x = jnp.transpose(x_nchw, (0, 2, 3, 1)).astype(jnp.float32)   # NCHW -> NHWC

    patches, ho, wo = _layer1_patches_padded(x, k=5, stride=2, pad=1)
    hp, wp = ho + 2, wo + 2
    m_img = n * hp * wp
    m_rows = ((m_img + 7) // 8) * 8           # sublane-aligned row count
    guard = ((wp + 1 + 7) // 8) * 8           # guard rows >= max row shift (Wp+1)

    k1 = patches.shape[-1]
    p1 = jnp.pad(patches.reshape(m_img, k1), ((0, m_rows - m_img), (0, 0)))

    # Interior-row mask on the padded grid (1.0 where a real conv output lives).
    iy = (jnp.arange(hp) >= 1) & (jnp.arange(hp) <= ho)
    ix = (jnp.arange(wp) >= 1) & (jnp.arange(wp) <= wo)
    mimg = (iy[:, None] & ix[None, :]).astype(jnp.float32).reshape(-1)
    mask = jnp.pad(jnp.tile(mimg, n), (0, m_rows - m_img)).reshape(m_rows, 1)

    # Per-image average-pool selection matrix (mask and 1/(Ho*Wo) folded in).
    img_ids = jnp.repeat(jnp.arange(n), hp * wp)
    img_ids = jnp.pad(img_ids, (0, m_rows - m_img), constant_values=n)
    sel = (img_ids[None, :] == jnp.arange(n)[:, None]).astype(jnp.float32)
    sel = sel * mask.reshape(1, -1) / float(ho * wo)

    c1 = params["w1"].shape[0]
    c2 = params["w2"].shape[0]
    c3 = params["w3"].shape[0]

    w1m = weight_to_mat(params["w1"])                                    # [75, 8]
    w2t = jnp.transpose(params["w2"], (2, 3, 1, 0)).reshape(9, c1, c2)   # [9, 8, 16]
    w3t = jnp.transpose(params["w3"], (2, 3, 1, 0)).reshape(9, c2, c3)   # [9, 16, 5]

    row = lambda v: v.reshape(1, -1)
    kernel = functools.partial(_fused_model_kernel, wp=wp, m_rows=m_rows,
                               guard=guard, count=float(n * ho * wo), eps=EPS)

    return pl.pallas_call(
        kernel,
        out_shape=jax.ShapeDtypeStruct((n, c3), jnp.float32),
        in_specs=[_VMEM] * 15,
        out_specs=_VMEM,
        scratch_shapes=[
            pltpu.VMEM((2 * guard + m_rows, c1), jnp.float32),
            pltpu.VMEM((2 * guard + m_rows, c2), jnp.float32),
        ],
    )(p1, w1m, row(params["b1"]), row(params["g1"]), row(params["be1"]),
      w2t, row(params["b2"]), row(params["g2"]), row(params["be2"]),
      w3t, row(params["b3"]), row(params["g3"]), row(params["be3"]),
      mask, sel)


# --------------------------- pure-JAX reference ----------------------------

def ref_forward(x_nchw, params):
    def conv(x, w, b, stride, pad):
        y = jax.lax.conv_general_dilated(
            x, w, (stride, stride), [(pad, pad), (pad, pad)],
            dimension_numbers=("NCHW", "OIHW", "NCHW"))
        return y + b[None, :, None, None]

    def bn(x, g, be):
        mean = x.mean(axis=(0, 2, 3), keepdims=True)
        var = ((x - mean) ** 2).mean(axis=(0, 2, 3), keepdims=True)
        return (x - mean) / jnp.sqrt(var + EPS) * g[None, :, None, None] \
            + be[None, :, None, None]

    y = conv(x_nchw, params["w1"], params["b1"], 2, 1)
    y = jnp.where(y >= 0, y, 0.01 * y)
    y = bn(y, params["g1"], params["be1"])
    y = conv(y, params["w2"], params["b2"], 1, 1)
    y = jnp.maximum(y, 0.0)
    y = bn(y, params["g2"], params["be2"])
    y = conv(y, params["w3"], params["b3"], 1, 1)
    y = jnp.maximum(y, 0.0)
    y = bn(y, params["g3"], params["be3"])
    pooled = y.mean(axis=(2, 3))
    return jax.nn.softmax(pooled, axis=1)


# --------------------------------- main ------------------------------------

def init_params(key):
    ks = jax.random.split(key, 6)

    def conv_init(kw, kb, cout, cin, k):
        fan_in = cin * k * k
        std = (2.0 / fan_in) ** 0.5
        w = std * jax.random.normal(kw, (cout, cin, k, k), jnp.float32)
        b = 0.1 * jax.random.normal(kb, (cout,), jnp.float32)
        return w, b

    w1, b1 = conv_init(ks[0], ks[1], 8, 3, 5)
    w2, b2 = conv_init(ks[2], ks[3], 16, 8, 3)
    w3, b3 = conv_init(ks[4], ks[5], 5, 16, 3)
    return dict(
        w1=w1, b1=b1, g1=jnp.ones(8, jnp.float32), be1=jnp.zeros(8, jnp.float32),
        w2=w2, b2=b2, g2=jnp.ones(16, jnp.float32), be2=jnp.zeros(16, jnp.float32),
        w3=w3, b3=b3, g3=jnp.ones(5, jnp.float32), be3=jnp.zeros(5, jnp.float32),
    )


if __name__ == "__main__":
    root = jax.random.PRNGKey(0)
    k_in, k_par = jax.random.split(root)

    # Small shapes consistent with the module: batch=2, in_channels=3, 16x16.
    x = jax.random.normal(k_in, (2, 3, 16, 16), jnp.float32)
    params = init_params(k_par)

    out = jax.block_until_ready(model_forward(x, params))
    ref = jax.block_until_ready(jax.jit(ref_forward)(x, params))

    assert out.shape == (2, 5)
    assert jnp.allclose(jnp.sum(out, axis=1), 1.0, atol=1e-5)
    assert jnp.allclose(out, ref, atol=1e-4, rtol=1e-4), (out, ref)

    print("KERNEL_OK")
</pallas_src>

<mosaic_0001>
module attributes {stable_mosaic.version = 11 : i64} {
  func.func @_fused_model_kernel(%arg0: memref<168x75xf32, #tpu.memory_space<vmem>>, %arg1: memref<75x8xf32, #tpu.memory_space<vmem>>, %arg2: memref<1x8xf32, #tpu.memory_space<vmem>>, %arg3: memref<1x8xf32, #tpu.memory_space<vmem>>, %arg4: memref<1x8xf32, #tpu.memory_space<vmem>>, %arg5: memref<9x8x16xf32, #tpu.memory_space<vmem>>, %arg6: memref<1x16xf32, #tpu.memory_space<vmem>>, %arg7: memref<1x16xf32, #tpu.memory_space<vmem>>, %arg8: memref<1x16xf32, #tpu.memory_space<vmem>>, %arg9: memref<9x16x5xf32, #tpu.memory_space<vmem>>, %arg10: memref<1x5xf32, #tpu.memory_space<vmem>>, %arg11: memref<1x5xf32, #tpu.memory_space<vmem>>, %arg12: memref<1x5xf32, #tpu.memory_space<vmem>>, %arg13: memref<168x1xf32, #tpu.memory_space<vmem>>, %arg14: memref<2x168xf32, #tpu.memory_space<vmem>>, %arg15: memref<2x5xf32, #tpu.memory_space<vmem>>, %arg16: memref<200x8xf32, #tpu.memory_space<vmem>>, %arg17: memref<200x16xf32, #tpu.memory_space<vmem>>) attributes {dimension_semantics = [], scalar_prefetch = 0 : i64, scratch_operands = 2 : i64, tpu.core_type = #tpu.core_type<tc>} {
    %c0 = arith.constant 0 : index
    %c0_0 = arith.constant 0 : index
    %0 = vector.load %arg13[%c0, %c0_0] : memref<168x1xf32, #tpu.memory_space<vmem>>, vector<168x1xf32>
    %c0_1 = arith.constant 0 : index
    %c0_2 = arith.constant 0 : index
    %1 = vector.load %arg0[%c0_1, %c0_2] : memref<168x75xf32, #tpu.memory_space<vmem>>, vector<168x75xf32>
    %c0_3 = arith.constant 0 : index
    %c0_4 = arith.constant 0 : index
    %2 = vector.load %arg1[%c0_3, %c0_4] : memref<75x8xf32, #tpu.memory_space<vmem>>, vector<75x8xf32>
    %cst = arith.constant dense<0.000000e+00> : vector<168x8xf32>
    %3 = tpu.matmul %1, %2, %cst {dimension_numbers = #tpu.dot_dimension_numbers<[1], [0], [0], [1], [0, 0, 1, 1], [], []>} : vector<168x75xf32>, vector<75x8xf32>, vector<168x8xf32> -> vector<168x8xf32>
    %c0_5 = arith.constant 0 : index
    %c0_6 = arith.constant 0 : index
    %4 = vector.load %arg2[%c0_5, %c0_6] : memref<1x8xf32, #tpu.memory_space<vmem>>, vector<1x8xf32>
    %c0_7 = arith.constant 0 : index
    %c0_8 = arith.constant 0 : index
    %5 = vector.load %arg3[%c0_7, %c0_8] : memref<1x8xf32, #tpu.memory_space<vmem>>, vector<1x8xf32>
    %c0_9 = arith.constant 0 : index
    %c0_10 = arith.constant 0 : index
    %6 = vector.load %arg4[%c0_9, %c0_10] : memref<1x8xf32, #tpu.memory_space<vmem>>, vector<1x8xf32>
    %7 = vector.broadcast %4 : vector<1x8xf32> to vector<168x8xf32>
    %8 = arith.addf %3, %7 : vector<168x8xf32>
    %cst_11 = arith.constant 0.000000e+00 : f32
    %9 = vector.broadcast %cst_11 : f32 to vector<168x8xf32>
    %10 = arith.cmpf oge, %8, %9 : vector<168x8xf32>
    %cst_12 = arith.constant 0.00999999977 : f32
    %11 = vector.broadcast %cst_12 : f32 to vector<168x8xf32>
    %12 = arith.mulf %11, %8 : vector<168x8xf32>
    %13 = arith.select %10, %8, %12 : vector<168x8xi1>, vector<168x8xf32>
    %14 = vector.broadcast %0 : vector<168x1xf32> to vector<168x8xf32>
    %15 = arith.mulf %13, %14 : vector<168x8xf32>
    %cst_13 = arith.constant dense<0.000000e+00> : vector<8xf32>
    %16 = vector.multi_reduction <add>, %15, %cst_13 [0] : vector<168x8xf32> to vector<8xf32>
    %17 = vector.shape_cast %16 : vector<8xf32> to vector<1x8xf32>
    %cst_14 = arith.constant 0.0102040814 : f32
    %18 = vector.broadcast %cst_14 : f32 to vector<1x8xf32>
    %19 = arith.mulf %17, %18 : vector<1x8xf32>
    %20 = arith.mulf %15, %13 : vector<168x8xf32>
    %cst_15 = arith.constant dense<0.000000e+00> : vector<8xf32>
    %21 = vector.multi_reduction <add>, %20, %cst_15 [0] : vector<168x8xf32> to vector<8xf32>
    %22 = vector.shape_cast %21 : vector<8xf32> to vector<1x8xf32>
    %cst_16 = arith.constant 0.0102040814 : f32
    %23 = vector.broadcast %cst_16 : f32 to vector<1x8xf32>
    %24 = arith.mulf %22, %23 : vector<1x8xf32>
    %25 = arith.mulf %19, %19 : vector<1x8xf32>
    %26 = arith.subf %24, %25 : vector<1x8xf32>
    %27 = vector.broadcast %19 : vector<1x8xf32> to vector<168x8xf32>
    %28 = arith.subf %13, %27 : vector<168x8xf32>
    %cst_17 = arith.constant 9.99999974E-6 : f32
    %29 = vector.broadcast %cst_17 : f32 to vector<1x8xf32>
    %30 = arith.addf %26, %29 : vector<1x8xf32>
    %31 = math.rsqrt %30 : vector<1x8xf32>
    %32 = vector.broadcast %31 : vector<1x8xf32> to vector<168x8xf32>
    %33 = arith.mulf %28, %32 : vector<168x8xf32>
    %34 = vector.broadcast %5 : vector<1x8xf32> to vector<168x8xf32>
    %35 = arith.mulf %33, %34 : vector<168x8xf32>
    %36 = vector.broadcast %6 : vector<1x8xf32> to vector<168x8xf32>
    %37 = arith.addf %35, %36 : vector<168x8xf32>
    %38 = vector.broadcast %0 : vector<168x1xf32> to vector<168x8xf32>
    %39 = arith.mulf %37, %38 : vector<168x8xf32>
    %cst_18 = arith.constant 0.000000e+00 : f32
    %40 = vector.broadcast %cst_18 : f32 to vector<200x8xf32>
    %c0_19 = arith.constant 0 : index
    %c0_20 = arith.constant 0 : index
    %41 = vector.load %arg16[%c0_19, %c0_20] : memref<200x8xf32, #tpu.memory_space<vmem>>, vector<200x8xf32>
    tpu.vector_store %arg16[%c0_19, %c0_20], %40 {strides = array<i32>} : memref<200x8xf32, #tpu.memory_space<vmem>>, vector<200x8xf32>,
    %c16 = arith.constant 16 : index
    %c0_21 = arith.constant 0 : index
    %42 = vector.load %arg16[%c16, %c0_21] : memref<200x8xf32, #tpu.memory_space<vmem>>, vector<168x8xf32>
    tpu.vector_store %arg16[%c16, %c0_21], %39 {strides = array<i32>} : memref<200x8xf32, #tpu.memory_space<vmem>>, vector<168x8xf32>,
    %c6 = arith.constant 6 : index
    %c0_22 = arith.constant 0 : index
    %43 = vector.load %arg16[%c6, %c0_22] : memref<200x8xf32, #tpu.memory_space<vmem>>, vector<168x8xf32>
    %c0_23 = arith.constant 0 : index
    %c0_24 = arith.constant 0 : index
    %c0_25 = arith.constant 0 : index
    %44 = vector.load %arg5[%c0_23, %c0_24, %c0_25] : memref<9x8x16xf32, #tpu.memory_space<vmem>>, vector<1x8x16xf32>
    %45 = vector.shape_cast %44 : vector<1x8x16xf32> to vector<8x16xf32>
    %cst_26 = arith.constant dense<0.000000e+00> : vector<168x16xf32>
    %46 = tpu.matmul %43, %45, %cst_26 {dimension_numbers = #tpu.dot_dimension_numbers<[1], [0], [0], [1], [0, 0, 1, 1], [], []>} : vector<168x8xf32>, vector<8x16xf32>, vector<168x16xf32> -> vector<168x16xf32>
    %c7 = arith.constant 7 : index
    %c0_27 = arith.constant 0 : index
    %47 = vector.load %arg16[%c7, %c0_27] : memref<200x8xf32, #tpu.memory_space<vmem>>, vector<168x8xf32>
    %c1 = arith.constant 1 : index
    %c0_28 = arith.constant 0 : index
    %c0_29 = arith.constant 0 : index
    %48 = vector.load %arg5[%c1, %c0_28, %c0_29] : memref<9x8x16xf32, #tpu.memory_space<vmem>>, vector<1x8x16xf32>
    %49 = vector.shape_cast %48 : vector<1x8x16xf32> to vector<8x16xf32>
    %cst_30 = arith.constant dense<0.000000e+00> : vector<168x16xf32>
    %50 = tpu.matmul %47, %49, %cst_30 {dimension_numbers = #tpu.dot_dimension_numbers<[1], [0], [0], [1], [0, 0, 1, 1], [], []>} : vector<168x8xf32>, vector<8x16xf32>, vector<168x16xf32> -> vector<168x16xf32>
    %51 = arith.addf %46, %50 : vector<168x16xf32>
    %c8 = arith.constant 8 : index
    %c0_31 = arith.constant 0 : index
    %52 = vector.load %arg16[%c8, %c0_31] : memref<200x8xf32, #tpu.memory_space<vmem>>, vector<168x8xf32>
    %c2 = arith.constant 2 : index
    %c0_32 = arith.constant 0 : index
    %c0_33 = arith.constant 0 : index
    %53 = vector.load %arg5[%c2, %c0_32, %c0_33] : memref<9x8x16xf32, #tpu.memory_space<vmem>>, vector<1x8x16xf32>
    %54 = vector.shape_cast %53 : vector<1x8x16xf32> to vector<8x16xf32>
    %cst_34 = arith.constant dense<0.000000e+00> : vector<168x16xf32>
    %55 = tpu.matmul %52, %54, %cst_34 {dimension_numbers = #tpu.dot_dimension_numbers<[1], [0], [0], [1], [0, 0, 1, 1], [], []>} : vector<168x8xf32>, vector<8x16xf32>, vector<168x16xf32> -> vector<168x16xf32>
    %56 = arith.addf %51, %55 : vector<168x16xf32>
    %c15 = arith.constant 15 : index
    %c0_35 = arith.constant 0 : index
    %57 = vector.load %arg16[%c15, %c0_35] : memref<200x8xf32, #tpu.memory_space<vmem>>, vector<168x8xf32>
    %c3 = arith.constant 3 : index
    %c0_36 = arith.constant 0 : index
    %c0_37 = arith.constant 0 : index
    %58 = vector.load %arg5[%c3, %c0_36, %c0_37] : memref<9x8x16xf32, #tpu.memory_space<vmem>>, vector<1x8x16xf32>
    %59 = vector.shape_cast %58 : vector<1x8x16xf32> to vector<8x16xf32>
    %cst_38 = arith.constant dense<0.000000e+00> : vector<168x16xf32>
    %60 = tpu.matmul %57, %59, %cst_38 {dimension_numbers = #tpu.dot_dimension_numbers<[1], [0], [0], [1], [0, 0, 1, 1], [], []>} : vector<168x8xf32>, vector<8x16xf32>, vector<168x16xf32> -> vector<168x16xf32>
    %61 = arith.addf %56, %60 : vector<168x16xf32>
    %c16_39 = arith.constant 16 : index
    %c0_40 = arith.constant 0 : index
    %62 = vector.load %arg16[%c16_39, %c0_40] : memref<200x8xf32, #tpu.memory_space<vmem>>, vector<168x8xf32>
    %c4 = arith.constant 4 : index
    %c0_41 = arith.constant 0 : index
    %c0_42 = arith.constant 0 : index
    %63 = vector.load %arg5[%c4, %c0_41, %c0_42] : memref<9x8x16xf32, #tpu.memory_space<vmem>>, vector<1x8x16xf32>
    %64 = vector.shape_cast %63 : vector<1x8x16xf32> to vector<8x16xf32>
    %cst_43 = arith.constant dense<0.000000e+00> : vector<168x16xf32>
    %65 = tpu.matmul %62, %64, %cst_43 {dimension_numbers = #tpu.dot_dimension_numbers<[1], [0], [0], [1], [0, 0, 1, 1], [], []>} : vector<168x8xf32>, vector<8x16xf32>, vector<168x16xf32> -> vector<168x16xf32>
    %66 = arith.addf %61, %65 : vector<168x16xf32>
    %c17 = arith.constant 17 : index
    %c0_44 = arith.constant 0 : index
    %67 = vector.load %arg16[%c17, %c0_44] : memref<200x8xf32, #tpu.memory_space<vmem>>, vector<168x8xf32>
    %c5 = arith.constant 5 : index
    %c0_45 = arith.constant 0 : index
    %c0_46 = arith.constant 0 : index
    %68 = vector.load %arg5[%c5, %c0_45, %c0_46] : memref<9x8x16xf32, #tpu.memory_space<vmem>>, vector<1x8x16xf32>
    %69 = vector.shape_cast %68 : vector<1x8x16xf32> to vector<8x16xf32>
    %cst_47 = arith.constant dense<0.000000e+00> : vector<168x16xf32>
    %70 = tpu.matmul %67, %69, %cst_47 {dimension_numbers = #tpu.dot_dimension_numbers<[1], [0], [0], [1], [0, 0, 1, 1], [], []>} : vector<168x8xf32>, vector<8x16xf32>, vector<168x16xf32> -> vector<168x16xf32>
    %71 = arith.addf %66, %70 : vector<168x16xf32>
    %c24 = arith.constant 24 : index
    %c0_48 = arith.constant 0 : index
    %72 = vector.load %arg16[%c24, %c0_48] : memref<200x8xf32, #tpu.memory_space<vmem>>, vector<168x8xf32>
    %c6_49 = arith.constant 6 : index
    %c0_50 = arith.constant 0 : index
    %c0_51 = arith.constant 0 : index
    %73 = vector.load %arg5[%c6_49, %c0_50, %c0_51] : memref<9x8x16xf32, #tpu.memory_space<vmem>>, vector<1x8x16xf32>
    %74 = vector.shape_cast %73 : vector<1x8x16xf32> to vector<8x16xf32>
    %cst_52 = arith.constant dense<0.000000e+00> : vector<168x16xf32>
    %75 = tpu.matmul %72, %74, %cst_52 {dimension_numbers = #tpu.dot_dimension_numbers<[1], [0], [0], [1], [0, 0, 1, 1], [], []>} : vector<168x8xf32>, vector<8x16xf32>, vector<168x16xf32> -> vector<168x16xf32>
    %76 = arith.addf %71, %75 : vector<168x16xf32>
    %c25 = arith.constant 25 : index
    %c0_53 = arith.constant 0 : index
    %77 = vector.load %arg16[%c25, %c0_53] : memref<200x8xf32, #tpu.memory_space<vmem>>, vector<168x8xf32>
    %c7_54 = arith.constant 7 : index
    %c0_55 = arith.constant 0 : index
    %c0_56 = arith.constant 0 : index
    %78 = vector.load %arg5[%c7_54, %c0_55, %c0_56] : memref<9x8x16xf32, #tpu.memory_space<vmem>>, vector<1x8x16xf32>
    %79 = vector.shape_cast %78 : vector<1x8x16xf32> to vector<8x16xf32>
    %cst_57 = arith.constant dense<0.000000e+00> : vector<168x16xf32>
    %80 = tpu.matmul %77, %79, %cst_57 {dimension_numbers = #tpu.dot_dimension_numbers<[1], [0], [0], [1], [0, 0, 1, 1], [], []>} : vector<168x8xf32>, vector<8x16xf32>, vector<168x16xf32> -> vector<168x16xf32>
    %81 = arith.addf %76, %80 : vector<168x16xf32>
    %c26 = arith.constant 26 : index
    %c0_58 = arith.constant 0 : index
    %82 = vector.load %arg16[%c26, %c0_58] : memref<200x8xf32, #tpu.memory_space<vmem>>, vector<168x8xf32>
    %c8_59 = arith.constant 8 : index
    %c0_60 = arith.constant 0 : index
    %c0_61 = arith.constant 0 : index
    %83 = vector.load %arg5[%c8_59, %c0_60, %c0_61] : memref<9x8x16xf32, #tpu.memory_space<vmem>>, vector<1x8x16xf32>
    %84 = vector.shape_cast %83 : vector<1x8x16xf32> to vector<8x16xf32>
    %cst_62 = arith.constant dense<0.000000e+00> : vector<168x16xf32>
    %85 = tpu.matmul %82, %84, %cst_62 {dimension_numbers = #tpu.dot_dimension_numbers<[1], [0], [0], [1], [0, 0, 1, 1], [], []>} : vector<168x8xf32>, vector<8x16xf32>, vector<168x16xf32> -> vector<168x16xf32>
    %86 = arith.addf %81, %85 : vector<168x16xf32>
    %c0_63 = arith.constant 0 : index
    %c0_64 = arith.constant 0 : index
    %87 = vector.load %arg6[%c0_63, %c0_64] : memref<1x16xf32, #tpu.memory_space<vmem>>, vector<1x16xf32>
    %c0_65 = arith.constant 0 : index
    %c0_66 = arith.constant 0 : index
    %88 = vector.load %arg7[%c0_65, %c0_66] : memref<1x16xf32, #tpu.memory_space<vmem>>, vector<1x16xf32>
    %c0_67 = arith.constant 0 : index
    %c0_68 = arith.constant 0 : index
    %89 = vector.load %arg8[%c0_67, %c0_68] : memref<1x16xf32, #tpu.memory_space<vmem>>, vector<1x16xf32>
    %90 = vector.broadcast %87 : vector<1x16xf32> to vector<168x16xf32>
    %91 = arith.addf %86, %90 : vector<168x16xf32>
    %cst_69 = arith.constant 0.000000e+00 : f32
    %92 = vector.broadcast %cst_69 : f32 to vector<168x16xf32>
    %93 = arith.cmpf oge, %91, %92 : vector<168x16xf32>
    %cst_70 = arith.constant 0.000000e+00 : f32
    %94 = vector.broadcast %cst_70 : f32 to vector<168x16xf32>
    %95 = arith.mulf %94, %91 : vector<168x16xf32>
    %96 = arith.select %93, %91, %95 : vector<168x16xi1>, vector<168x16xf32>
    %97 = vector.broadcast %0 : vector<168x1xf32> to vector<168x16xf32>
    %98 = arith.mulf %96, %97 : vector<168x16xf32>
    %cst_71 = arith.constant dense<0.000000e+00> : vector<16xf32>
    %99 = vector.multi_reduction <add>, %98, %cst_71 [0] : vector<168x16xf32> to vector<16xf32>
    %100 = vector.shape_cast %99 : vector<16xf32> to vector<1x16xf32>
    %cst_72 = arith.constant 0.0102040814 : f32
    %101 = vector.broadcast %cst_72 : f32 to vector<1x16xf32>
    %102 = arith.mulf %100, %101 : vector<1x16xf32>
    %103 = arith.mulf %98, %96 : vector<168x16xf32>
    %cst_73 = arith.constant dense<0.000000e+00> : vector<16xf32>
    %104 = vector.multi_reduction <add>, %103, %cst_73 [0] : vector<168x16xf32> to vector<16xf32>
    %105 = vector.shape_cast %104 : vector<16xf32> to vector<1x16xf32>
    %cst_74 = arith.constant 0.0102040814 : f32
    %106 = vector.broadcast %cst_74 : f32 to vector<1x16xf32>
    %107 = arith.mulf %105, %106 : vector<1x16xf32>
    %108 = arith.mulf %102, %102 : vector<1x16xf32>
    %109 = arith.subf %107, %108 : vector<1x16xf32>
    %110 = vector.broadcast %102 : vector<1x16xf32> to vector<168x16xf32>
    %111 = arith.subf %96, %110 : vector<168x16xf32>
    %cst_75 = arith.constant 9.99999974E-6 : f32
    %112 = vector.broadcast %cst_75 : f32 to vector<1x16xf32>
    %113 = arith.addf %109, %112 : vector<1x16xf32>
    %114 = math.rsqrt %113 : vector<1x16xf32>
    %115 = vector.broadcast %114 : vector<1x16xf32> to vector<168x16xf32>
    %116 = arith.mulf %111, %115 : vector<168x16xf32>
    %117 = vector.broadcast %88 : vector<1x16xf32> to vector<168x16xf32>
    %118 = arith.mulf %116, %117 : vector<168x16xf32>
    %119 = vector.broadcast %89 : vector<1x16xf32> to vector<168x16xf32>
    %120 = arith.addf %118, %119 : vector<168x16xf32>
    %121 = vector.broadcast %0 : vector<168x1xf32> to vector<168x16xf32>
    %122 = arith.mulf %120, %121 : vector<168x16xf32>
    %cst_76 = arith.constant 0.000000e+00 : f32
    %123 = vector.broadcast %cst_76 : f32 to vector<200x16xf32>
    %c0_77 = arith.constant 0 : index
    %c0_78 = arith.constant 0 : index
    %124 = vector.load %arg17[%c0_77, %c0_78] : memref<200x16xf32, #tpu.memory_space<vmem>>, vector<200x16xf32>
    tpu.vector_store %arg17[%c0_77, %c0_78], %123 {strides = array<i32>} : memref<200x16xf32, #tpu.memory_space<vmem>>, vector<200x16xf32>,
    %c16_79 = arith.constant 16 : index
    %c0_80 = arith.constant 0 : index
    %125 = vector.load %arg17[%c16_79, %c0_80] : memref<200x16xf32, #tpu.memory_space<vmem>>, vector<168x16xf32>
    tpu.vector_store %arg17[%c16_79, %c0_80], %122 {strides = array<i32>} : memref<200x16xf32, #tpu.memory_space<vmem>>, vector<168x16xf32>,
    %c6_81 = arith.constant 6 : index
    %c0_82 = arith.constant 0 : index
    %126 = vector.load %arg17[%c6_81, %c0_82] : memref<200x16xf32, #tpu.memory_space<vmem>>, vector<168x16xf32>
    %c0_83 = arith.constant 0 : index
    %c0_84 = arith.constant 0 : index
    %c0_85 = arith.constant 0 : index
    %127 = vector.load %arg9[%c0_83, %c0_84, %c0_85] : memref<9x16x5xf32, #tpu.memory_space<vmem>>, vector<1x16x5xf32>
    %128 = vector.shape_cast %127 : vector<1x16x5xf32> to vector<16x5xf32>
    %cst_86 = arith.constant dense<0.000000e+00> : vector<168x5xf32>
    %129 = tpu.matmul %126, %128, %cst_86 {dimension_numbers = #tpu.dot_dimension_numbers<[1], [0], [0], [1], [0, 0, 1, 1], [], []>} : vector<168x16xf32>, vector<16x5xf32>, vector<168x5xf32> -> vector<168x5xf32>
    %c7_87 = arith.constant 7 : index
    %c0_88 = arith.constant 0 : index
    %130 = vector.load %arg17[%c7_87, %c0_88] : memref<200x16xf32, #tpu.memory_space<vmem>>, vector<168x16xf32>
    %c1_89 = arith.constant 1 : index
    %c0_90 = arith.constant 0 : index
    %c0_91 = arith.constant 0 : index
    %131 = vector.load %arg9[%c1_89, %c0_90, %c0_91] : memref<9x16x5xf32, #tpu.memory_space<vmem>>, vector<1x16x5xf32>
    %132 = vector.shape_cast %131 : vector<1x16x5xf32> to vector<16x5xf32>
    %cst_92 = arith.constant dense<0.000000e+00> : vector<168x5xf32>
    %133 = tpu.matmul %130, %132, %cst_92 {dimension_numbers = #tpu.dot_dimension_numbers<[1], [0], [0], [1], [0, 0, 1, 1], [], []>} : vector<168x16xf32>, vector<16x5xf32>, vector<168x5xf32> -> vector<168x5xf32>
    %134 = arith.addf %129, %133 : vector<168x5xf32>
    %c8_93 = arith.constant 8 : index
    %c0_94 = arith.constant 0 : index
    %135 = vector.load %arg17[%c8_93, %c0_94] : memref<200x16xf32, #tpu.memory_space<vmem>>, vector<168x16xf32>
    %c2_95 = arith.constant 2 : index
    %c0_96 = arith.constant 0 : index
    %c0_97 = arith.constant 0 : index
    %136 = vector.load %arg9[%c2_95, %c0_96, %c0_97] : memref<9x16x5xf32, #tpu.memory_space<vmem>>, vector<1x16x5xf32>
    %137 = vector.shape_cast %136 : vector<1x16x5xf32> to vector<16x5xf32>
    %cst_98 = arith.constant dense<0.000000e+00> : vector<168x5xf32>
    %138 = tpu.matmul %135, %137, %cst_98 {dimension_numbers = #tpu.dot_dimension_numbers<[1], [0], [0], [1], [0, 0, 1, 1], [], []>} : vector<168x16xf32>, vector<16x5xf32>, vector<168x5xf32> -> vector<168x5xf32>
    %139 = arith.addf %134, %138 : vector<168x5xf32>
    %c15_99 = arith.constant 15 : index
    %c0_100 = arith.constant 0 : index
    %140 = vector.load %arg17[%c15_99, %c0_100] : memref<200x16xf32, #tpu.memory_space<vmem>>, vector<168x16xf32>
    %c3_101 = arith.constant 3 : index
    %c0_102 = arith.constant 0 : index
    %c0_103 = arith.constant 0 : index
    %141 = vector.load %arg9[%c3_101, %c0_102, %c0_103] : memref<9x16x5xf32, #tpu.memory_space<vmem>>, vector<1x16x5xf32>
    %142 = vector.shape_cast %141 : vector<1x16x5xf32> to vector<16x5xf32>
    %cst_104 = arith.constant dense<0.000000e+00> : vector<168x5xf32>
    %143 = tpu.matmul %140, %142, %cst_104 {dimension_numbers = #tpu.dot_dimension_numbers<[1], [0], [0], [1], [0, 0, 1, 1], [], []>} : vector<168x16xf32>, vector<16x5xf32>, vector<168x5xf32> -> vector<168x5xf32>
    %144 = arith.addf %139, %143 : vector<168x5xf32>
    %c16_105 = arith.constant 16 : index
    %c0_106 = arith.constant 0 : index
    %145 = vector.load %arg17[%c16_105, %c0_106] : memref<200x16xf32, #tpu.memory_space<vmem>>, vector<168x16xf32>
    %c4_107 = arith.constant 4 : index
    %c0_108 = arith.constant 0 : index
    %c0_109 = arith.constant 0 : index
    %146 = vector.load %arg9[%c4_107, %c0_108, %c0_109] : memref<9x16x5xf32, #tpu.memory_space<vmem>>, vector<1x16x5xf32>
    %147 = vector.shape_cast %146 : vector<1x16x5xf32> to vector<16x5xf32>
    %cst_110 = arith.constant dense<0.000000e+00> : vector<168x5xf32>
    %148 = tpu.matmul %145, %147, %cst_110 {dimension_numbers = #tpu.dot_dimension_numbers<[1], [0], [0], [1], [0, 0, 1, 1], [], []>} : vector<168x16xf32>, vector<16x5xf32>, vector<168x5xf32> -> vector<168x5xf32>
    %149 = arith.addf %144, %148 : vector<168x5xf32>
    %c17_111 = arith.constant 17 : index
    %c0_112 = arith.constant 0 : index
    %150 = vector.load %arg17[%c17_111, %c0_112] : memref<200x16xf32, #tpu.memory_space<vmem>>, vector<168x16xf32>
    %c5_113 = arith.constant 5 : index
    %c0_114 = arith.constant 0 : index
    %c0_115 = arith.constant 0 : index
    %151 = vector.load %arg9[%c5_113, %c0_114, %c0_115] : memref<9x16x5xf32, #tpu.memory_space<vmem>>, vector<1x16x5xf32>
    %152 = vector.shape_cast %151 : vector<1x16x5xf32> to vector<16x5xf32>
    %cst_116 = arith.constant dense<0.000000e+00> : vector<168x5xf32>
    %153 = tpu.matmul %150, %152, %cst_116 {dimension_numbers = #tpu.dot_dimension_numbers<[1], [0], [0], [1], [0, 0, 1, 1], [], []>} : vector<168x16xf32>, vector<16x5xf32>, vector<168x5xf32> -> vector<168x5xf32>
    %154 = arith.addf %149, %153 : vector<168x5xf32>
    %c24_117 = arith.constant 24 : index
    %c0_118 = arith.constant 0 : index
    %155 = vector.load %arg17[%c24_117, %c0_118] : memref<200x16xf32, #tpu.memory_space<vmem>>, vector<168x16xf32>
    %c6_119 = arith.constant 6 : index
    %c0_120 = arith.constant 0 : index
    %c0_121 = arith.constant 0 : index
    %156 = vector.load %arg9[%c6_119, %c0_120, %c0_121] : memref<9x16x5xf32, #tpu.memory_space<vmem>>, vector<1x16x5xf32>
    %157 = vector.shape_cast %156 : vector<1x16x5xf32> to vector<16x5xf32>
    %cst_122 = arith.constant dense<0.000000e+00> : vector<168x5xf32>
    %158 = tpu.matmul %155, %157, %cst_122 {dimension_numbers = #tpu.dot_dimension_numbers<[1], [0], [0], [1], [0, 0, 1, 1], [], []>} : vector<168x16xf32>, vector<16x5xf32>, vector<168x5xf32> -> vector<168x5xf32>
    %159 = arith.addf %154, %158 : vector<168x5xf32>
    %c25_123 = arith.constant 25 : index
    %c0_124 = arith.constant 0 : index
    %160 = vector.load %arg17[%c25_123, %c0_124] : memref<200x16xf32, #tpu.memory_space<vmem>>, vector<168x16xf32>
    %c7_125 = arith.constant 7 : index
    %c0_126 = arith.constant 0 : index
    %c0_127 = arith.constant 0 : index
    %161 = vector.load %arg9[%c7_125, %c0_126, %c0_127] : memref<9x16x5xf32, #tpu.memory_space<vmem>>, vector<1x16x5xf32>
    %162 = vector.shape_cast %161 : vector<1x16x5xf32> to vector<16x5xf32>
    %cst_128 = arith.constant dense<0.000000e+00> : vector<168x5xf32>
    %163 = tpu.matmul %160, %162, %cst_128 {dimension_numbers = #tpu.dot_dimension_numbers<[1], [0], [0], [1], [0, 0, 1, 1], [], []>} : vector<168x16xf32>, vector<16x5xf32>, vector<168x5xf32> -> vector<168x5xf32>
    %164 = arith.addf %159, %163 : vector<168x5xf32>
    %c26_129 = arith.constant 26 : index
    %c0_130 = arith.constant 0 : index
    %165 = vector.load %arg17[%c26_129, %c0_130] : memref<200x16xf32, #tpu.memory_space<vmem>>, vector<168x16xf32>
    %c8_131 = arith.constant 8 : index
    %c0_132 = arith.constant 0 : index
    %c0_133 = arith.constant 0 : index
    %166 = vector.load %arg9[%c8_131, %c0_132, %c0_133] : memref<9x16x5xf32, #tpu.memory_space<vmem>>, vector<1x16x5xf32>
    %167 = vector.shape_cast %166 : vector<1x16x5xf32> to vector<16x5xf32>
    %cst_134 = arith.constant dense<0.000000e+00> : vector<168x5xf32>
    %168 = tpu.matmul %165, %167, %cst_134 {dimension_numbers = #tpu.dot_dimension_numbers<[1], [0], [0], [1], [0, 0, 1, 1], [], []>} : vector<168x16xf32>, vector<16x5xf32>, vector<168x5xf32> -> vector<168x5xf32>
    %169 = arith.addf %164, %168 : vector<168x5xf32>
    %c0_135 = arith.constant 0 : index
    %c0_136 = arith.constant 0 : index
    %170 = vector.load %arg10[%c0_135, %c0_136] : memref<1x5xf32, #tpu.memory_space<vmem>>, vector<1x5xf32>
    %c0_137 = arith.constant 0 : index
    %c0_138 = arith.constant 0 : index
    %171 = vector.load %arg11[%c0_137, %c0_138] : memref<1x5xf32, #tpu.memory_space<vmem>>, vector<1x5xf32>
    %c0_139 = arith.constant 0 : index
    %c0_140 = arith.constant 0 : index
    %172 = vector.load %arg12[%c0_139, %c0_140] : memref<1x5xf32, #tpu.memory_space<vmem>>, vector<1x5xf32>
    %173 = vector.broadcast %170 : vector<1x5xf32> to vector<168x5xf32>
    %174 = arith.addf %169, %173 : vector<168x5xf32>
    %cst_141 = arith.constant 0.000000e+00 : f32
    %175 = vector.broadcast %cst_141 : f32 to vector<168x5xf32>
    %176 = arith.cmpf oge, %174, %175 : vector<168x5xf32>
    %cst_142 = arith.constant 0.000000e+00 : f32
    %177 = vector.broadcast %cst_142 : f32 to vector<168x5xf32>
    %178 = arith.mulf %177, %174 : vector<168x5xf32>
    %179 = arith.select %176, %174, %178 : vector<168x5xi1>, vector<168x5xf32>
    %180 = vector.broadcast %0 : vector<168x1xf32> to vector<168x5xf32>
    %181 = arith.mulf %179, %180 : vector<168x5xf32>
    %cst_143 = arith.constant dense<0.000000e+00> : vector<5xf32>
    %182 = vector.multi_reduction <add>, %181, %cst_143 [0] : vector<168x5xf32> to vector<5xf32>
    %183 = vector.shape_cast %182 : vector<5xf32> to vector<1x5xf32>
    %cst_144 = arith.constant 0.0102040814 : f32
    %184 = vector.broadcast %cst_144 : f32 to vector<1x5xf32>
    %185 = arith.mulf %183, %184 : vector<1x5xf32>
    %186 = arith.mulf %181, %179 : vector<168x5xf32>
    %cst_145 = arith.constant dense<0.000000e+00> : vector<5xf32>
    %187 = vector.multi_reduction <add>, %186, %cst_145 [0] : vector<168x5xf32> to vector<5xf32>
    %188 = vector.shape_cast %187 : vector<5xf32> to vector<1x5xf32>
    %cst_146 = arith.constant 0.0102040814 : f32
    %189 = vector.broadcast %cst_146 : f32 to vector<1x5xf32>
    %190 = arith.mulf %188, %189 : vector<1x5xf32>
    %191 = arith.mulf %185, %185 : vector<1x5xf32>
    %192 = arith.subf %190, %191 : vector<1x5xf32>
    %193 = vector.broadcast %185 : vector<1x5xf32> to vector<168x5xf32>
    %194 = arith.subf %179, %193 : vector<168x5xf32>
    %cst_147 = arith.constant 9.99999974E-6 : f32
    %195 = vector.broadcast %cst_147 : f32 to vector<1x5xf32>
    %196 = arith.addf %192, %195 : vector<1x5xf32>
    %197 = math.rsqrt %196 : vector<1x5xf32>
    %198 = vector.broadcast %197 : vector<1x5xf32> to vector<168x5xf32>
    %199 = arith.mulf %194, %198 : vector<168x5xf32>
    %200 = vector.broadcast %171 : vector<1x5xf32> to vector<168x5xf32>
    %201 = arith.mulf %199, %200 : vector<168x5xf32>
    %202 = vector.broadcast %172 : vector<1x5xf32> to vector<168x5xf32>
    %203 = arith.addf %201, %202 : vector<168x5xf32>
    %204 = vector.broadcast %0 : vector<168x1xf32> to vector<168x5xf32>
    %205 = arith.mulf %203, %204 : vector<168x5xf32>
    %c0_148 = arith.constant 0 : index
    %c0_149 = arith.constant 0 : index
    %206 = vector.load %arg14[%c0_148, %c0_149] : memref<2x168xf32, #tpu.memory_space<vmem>>, vector<2x168xf32>
    %cst_150 = arith.constant dense<0.000000e+00> : vector<2x5xf32>
    %207 = tpu.matmul %206, %205, %cst_150 {dimension_numbers = #tpu.dot_dimension_numbers<[1], [0], [0], [1], [0, 0, 1, 1], [], []>} : vector<2x168xf32>, vector<168x5xf32>, vector<2x5xf32> -> vector<2x5xf32>
    %cst_151 = arith.constant dense<0xFF800000> : vector<2xf32>
    %208 = vector.multi_reduction <maximumf>, %207, %cst_151 [1] : vector<2x5xf32> to vector<2xf32>
    %209 = vector.shape_cast %208 : vector<2xf32> to vector<2x1xf32>
    %210 = vector.broadcast %209 : vector<2x1xf32> to vector<2x5xf32>
    %211 = arith.subf %207, %210 : vector<2x5xf32>
    %212 = math.exp %211 : vector<2x5xf32>
    %cst_152 = arith.constant dense<0.000000e+00> : vector<2xf32>
    %213 = vector.multi_reduction <add>, %212, %cst_152 [1] : vector<2x5xf32> to vector<2xf32>
    %214 = vector.shape_cast %213 : vector<2xf32> to vector<2x1xf32>
    %215 = vector.broadcast %214 : vector<2x1xf32> to vector<2x5xf32>
    %216 = arith.divf %212, %215 : vector<2x5xf32>
    %c0_153 = arith.constant 0 : index
    %c0_154 = arith.constant 0 : index
    %217 = vector.load %arg15[%c0_153, %c0_154] : memref<2x5xf32, #tpu.memory_space<vmem>>, vector<2x5xf32>
    tpu.vector_store %arg15[%c0_153, %c0_154], %216 {strides = array<i32>} : memref<2x5xf32, #tpu.memory_space<vmem>>, vector<2x5xf32>,
    return
  }
}

</mosaic_0001>

<bundles_post_ra>
// kernel: tile.6
= control target key start
LH: loop header
LB: loop body
LE: loop exit
PB: predicated region body
PF: predicated region fallthrough
CT: control target
= control target key end

     0   :  { %s22_s0 = inlined_call_operand.vmem [shape: f32[81], index: 0, kind: input, shape index: {}]   ;;  %s23_s1 = inlined_call_operand.vmem [shape: f32[2,81], index: 1, kind: output, shape index: {}]  }
   0x1   :  { %v4_v0 = vld [vmem:[%s22_s0] ss:$0 sm:$0xff] }
   0x2   :  { %5 = vst [vmem:[%s23_s1] sm:$0x3] %v4_v0 }

// kernel: tile.7
= control target key start
LH: loop header
LB: loop body
LE: loop exit
PB: predicated region body
PF: predicated region fallthrough
CT: control target
= control target key end

     0   :  { %vm13_vm0 = vcmask 384000   ;;  %vm7_vm1 = vcmask 662528   ;;  %vm17_vm2 = vcmask 277504   ;;  %vm20_vm3 = vcmask 1048200   ;;  %s46_s0 = inlined_call_operand.vmem [shape: f32[2,81], index: 0, kind: input, shape index: {}]   ;;  %s47_s1 = inlined_call_operand.vmem [shape: f32[162], index: 1, kind: output, shape index: {}]  }
   0x1   :  { %v4_v0 = vld [vmem:[%s46_s0] sm:$0x3]  ;;  %s29_s0 = smov 81  }
   0x2   :  { %5 = vst [vmem:[#allocation1] sm:$0x3] %v4_v0 }
   0x9   :  { %v10_v1 = vld [vmem:[#allocation1 + $0x1] sm:$0x1]   ;;  %v6_v3 = vld [vmem:[#allocation1] sm:$0x1]  }
   0xa   :  { %v12_v2 = vld [vmem:[#allocation1 + $0x1] sm:$0x1]   ;;  %8 = vst.msk [vmem:[#allocation0] sm:$0x1] %vm7_vm1, %v6_v3  }
   0xb   :  { %v14_v4 = vsel %vm13_vm0, %v12_v2, %v10_v1 }
   0xc   :  { %15 = vrot.lane.b32.xlu0 %v14_v4, %s29_s0 }
  0x7e   :  { %v16_v5 = vpop.permute.xlu0 %15  }
  0x7f   :  { %19 = vst.msk [vmem:[#allocation0 + $0x1] sm:$0x1] %vm17_vm2, %v16_v5  }
  0x80   :  { %21 = vst.msk [vmem:[#allocation0] sm:$0x1] %vm20_vm3, %v16_v5  }
  0x87   :  { %v25_v6 = vld [vmem:[#allocation0] sm:$0x3] }
  0x88   :  { %27 = vst [vmem:[%s47_s1] sm:$0x3] %v25_v6 }

// kernel: model_forward.1
= control target key start
LH: loop header
LB: loop body
LE: loop exit
PB: predicated region body
PF: predicated region fallthrough
CT: control target
= control target key end

     0   :  { %v12854_v3 = vmov 0.0|0.0   ;;  %vm8856_vm0 = vmmov 0   ;;  %v12856_v6 = vmov 0.0   ;;  %v8858_v8 = vmov 0   ;;  %s12838_s0 = inlined_call_operand.vmem [shape: f32[168,75], index: 0, kind: input, shape index: {}]   ;;  %s12839_s1 = inlined_call_operand.vmem [shape: f32[75,8], index: 1, kind: input, shape index: {}]   ;;  %s12840_s2 = inlined_call_operand.vmem [shape: f32[1,8], index: 2, kind: input, shape index: {}]   ;;  %s12841_s3 = inlined_call_operand.vmem [shape: f32[1,8], index: 3, kind: input, shape index: {}]   ;;  %s12842_s4 = inlined_call_operand.vmem [shape: f32[1,8], index: 4, kind: input, shape index: {}]   ;;  %s12843_s5 = inlined_call_operand.vmem [shape: f32[9,8,16], index: 5, kind: input, shape index: {}]   ;;  %s12844_s6 = inlined_call_operand.vmem [shape: f32[1,16], index: 6, kind: input, shape index: {}]   ;;  %s12845_s7 = inlined_call_operand.vmem [shape: f32[1,16], index: 7, kind: input, shape index: {}]   ;;  %s12846_s8 = inlined_call_operand.vmem [shape: f32[1,16], index: 8, kind: input, shape index: {}]   ;;  %s12847_s9 = inlined_call_operand.vmem [shape: f32[9,16,5], index: 9, kind: input, shape index: {}]   ;;  %s12848_s10 = inlined_call_operand.vmem [shape: f32[1,5], index: 10, kind: input, shape index: {}]   ;;  %s12849_s11 = inlined_call_operand.vmem [shape: f32[1,5], index: 11, kind: input, shape index: {}]   ;;  %s12850_s12 = inlined_call_operand.vmem [shape: f32[1,5], index: 12, kind: input, shape index: {}]   ;;  %s12851_s13 = inlined_call_operand.vmem [shape: f32[168,1], index: 13, kind: input, shape index: {}]   ;;  %s12852_s14 = inlined_call_operand.vmem [shape: f32[2,168], index: 14, kind: input, shape index: {}]   ;;  %s12853_s15 = inlined_call_operand.hbm [shape: f32[2,5], index: 15, kind: output, shape index: {}]  }
   0x1   :  { %v93_v0 = vld [vmem:[%s12839_s1] sm:$0xff]  ;;  %v94_v1 = vld [vmem:[%s12839_s1 + $0x8] sm:$0xff]  ;;  %v95_v2 = vld [vmem:[%s12839_s1 + $0x10] sm:$0xff]  ;;  %8738 = vmatprep.subr.bf16.mxu0 %v12854_v3  ;;  %7487 = vmatprep.mubr.msk.f32.mxu0 %vm8856_vm0, %v12856_v6  ;;  %vm176_vm1 = vcmask 1042432   ;;  %vm8859_vm2 = vmmov 1  }
   0x2   :  { %v8739_v4 = vpack.c.bf16 %v94_v1, %v93_v0  ;;  %v96_v5 = vld [vmem:[%s12839_s1 + $0x18] sm:$0xff]  ;;  %8811 = vmatprep.subr.mxu1 %v12856_v6  ;;  %8819 = vset.pattern.permute.xlu0 %v8858_v8  ;;  %v97_v9 = vld [vmem:[%s12839_s1 + $0x20] sm:$0xff]  ;;  %v98_v10 = vld [vmem:[%s12839_s1 + $0x28] sm:$0xff] }
   0x3   :  { %v8742_v7 = vpack.c.bf16 %v96_v5, %v95_v2  ;;  %8820 = vset.pattern.permute.xlu1 %v8858_v8  ;;  %7573 = vmatprep.mubr.msk.f32.mxu1 %vm8856_vm0, %v12856_v6  ;;  %v8745_v11 = vpack.c.bf16 %v98_v10, %v97_v9  ;;  %v99_v12 = vld [vmem:[%s12839_s1 + $0x30] sm:$0xff]  ;;  %v100_v13 = vld [vmem:[%s12839_s1 + $0x38] sm:$0xff]  ;;  %v51_v14 = vld [vmem:[%s12851_s13] sm:$0xff] }
   0x4   :  { %8740 = vmatpush3.bf16.msra.mxu0 %v8739_v4  ;;  %v8748_v15 = vpack.c.bf16 %v100_v13, %v99_v12  ;;  %415 = vperm.xlu0 %8819, %v51_v14   ;;  %v53_v16 = vld [vmem:[%s12851_s13 + $0x10] sm:$0xff]  ;;  %v101_v17 = vld [vmem:[%s12839_s1 + $0x40] sm:$0xff]  ;;  %v102_v18 = vld [vmem:[%s12839_s1 + $0x48] sm:$0x7] }
   0x5   :  { %8741 = vmatprep.subr.bf16.mxu0 %v12854_v3  ;;  %v52_v19 = vld [vmem:[%s12851_s13 + $0x8] sm:$0xff]  ;;  %425 = vperm.xlu1 %8820, %v53_v16   ;;  %v54_v20 = vld [vmem:[%s12851_s13 + $0x18] sm:$0xff]  ;;  %v8751_v21 = vpack.c.bf16 %v102_v18, %v101_v17  ;;  %vm8752_vm3 = vmpackc.low %vm176_vm1, %vm8859_vm2 }
   0x6   :  { %v55_v22 = vld [vmem:[%s12851_s13 + $0x20] sm:$0xff]  ;;  %v56_v23 = vld [vmem:[%s12851_s13 + $0x28] sm:$0xff] }
   0x8   :  { %8743 = vmatpush3.bf16.msra.mxu0 %v8742_v7  ;;  %420 = vperm.xlu0 %8819, %v52_v19  }
   0x9   :  { %8744 = vmatprep.subr.bf16.mxu0 %v12854_v3  ;;  %430 = vperm.xlu1 %8820, %v54_v20  }
   0xc   :  { %8746 = vmatpush3.bf16.msra.mxu0 %v8745_v11 }
   0xd   :  { %8747 = vmatprep.subr.bf16.mxu0 %v12854_v3 }
  0x10   :  { %8749 = vmatpush3.bf16.msra.mxu0 %v8748_v15 }
  0x11   :  { %8750 = vmatprep.subr.bf16.mxu0 %v12854_v3 }
  0x12   :  { %20 = vsyncpa [#allocation5], 0  ;;  %v72_v24 = vld [vmem:[%s12838_s0] sm:$0xff]  ;;  %vm112_vm4 = vcmask 613376   ;;  %435 = vperm.xlu0 %8819, %v55_v22   ;;  %v57_v25 = vld [vmem:[%s12851_s13 + $0x30] sm:$0xff]  ;;  %440 = vperm.xlu1 %8820, %v56_v23   ;;  %vm539_vm5 = vcmask 64512  }
  0x13   :  { %v58_v26 = vld [vmem:[%s12851_s13 + $0x38] sm:$0xff]  ;;  %v73_v27 = vld [vmem:[%s12838_s0 + $0x8] sm:$0xff]  ;;  %v59_v28 = vld [vmem:[%s12851_s13 + $0x40] sm:$0xff]  ;;  %778 = vst.msk [vmem:[#allocation2] sm:$0xff] %vm539_vm5, %v12856_v6 }
  0x14   :  { %8753 = vmatpush3.bf16.msk.msra.mxu0 %vm8752_vm3, %v8751_v21  ;;  %v60_v29 = vld [vmem:[%s12851_s13 + $0x48] sm:$0xff]  ;;  %v74_v30 = vld [vmem:[%s12838_s0 + $0x10] sm:$0xff]  ;;  %v62_v32 = vld [vmem:[%s12851_s13 + $0x58] sm:$0xff]  ;;  %779 = vst.msk [vmem:[#allocation2 + $0x8] sm:$0xff] %vm539_vm5, %v12856_v6 }
  0x15   :  { %7550 = vmatprep.subr.mxu0 %v12856_v6  ;;  %v61_v31 = vld [vmem:[%s12851_s13 + $0x50] sm:$0xff]  ;;  %v75_v33 = vld [vmem:[%s12838_s0 + $0x18] sm:$0xff]  ;;  %v63_v34 = vld [vmem:[%s12851_s13 + $0x60] sm:$0xff]  ;;  %780 = vst.msk [vmem:[#allocation2 + $0x10] sm:$0xff] %vm539_vm5, %v12856_v6 }
  0x16   :  { %445 = vperm.xlu0 %8819, %v57_v25   ;;  %450 = vperm.xlu1 %8820, %v58_v26   ;;  %v64_v35 = vld [vmem:[%s12851_s13 + $0x68] sm:$0xff]  ;;  %v76_v36 = vld [vmem:[%s12838_s0 + $0x20] sm:$0xff]  ;;  %v65_v37 = vld [vmem:[%s12851_s13 + $0x70] sm:$0xff]  ;;  %781 = vst.msk [vmem:[#allocation2 + $0x18] sm:$0xff] %vm539_vm5, %v12856_v6 }
  0x17   :  { %7488 = vmatmul.mubr.msk.f32.vlgmr.msra.gmra.mrb[0].mxu0 %vm112_vm4, %v72_v24  ;;  %v66_v38 = vld [vmem:[%s12851_s13 + $0x78] sm:$0xff]  ;;  %v77_v39 = vld [vmem:[%s12838_s0 + $0x28] sm:$0xff]  ;;  %v67_v40 = vld [vmem:[%s12851_s13 + $0x80] sm:$0xff]  ;;  %782 = vst.msk [vmem:[#allocation2 + $0x20] sm:$0xff] %vm539_vm5, %v12856_v6 }
  0x18   :  { %7490 = vmatprep.mubr.msk.f32.mxu0 %vm8856_vm0, %v12856_v6  ;;  %v68_v41 = vld [vmem:[%s12851_s13 + $0x88] sm:$0xff]  ;;  %v78_v42 = vld [vmem:[%s12838_s0 + $0x30] sm:$0xff]  ;;  %v70_v44 = vld [vmem:[%s12851_s13 + $0x98] sm:$0xff]  ;;  %783 = vst.msk [vmem:[#allocation2 + $0x28] sm:$0xff] %vm539_vm5, %v12856_v6 }
  0x19   :  { %v69_v43 = vld [vmem:[%s12851_s13 + $0x90] sm:$0xff]  ;;  %v79_v45 = vld [vmem:[%s12838_s0 + $0x38] sm:$0xff]  ;;  %v71_v46 = vld [vmem:[%s12851_s13 + $0xa0] sm:$0xff]  ;;  %784 = vst.msk [vmem:[#allocation2 + $0x30] sm:$0xff] %vm539_vm5, %v12856_v6 }
  0x1a   :  { %455 = vperm.xlu0 %8819, %v59_v28   ;;  %460 = vperm.xlu1 %8820, %v60_v29   ;;  %v80_v47 = vld [vmem:[%s12838_s0 + $0x40] sm:$0xff]  ;;  %v81_v48 = vld [vmem:[%s12838_s0 + $0x48] sm:$0xff]  ;;  %v82_v49 = vld [vmem:[%s12838_s0 + $0x50] sm:$0xff]  ;;  %785 = vst.msk [vmem:[#allocation2 + $0x38] sm:$0xff] %vm539_vm5, %v12856_v6 }
  0x1b   :  { %7491 = vmatmul.mubr.msk.f32.gmra.mrb[2].mxu0 %vm112_vm4, %v73_v27  ;;  %v83_v50 = vld [vmem:[%s12838_s0 + $0x58] sm:$0xff]  ;;  %v84_v51 = vld [vmem:[%s12838_s0 + $0x60] sm:$0xff]  ;;  %v85_v52 = vld [vmem:[%s12838_s0 + $0x68] sm:$0xff]  ;;  %786 = vst.msk [vmem:[#allocation2 + $0x40] sm:$0xff] %vm539_vm5, %v12856_v6 }
  0x1c   :  { %7493 = vmatprep.mubr.msk.f32.mxu0 %vm8856_vm0, %v12856_v6  ;;  %v86_v53 = vld [vmem:[%s12838_s0 + $0x70] sm:$0xff]  ;;  %v87_v54 = vld [vmem:[%s12838_s0 + $0x78] sm:$0xff]  ;;  %v88_v55 = vld [vmem:[%s12838_s0 + $0x80] sm:$0xff]  ;;  %787 = vst.msk [vmem:[#allocation2 + $0x48] sm:$0xff] %vm539_vm5, %v12856_v6 }
  0x1d   :  { %v89_v56 = vld [vmem:[%s12838_s0 + $0x88] sm:$0xff]  ;;  %v90_v57 = vld [vmem:[%s12838_s0 + $0x90] sm:$0xff]  ;;  %v91_v58 = vld [vmem:[%s12838_s0 + $0x98] sm:$0xff]  ;;  %788 = vst.msk [vmem:[#allocation2 + $0x50] sm:$0xff] %vm539_vm5, %v12856_v6 }
  0x1e   :  { %465 = vperm.xlu0 %8819, %v61_v31   ;;  %470 = vperm.xlu1 %8820, %v62_v32   ;;  %v92_v59 = vld [vmem:[%s12838_s0 + $0xa0] sm:$0xff]  ;;  %789 = vst.msk [vmem:[#allocation2 + $0x58] sm:$0xff] %vm539_vm5, %v12856_v6  ;;  %790 = vst.msk [vmem:[#allocation2 + $0x60] sm:$0xff] %vm539_vm5, %v12856_v6  ;;  %v6621_v63 = vld [vmem:[%s12843_s5 + $0x8] sm:$0xff] }
  0x1f   :  { %7494 = vmatmul.mubr.msk.f32.gmra.mrb[4].mxu0 %vm112_vm4, %v74_v30  ;;  %791 = vst.msk [vmem:[#allocation2 + $0x68] sm:$0xff] %vm539_vm5, %v12856_v6  ;;  %792 = vst.msk [vmem:[#allocation2 + $0x70] sm:$0xff] %vm539_vm5, %v12856_v6  ;;  %v9224_v62 = vld [vmem:[%s12840_s2] ss:$0 sm:$0xff]  ;;  %v846_v0 = vld [vmem:[#allocation2 + $0x7] sm:$0xff]  ;;  %8812 = vmatpush3.msra.mxu1 %v6621_v63 }
  0x20   :  { %7496 = vmatprep.mubr.msk.f32.mxu0 %vm8856_vm0, %v12856_v6  ;;  %793 = vst.msk [vmem:[#allocation2 + $0x78] sm:$0xff] %vm539_vm5, %v12856_v6  ;;  %794 = vst.msk [vmem:[#allocation2 + $0x80] sm:$0xff] %vm539_vm5, %v12856_v6  ;;  %7551 = vmatpush3.msra.mxu0 %v6621_v63 }
  0x21   :  { %795 = vst.msk [vmem:[#allocation2 + $0x88] sm:$0xff] %vm539_vm5, %v12856_v6  ;;  %796 = vst.msk [vmem:[#allocation2 + $0x90] sm:$0xff] %vm539_vm5, %v12856_v6  ;;  %7680 = vmatprep.subr.mxu0 %v12856_v6  ;;  %7615 = vmatprep.subr.mxu1 %v12856_v6 }
  0x22   :  { %475 = vperm.xlu0 %8819, %v63_v34   ;;  %480 = vperm.xlu1 %8820, %v64_v35   ;;  %797 = vst.msk [vmem:[#allocation2 + $0x98] sm:$0xff] %vm539_vm5, %v12856_v6  ;;  %798 = vst.msk [vmem:[#allocation2 + $0xa0] sm:$0xff] %vm539_vm5, %v12856_v6 }
  0x23   :  { %7497 = vmatmul.mubr.msk.f32.gmra.mrb[6].mxu0 %vm112_vm4, %v75_v33  ;;  %799 = vst.msk [vmem:[#allocation2 + $0xa8] sm:$0xff] %vm539_vm5, %v12856_v6  ;;  %800 = vst.msk [vmem:[#allocation2 + $0xb0] sm:$0xff] %vm539_vm5, %v12856_v6 }
  0x24   :  { %7499 = vmatprep.mubr.msk.f32.mxu0 %vm8856_vm0, %v12856_v6  ;;  %801 = vst.msk [vmem:[#allocation2 + $0xb8] sm:$0xff] %vm539_vm5, %v12856_v6  ;;  %802 = vst.msk [vmem:[#allocation2 + $0xc0] sm:$0xff] %vm539_vm5, %v12856_v6 }
  0x26   :  { %485 = vperm.xlu0 %8819, %v65_v37   ;;  %490 = vperm.xlu1 %8820, %v66_v38  }
  0x27   :  { %7500 = vmatmul.mubr.msk.f32.gmra.mrb[8].mxu0 %vm112_vm4, %v76_v36 }
  0x28   :  { %7502 = vmatprep.mubr.msk.f32.mxu0 %vm8856_vm0, %v12856_v6 }
  0x2a   :  { %495 = vperm.xlu0 %8819, %v67_v40   ;;  %500 = vperm.xlu1 %8820, %v68_v41  }
  0x2b   :  { %7503 = vmatmul.mubr.msk.f32.gmra.mrb[10].mxu0 %vm112_vm4, %v77_v39 }
  0x2c   :  { %7505 = vmatprep.mubr.msk.f32.mxu0 %vm8856_vm0, %v12856_v6 }
  0x2e   :  { %505 = vperm.xlu0 %8819, %v69_v43   ;;  %510 = vperm.xlu1 %8820, %v70_v44  }
  0x2f   :  { %7506 = vmatmul.mubr.msk.f32.gmra.mrb[12].mxu0 %vm112_vm4, %v78_v42 }
  0x30   :  { %7508 = vmatprep.mubr.msk.f32.mxu0 %vm8856_vm0, %v12856_v6 }
  0x32   :  { %515 = vperm.xlu0 %8819, %v71_v46  }
  0x33   :  { %7509 = vmatmul.mubr.msk.f32.gmra.mrb[14].mxu0 %vm112_vm4, %v79_v45 }
  0x34   :  { %7511 = vmatprep.mubr.msk.f32.mxu0 %vm8856_vm0, %v12856_v6 }
  0x37   :  { %7512 = vmatmul.mubr.msk.f32.gmra.mrb[16].mxu0 %vm112_vm4, %v80_v47 }
  0x38   :  { %7514 = vmatprep.mubr.msk.f32.mxu0 %vm8856_vm0, %v12856_v6 }
  0x3b   :  { %7515 = vmatmul.mubr.msk.f32.gmra.mrb[18].mxu0 %vm112_vm4, %v81_v48 }
  0x3c   :  { %7517 = vmatprep.mubr.msk.f32.mxu0 %vm8856_vm0, %v12856_v6 }
  0x3f   :  { %7518 = vmatmul.mubr.msk.f32.gmra.mrb[20].mxu0 %vm112_vm4, %v82_v49 }
  0x40   :  { %7520 = vmatprep.mubr.msk.f32.mxu0 %vm8856_vm0, %v12856_v6 }
  0x43   :  { %7521 = vmatmul.mubr.msk.f32.gmra.mrb[22].mxu0 %vm112_vm4, %v83_v50 }
  0x44   :  { %7523 = vmatprep.mubr.msk.f32.mxu0 %vm8856_vm0, %v12856_v6 }
  0x47   :  { %7524 = vmatmul.mubr.msk.f32.gmra.mrb[24].mxu0 %vm112_vm4, %v84_v51 }
  0x48   :  { %7526 = vmatprep.mubr.msk.f32.mxu0 %vm8856_vm0, %v12856_v6 }
  0x4b   :  { %7527 = vmatmul.mubr.msk.f32.gmra.mrb[26].mxu0 %vm112_vm4, %v85_v52 }
  0x4c   :  { %7529 = vmatprep.mubr.msk.f32.mxu0 %vm8856_vm0, %v12856_v6 }
  0x4f   :  { %7530 = vmatmul.mubr.msk.f32.gmra.mrb[28].mxu0 %vm112_vm4, %v86_v53 }
  0x50   :  { %7532 = vmatprep.mubr.msk.f32.mxu0 %vm8856_vm0, %v12856_v6 }
  0x53   :  { %7533 = vmatmul.mubr.msk.f32.gmra.mrb[30].mxu0 %vm112_vm4, %v87_v54 }
  0x54   :  { %7535 = vmatprep.mubr.msk.f32.mxu0 %vm8856_vm0, %v12856_v6 }
  0x57   :  { %7536 = vmatmul.mubr.msk.f32.gmra.mrb[32].mxu0 %vm112_vm4, %v88_v55 }
  0x58   :  { %7538 = vmatprep.mubr.msk.f32.mxu0 %vm8856_vm0, %v12856_v6 }
  0x5b   :  { %7539 = vmatmul.mubr.msk.f32.gmra.mrb[34].mxu0 %vm112_vm4, %v89_v56 }
  0x5c   :  { %7541 = vmatprep.mubr.msk.f32.mxu0 %vm8856_vm0, %v12856_v6 }
  0x5f   :  { %7542 = vmatmul.mubr.msk.f32.gmra.mrb[36].mxu0 %vm112_vm4, %v90_v57 }
  0x60   :  { %7544 = vmatprep.mubr.msk.f32.mxu0 %vm8856_vm0, %v12856_v6 }
  0x63   :  { %7545 = vmatmul.mubr.msk.f32.gmra.mrb[38].mxu0 %vm112_vm4, %v91_v58 }
  0x64   :  { %7547 = vmatprep.mubr.msk.f32.mxu0 %vm8856_vm0, %v12856_v6 }
  0x67   :  { %7548 = vmatmul.mubr.msk.f32.gmra.mrb[40].mxu0 %vm112_vm4, %v92_v59 }
  0x68   :  { %7552 = vmatprep.mubr.msk.f32.mxu0 %vm8856_vm0, %v12856_v6 }
  0x6b   :  { %7553 = vmatmul.mubr.msk.f32.vlgmr.msra.gmra.mrb[42].mxu0 %vm539_vm5, %v846_v0 }
  0x6c   :  { %7555 = vmatprep.mubr.msk.f32.mxu0 %vm8856_vm0, %v12856_v6 }
  0x83   :  { %v9236_v7 = vpop.permute.xlu0 %415 }
  0x84   :  { %v9241_v15 = vpop.permute.xlu1 %425 }
  0x87   :  { %v9245_v18 = vpop.permute.xlu0 %420 }
  0x88   :  { %v9258_v28 = vpop.permute.xlu1 %430 }
  0x89   :  { %12912 = vst [vmem:[#allocation7_spill] sm:$0xff] %v9258_v28 }
  0x91   :  { %v9268_v39 = vpop.permute.xlu0 %435  ;;  %v9282_v56 = vpop.permute.xlu1 %440 }
  0x92   :  { %12913 = vst [vmem:[#allocation8_spill] sm:$0xff] %v9268_v39  ;;  %12914 = vst [vmem:[#allocation9_spill] sm:$0xff] %v9282_v56 }
  0xea   :  { %v246_v60 = vpop.f32.mrb[0].mxu0 }
  0xeb   :  { %v7489_v61 = vpop.f32.mrb[1].mxu0  ;;  %v247_v2 = vadd.f32 %v9224_v62, %v246_v60 }
  0xed   :  { %v371_v10 = vmul.f32 0.01, %v247_v2  ;;  %vm350_vm7 = vcmp.ge.f32.partialorder %v247_v2, 0.0 }
  0xee   :  { %v251_v1 = vpop.f32.mrb[2].mxu0 }
  0xef   :  { %v252_v4 = vadd.f32 %v9224_v62, %v251_v1  ;;  %v7492_v5 = vpop.f32.mrb[3].mxu0  ;;  %v9243_v17 = vsel %vm350_vm7, %v247_v2, %v371_v10  ;;  %v9294_v10 = vpop.permute.xlu0 %445 }
  0xf0   :  { %v518_v24 = vmul.f32 %v9236_v7, %v9243_v17  ;;  %12915 = vst [vmem:[#allocation10_spill] sm:$0xff] %v9294_v10 }
  0xf1   :  { %v372_v8 = vmul.f32 0.01, %v252_v4  ;;  %vm351_vm6 = vcmp.ge.f32.partialorder %v252_v4, 0.0 }
  0xf2   :  { %v256_v9 = vpop.f32.mrb[4].mxu0  ;;  %v588_v34 = vmul.f32 %v518_v24, %v9243_v17  ;;  %v540_v38 = vsel %vm539_vm5, %v518_v24, 0.0 }
  0xf3   :  { %v257_v11 = vadd.f32 %v9224_v62, %v256_v9  ;;  %v7495_v12 = vpop.f32.mrb[5].mxu0  ;;  %v9239_v13 = vsel %vm351_vm6, %v252_v4, %v372_v8 }
  0xf4   :  { %v519_v22 = vmul.f32 %v9245_v18, %v9239_v13  ;;  %v609_v49 = vsel %vm539_vm5, %v588_v34, 0.0 }
  0xf5   :  { %vm352_vm8 = vcmp.ge.f32.partialorder %v257_v11, 0.0  ;;  %v373_v14 = vmul.f32 0.01, %v257_v11 }
  0xf6   :  { %v261_v16 = vpop.f32.mrb[6].mxu0  ;;  %v589_v31 = vmul.f32 %v519_v22, %v9239_v13  ;;  %v541_v35 = vsel %vm539_vm5, %v519_v22, 0.0 }
  0xf7   :  { %v9247_v19 = vsel %vm352_vm8, %v257_v11, %v373_v14  ;;  %v262_v20 = vadd.f32 %v9224_v62, %v261_v16  ;;  %v7498_v21 = vpop.f32.mrb[7].mxu0  ;;  %v542_v47 = vadd.f32 %v541_v35, %v540_v38 }
  0xf8   :  { %v520_v25 = vmul.f32 %v9241_v15, %v9247_v19  ;;  %v610_v43 = vsel %vm539_vm5, %v589_v31, 0.0 }
  0xf9   :  { %vm353_vm9 = vcmp.ge.f32.partialorder %v262_v20, 0.0  ;;  %v374_v23 = vmul.f32 0.01, %v262_v20  ;;  %v611_v54 = vadd.f32 %v610_v43, %v609_v49 }
  0xfa   :  { %v266_v26 = vpop.f32.mrb[8].mxu0  ;;  %v590_v36 = vmul.f32 %v520_v25, %v9247_v19  ;;  %v543_v44 = vsel %vm539_vm5, %v520_v25, 0.0 }
  0xfb   :  { %v9256_v27 = vsel %vm353_vm9, %v262_v20, %v374_v23  ;;  %v267_v29 = vadd.f32 %v9224_v62, %v266_v26  ;;  %v7501_v30 = vpop.f32.mrb[9].mxu0  ;;  %v544_v55 = vadd.f32 %v543_v44, %v542_v47  ;;  %v6664_v26 = vld [vmem:[%s12843_s5 + $0x10] sm:$0xff]  ;;  %v9318_v47 = vpop.permute.xlu0 %455 }
  0xfc   :  { %v521_v32 = vmul.f32 %v9258_v28, %v9256_v27  ;;  %v612_v50 = vsel %vm539_vm5, %v590_v36, 0.0  ;;  %7681 = vmatpush3.msra.mxu0 %v6664_v26  ;;  %12917 = vst [vmem:[#allocation12_spill] sm:$0xff] %v9318_v47 }
  0xfd   :  { %vm354_vm10 = vcmp.ge.f32.partialorder %v267_v29, 0.0  ;;  %v375_v33 = vmul.f32 0.01, %v267_v29  ;;  %v613_v0 = vadd.f32 %v612_v50, %v611_v54  ;;  %7810 = vmatprep.subr.mxu0 %v12856_v6 }
  0xfe   :  { %v271_v37 = vpop.f32.mrb[10].mxu0  ;;  %v591_v45 = vmul.f32 %v521_v32, %v9256_v27  ;;  %v545_v51 = vsel %vm539_vm5, %v521_v32, 0.0 }
  0xff   :  { %v9270_v40 = vsel %vm354_vm10, %v267_v29, %v375_v33  ;;  %v272_v41 = vadd.f32 %v9224_v62, %v271_v37  ;;  %v7504_v42 = vpop.f32.mrb[11].mxu0  ;;  %v546_v1 = vadd.f32 %v545_v51, %v544_v55  ;;  %v9307_v33 = vpop.permute.xlu1 %450 }
 0x100   :  { %v522_v46 = vmul.f32 %v9268_v39, %v9270_v40  ;;  %v614_v60 = vsel %vm539_vm5, %v591_v45, 0.0  ;;  %12916 = vst [vmem:[#allocation11_spill] sm:$0xff] %v9307_v33 }
 0x101   :  { %vm355_vm11 = vcmp.ge.f32.partialorder %v272_v41, 0.0  ;;  %v376_v48 = vmul.f32 0.01, %v272_v41  ;;  %v615_v12 = vadd.f32 %v614_v60, %v613_v0 }
 0x102   :  { %v592_v52 = vmul.f32 %v522_v46, %v9270_v40  ;;  %v276_v53 = vpop.f32.mrb[12].mxu0  ;;  %v547_v61 = vsel %vm539_vm5, %v522_v46, 0.0 }
 0x103   :  { %v9284_v57 = vsel %vm355_vm11, %v272_v41, %v376_v48  ;;  %v277_v58 = vadd.f32 %v9224_v62, %v276_v53  ;;  %v7507_v59 = vpop.f32.mrb[13].mxu0  ;;  %v548_v11 = vadd.f32 %v547_v61, %v546_v1  ;;  %v9328_v61 = vpop.permute.xlu1 %460 }
 0x104   :  { %v523_v63 = vmul.f32 %v9282_v56, %v9284_v57  ;;  %v616_v4 = vsel %vm539_vm5, %v592_v52, 0.0  ;;  %12918 = vst [vmem:[#allocation13_spill] sm:$0xff] %v9328_v61 }
 0x105   :  { %vm356_vm12 = vcmp.ge.f32.partialorder %v277_v58, 0.0  ;;  %v377_v2 = vmul.f32 0.01, %v277_v58  ;;  %v617_v23 = vadd.f32 %v616_v4, %v615_v12 }
 0x106   :  { %v549_v5 = vsel %vm539_vm5, %v523_v63, 0.0  ;;  %v593_v8 = vmul.f32 %v523_v63, %v9284_v57  ;;  %v281_v9 = vpop.f32.mrb[14].mxu0 }
 0x107   :  { %v9296_v14 = vsel %vm356_vm12, %v277_v58, %v377_v2  ;;  %v282_v16 = vadd.f32 %v9224_v62, %v281_v9  ;;  %v7510_v20 = vpop.f32.mrb[15].mxu0  ;;  %v550_v24 = vadd.f32 %v549_v5, %v548_v11 }
 0x108   :  { %v618_v21 = vsel %vm539_vm5, %v593_v8, 0.0  ;;  %v524_v22 = vmul.f32 %v9294_v10, %v9296_v14  ;;  %v9338_v20 = vpop.permute.xlu0 %465 }
 0x109   :  { %vm357_vm13 = vcmp.ge.f32.partialorder %v282_v16, 0.0  ;;  %v378_v25 = vmul.f32 0.01, %v282_v16  ;;  %v619_v32 = vadd.f32 %v618_v21, %v617_v23  ;;  %12919 = vst [vmem:[#allocation14_spill] sm:$0xff] %v9338_v20 }
 0x10a   :  { %v551_v29 = vsel %vm539_vm5, %v524_v22, 0.0  ;;  %v594_v30 = vmul.f32 %v524_v22, %v9296_v14  ;;  %v286_v31 = vpop.f32.mrb[16].mxu0 }
 0x10b   :  { %v552_v34 = vadd.f32 %v551_v29, %v550_v24  ;;  %v9309_v35 = vsel %vm357_vm13, %v282_v16, %v378_v25  ;;  %v287_v36 = vadd.f32 %v9224_v62, %v286_v31  ;;  %v7513_v37 = vpop.f32.mrb[17].mxu0 }
 0x10c   :  { %v620_v38 = vsel %vm539_vm5, %v594_v30, 0.0  ;;  %v525_v41 = vmul.f32 %v9307_v33, %v9309_v35 }
 0x10d   :  { %v621_v42 = vadd.f32 %v620_v38, %v619_v32  ;;  %vm358_vm14 = vcmp.ge.f32.partialorder %v287_v36, 0.0  ;;  %v379_v43 = vmul.f32 0.01, %v287_v36 }
 0x10e   :  { %v553_v44 = vsel %vm539_vm5, %v525_v41, 0.0  ;;  %v595_v45 = vmul.f32 %v525_v41, %v9309_v35  ;;  %v291_v46 = vpop.f32.mrb[18].mxu0 }
 0x10f   :  { %v554_v48 = vadd.f32 %v553_v44, %v552_v34  ;;  %v9320_v49 = vsel %vm358_vm14, %v287_v36, %v379_v43  ;;  %v292_v50 = vadd.f32 %v9224_v62, %v291_v46  ;;  %v7516_v51 = vpop.f32.mrb[19].mxu0  ;;  %v9348_v36 = vpop.permute.xlu1 %470 }
 0x110   :  { %v622_v52 = vsel %vm539_vm5, %v595_v45, 0.0  ;;  %v526_v53 = vmul.f32 %v9318_v47, %v9320_v49  ;;  %12920 = vst [vmem:[#allocation15_spill] sm:$0xff] %v9348_v36 }
 0x111   :  { %v623_v54 = vadd.f32 %v622_v52, %v621_v42  ;;  %vm359_vm15 = vcmp.ge.f32.partialorder %v292_v50, 0.0  ;;  %v380_v55 = vmul.f32 0.01, %v292_v50  ;;  %v9358_v52 = vpop.permute.xlu0 %475 }
 0x112   :  { %v555_v58 = vsel %vm539_vm5, %v526_v53, 0.0  ;;  %v596_v59 = vmul.f32 %v526_v53, %v9320_v49  ;;  %v296_v60 = vpop.f32.mrb[20].mxu0  ;;  %12921 = vst [vmem:[#allocation16_spill] sm:$0xff] %v9358_v52 }
 0x113   :  { %v556_v63 = vadd.f32 %v555_v58, %v554_v48  ;;  %v9330_v0 = vsel %vm359_vm15, %v292_v50, %v380_v55  ;;  %v297_v1 = vadd.f32 %v9224_v62, %v296_v60  ;;  %v7519_v2 = vpop.f32.mrb[21].mxu0 }
 0x114   :  { %v624_v4 = vsel %vm539_vm5, %v596_v59, 0.0  ;;  %v527_v5 = vmul.f32 %v9328_v61, %v9330_v0 }
 0x115   :  { %v625_v8 = vadd.f32 %v624_v4, %v623_v54  ;;  %vm360_vm1 = vcmp.ge.f32.partialorder %v297_v1, 0.0  ;;  %v381_v9 = vmul.f32 0.01, %v297_v1 }
 0x116   :  { %v557_v11 = vsel %vm539_vm5, %v527_v5, 0.0  ;;  %v597_v12 = vmul.f32 %v527_v5, %v9330_v0  ;;  %v301_v16 = vpop.f32.mrb[22].mxu0 }
 0x117   :  { %v558_v21 = vadd.f32 %v557_v11, %v556_v63  ;;  %v9340_v22 = vsel %vm360_vm1, %v297_v1, %v381_v9  ;;  %v302_v23 = vadd.f32 %v9224_v62, %v301_v16  ;;  %v7522_v24 = vpop.f32.mrb[23].mxu0 }
 0x118   :  { %v626_v25 = vsel %vm539_vm5, %v597_v12, 0.0  ;;  %v528_v26 = vmul.f32 %v9338_v20, %v9340_v22 }
 0x119   :  { %v627_v29 = vadd.f32 %v626_v25, %v625_v8  ;;  %vm361_vm2 = vcmp.ge.f32.partialorder %v302_v23, 0.0  ;;  %v382_v30 = vmul.f32 0.01, %v302_v23  ;;  %v9368_v8 = vpop.permute.xlu1 %480 }
 0x11a   :  { %v559_v31 = vsel %vm539_vm5, %v528_v26, 0.0  ;;  %v598_v32 = vmul.f32 %v528_v26, %v9340_v22  ;;  %v306_v34 = vpop.f32.mrb[24].mxu0  ;;  %12922 = vst [vmem:[#allocation17_spill] sm:$0xff] %v9368_v8 }
 0x11b   :  { %v560_v37 = vadd.f32 %v559_v31, %v558_v21  ;;  %v9350_v38 = vsel %vm361_vm2, %v302_v23, %v382_v30  ;;  %v307_v41 = vadd.f32 %v9224_v62, %v306_v34  ;;  %v7525_v42 = vpop.f32.mrb[25].mxu0  ;;  %v9378_v31 = vpop.permute.xlu0 %485 }
 0x11c   :  { %v628_v43 = vsel %vm539_vm5, %v598_v32, 0.0  ;;  %v529_v44 = vmul.f32 %v9348_v36, %v9350_v38  ;;  %12923 = vst [vmem:[#allocation18_spill] sm:$0xff] %v9378_v31 }
 0x11d   :  { %v629_v45 = vadd.f32 %v628_v43, %v627_v29  ;;  %vm362_vm3 = vcmp.ge.f32.partialorder %v307_v41, 0.0  ;;  %v383_v46 = vmul.f32 0.01, %v307_v41 }
 0x11e   :  { %v561_v48 = vsel %vm539_vm5, %v529_v44, 0.0  ;;  %v599_v50 = vmul.f32 %v529_v44, %v9350_v38  ;;  %v311_v51 = vpop.f32.mrb[26].mxu0 }
 0x11f   :  { %v562_v53 = vadd.f32 %v561_v48, %v560_v37  ;;  %v9360_v54 = vsel %vm362_vm3, %v307_v41, %v383_v46  ;;  %v312_v55 = vadd.f32 %v9224_v62, %v311_v51  ;;  %v7528_v58 = vpop.f32.mrb[27].mxu0  ;;  %v9388_v51 = vpop.permute.xlu1 %490 }
 0x120   :  { %v630_v59 = vsel %vm539_vm5, %v599_v50, 0.0  ;;  %v530_v60 = vmul.f32 %v9358_v52, %v9360_v54  ;;  %12924 = vst [vmem:[#allocation19_spill] sm:$0xff] %v9388_v51 }
 0x121   :  { %v631_v63 = vadd.f32 %v630_v59, %v629_v45  ;;  %vm363_vm4 = vcmp.ge.f32.partialorder %v312_v55, 0.0  ;;  %v384_v1 = vmul.f32 0.01, %v312_v55 }
 0x122   :  { %v563_v2 = vsel %vm539_vm5, %v530_v60, 0.0  ;;  %v600_v4 = vmul.f32 %v530_v60, %v9360_v54  ;;  %v316_v5 = vpop.f32.mrb[28].mxu0 }
 0x123   :  { %v564_v9 = vadd.f32 %v563_v2, %v562_v53  ;;  %v9370_v11 = vsel %vm363_vm4, %v312_v55, %v384_v1  ;;  %v317_v12 = vadd.f32 %v9224_v62, %v316_v5  ;;  %v7531_v16 = vpop.f32.mrb[29].mxu0 }
 0x124   :  { %v632_v21 = vsel %vm539_vm5, %v600_v4, 0.0  ;;  %v531_v23 = vmul.f32 %v9368_v8, %v9370_v11 }
 0x125   :  { %v633_v24 = vadd.f32 %v632_v21, %v631_v63  ;;  %vm364_vm6 = vcmp.ge.f32.partialorder %v317_v12, 0.0  ;;  %v385_v25 = vmul.f32 0.01, %v317_v12 }
 0x126   :  { %v565_v26 = vsel %vm539_vm5, %v531_v23, 0.0  ;;  %v601_v29 = vmul.f32 %v531_v23, %v9370_v11  ;;  %v321_v30 = vpop.f32.mrb[30].mxu0 }
 0x127   :  { %v566_v32 = vadd.f32 %v565_v26, %v564_v9  ;;  %v9380_v34 = vsel %vm364_vm6, %v317_v12, %v385_v25  ;;  %v322_v37 = vadd.f32 %v9224_v62, %v321_v30  ;;  %v7534_v41 = vpop.f32.mrb[31].mxu0  ;;  %v9398_v12 = vpop.permute.xlu0 %495 }
 0x128   :  { %v634_v42 = vsel %vm539_vm5, %v601_v29, 0.0  ;;  %v532_v43 = vmul.f32 %v9378_v31, %v9380_v34  ;;  %12925 = vst [vmem:[#allocation20_spill] sm:$0xff] %v9398_v12 }
 0x129   :  { %v635_v44 = vadd.f32 %v634_v42, %v633_v24  ;;  %vm365_vm7 = vcmp.ge.f32.partialorder %v322_v37, 0.0  ;;  %v386_v45 = vmul.f32 0.01, %v322_v37  ;;  %v9408_v42 = vpop.permute.xlu1 %500 }
 0x12a   :  { %v567_v46 = vsel %vm539_vm5, %v532_v43, 0.0  ;;  %v602_v48 = vmul.f32 %v532_v43, %v9380_v34  ;;  %v326_v50 = vpop.f32.mrb[32].mxu0  ;;  %12926 = vst [vmem:[#allocation21_spill] sm:$0xff] %v9408_v42 }
 0x12b   :  { %v568_v53 = vadd.f32 %v567_v46, %v566_v32  ;;  %v9390_v55 = vsel %vm365_vm7, %v322_v37, %v386_v45  ;;  %v327_v58 = vadd.f32 %v9224_v62, %v326_v50  ;;  %v7537_v59 = vpop.f32.mrb[33].mxu0 }
 0x12c   :  { %v636_v60 = vsel %vm539_vm5, %v602_v48, 0.0  ;;  %v533_v63 = vmul.f32 %v9388_v51, %v9390_v55 }
 0x12d   :  { %v637_v1 = vadd.f32 %v636_v60, %v635_v44  ;;  %vm366_vm8 = vcmp.ge.f32.partialorder %v327_v58, 0.0  ;;  %v387_v2 = vmul.f32 0.01, %v327_v58 }
 0x12e   :  { %v569_v4 = vsel %vm539_vm5, %v533_v63, 0.0  ;;  %v603_v5 = vmul.f32 %v533_v63, %v9390_v55  ;;  %v331_v9 = vpop.f32.mrb[34].mxu0 }
 0x12f   :  { %v570_v16 = vadd.f32 %v569_v4, %v568_v53  ;;  %v9400_v21 = vsel %vm366_vm8, %v327_v58, %v387_v2  ;;  %v332_v23 = vadd.f32 %v9224_v62, %v331_v9  ;;  %v7540_v24 = vpop.f32.mrb[35].mxu0 }
 0x130   :  { %v638_v25 = vsel %vm539_vm5, %v603_v5, 0.0  ;;  %v534_v26 = vmul.f32 %v9398_v12, %v9400_v21 }
 0x131   :  { %v639_v29 = vadd.f32 %v638_v25, %v637_v1  ;;  %vm367_vm9 = vcmp.ge.f32.partialorder %v332_v23, 0.0  ;;  %v388_v30 = vmul.f32 0.01, %v332_v23  ;;  %v9418_v1 = vpop.permute.xlu0 %505 }
 0x132   :  { %v571_v32 = vsel %vm539_vm5, %v534_v26, 0.0  ;;  %v604_v37 = vmul.f32 %v534_v26, %v9400_v21  ;;  %v336_v41 = vpop.f32.mrb[36].mxu0  ;;  %12927 = vst [vmem:[#allocation22_spill] sm:$0xff] %v9418_v1 }
 0x133   :  { %v572_v43 = vadd.f32 %v571_v32, %v570_v16  ;;  %v9410_v44 = vsel %vm367_vm9, %v332_v23, %v388_v30  ;;  %v337_v45 = vadd.f32 %v9224_v62, %v336_v41  ;;  %v7543_v46 = vpop.f32.mrb[37].mxu0  ;;  %v9428_v32 = vpop.permute.xlu1 %510 }
 0x134   :  { %v640_v48 = vsel %vm539_vm5, %v604_v37, 0.0  ;;  %v535_v50 = vmul.f32 %v9408_v42, %v9410_v44  ;;  %12928 = vst [vmem:[#allocation23_spill] sm:$0xff] %v9428_v32 }
 0x135   :  { %v641_v53 = vadd.f32 %v640_v48, %v639_v29  ;;  %vm368_vm10 = vcmp.ge.f32.partialorder %v337_v45, 0.0  ;;  %v389_v58 = vmul.f32 0.01, %v337_v45 }
 0x136   :  { %v573_v59 = vsel %vm539_vm5, %v535_v50, 0.0  ;;  %v605_v60 = vmul.f32 %v535_v50, %v9410_v44  ;;  %v341_v63 = vpop.f32.mrb[38].mxu0 }
 0x137   :  { %v574_v2 = vadd.f32 %v573_v59, %v572_v43  ;;  %v9420_v4 = vsel %vm368_vm10, %v337_v45, %v389_v58  ;;  %v342_v5 = vadd.f32 %v9224_v62, %v341_v63  ;;  %v7546_v9 = vpop.f32.mrb[39].mxu0 }
 0x138   :  { %v642_v16 = vsel %vm539_vm5, %v605_v60, 0.0  ;;  %v536_v23 = vmul.f32 %v9418_v1, %v9420_v4  ;;  %v9438_v60 = vpop.permute.xlu0 %515 }
 0x139   :  { %v643_v24 = vadd.f32 %v642_v16, %v641_v53  ;;  %vm369_vm11 = vcmp.ge.f32.partialorder %v342_v5, 0.0  ;;  %v390_v25 = vmul.f32 0.01, %v342_v5  ;;  %12929 = vst [vmem:[#allocation24_spill] sm:$0xff] %v9438_v60 }
 0x13a   :  { %v575_v26 = vsel %vm539_vm5, %v536_v23, 0.0  ;;  %v606_v29 = vmul.f32 %v536_v23, %v9420_v4  ;;  %v346_v30 = vpop.f32.mrb[40].mxu0 }
 0x13b   :  { %v576_v37 = vadd.f32 %v575_v26, %v574_v2  ;;  %v9430_v41 = vsel %vm369_vm11, %v342_v5, %v390_v25  ;;  %v347_v43 = vadd.f32 %v9224_v62, %v346_v30  ;;  %v7549_v45 = vpop.f32.mrb[41].mxu0 }
 0x13c   :  { %v644_v46 = vsel %vm539_vm5, %v606_v29, 0.0  ;;  %v537_v48 = vmul.f32 %v9428_v32, %v9430_v41 }
 0x13d   :  { %v645_v50 = vadd.f32 %v644_v46, %v643_v24  ;;  %vm370_vm12 = vcmp.ge.f32.partialorder %v347_v43, 0.0  ;;  %v391_v53 = vmul.f32 0.01, %v347_v43 }
 0x13e   :  { %v577_v58 = vsel %vm539_vm5, %v537_v48, 0.0  ;;  %v607_v59 = vmul.f32 %v537_v48, %v9430_v41 }
 0x13f   :  { %v578_v63 = vadd.f32 %v577_v58, %v576_v37  ;;  %v412_v2 = vsel %vm370_vm12, %v347_v43, %v391_v53 }
 0x140   :  { %v646_v5 = vsel %vm539_vm5, %v607_v59, 0.0  ;;  %v538_v62 = vmul.f32 %v9438_v60, %v412_v2 }
 0x141   :  { %v647_v9 = vadd.f32 %v646_v5, %v645_v50 }
 0x142   :  { %v579_v16 = vsel %vm539_vm5, %v538_v62, 0.0  ;;  %v608_v23 = vmul.f32 %v538_v62, %v412_v2 }
 0x143   :  { %v580_v25 = vadd.f32 %v579_v16, %v578_v63 }
 0x144   :  { %v648_v24 = vsel %vm539_vm5, %v608_v23, 0.0 }
 0x145   :  { %v581_v26 = vrot.slane %v580_v25, 4  ;;  %v649_v29 = vadd.f32 %v648_v24, %v647_v9 }
 0x147   :  { %v582_v30 = vadd.f32 %v581_v26, %v580_v25  ;;  %v650_v45 = vrot.slane %v649_v29, 4 }
 0x149   :  { %v583_v46 = vrot.slane %v582_v30, 2  ;;  %v651_v48 = vadd.f32 %v650_v45, %v649_v29  ;;  %v9486_v45 = vld [vmem:[%s12841_s3] ss:$0 sm:$0xff] }
 0x14b   :  { %v584_v3 = vadd.f32 %v583_v46, %v582_v30  ;;  %v652_v37 = vrot.slane %v651_v48, 2 }
 0x14d   :  { %v585_v43 = vrot.slane %v584_v3, 1  ;;  %v653_v53 = vadd.f32 %v652_v37, %v651_v48 }
 0x14f   :  { %v586_v58 = vadd.f32 %v585_v43, %v584_v3  ;;  %v654_v59 = vrot.slane %v653_v53, 1 }
 0x151   :  { %v9444_v6 = vmul.f32 0.010204081, %v586_v58  ;;  %v655_v50 = vadd.f32 %v654_v59, %v653_v53 }
 0x153   :  { %v656_v5 = vmul.f32 0.010204081, %v655_v50  ;;  %v657_v63 = vmul.f32 %v9444_v6, %v9444_v6  ;;  %v679_v62 = vsub.f32 %v412_v2, %v9444_v6  ;;  %v664_v9 = vsub.f32 %v9284_v57, %v9444_v6 }
 0x154   :  { %v665_v16 = vsub.f32 %v9296_v14, %v9444_v6  ;;  %v666_v23 = vsub.f32 %v9309_v35, %v9444_v6  ;;  %v667_v25 = vsub.f32 %v9320_v49, %v9444_v6  ;;  %v668_v24 = vsub.f32 %v9330_v0, %v9444_v6 }
 0x155   :  { %v658_v3 = vsub.f32 %v656_v5, %v657_v63  ;;  %v669_v26 = vsub.f32 %v9340_v22, %v9444_v6  ;;  %v670_v2 = vsub.f32 %v9350_v38, %v9444_v6  ;;  %v671_v14 = vsub.f32 %v9360_v54, %v9444_v6 }
 0x156   :  { %v672_v35 = vsub.f32 %v9370_v11, %v9444_v6  ;;  %v673_v29 = vsub.f32 %v9380_v34, %v9444_v6  ;;  %v674_v49 = vsub.f32 %v9390_v55, %v9444_v6  ;;  %v675_v0 = vsub.f32 %v9400_v21, %v9444_v6 }
 0x157   :  { %v680_v57 = vadd.f32 1e-05, %v658_v3  ;;  %v676_v22 = vsub.f32 %v9410_v44, %v9444_v6  ;;  %v677_v30 = vsub.f32 %v9420_v4, %v9444_v6  ;;  %v678_v54 = vsub.f32 %v9430_v41, %v9444_v6 }
 0x158   :  { %v659_v11 = vsub.f32 %v9243_v17, %v9444_v6  ;;  %v660_v46 = vsub.f32 %v9239_v13, %v9444_v6  ;;  %v661_v48 = vsub.f32 %v9247_v19, %v9444_v6  ;;  %v662_v37 = vsub.f32 %v9256_v27, %v9444_v6  ;;  %v9503_v13 = vld [vmem:[%s12842_s4] ss:$0 sm:$0xff] }
 0x159   :  { %8821 = vrsqrt.f32 %v680_v57  ;;  %v663_v43 = vsub.f32 %v9270_v40, %v9444_v6 }
 0x163   :  { %v9481_v34 = vpop.eup %8821 }
 0x164   :  { %v702_v17 = vmul.f32 %v9481_v34, %v679_v62  ;;  %v682_v53 = vmul.f32 %v9481_v34, %v659_v11  ;;  %v687_v58 = vmul.f32 %v9481_v34, %v664_v9  ;;  %v688_v59 = vmul.f32 %v9481_v34, %v665_v16 }
 0x165   :  { %v683_v19 = vmul.f32 %v9481_v34, %v660_v46  ;;  %v689_v27 = vmul.f32 %v9481_v34, %v666_v23  ;;  %v684_v50 = vmul.f32 %v9481_v34, %v661_v48  ;;  %v690_v40 = vmul.f32 %v9481_v34, %v667_v25 }
 0x166   :  { %v729_v5 = vmul.f32 %v9486_v45, %v702_v17  ;;  %v709_v63 = vmul.f32 %v9486_v45, %v682_v53  ;;  %v714_v62 = vmul.f32 %v9486_v45, %v687_v58  ;;  %v715_v9 = vmul.f32 %v9486_v45, %v688_v59 }
 0x167   :  { %v710_v16 = vmul.f32 %v9486_v45, %v683_v19  ;;  %v716_v3 = vmul.f32 %v9486_v45, %v689_v27  ;;  %v711_v57 = vmul.f32 %v9486_v45, %v684_v50  ;;  %v717_v23 = vmul.f32 %v9486_v45, %v690_v40 }
 0x168   :  { %v756_v11 = vadd.f32 %v9503_v13, %v729_v5  ;;  %v736_v25 = vadd.f32 %v9503_v13, %v709_v63  ;;  %v741_v46 = vadd.f32 %v9503_v13, %v714_v62  ;;  %v742_v48 = vadd.f32 %v9503_v13, %v715_v9 }
 0x169   :  { %v737_v17 = vadd.f32 %v9503_v13, %v710_v16  ;;  %v743_v53 = vadd.f32 %v9503_v13, %v716_v3  ;;  %v738_v58 = vadd.f32 %v9503_v13, %v711_v57  ;;  %v744_v59 = vadd.f32 %v9503_v13, %v717_v23 }
 0x16a   :  { %v777_v19 = vmul.f32 %v756_v11, %v9438_v60  ;;  %v757_v27 = vmul.f32 %v736_v25, %v9236_v7  ;;  %v762_v50 = vmul.f32 %v741_v46, %v9282_v56  ;;  %v763_v40 = vmul.f32 %v742_v48, %v9294_v10 }
 0x16b   :  { %v758_v5 = vmul.f32 %v737_v17, %v9245_v18  ;;  %v764_v63 = vmul.f32 %v743_v53, %v9307_v33  ;;  %v759_v62 = vmul.f32 %v738_v58, %v9241_v15  ;;  %v765_v9 = vmul.f32 %v744_v59, %v9318_v47 }
 0x16c   :  { %823 = vst.msk [vmem:[#allocation2 + $0xb0] sm:$0xff] %vm539_vm5, %v777_v19  ;;  %803 = vst.msk [vmem:[#allocation2 + $0x10] sm:$0xff] %vm539_vm5, %v757_v27  ;;  %v685_v16 = vmul.f32 %v9481_v34, %v662_v37  ;;  %v691_v3 = vmul.f32 %v9481_v34, %v668_v24  ;;  %v686_v57 = vmul.f32 %v9481_v34, %v663_v43 }
 0x16d   :  { %808 = vst.msk [vmem:[#allocation2 + $0x38] sm:$0xff] %vm539_vm5, %v762_v50  ;;  %809 = vst.msk [vmem:[#allocation2 + $0x40] sm:$0xff] %vm539_vm5, %v763_v40  ;;  %v692_v23 = vmul.f32 %v9481_v34, %v669_v26  ;;  %v693_v11 = vmul.f32 %v9481_v34, %v670_v2  ;;  %v694_v37 = vmul.f32 %v9481_v34, %v671_v14 }
 0x16e   :  { %804 = vst.msk [vmem:[#allocation2 + $0x18] sm:$0xff] %vm539_vm5, %v758_v5  ;;  %810 = vst.msk [vmem:[#allocation2 + $0x48] sm:$0xff] %vm539_vm5, %v764_v63  ;;  %v695_v24 = vmul.f32 %v9481_v34, %v672_v35  ;;  %v696_v43 = vmul.f32 %v9481_v34, %v673_v29  ;;  %v712_v26 = vmul.f32 %v9486_v45, %v685_v16 }
 0x16f   :  { %805 = vst.msk [vmem:[#allocation2 + $0x20] sm:$0xff] %vm539_vm5, %v759_v62  ;;  %811 = vst.msk [vmem:[#allocation2 + $0x50] sm:$0xff] %vm539_vm5, %v765_v9  ;;  %v718_v25 = vmul.f32 %v9486_v45, %v691_v3  ;;  %v713_v46 = vmul.f32 %v9486_v45, %v686_v57  ;;  %v719_v48 = vmul.f32 %v9486_v45, %v692_v23 }
 0x170   :  { %v720_v17 = vmul.f32 %v9486_v45, %v693_v11  ;;  %v721_v38 = vmul.f32 %v9486_v45, %v694_v37  ;;  %v722_v2 = vmul.f32 %v9486_v45, %v695_v24  ;;  %v723_v14 = vmul.f32 %v9486_v45, %v696_v43  ;;  %v845_v37 = vld [vmem:[%s12843_s5] sm:$0xff] }
 0x171   :  { %v739_v35 = vadd.f32 %v9503_v13, %v712_v26  ;;  %v745_v29 = vadd.f32 %v9503_v13, %v718_v25  ;;  %v740_v53 = vadd.f32 %v9503_v13, %v713_v46  ;;  %v746_v58 = vadd.f32 %v9503_v13, %v719_v48 }
 0x172   :  { %v747_v59 = vadd.f32 %v9503_v13, %v720_v17  ;;  %v748_v19 = vadd.f32 %v9503_v13, %v721_v38  ;;  %v749_v27 = vadd.f32 %v9503_v13, %v722_v2  ;;  %v750_v50 = vadd.f32 %v9503_v13, %v723_v14 }
 0x173   :  { %v760_v40 = vmul.f32 %v739_v35, %v9258_v28  ;;  %v766_v5 = vmul.f32 %v745_v29, %v9328_v61  ;;  %v761_v63 = vmul.f32 %v740_v53, %v9268_v39  ;;  %v767_v62 = vmul.f32 %v746_v58, %v9338_v20  ;;  %v9572_v9 = vld [vmem:[#allocation2 + $0xf] sm:$0xff] }
 0x174   :  { %v9574_v16 = vld [vmem:[#allocation2 + $0x3f] sm:$0xff]  ;;  %v768_v3 = vmul.f32 %v747_v59, %v9348_v36  ;;  %v769_v57 = vmul.f32 %v748_v19, %v9358_v52  ;;  %v770_v23 = vmul.f32 %v749_v27, %v9368_v8  ;;  %v771_v11 = vmul.f32 %v750_v50, %v9378_v31  ;;  %7556 = vmatmul.mubr.msk.f32.gmra.mrb[44].mxu0 %vm539_vm5, %v9572_v9  ;;  %v1335_v50 = vld [vmem:[#allocation2 + $0x8] sm:$0xff] }
 0x175   :  { %7574 = vmatmul.mubr.msk.f32.vlgmr.msra.gmra.mrb[0].mxu1 %vm539_vm5, %v9574_v16  ;;  %806 = vst.msk [vmem:[#allocation2 + $0x28] sm:$0xff] %vm539_vm5, %v760_v40  ;;  %812 = vst.msk [vmem:[#allocation2 + $0x58] sm:$0xff] %vm539_vm5, %v766_v5  ;;  %v697_v24 = vmul.f32 %v9481_v34, %v674_v49  ;;  %v698_v43 = vmul.f32 %v9481_v34, %v675_v0  ;;  %v699_v26 = vmul.f32 %v9481_v34, %v676_v22  ;;  %v12930_v25 = vmov 0.0   ;;  %v9622_v22 = vld [vmem:[#allocation2 + $0x17] sm:$0xff]  ;;  %v9624_v46 = vld [vmem:[#allocation2 + $0x47] sm:$0xff] }
 0x176   :  { %807 = vst.msk [vmem:[#allocation2 + $0x30] sm:$0xff] %vm539_vm5, %v761_v63  ;;  %813 = vst.msk [vmem:[#allocation2 + $0x60] sm:$0xff] %vm539_vm5, %v767_v62  ;;  %7558 = vmatprep.mubr.msk.f32.mxu0 %vm8856_vm0, %v12930_v25  ;;  %7576 = vmatprep.mubr.msk.f32.mxu1 %vm8856_vm0, %v12930_v25  ;;  %v700_v55 = vmul.f32 %v9481_v34, %v677_v30  ;;  %v701_v21 = vmul.f32 %v9481_v34, %v678_v54  ;;  %v9645_v2 = vld [vmem:[#allocation2 + $0x1f] sm:$0xff]  ;;  %v9647_v14 = vld [vmem:[#allocation2 + $0x4f] sm:$0xff] }
 0x177   :  { %814 = vst.msk [vmem:[#allocation2 + $0x68] sm:$0xff] %vm539_vm5, %v768_v3  ;;  %815 = vst.msk [vmem:[#allocation2 + $0x70] sm:$0xff] %vm539_vm5, %v769_v57  ;;  %v724_v44 = vmul.f32 %v9486_v45, %v697_v24  ;;  %v725_v49 = vmul.f32 %v9486_v45, %v698_v43  ;;  %7616 = vmatpush3.msra.mxu1 %v845_v37  ;;  %v726_v0 = vmul.f32 %v9486_v45, %v699_v26  ;;  %v6708_v5 = vld [vmem:[%s12843_s5 + $0x20] sm:$0xff]  ;;  %v9714_v62 = vld [vmem:[#allocation2 + $0x10] sm:$0xff] }
 0x178   :  { %816 = vst.msk [vmem:[#allocation2 + $0x78] sm:$0xff] %vm539_vm5, %v770_v23  ;;  %817 = vst.msk [vmem:[#allocation2 + $0x80] sm:$0xff] %vm539_vm5, %v771_v11  ;;  %v727_v4 = vmul.f32 %v9486_v45, %v700_v55  ;;  %v728_v30 = vmul.f32 %v9486_v45, %v701_v21  ;;  %7745 = vmatprep.subr.mxu1 %v12930_v25  ;;  %7559 = vmatmul.mubr.msk.f32.gmra.mrb[46].mxu0 %vm539_vm5, %v9622_v22  ;;  %v9727_v57 = vld [vmem:[#allocation2 + $0x18] sm:$0xff]  ;;  %v9739_v11 = vld [vmem:[#allocation2 + $0x20] sm:$0xff] }
 0x179   :  { %7577 = vmatmul.mubr.msk.f32.gmra.mrb[2].mxu1 %vm539_vm5, %v9624_v46  ;;  %v751_v6 = vadd.f32 %v9503_v13, %v724_v44  ;;  %v752_v41 = vadd.f32 %v9503_v13, %v725_v49  ;;  %v753_v54 = vadd.f32 %v9503_v13, %v726_v0  ;;  %7561 = vmatprep.mubr.msk.f32.mxu0 %vm8856_vm0, %v12930_v25  ;;  %v9775_v21 = vld [vmem:[#allocation2 + $0x38] sm:$0xff]  ;;  %v9787_v49 = vld [vmem:[#allocation2 + $0x40] sm:$0xff] }
 0x17a   :  { %7579 = vmatprep.mubr.msk.f32.mxu1 %vm8856_vm0, %v12930_v25  ;;  %v754_v34 = vadd.f32 %v9503_v13, %v727_v4  ;;  %v755_v45 = vadd.f32 %v9503_v13, %v728_v30  ;;  %v824_v0 = vld [vmem:[#allocation2 + $0x6] sm:$0xff]  ;;  %v6686_v30 = vld [vmem:[%s12843_s5 + $0x18] sm:$0xff] }
 0x17b   :  { %v772_v48 = vmul.f32 %v751_v6, %v9388_v51  ;;  %v773_v17 = vmul.f32 %v752_v41, %v9398_v12  ;;  %v774_v38 = vmul.f32 %v753_v54, %v9408_v42  ;;  %v9797_v4 = vld [vmem:[#allocation2 + $0x48] sm:$0xff]  ;;  %v9809_v41 = vld [vmem:[#allocation2 + $0x50] sm:$0xff] }
 0x17c   :  { %v775_v35 = vmul.f32 %v754_v34, %v9418_v1  ;;  %v776_v29 = vmul.f32 %v755_v45, %v9428_v32  ;;  %7562 = vmatmul.mubr.msk.f32.gmra.mrb[48].mxu0 %vm539_vm5, %v9645_v2  ;;  %v9664_v13 = vld [vmem:[#allocation2 + $0x27] sm:$0xff]  ;;  %v9666_v53 = vld [vmem:[#allocation2 + $0x57] sm:$0xff] }
 0x17d   :  { %7580 = vmatmul.mubr.msk.f32.gmra.mrb[4].mxu1 %vm539_vm5, %v9647_v14  ;;  %818 = vst.msk [vmem:[#allocation2 + $0x88] sm:$0xff] %vm539_vm5, %v772_v48  ;;  %819 = vst.msk [vmem:[#allocation2 + $0x90] sm:$0xff] %vm539_vm5, %v773_v17  ;;  %7564 = vmatprep.mubr.msk.f32.mxu0 %vm8856_vm0, %v12930_v25  ;;  %v9676_v58 = vld [vmem:[#allocation2 + $0x2f] sm:$0xff]  ;;  %v9678_v59 = vld [vmem:[#allocation2 + $0x5f] sm:$0xff] }
 0x17e   :  { %820 = vst.msk [vmem:[#allocation2 + $0x98] sm:$0xff] %vm539_vm5, %v774_v38  ;;  %7582 = vmatprep.mubr.msk.f32.mxu1 %vm8856_vm0, %v12930_v25  ;;  %821 = vst.msk [vmem:[#allocation2 + $0xa0] sm:$0xff] %vm539_vm5, %v775_v35  ;;  %v9688_v19 = vld [vmem:[#allocation2 + $0x37] sm:$0xff]  ;;  %v9690_v27 = vld [vmem:[#allocation2 + $0x67] sm:$0xff] }
 0x17f   :  { %822 = vst.msk [vmem:[#allocation2 + $0xa8] sm:$0xff] %vm539_vm5, %v776_v29  ;;  %v9700_v40 = vld [vmem:[#allocation2 + $0x6f] sm:$0xff]  ;;  %v9712_v63 = vld [vmem:[#allocation2 + $0x77] sm:$0xff]  ;;  %v9725_v3 = vld [vmem:[#allocation2 + $0x7f] sm:$0xff] }
 0x180   :  { %7565 = vmatmul.mubr.msk.f32.gmra.mrb[50].mxu0 %vm539_vm5, %v9664_v13  ;;  %v9751_v24 = vld [vmem:[#allocation2 + $0x28] sm:$0xff]  ;;  %v9763_v26 = vld [vmem:[#allocation2 + $0x30] sm:$0xff]  ;;  %v9819_v34 = vld [vmem:[#allocation2 + $0x58] sm:$0xff] }
 0x181   :  { %7583 = vmatmul.mubr.msk.f32.gmra.mrb[6].mxu1 %vm539_vm5, %v9666_v53  ;;  %7567 = vmatprep.mubr.msk.f32.mxu0 %vm8856_vm0, %v12930_v25  ;;  %v825_v6 = vld [vmem:[#allocation2 + $0xe] sm:$0xff]  ;;  %v826_v54 = vld [vmem:[#allocation2 + $0x16] sm:$0xff]  ;;  %v827_v45 = vld [vmem:[#allocation2 + $0x1e] sm:$0xff] }
 0x182   :  { %7585 = vmatprep.mubr.msk.f32.mxu1 %vm8856_vm0, %v12930_v25  ;;  %v9828_v48 = vld [vmem:[#allocation2 + $0x60] sm:$0xff]  ;;  %v9837_v38 = vld [vmem:[#allocation2 + $0x68] sm:$0xff]  ;;  %v9846_v29 = vld [vmem:[#allocation2 + $0x70] sm:$0xff] }
 0x183   :  { %v828_v17 = vld [vmem:[#allocation2 + $0x26] sm:$0xff]  ;;  %v829_v35 = vld [vmem:[#allocation2 + $0x2e] sm:$0xff] }
 0x184   :  { %7568 = vmatmul.mubr.msk.f32.gmra.mrb[52].mxu0 %vm539_vm5, %v9676_v58  ;;  %v9737_v23 = vld [vmem:[#allocation2 + $0x87] sm:$0xff]  ;;  %v9749_v37 = vld [vmem:[#allocation2 + $0x8f] sm:$0xff] }
 0x185   :  { %7586 = vmatmul.mubr.msk.f32.gmra.mrb[8].mxu1 %vm539_vm5, %v9678_v59  ;;  %7570 = vmatprep.mubr.msk.f32.mxu0 %vm8856_vm0, %v12930_v25  ;;  %v9761_v43 = vld [vmem:[#allocation2 + $0x97] sm:$0xff]  ;;  %v9773_v55 = vld [vmem:[#allocation2 + $0x9f] sm:$0xff]  ;;  %v10326_v12 = vld [vmem:[#allocation2 + $0x69] sm:$0xff] }
 0x186   :  { %7588 = vmatprep.mubr.msk.f32.mxu1 %vm8856_vm0, %v12930_v25  ;;  %v9785_v44 = vld [vmem:[#allocation2 + $0xa7] sm:$0xff]  ;;  %v6752_v32 = vld [vmem:[%s12843_s5 + $0x30] sm:$0xff] }
 0x187   :  { %v9911_v60 = vld [vmem:[#allocation2 + $0xa8] sm:$0xff] }
 0x188   :  { %7571 = vmatmul.mubr.msk.f32.gmra.mrb[54].mxu0 %vm539_vm5, %v9688_v19  ;;  %v10314_v1 = vld [vmem:[#allocation2 + $0x61] sm:$0xff] }
 0x189   :  { %7589 = vmatmul.mubr.msk.f32.gmra.mrb[10].mxu1 %vm539_vm5, %v9690_v27  ;;  %7682 = vmatprep.mubr.msk.f32.mxu0 %vm8856_vm0, %v12930_v25 }
 0x18a   :  { %7591 = vmatprep.mubr.msk.f32.mxu1 %vm8856_vm0, %v12930_v25 }
 0x18c   :  { %7683 = vmatmul.mubr.msk.f32.vlgmr.msra.gmra.mrb[56].mxu0 %vm539_vm5, %v1335_v50  ;;  %v830_v50 = vld [vmem:[#allocation2 + $0x36] sm:$0xff] }
 0x18d   :  { %7592 = vmatmul.mubr.msk.f32.gmra.mrb[12].mxu1 %vm539_vm5, %v9700_v40  ;;  %7685 = vmatprep.mubr.msk.f32.mxu0 %vm8856_vm0, %v12930_v25 }
 0x18e   :  { %7594 = vmatprep.mubr.msk.f32.mxu1 %vm8856_vm0, %v12930_v25  ;;  %7811 = vmatpush3.msra.mxu0 %v6708_v5  ;;  %v9855_v5 = vld [vmem:[#allocation2 + $0x78] sm:$0xff] }
 0x18f   :  { %7940 = vmatprep.subr.mxu0 %v12930_v25 }
 0x190   :  { %7686 = vmatmul.mubr.msk.f32.gmra.mrb[58].mxu0 %vm539_vm5, %v9714_v62 }
 0x191   :  { %7595 = vmatmul.mubr.msk.f32.gmra.mrb[14].mxu1 %vm539_vm5, %v9712_v63  ;;  %7688 = vmatprep.mubr.msk.f32.mxu0 %vm8856_vm0, %v12930_v25 }
 0x192   :  { %7597 = vmatprep.mubr.msk.f32.mxu1 %vm8856_vm0, %v12930_v25 }
 0x194   :  { %7689 = vmatmul.mubr.msk.f32.gmra.mrb[60].mxu0 %vm539_vm5, %v9727_v57 }
 0x195   :  { %7598 = vmatmul.mubr.msk.f32.gmra.mrb[16].mxu1 %vm539_vm5, %v9725_v3  ;;  %7691 = vmatprep.mubr.msk.f32.mxu0 %vm8856_vm0, %v12930_v25 }
 0x196   :  { %7600 = vmatprep.mubr.msk.f32.mxu1 %vm8856_vm0, %v12930_v25 }
 0x198   :  { %7692 = vmatmul.mubr.msk.f32.gmra.mrb[62].mxu0 %vm539_vm5, %v9739_v11 }
 0x199   :  { %7601 = vmatmul.mubr.msk.f32.gmra.mrb[18].mxu1 %vm539_vm5, %v9737_v23  ;;  %7694 = vmatprep.mubr.msk.f32.mxu0 %vm8856_vm0, %v12930_v25 }
 0x19a   :  { %7603 = vmatprep.mubr.msk.f32.mxu1 %vm8856_vm0, %v12930_v25 }
 0x19c   :  { %7695 = vmatmul.mubr.msk.f32.gmra.mrb[64].mxu0 %vm539_vm5, %v9751_v24 }
 0x19d   :  { %7604 = vmatmul.mubr.msk.f32.gmra.mrb[20].mxu1 %vm539_vm5, %v9749_v37  ;;  %7697 = vmatprep.mubr.msk.f32.mxu0 %vm8856_vm0, %v12930_v25 }
 0x19e   :  { %7606 = vmatprep.mubr.msk.f32.mxu1 %vm8856_vm0, %v12930_v25 }
 0x1a0   :  { %7698 = vmatmul.mubr.msk.f32.gmra.mrb[66].mxu0 %vm539_vm5, %v9763_v26 }
 0x1a1   :  { %7607 = vmatmul.mubr.msk.f32.gmra.mrb[22].mxu1 %vm539_vm5, %v9761_v43  ;;  %7700 = vmatprep.mubr.msk.f32.mxu0 %vm8856_vm0, %v12930_v25 }
 0x1a2   :  { %7609 = vmatprep.mubr.msk.f32.mxu1 %vm8856_vm0, %v12930_v25 }
 0x1a4   :  { %7701 = vmatmul.mubr.msk.f32.gmra.mrb[68].mxu0 %vm539_vm5, %v9775_v21 }
 0x1a5   :  { %7610 = vmatmul.mubr.msk.f32.gmra.mrb[24].mxu1 %vm539_vm5, %v9773_v55  ;;  %7703 = vmatprep.mubr.msk.f32.mxu0 %vm8856_vm0, %v12930_v25 }
 0x1a6   :  { %7612 = vmatprep.mubr.msk.f32.mxu1 %vm8856_vm0, %v12930_v25 }
 0x1a8   :  { %7704 = vmatmul.mubr.msk.f32.gmra.mrb[70].mxu0 %vm539_vm5, %v9787_v49 }
 0x1a9   :  { %7613 = vmatmul.mubr.msk.f32.gmra.mrb[26].mxu1 %vm539_vm5, %v9785_v44  ;;  %7706 = vmatprep.mubr.msk.f32.mxu0 %vm8856_vm0, %v12930_v25 }
 0x1aa   :  { %7617 = vmatprep.mubr.msk.f32.mxu1 %vm8856_vm0, %v12930_v25 }
 0x1ac   :  { %7707 = vmatmul.mubr.msk.f32.gmra.mrb[72].mxu0 %vm539_vm5, %v9797_v4 }
 0x1ad   :  { %7618 = vmatmul.mubr.msk.f32.vlgmr.msra.gmra.mrb[28].mxu1 %vm539_vm5, %v824_v0  ;;  %7709 = vmatprep.mubr.msk.f32.mxu0 %vm8856_vm0, %v12930_v25  ;;  %v9860_v0 = vpop.f32.mrb[42].mxu0 }
 0x1ae   :  { %7620 = vmatprep.mubr.msk.f32.mxu1 %vm8856_vm0, %v12930_v25  ;;  %7746 = vmatpush3.msra.mxu1 %v6686_v30  ;;  %v7554_v30 = vpop.f32.mrb[43].mxu0 }
 0x1af   :  { %7875 = vmatprep.subr.mxu1 %v12930_v25  ;;  %v834_v30 = vld [vmem:[#allocation2 + $0x56] sm:$0xff] }
 0x1b0   :  { %7710 = vmatmul.mubr.msk.f32.gmra.mrb[74].mxu0 %vm539_vm5, %v9809_v41 }
 0x1b1   :  { %7621 = vmatmul.mubr.msk.f32.gmra.mrb[30].mxu1 %vm539_vm5, %v825_v6  ;;  %7712 = vmatprep.mubr.msk.f32.mxu0 %vm8856_vm0, %v12930_v25  ;;  %v831_v6 = vld [vmem:[#allocation2 + $0x3e] sm:$0xff] }
 0x1b2   :  { %7623 = vmatprep.mubr.msk.f32.mxu1 %vm8856_vm0, %v12930_v25 }
 0x1b4   :  { %7713 = vmatmul.mubr.msk.f32.gmra.mrb[76].mxu0 %vm539_vm5, %v9819_v34 }
 0x1b5   :  { %7624 = vmatmul.mubr.msk.f32.gmra.mrb[32].mxu1 %vm539_vm5, %v826_v54  ;;  %7715 = vmatprep.mubr.msk.f32.mxu0 %vm8856_vm0, %v12930_v25  ;;  %v9866_v54 = vld [vmem:[#allocation2 + $0x80] sm:$0xff] }
 0x1b6   :  { %7626 = vmatprep.mubr.msk.f32.mxu1 %vm8856_vm0, %v12930_v25 }
 0x1b8   :  { %7716 = vmatmul.mubr.msk.f32.gmra.mrb[78].mxu0 %vm539_vm5, %v9828_v48 }
 0x1b9   :  { %7627 = vmatmul.mubr.msk.f32.gmra.mrb[34].mxu1 %vm539_vm5, %v827_v45  ;;  %7718 = vmatprep.mubr.msk.f32.mxu0 %vm8856_vm0, %v12930_v25  ;;  %v832_v45 = vld [vmem:[#allocation2 + $0x46] sm:$0xff] }
 0x1ba   :  { %7629 = vmatprep.mubr.msk.f32.mxu1 %vm8856_vm0, %v12930_v25 }
 0x1bc   :  { %7719 = vmatmul.mubr.msk.f32.gmra.mrb[80].mxu0 %vm539_vm5, %v9837_v38 }
 0x1bd   :  { %7630 = vmatmul.mubr.msk.f32.gmra.mrb[36].mxu1 %vm539_vm5, %v828_v17  ;;  %7721 = vmatprep.mubr.msk.f32.mxu0 %vm8856_vm0, %v12930_v25  ;;  %v9875_v17 = vld [vmem:[#allocation2 + $0x88] sm:$0xff] }
 0x1be   :  { %7632 = vmatprep.mubr.msk.f32.mxu1 %vm8856_vm0, %v12930_v25 }
 0x1c0   :  { %7722 = vmatmul.mubr.msk.f32.gmra.mrb[82].mxu0 %vm539_vm5, %v9846_v29 }
 0x1c1   :  { %7633 = vmatmul.mubr.msk.f32.gmra.mrb[38].mxu1 %vm539_vm5, %v829_v35  ;;  %7724 = vmatprep.mubr.msk.f32.mxu0 %vm8856_vm0, %v12930_v25  ;;  %v833_v35 = vld [vmem:[#allocation2 + $0x4e] sm:$0xff] }
 0x1c2   :  { %7635 = vmatprep.mubr.msk.f32.mxu1 %vm8856_vm0, %v12930_v25 }
 0x1c4   :  { %7725 = vmatmul.mubr.msk.f32.gmra.mrb[84].mxu0 %vm539_vm5, %v9855_v5 }
 0x1c5   :  { %7636 = vmatmul.mubr.msk.f32.gmra.mrb[40].mxu1 %vm539_vm5, %v830_v50  ;;  %7727 = vmatprep.mubr.msk.f32.mxu0 %vm8856_vm0, %v12930_v25  ;;  %v9884_v50 = vld [vmem:[#allocation2 + $0x90] sm:$0xff] }
 0x1c6   :  { %7638 = vmatprep.mubr.msk.f32.mxu1 %vm8856_vm0, %v12930_v25 }
 0x1c8   :  { %7728 = vmatmul.mubr.msk.f32.gmra.mrb[86].mxu0 %vm539_vm5, %v9866_v54 }
 0x1c9   :  { %7639 = vmatmul.mubr.msk.f32.gmra.mrb[42].mxu1 %vm539_vm5, %v831_v6  ;;  %7730 = vmatprep.mubr.msk.f32.mxu0 %vm8856_vm0, %v12930_v25  ;;  %v9893_v6 = vld [vmem:[#allocation2 + $0x98] sm:$0xff] }
 0x1ca   :  { %7641 = vmatprep.mubr.msk.f32.mxu1 %vm8856_vm0, %v12930_v25 }
 0x1cc   :  { %7731 = vmatmul.mubr.msk.f32.gmra.mrb[88].mxu0 %vm539_vm5, %v9875_v17 }
 0x1cd   :  { %7642 = vmatmul.mubr.msk.f32.gmra.mrb[44].mxu1 %vm539_vm5, %v832_v45  ;;  %7733 = vmatprep.mubr.msk.f32.mxu0 %vm8856_vm0, %v12930_v25  ;;  %v835_v45 = vld [vmem:[#allocation2 + $0x5e] sm:$0xff] }
 0x1ce   :  { %7644 = vmatprep.mubr.msk.f32.mxu1 %vm8856_vm0, %v12930_v25 }
 0x1d0   :  { %7734 = vmatmul.mubr.msk.f32.gmra.mrb[90].mxu0 %vm539_vm5, %v9884_v50 }
 0x1d1   :  { %7645 = vmatmul.mubr.msk.f32.gmra.mrb[46].mxu1 %vm539_vm5, %v833_v35  ;;  %7736 = vmatprep.mubr.msk.f32.mxu0 %vm8856_vm0, %v12930_v25  ;;  %v9902_v35 = vld [vmem:[#allocation2 + $0xa0] sm:$0xff] }
 0x1d2   :  { %7647 = vmatprep.mubr.msk.f32.mxu1 %vm8856_vm0, %v12930_v25 }
 0x1d4   :  { %7737 = vmatmul.mubr.msk.f32.gmra.mrb[92].mxu0 %vm539_vm5, %v9893_v6 }
 0x1d5   :  { %7648 = vmatmul.mubr.msk.f32.gmra.mrb[48].mxu1 %vm539_vm5, %v834_v30  ;;  %7739 = vmatprep.mubr.msk.f32.mxu0 %vm8856_vm0, %v12930_v25  ;;  %v836_v30 = vld [vmem:[#allocation2 + $0x66] sm:$0xff] }
 0x1d6   :  { %7650 = vmatprep.mubr.msk.f32.mxu1 %vm8856_vm0, %v12930_v25 }
 0x1d8   :  { %7740 = vmatmul.mubr.msk.f32.gmra.mrb[94].mxu0 %vm539_vm5, %v9902_v35 }
 0x1d9   :  { %7651 = vmatmul.mubr.msk.f32.gmra.mrb[50].mxu1 %vm539_vm5, %v835_v45  ;;  %7742 = vmatprep.mubr.msk.f32.mxu0 %vm8856_vm0, %v12930_v25  ;;  %v837_v45 = vld [vmem:[#allocation2 + $0x6e] sm:$0xff] }
 0x1da   :  { %7653 = vmatprep.mubr.msk.f32.mxu1 %vm8856_vm0, %v12930_v25 }
 0x1dc   :  { %7743 = vmatmul.mubr.msk.f32.gmra.mrb[96].mxu0 %vm539_vm5, %v9911_v60 }
 0x1dd   :  { %7654 = vmatmul.mubr.msk.f32.gmra.mrb[52].mxu1 %vm539_vm5, %v836_v30  ;;  %7812 = vmatprep.mubr.msk.f32.mxu0 %vm8856_vm0, %v12930_v25  ;;  %v838_v30 = vld [vmem:[#allocation2 + $0x76] sm:$0xff] }
 0x1de   :  { %7656 = vmatprep.mubr.msk.f32.mxu1 %vm8856_vm0, %v12930_v25 }
 0x1e0   :  { %7813 = vmatmul.mubr.msk.f32.vlgmr.msra.gmra.mrb[98].mxu0 %vm539_vm5, %v9714_v62  ;;  %v839_v62 = vld [vmem:[#allocation2 + $0x7e] sm:$0xff] }
 0x1e1   :  { %7657 = vmatmul.mubr.msk.f32.gmra.mrb[54].mxu1 %vm539_vm5, %v837_v45  ;;  %7815 = vmatprep.mubr.msk.f32.mxu0 %vm8856_vm0, %v12930_v25  ;;  %v841_v45 = vld [vmem:[#allocation2 + $0x8e] sm:$0xff] }
 0x1e2   :  { %7659 = vmatprep.mubr.msk.f32.mxu1 %vm8856_vm0, %v12930_v25  ;;  %7941 = vmatpush3.msra.mxu0 %v6752_v32  ;;  %v840_v32 = vld [vmem:[#allocation2 + $0x86] sm:$0xff] }
 0x1e3   :  { %8070 = vmatprep.subr.mxu0 %v12930_v25 }
 0x1e4   :  { %7816 = vmatmul.mubr.msk.f32.gmra.mrb[100].mxu0 %vm539_vm5, %v9727_v57 }
 0x1e5   :  { %7660 = vmatmul.mubr.msk.f32.gmra.mrb[56].mxu1 %vm539_vm5, %v838_v30  ;;  %7818 = vmatprep.mubr.msk.f32.mxu0 %vm8856_vm0, %v12930_v25  ;;  %v842_v30 = vld [vmem:[#allocation2 + $0x96] sm:$0xff] }
 0x1e6   :  { %7662 = vmatprep.mubr.msk.f32.mxu1 %vm8856_vm0, %v12930_v25 }
 0x1e8   :  { %7819 = vmatmul.mubr.msk.f32.gmra.mrb[102].mxu0 %vm539_vm5, %v9739_v11 }
 0x1e9   :  { %7663 = vmatmul.mubr.msk.f32.gmra.mrb[58].mxu1 %vm539_vm5, %v839_v62  ;;  %7821 = vmatprep.mubr.msk.f32.mxu0 %vm8856_vm0, %v12930_v25  ;;  %v843_v62 = vld [vmem:[#allocation2 + $0x9e] sm:$0xff] }
 0x1ea   :  { %7665 = vmatprep.mubr.msk.f32.mxu1 %vm8856_vm0, %v12930_v25 }
 0x1ec   :  { %7822 = vmatmul.mubr.msk.f32.gmra.mrb[104].mxu0 %vm539_vm5, %v9751_v24 }
 0x1ed   :  { %7666 = vmatmul.mubr.msk.f32.gmra.mrb[60].mxu1 %vm539_vm5, %v840_v32  ;;  %7824 = vmatprep.mubr.msk.f32.mxu0 %vm8856_vm0, %v12930_v25  ;;  %v844_v32 = vld [vmem:[#allocation2 + $0xa6] sm:$0xff] }
 0x1ee   :  { %7668 = vmatprep.mubr.msk.f32.mxu1 %vm8856_vm0, %v12930_v25 }
 0x1f0   :  { %7825 = vmatmul.mubr.msk.f32.gmra.mrb[106].mxu0 %vm539_vm5, %v9763_v26 }
 0x1f1   :  { %7669 = vmatmul.mubr.msk.f32.gmra.mrb[62].mxu1 %vm539_vm5, %v841_v45  ;;  %7827 = vmatprep.mubr.msk.f32.mxu0 %vm8856_vm0, %v12930_v25  ;;  %v6730_v45 = vld [vmem:[%s12843_s5 + $0x28] sm:$0xff] }
 0x1f2   :  { %7671 = vmatprep.mubr.msk.f32.mxu1 %vm8856_vm0, %v12930_v25 }
 0x1f4   :  { %7828 = vmatmul.mubr.msk.f32.gmra.mrb[108].mxu0 %vm539_vm5, %v9775_v21 }
 0x1f5   :  { %7672 = vmatmul.mubr.msk.f32.gmra.mrb[64].mxu1 %vm539_vm5, %v842_v30  ;;  %7830 = vmatprep.mubr.msk.f32.mxu0 %vm8856_vm0, %v12930_v25  ;;  %v10202_v30 = vld [vmem:[#allocation2 + $0x21] sm:$0xff] }
 0x1f6   :  { %7674 = vmatprep.mubr.msk.f32.mxu1 %vm8856_vm0, %v12930_v25 }
 0x1f8   :  { %7831 = vmatmul.mubr.msk.f32.gmra.mrb[110].mxu0 %vm539_vm5, %v9787_v49 }
 0x1f9   :  { %7675 = vmatmul.mubr.msk.f32.gmra.mrb[66].mxu1 %vm539_vm5, %v843_v62  ;;  %7833 = vmatprep.mubr.msk.f32.mxu0 %vm8856_vm0, %v12930_v25 }
 0x1fa   :  { %7677 = vmatprep.mubr.msk.f32.mxu1 %vm8856_vm0, %v12930_v25 }
 0x1fc   :  { %7834 = vmatmul.mubr.msk.f32.gmra.mrb[112].mxu0 %vm539_vm5, %v9797_v4 }
 0x1fd   :  { %7678 = vmatmul.mubr.msk.f32.gmra.mrb[68].mxu1 %vm539_vm5, %v844_v32  ;;  %7836 = vmatprep.mubr.msk.f32.mxu0 %vm8856_vm0, %v12930_v25 }
 0x1fe   :  { %7747 = vmatprep.mubr.msk.f32.mxu1 %vm8856_vm0, %v12930_v25 }
 0x200   :  { %7837 = vmatmul.mubr.msk.f32.gmra.mrb[114].mxu0 %vm539_vm5, %v9809_v41 }
 0x201   :  { %7748 = vmatmul.mubr.msk.f32.vlgmr.msra.gmra.mrb[70].mxu1 %vm539_vm5, %v9572_v9  ;;  %7839 = vmatprep.mubr.msk.f32.mxu0 %vm8856_vm0, %v12930_v25  ;;  %v10080_v9 = vld [vmem:[#allocation2 + $0xb0] sm:$0xff] }
 0x202   :  { %7750 = vmatprep.mubr.msk.f32.mxu1 %vm8856_vm0, %v12930_v25  ;;  %7876 = vmatpush3.msra.mxu1 %v6730_v45  ;;  %v10214_v45 = vld [vmem:[#allocation2 + $0x29] sm:$0xff] }
 0x203   :  { %8005 = vmatprep.subr.mxu1 %v12930_v25 }
 0x204   :  { %7840 = vmatmul.mubr.msk.f32.gmra.mrb[116].mxu0 %vm539_vm5, %v9819_v34 }
 0x205   :  { %7751 = vmatmul.mubr.msk.f32.gmra.mrb[72].mxu1 %vm539_vm5, %v9622_v22  ;;  %7842 = vmatprep.mubr.msk.f32.mxu0 %vm8856_vm0, %v12930_v25  ;;  %v12931_v22 = vmov 0.0|0.0  }
 0x206   :  { %7753 = vmatprep.mubr.msk.f32.mxu1 %vm8856_vm0, %v12930_v25 }
 0x208   :  { %7843 = vmatmul.mubr.msk.f32.gmra.mrb[118].mxu0 %vm539_vm5, %v9828_v48 }
 0x209   :  { %7754 = vmatmul.mubr.msk.f32.gmra.mrb[74].mxu1 %vm539_vm5, %v9645_v2  ;;  %7845 = vmatprep.mubr.msk.f32.mxu0 %vm8856_vm0, %v12930_v25 }
 0x20a   :  { %7756 = vmatprep.mubr.msk.f32.mxu1 %vm8856_vm0, %v12930_v25 }
 0x20c   :  { %7846 = vmatmul.mubr.msk.f32.gmra.mrb[120].mxu0 %vm539_vm5, %v9837_v38 }
 0x20d   :  { %7757 = vmatmul.mubr.msk.f32.gmra.mrb[76].mxu1 %vm539_vm5, %v9664_v13  ;;  %7848 = vmatprep.mubr.msk.f32.mxu0 %vm8856_vm0, %v12930_v25 }
 0x20e   :  { %7759 = vmatprep.mubr.msk.f32.mxu1 %vm8856_vm0, %v12930_v25 }
 0x210   :  { %7849 = vmatmul.mubr.msk.f32.gmra.mrb[122].mxu0 %vm539_vm5, %v9846_v29 }
 0x211   :  { %7760 = vmatmul.mubr.msk.f32.gmra.mrb[78].mxu1 %vm539_vm5, %v9676_v58  ;;  %7851 = vmatprep.mubr.msk.f32.mxu0 %vm8856_vm0, %v12930_v25 }
 0x212   :  { %7762 = vmatprep.mubr.msk.f32.mxu1 %vm8856_vm0, %v12930_v25 }
 0x214   :  { %7852 = vmatmul.mubr.msk.f32.gmra.mrb[124].mxu0 %vm539_vm5, %v9855_v5 }
 0x215   :  { %7763 = vmatmul.mubr.msk.f32.gmra.mrb[80].mxu1 %vm539_vm5, %v9688_v19  ;;  %7854 = vmatprep.mubr.msk.f32.mxu0 %vm8856_vm0, %v12930_v25 }
 0x216   :  { %7765 = vmatprep.mubr.msk.f32.mxu1 %vm8856_vm0, %v12930_v25 }
 0x218   :  { %7855 = vmatmul.mubr.msk.f32.gmra.mrb[126].mxu0 %vm539_vm5, %v9866_v54 }
 0x219   :  { %7766 = vmatmul.mubr.msk.f32.gmra.mrb[82].mxu1 %vm539_vm5, %v9574_v16  ;;  %7857 = vmatprep.mubr.msk.f32.mxu0 %vm8856_vm0, %v12930_v25  ;;  %v6796_v16 = vld [vmem:[%s12843_s5 + $0x40] sm:$0xff] }
 0x21a   :  { %7768 = vmatprep.mubr.msk.f32.mxu1 %vm8856_vm0, %v12930_v25 }
 0x21c   :  { %7858 = vmatmul.mubr.msk.f32.gmra.mrb[128].mxu0 %vm539_vm5, %v9875_v17 }
 0x21d   :  { %7769 = vmatmul.mubr.msk.f32.gmra.mrb[84].mxu1 %vm539_vm5, %v9624_v46  ;;  %7860 = vmatprep.mubr.msk.f32.mxu0 %vm8856_vm0, %v12930_v25 }
 0x21e   :  { %7771 = vmatprep.mubr.msk.f32.mxu1 %vm8856_vm0, %v12930_v25 }
 0x220   :  { %7861 = vmatmul.mubr.msk.f32.gmra.mrb[130].mxu0 %vm539_vm5, %v9884_v50 }
 0x221   :  { %7772 = vmatmul.mubr.msk.f32.gmra.mrb[86].mxu1 %vm539_vm5, %v9647_v14  ;;  %7863 = vmatprep.mubr.msk.f32.mxu0 %vm8856_vm0, %v12930_v25 }
 0x222   :  { %7774 = vmatprep.mubr.msk.f32.mxu1 %vm8856_vm0, %v12930_v25 }
 0x224   :  { %7864 = vmatmul.mubr.msk.f32.gmra.mrb[132].mxu0 %vm539_vm5, %v9893_v6 }
 0x225   :  { %7775 = vmatmul.mubr.msk.f32.gmra.mrb[88].mxu1 %vm539_vm5, %v9666_v53  ;;  %7866 = vmatprep.mubr.msk.f32.mxu0 %vm8856_vm0, %v12930_v25 }
 0x226   :  { %7777 = vmatprep.mubr.msk.f32.mxu1 %vm8856_vm0, %v12930_v25 }
 0x228   :  { %7867 = vmatmul.mubr.msk.f32.gmra.mrb[134].mxu0 %vm539_vm5, %v9902_v35 }
 0x229   :  { %7778 = vmatmul.mubr.msk.f32.gmra.mrb[90].mxu1 %vm539_vm5, %v9678_v59  ;;  %7869 = vmatprep.mubr.msk.f32.mxu0 %vm8856_vm0, %v12930_v25 }
 0x22a   :  { %7780 = vmatprep.mubr.msk.f32.mxu1 %vm8856_vm0, %v12930_v25 }
 0x22c   :  { %7870 = vmatmul.mubr.msk.f32.gmra.mrb[136].mxu0 %vm539_vm5, %v9911_v60 }
 0x22d   :  { %7781 = vmatmul.mubr.msk.f32.gmra.mrb[92].mxu1 %vm539_vm5, %v9690_v27  ;;  %7872 = vmatprep.mubr.msk.f32.mxu0 %vm8856_vm0, %v12930_v25 }
 0x22e   :  { %7783 = vmatprep.mubr.msk.f32.mxu1 %vm8856_vm0, %v12930_v25 }
 0x230   :  { %7873 = vmatmul.mubr.msk.f32.gmra.mrb[138].mxu0 %vm539_vm5, %v10080_v9 }
 0x231   :  { %7784 = vmatmul.mubr.msk.f32.gmra.mrb[94].mxu1 %vm539_vm5, %v9700_v40  ;;  %7942 = vmatprep.mubr.msk.f32.mxu0 %vm8856_vm0, %v12930_v25 }
 0x232   :  { %7786 = vmatprep.mubr.msk.f32.mxu1 %vm8856_vm0, %v12930_v25 }
 0x234   :  { %7943 = vmatmul.mubr.msk.f32.vlgmr.msra.gmra.mrb[140].mxu0 %vm539_vm5, %v9727_v57 }
 0x235   :  { %7787 = vmatmul.mubr.msk.f32.gmra.mrb[96].mxu1 %vm539_vm5, %v9712_v63  ;;  %7945 = vmatprep.mubr.msk.f32.mxu0 %vm8856_vm0, %v12930_v25  ;;  %v1632_v63 = vld [vmem:[#allocation2 + $0xaf] sm:$0xff] }
 0x236   :  { %7789 = vmatprep.mubr.msk.f32.mxu1 %vm8856_vm0, %v12930_v25  ;;  %8071 = vmatpush3.msra.mxu0 %v6796_v16 }
 0x237   :  { %8757 = vmatprep.subr.bf16.mxu0 %v12931_v22 }
 0x238   :  { %7946 = vmatmul.mubr.msk.f32.gmra.mrb[142].mxu0 %vm539_vm5, %v9739_v11 }
 0x239   :  { %7790 = vmatmul.mubr.msk.f32.gmra.mrb[98].mxu1 %vm539_vm5, %v9725_v3  ;;  %7948 = vmatprep.mubr.msk.f32.mxu0 %vm8856_vm0, %v12930_v25 }
 0x23a   :  { %7792 = vmatprep.mubr.msk.f32.mxu1 %vm8856_vm0, %v12930_v25 }
 0x23c   :  { %7949 = vmatmul.mubr.msk.f32.gmra.mrb[144].mxu0 %vm539_vm5, %v9751_v24  ;;  %v6774_v24 = vld [vmem:[%s12843_s5 + $0x38] sm:$0xff] }
 0x23d   :  { %7793 = vmatmul.mubr.msk.f32.gmra.mrb[100].mxu1 %vm539_vm5, %v9737_v23  ;;  %7951 = vmatprep.mubr.msk.f32.mxu0 %vm8856_vm0, %v12930_v25 }
 0x23e   :  { %7795 = vmatprep.mubr.msk.f32.mxu1 %vm8856_vm0, %v12930_v25 }
 0x240   :  { %7952 = vmatmul.mubr.msk.f32.gmra.mrb[146].mxu0 %vm539_vm5, %v9763_v26 }
 0x241   :  { %7796 = vmatmul.mubr.msk.f32.gmra.mrb[102].mxu1 %vm539_vm5, %v9749_v37  ;;  %7954 = vmatprep.mubr.msk.f32.mxu0 %vm8856_vm0, %v12930_v25  ;;  %v2166_v37 = vld [vmem:[#allocation2 + $0x11] sm:$0xff] }
 0x242   :  { %7798 = vmatprep.mubr.msk.f32.mxu1 %vm8856_vm0, %v12930_v25 }
 0x244   :  { %7955 = vmatmul.mubr.msk.f32.gmra.mrb[148].mxu0 %vm539_vm5, %v9775_v21 }
 0x245   :  { %7799 = vmatmul.mubr.msk.f32.gmra.mrb[104].mxu1 %vm539_vm5, %v9761_v43  ;;  %7957 = vmatprep.mubr.msk.f32.mxu0 %vm8856_vm0, %v12930_v25 }
 0x246   :  { %7801 = vmatprep.mubr.msk.f32.mxu1 %vm8856_vm0, %v12930_v25 }
 0x247   :  { %v10134_v46 = vpop.f32.mrb[44].mxu0 }
 0x248   :  { %v10136_v2 = vpop.f32.mrb[0].mxu1  ;;  %v7557_v14 = vpop.f32.mrb[45].mxu0  ;;  %7958 = vmatmul.mubr.msk.f32.gmra.mrb[150].mxu0 %vm539_vm5, %v9787_v49 }
 0x249   :  { %v7575_v13 = vpop.f32.mrb[1].mxu1  ;;  %7802 = vmatmul.mubr.msk.f32.gmra.mrb[106].mxu1 %vm539_vm5, %v9773_v55  ;;  %7960 = vmatprep.mubr.msk.f32.mxu0 %vm8856_vm0, %v12930_v25 }
 0x24a   :  { %7804 = vmatprep.mubr.msk.f32.mxu1 %vm8856_vm0, %v12930_v25 }
 0x24b   :  { %v10146_v53 = vpop.f32.mrb[46].mxu0 }
 0x24c   :  { %v10148_v58 = vpop.f32.mrb[2].mxu1  ;;  %v7560_v59 = vpop.f32.mrb[47].mxu0  ;;  %7961 = vmatmul.mubr.msk.f32.gmra.mrb[152].mxu0 %vm539_vm5, %v9797_v4 }
 0x24d   :  { %v7578_v19 = vpop.f32.mrb[3].mxu1  ;;  %7805 = vmatmul.mubr.msk.f32.gmra.mrb[108].mxu1 %vm539_vm5, %v9785_v44  ;;  %7963 = vmatprep.mubr.msk.f32.mxu0 %vm8856_vm0, %v12930_v25  ;;  %v10187_v44 = vld [vmem:[#allocation2 + $0x19] sm:$0xff] }
 0x24e   :  { %7807 = vmatprep.mubr.msk.f32.mxu1 %vm8856_vm0, %v12930_v25  ;;  %v10230_v19 = vld [vmem:[#allocation2 + $0x31] sm:$0xff] }
 0x24f   :  { %v10158_v27 = vpop.f32.mrb[48].mxu0 }
 0x250   :  { %v10160_v40 = vpop.f32.mrb[4].mxu1  ;;  %v7563_v3 = vpop.f32.mrb[49].mxu0  ;;  %7964 = vmatmul.mubr.msk.f32.gmra.mrb[154].mxu0 %vm539_vm5, %v9809_v41 }
 0x251   :  { %v7581_v57 = vpop.f32.mrb[5].mxu1  ;;  %7808 = vmatmul.mubr.msk.f32.gmra.mrb[110].mxu1 %vm539_vm5, %v1632_v63  ;;  %7966 = vmatprep.mubr.msk.f32.mxu0 %vm8856_vm0, %v12930_v25 }
 0x252   :  { %7877 = vmatprep.mubr.msk.f32.mxu1 %vm8856_vm0, %v12930_v25 }
 0x253   :  { %v10169_v23 = vpop.f32.mrb[50].mxu0 }
 0x254   :  { %v10171_v11 = vpop.f32.mrb[6].mxu1  ;;  %v7566_v43 = vpop.f32.mrb[51].mxu0  ;;  %7967 = vmatmul.mubr.msk.f32.gmra.mrb[156].mxu0 %vm539_vm5, %v9819_v34 }
 0x255   :  { %v7584_v26 = vpop.f32.mrb[7].mxu1  ;;  %7878 = vmatmul.mubr.msk.f32.vlgmr.msra.gmra.mrb[112].mxu1 %vm539_vm5, %v2166_v37  ;;  %7969 = vmatprep.mubr.msk.f32.mxu0 %vm8856_vm0, %v12930_v25  ;;  %v10244_v37 = vld [vmem:[#allocation2 + $0x39] sm:$0xff] }
 0x256   :  { %7880 = vmatprep.mubr.msk.f32.mxu1 %vm8856_vm0, %v12930_v25  ;;  %8006 = vmatpush3.msra.mxu1 %v6774_v24 }
 0x257   :  { %v10183_v55 = vpop.f32.mrb[52].mxu0  ;;  %8754 = vmatprep.subr.bf16.mxu1 %v12931_v22 }
 0x258   :  { %v10185_v21 = vpop.f32.mrb[8].mxu1  ;;  %v7569_v49 = vpop.f32.mrb[53].mxu0  ;;  %7970 = vmatmul.mubr.msk.f32.gmra.mrb[158].mxu0 %vm539_vm5, %v9828_v48 }
 0x259   :  { %v7587_v4 = vpop.f32.mrb[9].mxu1  ;;  %7881 = vmatmul.mubr.msk.f32.gmra.mrb[114].mxu1 %vm539_vm5, %v10187_v44  ;;  %7972 = vmatprep.mubr.msk.f32.mxu0 %vm8856_vm0, %v12930_v25  ;;  %v10258_v49 = vld [vmem:[#allocation2 + $0x41] sm:$0xff] }
 0x25a   :  { %7883 = vmatprep.mubr.msk.f32.mxu1 %vm8856_vm0, %v12930_v25 }
 0x25b   :  { %v10198_v41 = vpop.f32.mrb[54].mxu0 }
 0x25c   :  { %v10200_v34 = vpop.f32.mrb[10].mxu1  ;;  %v7572_v62 = vpop.f32.mrb[55].mxu0  ;;  %7973 = vmatmul.mubr.msk.f32.gmra.mrb[160].mxu0 %vm539_vm5, %v9837_v38 }
 0x25d   :  { %v7590_v32 = vpop.f32.mrb[11].mxu1  ;;  %7884 = vmatmul.mubr.msk.f32.gmra.mrb[116].mxu1 %vm539_vm5, %v10202_v30  ;;  %7975 = vmatprep.mubr.msk.f32.mxu0 %vm8856_vm0, %v12930_v25 }
 0x25e   :  { %7886 = vmatprep.mubr.msk.f32.mxu1 %vm8856_vm0, %v12930_v25 }
 0x25f   :  { %v10216_v16 = vpop.f32.mrb[56].mxu0 }
 0x260   :  { %v10212_v48 = vpop.f32.mrb[12].mxu1  ;;  %7976 = vmatmul.mubr.msk.f32.gmra.mrb[162].mxu0 %vm539_vm5, %v9846_v29  ;;  %v7684_v38 = vpop.f32.mrb[57].mxu0 }
 0x261   :  { %v7593_v14 = vpop.f32.mrb[13].mxu1  ;;  %7887 = vmatmul.mubr.msk.f32.gmra.mrb[118].mxu1 %vm539_vm5, %v10214_v45  ;;  %7978 = vmatprep.mubr.msk.f32.mxu0 %vm8856_vm0, %v12930_v25 }
 0x262   :  { %7889 = vmatprep.mubr.msk.f32.mxu1 %vm8856_vm0, %v12930_v25  ;;  %v10272_v14 = vld [vmem:[#allocation2 + $0x49] sm:$0xff] }
 0x263   :  { %v10228_v59 = vpop.f32.mrb[58].mxu0 }
 0x264   :  { %v10226_v13 = vpop.f32.mrb[14].mxu1  ;;  %v7687_v3 = vpop.f32.mrb[59].mxu0  ;;  %7979 = vmatmul.mubr.msk.f32.gmra.mrb[164].mxu0 %vm539_vm5, %v9855_v5 }
 0x265   :  { %v7596_v63 = vpop.f32.mrb[15].mxu1  ;;  %7890 = vmatmul.mubr.msk.f32.gmra.mrb[120].mxu1 %vm539_vm5, %v10230_v19  ;;  %7981 = vmatprep.mubr.msk.f32.mxu0 %vm8856_vm0, %v12930_v25 }
 0x266   :  { %7892 = vmatprep.mubr.msk.f32.mxu1 %vm8856_vm0, %v12930_v25 }
 0x267   :  { %v10242_v57 = vpop.f32.mrb[60].mxu0 }
 0x268   :  { %v10240_v29 = vpop.f32.mrb[16].mxu1  ;;  %v7690_v43 = vpop.f32.mrb[61].mxu0  ;;  %7982 = vmatmul.mubr.msk.f32.gmra.mrb[166].mxu0 %vm539_vm5, %v9866_v54 }
 0x269   :  { %v7599_v24 = vpop.f32.mrb[17].mxu1  ;;  %7893 = vmatmul.mubr.msk.f32.gmra.mrb[122].mxu1 %vm539_vm5, %v10244_v37  ;;  %7984 = vmatprep.mubr.msk.f32.mxu0 %vm8856_vm0, %v12930_v25 }
 0x26a   :  { %7895 = vmatprep.mubr.msk.f32.mxu1 %vm8856_vm0, %v12930_v25  ;;  %v10286_v24 = vld [vmem:[#allocation2 + $0x51] sm:$0xff] }
 0x26b   :  { %v10256_v26 = vpop.f32.mrb[62].mxu0 }
 0x26c   :  { %v10254_v5 = vpop.f32.mrb[18].mxu1  ;;  %v7693_v62 = vpop.f32.mrb[63].mxu0  ;;  %7985 = vmatmul.mubr.msk.f32.gmra.mrb[168].mxu0 %vm539_vm5, %v9875_v17 }
 0x26d   :  { %v7602_v4 = vpop.f32.mrb[19].mxu1  ;;  %7896 = vmatmul.mubr.msk.f32.gmra.mrb[124].mxu1 %vm539_vm5, %v10258_v49  ;;  %7987 = vmatprep.mubr.msk.f32.mxu0 %vm8856_vm0, %v12930_v25 }
 0x26e   :  { %7898 = vmatprep.mubr.msk.f32.mxu1 %vm8856_vm0, %v12930_v25 }
 0x26f   :  { %v10270_v32 = vpop.f32.mrb[64].mxu0 }
 0x270   :  { %v10268_v54 = vpop.f32.mrb[20].mxu1  ;;  %v7696_v63 = vpop.f32.mrb[65].mxu0  ;;  %7988 = vmatmul.mubr.msk.f32.gmra.mrb[170].mxu0 %vm539_vm5, %v9884_v50 }
 0x271   :  { %v7605_v38 = vpop.f32.mrb[21].mxu1  ;;  %7899 = vmatmul.mubr.msk.f32.gmra.mrb[126].mxu1 %vm539_vm5, %v10272_v14  ;;  %7990 = vmatprep.mubr.msk.f32.mxu0 %vm8856_vm0, %v12930_v25 }
 0x272   :  { %7901 = vmatprep.mubr.msk.f32.mxu1 %vm8856_vm0, %v12930_v25  ;;  %v10300_v38 = vld [vmem:[#allocation2 + $0x59] sm:$0xff] }
 0x273   :  { %v10284_v3 = vpop.f32.mrb[66].mxu0 }
 0x274   :  { %v10282_v17 = vpop.f32.mrb[22].mxu1  ;;  %v7699_v4 = vpop.f32.mrb[67].mxu0  ;;  %7991 = vmatmul.mubr.msk.f32.gmra.mrb[172].mxu0 %vm539_vm5, %v9893_v6 }
 0x275   :  { %v7608_v43 = vpop.f32.mrb[23].mxu1  ;;  %7902 = vmatmul.mubr.msk.f32.gmra.mrb[128].mxu1 %vm539_vm5, %v10286_v24  ;;  %7993 = vmatprep.mubr.msk.f32.mxu0 %vm8856_vm0, %v12930_v25 }
 0x276   :  { %7904 = vmatprep.mubr.msk.f32.mxu1 %vm8856_vm0, %v12930_v25 }
 0x277   :  { %v10298_v62 = vpop.f32.mrb[68].mxu0 }
 0x278   :  { %v10296_v50 = vpop.f32.mrb[24].mxu1  ;;  %v7702_v43 = vpop.f32.mrb[69].mxu0  ;;  %7994 = vmatmul.mubr.msk.f32.gmra.mrb[174].mxu0 %vm539_vm5, %v9902_v35 }
 0x279   :  { %v7611_v63 = vpop.f32.mrb[25].mxu1  ;;  %7905 = vmatmul.mubr.msk.f32.gmra.mrb[130].mxu1 %vm539_vm5, %v10300_v38  ;;  %7996 = vmatprep.mubr.msk.f32.mxu0 %vm8856_vm0, %v12930_v25 }
 0x27a   :  { %7907 = vmatprep.mubr.msk.f32.mxu1 %vm8856_vm0, %v12930_v25 }
 0x27b   :  { %v10312_v4 = vpop.f32.mrb[70].mxu0 }
 0x27c   :  { %v10310_v6 = vpop.f32.mrb[26].mxu1  ;;  %v7705_v43 = vpop.f32.mrb[71].mxu0  ;;  %7997 = vmatmul.mubr.msk.f32.gmra.mrb[176].mxu0 %vm539_vm5, %v9911_v60  ;;  %v2463_v60 = vld [vmem:[#allocation2 + $0xb8] sm:$0xff] }
 0x27d   :  { %v7614_v63 = vpop.f32.mrb[27].mxu1  ;;  %7908 = vmatmul.mubr.msk.f32.gmra.mrb[132].mxu1 %vm539_vm5, %v10314_v1  ;;  %7999 = vmatprep.mubr.msk.f32.mxu0 %vm8856_vm0, %v12930_v25 }
 0x27e   :  { %7910 = vmatprep.mubr.msk.f32.mxu1 %vm8856_vm0, %v12930_v25 }
 0x27f   :  { %v10324_v42 = vpop.f32.mrb[72].mxu0 }
 0x280   :  { %v1231_v35 = vpop.f32.mrb[28].mxu1  ;;  %v7708_v51 = vpop.f32.mrb[73].mxu0  ;;  %8000 = vmatmul.mubr.msk.f32.gmra.mrb[178].mxu0 %vm539_vm5, %v10080_v9 }
 0x281   :  { %v1232_v63 = vadd.f32 %v1231_v35, %v9860_v0  ;;  %v7619_v43 = vpop.f32.mrb[29].mxu1  ;;  %7911 = vmatmul.mubr.msk.f32.gmra.mrb[134].mxu1 %vm539_vm5, %v10326_v12  ;;  %8002 = vmatprep.mubr.msk.f32.mxu0 %vm8856_vm0, %v12930_v25  ;;  %v10342_v51 = vld [vmem:[#allocation2 + $0x71] sm:$0xff] }
 0x282   :  { %7913 = vmatprep.mubr.msk.f32.mxu1 %vm8856_vm0, %v12930_v25 }
 0x283   :  { %v10338_v31 = vadd.f32 %v10216_v16, %v1232_v63  ;;  %v10340_v0 = vpop.f32.mrb[74].mxu0 }
 0x284   :  { %v1236_v8 = vpop.f32.mrb[30].mxu1  ;;  %v7711_v52 = vpop.f32.mrb[75].mxu0  ;;  %8003 = vmatmul.mubr.msk.f32.gmra.mrb[180].mxu0 %vm539_vm5, %v2463_v60 }
 0x285   :  { %v1237_v35 = vadd.f32 %v1236_v8, %v10134_v46  ;;  %v7622_v43 = vpop.f32.mrb[31].mxu1  ;;  %7914 = vmatmul.mubr.msk.f32.gmra.mrb[136].mxu1 %vm539_vm5, %v10342_v51  ;;  %8072 = vmatprep.mubr.msk.f32.mxu0 %vm8856_vm0, %v12930_v25  ;;  %v10357_v8 = vld [vmem:[#allocation2 + $0x79] sm:$0xff] }
 0x286   :  { %7916 = vmatprep.mubr.msk.f32.mxu1 %vm8856_vm0, %v12930_v25  ;;  %v2997_v52 = vld [vmem:[#allocation2 + $0x1a] sm:$0xff] }
 0x287   :  { %v10353_v9 = vadd.f32 %v10228_v59, %v1237_v35  ;;  %v10355_v63 = vpop.f32.mrb[76].mxu0 }
 0x288   :  { %v1241_v16 = vpop.f32.mrb[32].mxu1  ;;  %v7714_v36 = vpop.f32.mrb[77].mxu0  ;;  %8073 = vmatmul.mubr.msk.f32.vlgmr.msra.gmra.mrb[182].mxu0 %vm539_vm5, %v2997_v52 }
 0x289   :  { %v1242_v46 = vadd.f32 %v1241_v16, %v10146_v53  ;;  %v7625_v43 = vpop.f32.mrb[33].mxu1  ;;  %7917 = vmatmul.mubr.msk.f32.gmra.mrb[138].mxu1 %vm539_vm5, %v10357_v8  ;;  %8075 = vmatprep.mubr.msk.f32.mxu0 %vm8856_vm0, %v12930_v25  ;;  %v10372_v53 = vld [vmem:[#allocation2 + $0x81] sm:$0xff] }
 0x28a   :  { %7919 = vmatprep.mubr.msk.f32.mxu1 %vm8856_vm0, %v12930_v25  ;;  %v2998_v36 = vld [vmem:[#allocation2 + $0x22] sm:$0xff] }
 0x28b   :  { %v10368_v59 = vadd.f32 %v10242_v57, %v1242_v46  ;;  %v10370_v35 = vpop.f32.mrb[78].mxu0 }
 0x28c   :  { %v1246_v60 = vpop.f32.mrb[34].mxu1  ;;  %v7717_v20 = vpop.f32.mrb[79].mxu0  ;;  %8076 = vmatmul.mubr.msk.f32.gmra.mrb[184].mxu0 %vm539_vm5, %v2998_v36 }
 0x28d   :  { %v1247_v16 = vadd.f32 %v1246_v60, %v10158_v27  ;;  %v7628_v43 = vpop.f32.mrb[35].mxu1  ;;  %7920 = vmatmul.mubr.msk.f32.gmra.mrb[140].mxu1 %vm539_vm5, %v10372_v53  ;;  %8078 = vmatprep.mubr.msk.f32.mxu0 %vm8856_vm0, %v12930_v25  ;;  %v10387_v27 = vld [vmem:[#allocation2 + $0x89] sm:$0xff] }
 0x28e   :  { %7922 = vmatprep.mubr.msk.f32.mxu1 %vm8856_vm0, %v12930_v25  ;;  %v2999_v20 = vld [vmem:[#allocation2 + $0x2a] sm:$0xff] }
 0x28f   :  { %v10383_v57 = vadd.f32 %v10256_v26, %v1247_v16  ;;  %v10385_v46 = vpop.f32.mrb[80].mxu0 }
 0x290   :  { %v1251_v52 = vpop.f32.mrb[36].mxu1  ;;  %v7720_v61 = vpop.f32.mrb[81].mxu0  ;;  %8079 = vmatmul.mubr.msk.f32.gmra.mrb[186].mxu0 %vm539_vm5, %v2999_v20 }
 0x291   :  { %v1252_v60 = vadd.f32 %v1251_v52, %v10169_v23  ;;  %v7631_v43 = vpop.f32.mrb[37].mxu1  ;;  %7923 = vmatmul.mubr.msk.f32.gmra.mrb[142].mxu1 %vm539_vm5, %v10387_v27  ;;  %8081 = vmatprep.mubr.msk.f32.mxu0 %vm8856_vm0, %v12930_v25  ;;  %v10402_v23 = vld [vmem:[#allocation2 + $0x91] sm:$0xff] }
 0x292   :  { %7925 = vmatprep.mubr.msk.f32.mxu1 %vm8856_vm0, %v12930_v25  ;;  %v3000_v61 = vld [vmem:[#allocation2 + $0x32] sm:$0xff] }
 0x293   :  { %v10398_v26 = vadd.f32 %v10270_v32, %v1252_v60  ;;  %v10400_v16 = vpop.f32.mrb[82].mxu0 }
 0x294   :  { %v1256_v36 = vpop.f32.mrb[38].mxu1  ;;  %v7723_v47 = vpop.f32.mrb[83].mxu0  ;;  %8082 = vmatmul.mubr.msk.f32.gmra.mrb[188].mxu0 %vm539_vm5, %v3000_v61 }
 0x295   :  { %v1257_v52 = vadd.f32 %v1256_v36, %v10183_v55  ;;  %v7634_v43 = vpop.f32.mrb[39].mxu1  ;;  %7926 = vmatmul.mubr.msk.f32.gmra.mrb[144].mxu1 %vm539_vm5, %v10402_v23  ;;  %8084 = vmatprep.mubr.msk.f32.mxu0 %vm8856_vm0, %v12930_v25  ;;  %v10417_v55 = vld [vmem:[#allocation2 + $0x99] sm:$0xff] }
 0x296   :  { %7928 = vmatprep.mubr.msk.f32.mxu1 %vm8856_vm0, %v12930_v25  ;;  %v3001_v47 = vld [vmem:[#allocation2 + $0x3a] sm:$0xff] }
 0x297   :  { %v10413_v32 = vadd.f32 %v10284_v3, %v1257_v52  ;;  %v10415_v60 = vpop.f32.mrb[84].mxu0 }
 0x298   :  { %v1261_v20 = vpop.f32.mrb[40].mxu1  ;;  %v7726_v33 = vpop.f32.mrb[85].mxu0  ;;  %8085 = vmatmul.mubr.msk.f32.gmra.mrb[190].mxu0 %vm539_vm5, %v3001_v47 }
 0x299   :  { %v1262_v36 = vadd.f32 %v1261_v20, %v10198_v41  ;;  %v7637_v43 = vpop.f32.mrb[41].mxu1  ;;  %7929 = vmatmul.mubr.msk.f32.gmra.mrb[146].mxu1 %vm539_vm5, %v10417_v55  ;;  %8087 = vmatprep.mubr.msk.f32.mxu0 %vm8856_vm0, %v12930_v25  ;;  %v10432_v41 = vld [vmem:[#allocation2 + $0xa1] sm:$0xff] }
 0x29a   :  { %7931 = vmatprep.mubr.msk.f32.mxu1 %vm8856_vm0, %v12930_v25  ;;  %v3002_v33 = vld [vmem:[#allocation2 + $0x42] sm:$0xff] }
 0x29b   :  { %v10428_v3 = vadd.f32 %v10298_v62, %v1262_v36  ;;  %v10430_v52 = vpop.f32.mrb[86].mxu0 }
 0x29c   :  { %v1266_v61 = vpop.f32.mrb[42].mxu1  ;;  %v7729_v10 = vpop.f32.mrb[87].mxu0  ;;  %8088 = vmatmul.mubr.msk.f32.gmra.mrb[192].mxu0 %vm539_vm5, %v3002_v33 }
 0x29d   :  { %v1267_v20 = vadd.f32 %v1266_v61, %v10136_v2  ;;  %v7640_v43 = vpop.f32.mrb[43].mxu1  ;;  %7932 = vmatmul.mubr.msk.f32.gmra.mrb[148].mxu1 %vm539_vm5, %v10432_v41  ;;  %8090 = vmatprep.mubr.msk.f32.mxu0 %vm8856_vm0, %v12930_v25  ;;  %v10447_v2 = vld [vmem:[#allocation2 + $0xa9] sm:$0xff] }
 0x29e   :  { %7934 = vmatprep.mubr.msk.f32.mxu1 %vm8856_vm0, %v12930_v25  ;;  %v3003_v10 = vld [vmem:[#allocation2 + $0x4a] sm:$0xff] }
 0x29f   :  { %v10443_v62 = vadd.f32 %v10312_v4, %v1267_v20  ;;  %v10445_v36 = vpop.f32.mrb[88].mxu0 }
 0x2a0   :  { %v1271_v47 = vpop.f32.mrb[44].mxu1  ;;  %v7732_v56 = vpop.f32.mrb[89].mxu0  ;;  %8091 = vmatmul.mubr.msk.f32.gmra.mrb[194].mxu0 %vm539_vm5, %v3003_v10 }
 0x2a1   :  { %v1272_v61 = vadd.f32 %v1271_v47, %v10148_v58  ;;  %v7643_v43 = vpop.f32.mrb[45].mxu1  ;;  %7935 = vmatmul.mubr.msk.f32.gmra.mrb[150].mxu1 %vm539_vm5, %v10447_v2  ;;  %8093 = vmatprep.mubr.msk.f32.mxu0 %vm8856_vm0, %v12930_v25  ;;  %v10462_v58 = vld [vmem:[#allocation2 + $0xb1] sm:$0xff] }
 0x2a2   :  { %7937 = vmatprep.mubr.msk.f32.mxu1 %vm8856_vm0, %v12930_v25  ;;  %v3004_v56 = vld [vmem:[#allocation2 + $0x52] sm:$0xff] }
 0x2a3   :  { %v10458_v4 = vadd.f32 %v10324_v42, %v1272_v61  ;;  %v10460_v20 = vpop.f32.mrb[90].mxu0 }
 0x2a4   :  { %v1276_v33 = vpop.f32.mrb[46].mxu1  ;;  %v7735_v39 = vpop.f32.mrb[91].mxu0  ;;  %8094 = vmatmul.mubr.msk.f32.gmra.mrb[196].mxu0 %vm539_vm5, %v3004_v56 }
 0x2a5   :  { %v1277_v47 = vadd.f32 %v1276_v33, %v10160_v40  ;;  %v7646_v43 = vpop.f32.mrb[47].mxu1  ;;  %7938 = vmatmul.mubr.msk.f32.gmra.mrb[152].mxu1 %vm539_vm5, %v10462_v58  ;;  %8096 = vmatprep.mubr.msk.f32.mxu0 %vm8856_vm0, %v12930_v25  ;;  %v3005_v40 = vld [vmem:[#allocation2 + $0x5a] sm:$0xff] }
 0x2a6   :  { %8007 = vmatprep.mubr.msk.f32.mxu1 %vm8856_vm0, %v12930_v25 }
 0x2a7   :  { %v10473_v42 = vadd.f32 %v10340_v0, %v1277_v47  ;;  %v10475_v61 = vpop.f32.mrb[92].mxu0 }
 0x2a8   :  { %v1281_v10 = vpop.f32.mrb[48].mxu1  ;;  %v7738_v43 = vpop.f32.mrb[93].mxu0  ;;  %8097 = vmatmul.mubr.msk.f32.gmra.mrb[198].mxu0 %vm539_vm5, %v3005_v40 }
 0x2a9   :  { %v1282_v39 = vadd.f32 %v1281_v10, %v10171_v11  ;;  %v7649_v33 = vpop.f32.mrb[49].mxu1  ;;  %8008 = vmatmul.mubr.msk.f32.vlgmr.msra.gmra.mrb[154].mxu1 %vm539_vm5, %v10187_v44  ;;  %8099 = vmatprep.mubr.msk.f32.mxu0 %vm8856_vm0, %v12930_v25  ;;  %v3006_v11 = vld [vmem:[#allocation2 + $0x62] sm:$0xff] }
 0x2aa   :  { %8010 = vmatprep.mubr.msk.f32.mxu1 %vm8856_vm0, %v12930_v25 }
 0x2ab   :  { %v10486_v0 = vadd.f32 %v10355_v63, %v1282_v39  ;;  %v10488_v47 = vpop.f32.mrb[94].mxu0 }
 0x2ac   :  { %v1286_v56 = vpop.f32.mrb[50].mxu1  ;;  %v7741_v43 = vpop.f32.mrb[95].mxu0  ;;  %8100 = vmatmul.mubr.msk.f32.gmra.mrb[200].mxu0 %vm539_vm5, %v3006_v11 }
 0x2ad   :  { %v1287_v10 = vadd.f32 %v1286_v56, %v10185_v21  ;;  %v7652_v33 = vpop.f32.mrb[51].mxu1  ;;  %8011 = vmatmul.mubr.msk.f32.gmra.mrb[156].mxu1 %vm539_vm5, %v10202_v30  ;;  %8102 = vmatprep.mubr.msk.f32.mxu0 %vm8856_vm0, %v12930_v25  ;;  %v3007_v21 = vld [vmem:[#allocation2 + $0x6a] sm:$0xff] }
 0x2ae   :  { %8013 = vmatprep.mubr.msk.f32.mxu1 %vm8856_vm0, %v12930_v25 }
 0x2af   :  { %v10499_v44 = vadd.f32 %v10370_v35, %v1287_v10  ;;  %v10501_v40 = vpop.f32.mrb[96].mxu0 }
 0x2b0   :  { %v1291_v63 = vpop.f32.mrb[52].mxu1  ;;  %v7744_v33 = vpop.f32.mrb[97].mxu0  ;;  %8103 = vmatmul.mubr.msk.f32.gmra.mrb[202].mxu0 %vm539_vm5, %v3007_v21 }
 0x2b1   :  { %v1292_v39 = vadd.f32 %v1291_v63, %v10200_v34  ;;  %v7655_v56 = vpop.f32.mrb[53].mxu1  ;;  %8014 = vmatmul.mubr.msk.f32.gmra.mrb[158].mxu1 %vm539_vm5, %v10214_v45  ;;  %8105 = vmatprep.mubr.msk.f32.mxu0 %vm8856_vm0, %v12930_v25  ;;  %v3008_v34 = vld [vmem:[#allocation2 + $0x72] sm:$0xff] }
 0x2b2   :  { %8016 = vmatprep.mubr.msk.f32.mxu1 %vm8856_vm0, %v12930_v25 }
 0x2b3   :  { %v10512_v30 = vadd.f32 %v10385_v46, %v1292_v39  ;;  %v10514_v11 = vpop.f32.mrb[98].mxu0 }
 0x2b4   :  { %v1296_v35 = vpop.f32.mrb[54].mxu1  ;;  %v7814_v63 = vpop.f32.mrb[99].mxu0  ;;  %8106 = vmatmul.mubr.msk.f32.gmra.mrb[204].mxu0 %vm539_vm5, %v3008_v34 }
 0x2b5   :  { %v1297_v10 = vadd.f32 %v1296_v35, %v10212_v48  ;;  %v7658_v43 = vpop.f32.mrb[55].mxu1  ;;  %8017 = vmatmul.mubr.msk.f32.gmra.mrb[160].mxu1 %vm539_vm5, %v10230_v19  ;;  %8108 = vmatprep.mubr.msk.f32.mxu0 %vm8856_vm0, %v12930_v25  ;;  %v3009_v48 = vld [vmem:[#allocation2 + $0x7a] sm:$0xff] }
 0x2b6   :  { %8019 = vmatprep.mubr.msk.f32.mxu1 %vm8856_vm0, %v12930_v25 }
 0x2b7   :  { %v10525_v45 = vadd.f32 %v10400_v16, %v1297_v10  ;;  %v10527_v21 = vpop.f32.mrb[100].mxu0 }
 0x2b8   :  { %v1301_v46 = vpop.f32.mrb[56].mxu1  ;;  %v7817_v33 = vpop.f32.mrb[101].mxu0  ;;  %8109 = vmatmul.mubr.msk.f32.gmra.mrb[206].mxu0 %vm539_vm5, %v3009_v48 }
 0x2b9   :  { %v1302_v39 = vadd.f32 %v1301_v46, %v10226_v13  ;;  %v7661_v56 = vpop.f32.mrb[57].mxu1  ;;  %8020 = vmatmul.mubr.msk.f32.gmra.mrb[162].mxu1 %vm539_vm5, %v10244_v37  ;;  %8111 = vmatprep.mubr.msk.f32.mxu0 %vm8856_vm0, %v12930_v25  ;;  %v3010_v13 = vld [vmem:[#allocation2 + $0x82] sm:$0xff] }
 0x2ba   :  { %8022 = vmatprep.mubr.msk.f32.mxu1 %vm8856_vm0, %v12930_v25 }
 0x2bb   :  { %v10538_v19 = vadd.f32 %v10415_v60, %v1302_v39  ;;  %v10540_v35 = vpop.f32.mrb[102].mxu0 }
 0x2bc   :  { %v1306_v16 = vpop.f32.mrb[58].mxu1  ;;  %v7820_v43 = vpop.f32.mrb[103].mxu0  ;;  %8112 = vmatmul.mubr.msk.f32.gmra.mrb[208].mxu0 %vm539_vm5, %v3010_v13 }
 0x2bd   :  { %v1307_v34 = vadd.f32 %v1306_v16, %v10240_v29  ;;  %v7664_v10 = vpop.f32.mrb[59].mxu1  ;;  %8023 = vmatmul.mubr.msk.f32.gmra.mrb[164].mxu1 %vm539_vm5, %v10258_v49  ;;  %8114 = vmatprep.mubr.msk.f32.mxu0 %vm8856_vm0, %v12930_v25  ;;  %v3011_v29 = vld [vmem:[#allocation2 + $0x8a] sm:$0xff] }
 0x2be   :  { %8025 = vmatprep.mubr.msk.f32.mxu1 %vm8856_vm0, %v12930_v25 }
 0x2bf   :  { %v10551_v37 = vadd.f32 %v10430_v52, %v1307_v34  ;;  %v10553_v63 = vpop.f32.mrb[104].mxu0 }
 0x2c0   :  { %v1311_v60 = vpop.f32.mrb[60].mxu1  ;;  %v7823_v39 = vpop.f32.mrb[105].mxu0  ;;  %8115 = vmatmul.mubr.msk.f32.gmra.mrb[210].mxu0 %vm539_vm5, %v3011_v29 }
 0x2c1   :  { %v1312_v46 = vadd.f32 %v1311_v60, %v10254_v5  ;;  %v7667_v48 = vpop.f32.mrb[61].mxu1  ;;  %8026 = vmatmul.mubr.msk.f32.gmra.mrb[166].mxu1 %vm539_vm5, %v10272_v14  ;;  %8117 = vmatprep.mubr.msk.f32.mxu0 %vm8856_vm0, %v12930_v25  ;;  %v3012_v5 = vld [vmem:[#allocation2 + $0x92] sm:$0xff] }
 0x2c2   :  { %8028 = vmatprep.mubr.msk.f32.mxu1 %vm8856_vm0, %v12930_v25 }
 0x2c3   :  { %v10564_v49 = vadd.f32 %v10445_v36, %v1312_v46  ;;  %v10566_v56 = vpop.f32.mrb[106].mxu0 }
 0x2c4   :  { %v1316_v52 = vpop.f32.mrb[62].mxu1  ;;  %v7826_v13 = vpop.f32.mrb[107].mxu0  ;;  %8118 = vmatmul.mubr.msk.f32.gmra.mrb[212].mxu0 %vm539_vm5, %v3012_v5 }
 0x2c5   :  { %v1317_v33 = vadd.f32 %v1316_v52, %v10268_v54  ;;  %v7670_v16 = vpop.f32.mrb[63].mxu1  ;;  %8029 = vmatmul.mubr.msk.f32.gmra.mrb[168].mxu1 %vm539_vm5, %v10286_v24  ;;  %8120 = vmatprep.mubr.msk.f32.mxu0 %vm8856_vm0, %v12930_v25  ;;  %v3013_v54 = vld [vmem:[#allocation2 + $0x9a] sm:$0xff] }
 0x2c6   :  { %8031 = vmatprep.mubr.msk.f32.mxu1 %vm8856_vm0, %v12930_v25 }
 0x2c7   :  { %v10577_v14 = vadd.f32 %v10460_v20, %v1317_v33  ;;  %v10579_v34 = vpop.f32.mrb[108].mxu0 }
 0x2c8   :  { %v1321_v36 = vpop.f32.mrb[64].mxu1  ;;  %v7829_v60 = vpop.f32.mrb[109].mxu0  ;;  %8121 = vmatmul.mubr.msk.f32.gmra.mrb[214].mxu0 %vm539_vm5, %v3013_v54 }
 0x2c9   :  { %v1322_v10 = vadd.f32 %v1321_v36, %v10282_v17  ;;  %v7673_v43 = vpop.f32.mrb[65].mxu1  ;;  %8032 = vmatmul.mubr.msk.f32.gmra.mrb[170].mxu1 %vm539_vm5, %v10300_v38  ;;  %8123 = vmatprep.mubr.msk.f32.mxu0 %vm8856_vm0, %v12930_v25  ;;  %v3014_v17 = vld [vmem:[#allocation2 + $0xa2] sm:$0xff] }
 0x2ca   :  { %8034 = vmatprep.mubr.msk.f32.mxu1 %vm8856_vm0, %v12930_v25 }
 0x2cb   :  { %v10590_v24 = vadd.f32 %v10475_v61, %v1322_v10  ;;  %v10592_v29 = vpop.f32.mrb[110].mxu0 }
 0x2cc   :  { %v1326_v20 = vpop.f32.mrb[66].mxu1  ;;  %v7832_v39 = vpop.f32.mrb[111].mxu0  ;;  %8124 = vmatmul.mubr.msk.f32.gmra.mrb[216].mxu0 %vm539_vm5, %v3014_v17 }
 0x2cd   :  { %v1327_v46 = vadd.f32 %v1326_v20, %v10296_v50  ;;  %v7676_v48 = vpop.f32.mrb[67].mxu1  ;;  %8035 = vmatmul.mubr.msk.f32.gmra.mrb[172].mxu1 %vm539_vm5, %v10314_v1  ;;  %8126 = vmatprep.mubr.msk.f32.mxu0 %vm8856_vm0, %v12930_v25  ;;  %v3015_v50 = vld [vmem:[#allocation2 + $0xaa] sm:$0xff] }
 0x2ce   :  { %8037 = vmatprep.mubr.msk.f32.mxu1 %vm8856_vm0, %v12930_v25 }
 0x2cf   :  { %v10603_v38 = vadd.f32 %v10488_v47, %v1327_v46  ;;  %v10605_v52 = vpop.f32.mrb[112].mxu0 }
 0x2d0   :  { %v1331_v61 = vpop.f32.mrb[68].mxu1  ;;  %v7835_v16 = vpop.f32.mrb[113].mxu0  ;;  %8127 = vmatmul.mubr.msk.f32.gmra.mrb[218].mxu0 %vm539_vm5, %v3015_v50 }
 0x2d1   :  { %v1332_v5 = vadd.f32 %v1331_v61, %v10310_v6  ;;  %v7679_v33 = vpop.f32.mrb[69].mxu1  ;;  %8038 = vmatmul.mubr.msk.f32.gmra.mrb[174].mxu1 %vm539_vm5, %v10326_v12  ;;  %8129 = vmatprep.mubr.msk.f32.mxu0 %vm8856_vm0, %v12930_v25  ;;  %v3016_v6 = vld [vmem:[#allocation2 + $0xb2] sm:$0xff]  ;;  %v3017_v12 = vld [vmem:[#allocation2 + $0xba] sm:$0xff] }
 0x2d2   :  { %8040 = vmatprep.mubr.msk.f32.mxu1 %vm8856_vm0, %v12930_v25 }
 0x2d3   :  { %v10616_v1 = vadd.f32 %v10501_v40, %v1332_v5  ;;  %v10618_v13 = vpop.f32.mrb[114].mxu0 }
 0x2d4   :  { %v1764_v47 = vpop.f32.mrb[70].mxu1  ;;  %v7838_v10 = vpop.f32.mrb[115].mxu0  ;;  %8130 = vmatmul.mubr.msk.f32.gmra.mrb[220].mxu0 %vm539_vm5, %v3016_v6 }
 0x2d5   :  { %v1868_v36 = vadd.f32 %v1764_v47, %v10338_v31  ;;  %v7749_v54 = vpop.f32.mrb[71].mxu1  ;;  %8041 = vmatmul.mubr.msk.f32.gmra.mrb[176].mxu1 %vm539_vm5, %v10342_v51  ;;  %8132 = vmatprep.mubr.msk.f32.mxu0 %vm8856_vm0, %v12930_v25 }
 0x2d6   :  { %8043 = vmatprep.mubr.msk.f32.mxu1 %vm8856_vm0, %v12930_v25 }
 0x2d7   :  { %v10629_v40 = vadd.f32 %v10514_v11, %v1868_v36  ;;  %v10631_v60 = vpop.f32.mrb[116].mxu0 }
 0x2d8   :  { %v1769_v43 = vpop.f32.mrb[72].mxu1  ;;  %v7841_v17 = vpop.f32.mrb[117].mxu0  ;;  %8133 = vmatmul.mubr.msk.f32.gmra.mrb[222].mxu0 %vm539_vm5, %v3017_v12 }
 0x2d9   :  { %v1869_v31 = vadd.f32 %v1769_v43, %v10353_v9  ;;  %v7752_v20 = vpop.f32.mrb[73].mxu1  ;;  %8044 = vmatmul.mubr.msk.f32.gmra.mrb[178].mxu1 %vm539_vm5, %v10357_v8  ;;  %8206 = vmatprep.mubr.msk.f32.mxu0 %vm8856_vm0, %v12930_v25 }
 0x2da   :  { %8046 = vmatprep.mubr.msk.f32.mxu1 %vm8856_vm0, %v12930_v25 }
 0x2db   :  { %v10642_v51 = vadd.f32 %v10527_v21, %v1869_v31  ;;  %v10644_v46 = vpop.f32.mrb[118].mxu0 }
 0x2dc   :  { %v1774_v11 = vpop.f32.mrb[74].mxu1  ;;  %v7844_v39 = vpop.f32.mrb[119].mxu0 }
 0x2dd   :  { %v1870_v9 = vadd.f32 %v1774_v11, %v10368_v59  ;;  %v7755_v48 = vpop.f32.mrb[75].mxu1  ;;  %8047 = vmatmul.mubr.msk.f32.gmra.mrb[180].mxu1 %vm539_vm5, %v10372_v53 }
 0x2de   :  { %8049 = vmatprep.mubr.msk.f32.mxu1 %vm8856_vm0, %v12930_v25 }
 0x2df   :  { %v10652_v8 = vadd.f32 %v10540_v35, %v1870_v9  ;;  %v10654_v50 = vpop.f32.mrb[120].mxu0 }
 0x2e0   :  { %v1779_v61 = vpop.f32.mrb[76].mxu1  ;;  %v7847_v33 = vpop.f32.mrb[121].mxu0 }
 0x2e1   :  { %v1871_v21 = vadd.f32 %v1779_v61, %v10383_v57  ;;  %v7758_v5 = vpop.f32.mrb[77].mxu1  ;;  %8050 = vmatmul.mubr.msk.f32.gmra.mrb[182].mxu1 %vm539_vm5, %v10387_v27 }
 0x2e2   :  { %8052 = vmatprep.mubr.msk.f32.mxu1 %vm8856_vm0, %v12930_v25 }
 0x2e3   :  { %v10662_v59 = vadd.f32 %v10553_v63, %v1871_v21  ;;  %v10664_v16 = vpop.f32.mrb[122].mxu0 }
 0x2e4   :  { %v1784_v53 = vpop.f32.mrb[78].mxu1  ;;  %v7850_v6 = vpop.f32.mrb[123].mxu0 }
 0x2e5   :  { %v1872_v35 = vadd.f32 %v1784_v53, %v10398_v26  ;;  %v7761_v47 = vpop.f32.mrb[79].mxu1  ;;  %8053 = vmatmul.mubr.msk.f32.gmra.mrb[184].mxu1 %vm539_vm5, %v10402_v23 }
 0x2e6   :  { %8055 = vmatprep.mubr.msk.f32.mxu1 %vm8856_vm0, %v12930_v25 }
 0x2e7   :  { %v10672_v57 = vadd.f32 %v10566_v56, %v1872_v35  ;;  %v10674_v36 = vpop.f32.mrb[124].mxu0 }
 0x2e8   :  { %v1789_v27 = vpop.f32.mrb[80].mxu1  ;;  %v7853_v10 = vpop.f32.mrb[125].mxu0 }
 0x2e9   :  { %v1873_v63 = vadd.f32 %v1789_v27, %v10413_v32  ;;  %v7764_v54 = vpop.f32.mrb[81].mxu1  ;;  %8056 = vmatmul.mubr.msk.f32.gmra.mrb[186].mxu1 %vm539_vm5, %v10417_v55 }
 0x2ea   :  { %8058 = vmatprep.mubr.msk.f32.mxu1 %vm8856_vm0, %v12930_v25 }
 0x2eb   :  { %v10682_v26 = vadd.f32 %v10579_v34, %v1873_v63  ;;  %v10684_v12 = vpop.f32.mrb[126].mxu0 }
 0x2ec   :  { %v1794_v23 = vpop.f32.mrb[82].mxu1  ;;  %v7856_v31 = vpop.f32.mrb[127].mxu0 }
 0x2ed   :  { %v1874_v56 = vadd.f32 %v1794_v23, %v10428_v3  ;;  %v7767_v43 = vpop.f32.mrb[83].mxu1  ;;  %8059 = vmatmul.mubr.msk.f32.gmra.mrb[188].mxu1 %vm539_vm5, %v10432_v41 }
 0x2ee   :  { %8061 = vmatprep.mubr.msk.f32.mxu1 %vm8856_vm0, %v12930_v25 }
 0x2ef   :  { %v10692_v32 = vadd.f32 %v10592_v29, %v1874_v56  ;;  %v10694_v20 = vpop.f32.mrb[128].mxu0 }
 0x2f0   :  { %v1799_v55 = vpop.f32.mrb[84].mxu1  ;;  %v7859_v11 = vpop.f32.mrb[129].mxu0 }
 0x2f1   :  { %v1875_v34 = vadd.f32 %v1799_v55, %v10443_v62  ;;  %v7770_v17 = vpop.f32.mrb[85].mxu1  ;;  %8062 = vmatmul.mubr.msk.f32.gmra.mrb[190].mxu1 %vm539_vm5, %v10447_v2  ;;  %v2740_v62 = vld [vmem:[#allocation2 + $0xb9] sm:$0xff] }
 0x2f2   :  { %8064 = vmatprep.mubr.msk.f32.mxu1 %vm8856_vm0, %v12930_v25 }
 0x2f3   :  { %v10702_v3 = vadd.f32 %v10605_v52, %v1875_v34  ;;  %v10704_v9 = vpop.f32.mrb[130].mxu0 }
 0x2f4   :  { %v1804_v41 = vpop.f32.mrb[86].mxu1  ;;  %v7862_v39 = vpop.f32.mrb[131].mxu0 }
 0x2f5   :  { %v1876_v29 = vadd.f32 %v1804_v41, %v10458_v4  ;;  %v7773_v48 = vpop.f32.mrb[87].mxu1  ;;  %8065 = vmatmul.mubr.msk.f32.gmra.mrb[192].mxu1 %vm539_vm5, %v10462_v58 }
 0x2f6   :  { %8067 = vmatprep.mubr.msk.f32.mxu1 %vm8856_vm0, %v12930_v25 }
 0x2f7   :  { %v10712_v2 = vadd.f32 %v10618_v13, %v1876_v29  ;;  %v10714_v52 = vpop.f32.mrb[132].mxu0 }
 0x2f8   :  { %v1809_v61 = vpop.f32.mrb[88].mxu1  ;;  %v7865_v33 = vpop.f32.mrb[133].mxu0 }
 0x2f9   :  { %v1877_v21 = vadd.f32 %v1809_v61, %v10473_v42  ;;  %v7776_v5 = vpop.f32.mrb[89].mxu1  ;;  %8068 = vmatmul.mubr.msk.f32.gmra.mrb[194].mxu1 %vm539_vm5, %v2740_v62  ;;  %vm3388_vm5 = vcmask 130048  }
 0x2fa   :  { %8139 = vmatprep.mubr.msk.f32.mxu1 %vm8856_vm0, %v12930_v25  ;;  %3627 = vst.msk [vmem:[#allocation3] sm:$0xff] %vm3388_vm5, %v12930_v25  ;;  %3628 = vst.msk [vmem:[#allocation3 + $0x8] sm:$0xff] %vm3388_vm5, %v12930_v25 }
 0x2fb   :  { %v10721_v4 = vadd.f32 %v10631_v60, %v1877_v21  ;;  %v10723_v53 = vpop.f32.mrb[134].mxu0  ;;  %3629 = vst.msk [vmem:[#allocation3 + $0x10] sm:$0xff] %vm3388_vm5, %v12930_v25  ;;  %3630 = vst.msk [vmem:[#allocation3 + $0x18] sm:$0xff] %vm3388_vm5, %v12930_v25 }
 0x2fc   :  { %v1814_v58 = vpop.f32.mrb[90].mxu1  ;;  %v7868_v47 = vpop.f32.mrb[135].mxu0  ;;  %3631 = vst.msk [vmem:[#allocation3 + $0x20] sm:$0xff] %vm3388_vm5, %v12930_v25  ;;  %3632 = vst.msk [vmem:[#allocation3 + $0x28] sm:$0xff] %vm3388_vm5, %v12930_v25 }
 0x2fd   :  { %v1878_v13 = vadd.f32 %v1814_v58, %v10486_v0  ;;  %v7779_v35 = vpop.f32.mrb[91].mxu1  ;;  %3633 = vst.msk [vmem:[#allocation3 + $0x30] sm:$0xff] %vm3388_vm5, %v12930_v25  ;;  %3634 = vst.msk [vmem:[#allocation3 + $0x38] sm:$0xff] %vm3388_vm5, %v12930_v25 }
 0x2fe   :  { %3635 = vst.msk [vmem:[#allocation3 + $0x40] sm:$0xff] %vm3388_vm5, %v12930_v25  ;;  %3636 = vst.msk [vmem:[#allocation3 + $0x48] sm:$0xff] %vm3388_vm5, %v12930_v25 }
 0x2ff   :  { %v10727_v6 = vadd.f32 %v10644_v46, %v1878_v13  ;;  %v10729_v27 = vpop.f32.mrb[136].mxu0  ;;  %3637 = vst.msk [vmem:[#allocation3 + $0x50] sm:$0xff] %vm3388_vm5, %v12930_v25  ;;  %3638 = vst.msk [vmem:[#allocation3 + $0x58] sm:$0xff] %vm3388_vm5, %v12930_v25 }
 0x300   :  { %v1819_v42 = vpop.f32.mrb[92].mxu1  ;;  %v7871_v10 = vpop.f32.mrb[137].mxu0  ;;  %3639 = vst.msk [vmem:[#allocation3 + $0x60] sm:$0xff] %vm3388_vm5, %v12930_v25  ;;  %3640 = vst.msk [vmem:[#allocation3 + $0x68] sm:$0xff] %vm3388_vm5, %v12930_v25 }
 0x301   :  { %v1879_v63 = vadd.f32 %v1819_v42, %v10499_v44  ;;  %v7782_v54 = vpop.f32.mrb[93].mxu1  ;;  %3641 = vst.msk [vmem:[#allocation3 + $0x70] sm:$0xff] %vm3388_vm5, %v12930_v25  ;;  %3642 = vst.msk [vmem:[#allocation3 + $0x78] sm:$0xff] %vm3388_vm5, %v12930_v25 }
 0x302   :  { %3643 = vst.msk [vmem:[#allocation3 + $0x80] sm:$0xff] %vm3388_vm5, %v12930_v25  ;;  %3644 = vst.msk [vmem:[#allocation3 + $0x88] sm:$0xff] %vm3388_vm5, %v12930_v25 }
 0x303   :  { %v10733_v60 = vadd.f32 %v10654_v50, %v1879_v63  ;;  %v10735_v56 = vpop.f32.mrb[138].mxu0  ;;  %3645 = vst.msk [vmem:[#allocation3 + $0x90] sm:$0xff] %vm3388_vm5, %v12930_v25  ;;  %3646 = vst.msk [vmem:[#allocation3 + $0x98] sm:$0xff] %vm3388_vm5, %v12930_v25 }
 0x304   :  { %v1824_v23 = vpop.f32.mrb[94].mxu1  ;;  %v7874_v31 = vpop.f32.mrb[139].mxu0  ;;  %3647 = vst.msk [vmem:[#allocation3 + $0xa0] sm:$0xff] %vm3388_vm5, %v12930_v25  ;;  %3648 = vst.msk [vmem:[#allocation3 + $0xa8] sm:$0xff] %vm3388_vm5, %v12930_v25 }
 0x305   :  { %v1880_v0 = vadd.f32 %v1824_v23, %v10512_v30  ;;  %v7785_v43 = vpop.f32.mrb[95].mxu1  ;;  %3649 = vst.msk [vmem:[#allocation3 + $0xb0] sm:$0xff] %vm3388_vm5, %v12930_v25  ;;  %3650 = vst.msk [vmem:[#allocation3 + $0xb8] sm:$0xff] %vm3388_vm5, %v12930_v25 }
 0x306   :  { %3651 = vst.msk [vmem:[#allocation3 + $0xc0] sm:$0xff] %vm3388_vm5, %v12930_v25 }
 0x307   :  { %v10739_v46 = vadd.f32 %v10664_v16, %v1880_v0  ;;  %v2595_v30 = vpop.f32.mrb[140].mxu0 }
 0x308   :  { %v1829_v44 = vpop.f32.mrb[96].mxu1  ;;  %v7944_v55 = vpop.f32.mrb[141].mxu0 }
 0x309   :  { %v1881_v50 = vadd.f32 %v1829_v44, %v10525_v45  ;;  %v7788_v16 = vpop.f32.mrb[97].mxu1 }
 0x30b   :  { %v10793_v34 = vadd.f32 %v10674_v36, %v1881_v50  ;;  %v2600_v11 = vpop.f32.mrb[142].mxu0 }
 0x30c   :  { %v1834_v17 = vpop.f32.mrb[98].mxu1  ;;  %v7947_v48 = vpop.f32.mrb[143].mxu0 }
 0x30d   :  { %v1882_v41 = vadd.f32 %v1834_v17, %v10538_v19  ;;  %v7791_v29 = vpop.f32.mrb[99].mxu1 }
 0x30f   :  { %v10797_v39 = vadd.f32 %v10684_v12, %v1882_v41  ;;  %v2605_v61 = vpop.f32.mrb[144].mxu0 }
 0x310   :  { %v1839_v62 = vpop.f32.mrb[100].mxu1  ;;  %v7950_v45 = vpop.f32.mrb[145].mxu0 }
 0x311   :  { %v1883_v21 = vadd.f32 %v1839_v62, %v10551_v37  ;;  %v7794_v5 = vpop.f32.mrb[101].mxu1 }
 0x313   :  { %v10801_v33 = vadd.f32 %v10694_v20, %v1883_v21  ;;  %v2610_v58 = vpop.f32.mrb[146].mxu0 }
 0x314   :  { %v1844_v36 = vpop.f32.mrb[102].mxu1  ;;  %v7953_v19 = vpop.f32.mrb[147].mxu0 }
 0x315   :  { %v1884_v13 = vadd.f32 %v1844_v36, %v10564_v49  ;;  %v7797_v35 = vpop.f32.mrb[103].mxu1 }
 0x317   :  { %v10805_v47 = vadd.f32 %v10704_v9, %v1884_v13  ;;  %v2615_v42 = vpop.f32.mrb[148].mxu0 }
 0x318   :  { %v1849_v12 = vpop.f32.mrb[104].mxu1  ;;  %v7956_v37 = vpop.f32.mrb[149].mxu0 }
 0x319   :  { %v1885_v63 = vadd.f32 %v1849_v12, %v10577_v14  ;;  %v7800_v54 = vpop.f32.mrb[105].mxu1 }
 0x31b   :  { %v10809_v10 = vadd.f32 %v10714_v52, %v1885_v63  ;;  %v2620_v23 = vpop.f32.mrb[150].mxu0 }
 0x31c   :  { %v1854_v20 = vpop.f32.mrb[106].mxu1  ;;  %v7959_v49 = vpop.f32.mrb[151].mxu0 }
 0x31d   :  { %v1886_v0 = vadd.f32 %v1854_v20, %v10590_v24  ;;  %v7803_v43 = vpop.f32.mrb[107].mxu1 }
 0x31f   :  { %v10813_v31 = vadd.f32 %v10723_v53, %v1886_v0  ;;  %v2625_v44 = vpop.f32.mrb[152].mxu0 }
 0x320   :  { %v1859_v9 = vpop.f32.mrb[108].mxu1  ;;  %v7962_v14 = vpop.f32.mrb[153].mxu0 }
 0x321   :  { %v1887_v50 = vadd.f32 %v1859_v9, %v10603_v38  ;;  %v7806_v16 = vpop.f32.mrb[109].mxu1 }
 0x323   :  { %v10817_v55 = vadd.f32 %v10729_v27, %v1887_v50  ;;  %v2630_v17 = vpop.f32.mrb[154].mxu0 }
 0x324   :  { %v1864_v52 = vpop.f32.mrb[110].mxu1  ;;  %v7965_v24 = vpop.f32.mrb[155].mxu0 }
 0x325   :  { %v1888_v41 = vadd.f32 %v1864_v52, %v10616_v1  ;;  %v7809_v29 = vpop.f32.mrb[111].mxu1 }
 0x327   :  { %v10821_v48 = vadd.f32 %v10735_v56, %v1888_v41  ;;  %v2635_v62 = vpop.f32.mrb[156].mxu0 }
 0x328   :  { %v2318_v53 = vpop.f32.mrb[112].mxu1  ;;  %v7968_v38 = vpop.f32.mrb[157].mxu0 }
 0x329   :  { %v2422_v21 = vadd.f32 %v2318_v53, %v10629_v40  ;;  %v7879_v5 = vpop.f32.mrb[113].mxu1 }
 0x32b   :  { %v10824_v45 = vadd.f32 %v2595_v30, %v2422_v21  ;;  %v2640_v27 = vpop.f32.mrb[158].mxu0 }
 0x32c   :  { %v2323_v36 = vpop.f32.mrb[114].mxu1  ;;  %v7971_v19 = vpop.f32.mrb[159].mxu0 }
 0x32d   :  { %v2423_v13 = vadd.f32 %v2323_v36, %v10642_v51  ;;  %v7882_v35 = vpop.f32.mrb[115].mxu1 }
 0x32f   :  { %v10827_v1 = vadd.f32 %v2600_v11, %v2423_v13  ;;  %v2645_v63 = vpop.f32.mrb[160].mxu0 }
 0x330   :  { %v2328_v12 = vpop.f32.mrb[116].mxu1  ;;  %v7974_v37 = vpop.f32.mrb[161].mxu0 }
 0x331   :  { %v2424_v56 = vadd.f32 %v2328_v12, %v10652_v8  ;;  %v7885_v54 = vpop.f32.mrb[117].mxu1 }
 0x333   :  { %v10830_v20 = vadd.f32 %v2605_v61, %v2424_v56  ;;  %v2650_v0 = vpop.f32.mrb[162].mxu0 }
 0x334   :  { %v2333_v40 = vpop.f32.mrb[118].mxu1  ;;  %v7977_v49 = vpop.f32.mrb[163].mxu0 }
 0x335   :  { %v2425_v30 = vadd.f32 %v2333_v40, %v10662_v59  ;;  %v7888_v43 = vpop.f32.mrb[119].mxu1 }
 0x337   :  { %v10833_v9 = vadd.f32 %v2610_v58, %v2425_v30  ;;  %v2655_v50 = vpop.f32.mrb[164].mxu0 }
 0x338   :  { %v2338_v51 = vpop.f32.mrb[120].mxu1  ;;  %v7980_v14 = vpop.f32.mrb[165].mxu0 }
 0x339   :  { %v2426_v11 = vadd.f32 %v2338_v51, %v10672_v57  ;;  %v7891_v16 = vpop.f32.mrb[121].mxu1 }
 0x33b   :  { %v10836_v52 = vadd.f32 %v2615_v42, %v2426_v11  ;;  %v2660_v41 = vpop.f32.mrb[166].mxu0 }
 0x33c   :  { %v2343_v8 = vpop.f32.mrb[122].mxu1  ;;  %v7983_v24 = vpop.f32.mrb[167].mxu0 }
 0x33d   :  { %v2427_v61 = vadd.f32 %v2343_v8, %v10682_v26  ;;  %v7894_v29 = vpop.f32.mrb[123].mxu1 }
 0x33f   :  { %v10839_v53 = vadd.f32 %v2620_v23, %v2427_v61  ;;  %v2665_v21 = vpop.f32.mrb[168].mxu0 }
 0x340   :  { %v2348_v59 = vpop.f32.mrb[124].mxu1  ;;  %v7986_v38 = vpop.f32.mrb[169].mxu0 }
 0x341   :  { %v2428_v58 = vadd.f32 %v2348_v59, %v10692_v32  ;;  %v7897_v5 = vpop.f32.mrb[125].mxu1 }
 0x343   :  { %v10842_v36 = vadd.f32 %v2625_v44, %v2428_v58  ;;  %v2670_v13 = vpop.f32.mrb[170].mxu0 }
 0x344   :  { %v2353_v57 = vpop.f32.mrb[126].mxu1  ;;  %v7989_v19 = vpop.f32.mrb[171].mxu0 }
 0x345   :  { %v2429_v42 = vadd.f32 %v2353_v57, %v10702_v3  ;;  %v7900_v35 = vpop.f32.mrb[127].mxu1 }
 0x347   :  { %v10845_v12 = vadd.f32 %v2630_v17, %v2429_v42  ;;  %v2675_v56 = vpop.f32.mrb[172].mxu0 }
 0x348   :  { %v2358_v26 = vpop.f32.mrb[128].mxu1  ;;  %v7992_v37 = vpop.f32.mrb[173].mxu0 }
 0x349   :  { %v2430_v23 = vadd.f32 %v2358_v26, %v10712_v2  ;;  %v7903_v54 = vpop.f32.mrb[129].mxu1 }
 0x34b   :  { %v10848_v40 = vadd.f32 %v2635_v62, %v2430_v23  ;;  %v2680_v30 = vpop.f32.mrb[174].mxu0 }
 0x34c   :  { %v2363_v32 = vpop.f32.mrb[130].mxu1  ;;  %v7995_v49 = vpop.f32.mrb[175].mxu0 }
 0x34d   :  { %v2431_v44 = vadd.f32 %v2363_v32, %v10721_v4  ;;  %v7906_v43 = vpop.f32.mrb[131].mxu1 }
 0x34f   :  { %v10851_v51 = vadd.f32 %v2640_v27, %v2431_v44  ;;  %v2685_v11 = vpop.f32.mrb[176].mxu0 }
 0x350   :  { %v2368_v3 = vpop.f32.mrb[132].mxu1  ;;  %v7998_v14 = vpop.f32.mrb[177].mxu0 }
 0x351   :  { %v2432_v17 = vadd.f32 %v2368_v3, %v10727_v6  ;;  %v7909_v16 = vpop.f32.mrb[133].mxu1 }
 0x353   :  { %v10854_v8 = vadd.f32 %v2645_v63, %v2432_v17  ;;  %v2690_v61 = vpop.f32.mrb[178].mxu0 }
 0x354   :  { %v2373_v2 = vpop.f32.mrb[134].mxu1  ;;  %v8001_v24 = vpop.f32.mrb[179].mxu0 }
 0x355   :  { %v2433_v62 = vadd.f32 %v2373_v2, %v10733_v60  ;;  %v7912_v29 = vpop.f32.mrb[135].mxu1 }
 0x357   :  { %v10857_v59 = vadd.f32 %v2650_v0, %v2433_v62  ;;  %v2695_v58 = vpop.f32.mrb[180].mxu0 }
 0x358   :  { %v2378_v4 = vpop.f32.mrb[136].mxu1  ;;  %v8004_v38 = vpop.f32.mrb[181].mxu0 }
 0x359   :  { %v2434_v27 = vadd.f32 %v2378_v4, %v10739_v46  ;;  %v7915_v5 = vpop.f32.mrb[137].mxu1 }
 0x35b   :  { %v10860_v57 = vadd.f32 %v2655_v50, %v2434_v27  ;;  %v3149_v42 = vpop.f32.mrb[182].mxu0 }
 0x35c   :  { %v2383_v6 = vpop.f32.mrb[138].mxu1  ;;  %v8074_v19 = vpop.f32.mrb[183].mxu0 }
 0x35d   :  { %v2435_v63 = vadd.f32 %v2383_v6, %v10793_v34  ;;  %v7918_v35 = vpop.f32.mrb[139].mxu1 }
 0x35f   :  { %v10863_v26 = vadd.f32 %v2660_v41, %v2435_v63  ;;  %v3154_v23 = vpop.f32.mrb[184].mxu0 }
 0x360   :  { %v2388_v60 = vpop.f32.mrb[140].mxu1  ;;  %v8077_v37 = vpop.f32.mrb[185].mxu0 }
 0x361   :  { %v2436_v0 = vadd.f32 %v2388_v60, %v10797_v39  ;;  %v7921_v54 = vpop.f32.mrb[141].mxu1 }
 0x363   :  { %v10866_v32 = vadd.f32 %v2665_v21, %v2436_v0  ;;  %v10868_v44 = vpop.f32.mrb[186].mxu0 }
 0x364   :  { %v2393_v46 = vpop.f32.mrb[142].mxu1  ;;  %v8080_v49 = vpop.f32.mrb[187].mxu0 }
 0x365   :  { %v2437_v50 = vadd.f32 %v2393_v46, %v10801_v33  ;;  %v7924_v43 = vpop.f32.mrb[143].mxu1 }
 0x367   :  { %v10871_v34 = vadd.f32 %v2670_v13, %v2437_v50  ;;  %v10873_v41 = vpop.f32.mrb[188].mxu0 }
 0x368   :  { %v2398_v3 = vpop.f32.mrb[144].mxu1  ;;  %v8083_v39 = vpop.f32.mrb[189].mxu0 }
 0x369   :  { %v2438_v17 = vadd.f32 %v2398_v3, %v10805_v47  ;;  %v7927_v16 = vpop.f32.mrb[145].mxu1 }
 0x36b   :  { %v10876_v14 = vadd.f32 %v2675_v56, %v2438_v17  ;;  %v10878_v2 = vpop.f32.mrb[190].mxu0 }
 0x36c   :  { %v2403_v21 = vpop.f32.mrb[146].mxu1  ;;  %v8086_v33 = vpop.f32.mrb[191].mxu0 }
 0x36d   :  { %v2439_v62 = vadd.f32 %v2403_v21, %v10809_v10  ;;  %v7930_v29 = vpop.f32.mrb[147].mxu1 }
 0x36f   :  { %v10881_v24 = vadd.f32 %v2680_v30, %v2439_v62  ;;  %v10883_v4 = vpop.f32.mrb[192].mxu0  ;;  %v10919_v62 = vld [vmem:[%s12844_s6] ss:$0 sm:$0xff] }
 0x370   :  { %v2408_v13 = vpop.f32.mrb[148].mxu1  ;;  %v8089_v47 = vpop.f32.mrb[193].mxu0 }
 0x371   :  { %v2440_v27 = vadd.f32 %v2408_v13, %v10813_v31  ;;  %v7933_v5 = vpop.f32.mrb[149].mxu1 }
 0x373   :  { %v10886_v38 = vadd.f32 %v2685_v11, %v2440_v27  ;;  %v10888_v6 = vpop.f32.mrb[194].mxu0 }
 0x374   :  { %v2413_v56 = vpop.f32.mrb[150].mxu1  ;;  %v8092_v10 = vpop.f32.mrb[195].mxu0 }
 0x375   :  { %v2441_v63 = vadd.f32 %v2413_v56, %v10817_v55  ;;  %v7936_v35 = vpop.f32.mrb[151].mxu1 }
 0x377   :  { %v10891_v19 = vadd.f32 %v2690_v61, %v2441_v63  ;;  %v10893_v60 = vpop.f32.mrb[196].mxu0  ;;  %v3673_v63 = vld [vmem:[#allocation3 + $0x6] sm:$0xff] }
 0x378   :  { %v2418_v30 = vpop.f32.mrb[152].mxu1  ;;  %v8095_v31 = vpop.f32.mrb[197].mxu0 }
 0x379   :  { %v2442_v0 = vadd.f32 %v2418_v30, %v10821_v48  ;;  %v7939_v54 = vpop.f32.mrb[153].mxu1  ;;  %v6821_v48 = vld [vmem:[%s12847_s9 + $0x10] sm:$0xff] }
 0x37b   :  { %v10896_v37 = vadd.f32 %v2695_v58, %v2442_v0  ;;  %v10898_v46 = vpop.f32.mrb[198].mxu0  ;;  %v6822_v58 = vld [vmem:[%s12847_s9 + $0x18] sm:$0xff] }
 0x37c   :  { %v2872_v11 = vpop.f32.mrb[154].mxu1  ;;  %v8098_v55 = vpop.f32.mrb[199].mxu0  ;;  %v8755_v21 = vpack.c.bf16 %v6822_v58, %v6821_v48 }
 0x37d   :  { %v2976_v50 = vadd.f32 %v2872_v11, %v10824_v45  ;;  %v8009_v43 = vpop.f32.mrb[155].mxu1  ;;  %v3694_v45 = vld [vmem:[%s12847_s9] sm:$0xff] }
 0x37e   :  { %8756 = vmatpush3.bf16.msra.mxu1 %v8755_v21 }
 0x37f   :  { %v3253_v49 = vadd.f32 %v3149_v42, %v2976_v50  ;;  %v10901_v61 = vpop.f32.mrb[200].mxu0  ;;  %8760 = vmatprep.subr.bf16.mxu1 %v12931_v22 }
 0x380   :  { %v2877_v3 = vpop.f32.mrb[156].mxu1  ;;  %v8101_v39 = vpop.f32.mrb[201].mxu0 }
 0x381   :  { %v2977_v17 = vadd.f32 %v2877_v3, %v10827_v1  ;;  %v8012_v16 = vpop.f32.mrb[157].mxu1  ;;  %v3695_v1 = vld [vmem:[%s12847_s9 + $0x8] sm:$0xff]  ;;  %v3283_v35 = vadd.f32 %v10919_v62, %v3253_v49 }
 0x382   :  { %v8758_v13 = vpack.c.bf16 %v3695_v1, %v3694_v45 }
 0x383   :  { %v3254_v42 = vadd.f32 %v3154_v23, %v2977_v17  ;;  %v10921_v33 = vpop.f32.mrb[202].mxu0  ;;  %v3696_v23 = vld [vmem:[#allocation3 + $0x7] sm:$0xff]  ;;  %vm3304_vm14 = vcmp.ge.f32.partialorder %v3283_v35, 0.0 }
 0x384   :  { %v2882_v29 = vpop.f32.mrb[158].mxu1  ;;  %v8104_v47 = vpop.f32.mrb[203].mxu0  ;;  %8759 = vmatpush3.bf16.msra.mxu0 %v8758_v13  ;;  %8140 = vmatmul.mubr.msk.f32.vlgmr.msra.gmra.mrb[196].mxu1 %vm3388_vm5, %v3696_v23 }
 0x385   :  { %v2978_v27 = vadd.f32 %v2882_v29, %v10830_v20  ;;  %v8015_v5 = vpop.f32.mrb[159].mxu1  ;;  %v3284_v56 = vadd.f32 %v10919_v62, %v3254_v42  ;;  %8763 = vmatprep.subr.bf16.mxu0 %v12931_v22  ;;  %8142 = vmatprep.mubr.msk.f32.mxu1 %vm8856_vm0, %v12930_v25 }
 0x387   :  { %v3255_v10 = vadd.f32 %v10868_v44, %v2978_v27  ;;  %v10929_v0 = vpop.f32.mrb[204].mxu0  ;;  %8207 = vmatmul.mubr.msk.f32.vlgmr.msra.gmra.mrb[224].mxu0 %vm3388_vm5, %v3673_v63  ;;  %v3326_v50 = vmul.f32 0.0, %v3284_v56  ;;  %v3325_v44 = vmul.f32 0.0, %v3283_v35  ;;  %vm3305_vm13 = vcmp.ge.f32.partialorder %v3284_v56, 0.0 }
 0x388   :  { %v2887_v30 = vpop.f32.mrb[160].mxu1  ;;  %v8107_v11 = vpop.f32.mrb[205].mxu0  ;;  %8209 = vmatprep.mubr.msk.f32.mxu0 %vm8856_vm0, %v12930_v25 }
 0x389   :  { %v3285_v20 = vadd.f32 %v10919_v62, %v3255_v10  ;;  %v2979_v54 = vadd.f32 %v2887_v30, %v10833_v9  ;;  %v8018_v31 = vpop.f32.mrb[161].mxu1  ;;  %v10944_v48 = vsel %vm3305_vm13, %v3284_v56, %v3326_v50  ;;  %v10946_v58 = vsel %vm3304_vm14, %v3283_v35, %v3325_v44 }
 0x38a   :  { %v3368_v1 = vmul.f32 %v10944_v48, %v9245_v18  ;;  %v3367_v47 = vmul.f32 %v10946_v58, %v9236_v7 }
 0x38b   :  { %v3256_v43 = vadd.f32 %v10873_v41, %v2979_v54  ;;  %v10940_v49 = vpop.f32.mrb[206].mxu0  ;;  %v3327_v9 = vmul.f32 0.0, %v3285_v20  ;;  %vm3306_vm15 = vcmp.ge.f32.partialorder %v3285_v20, 0.0 }
 0x38c   :  { %v2892_v55 = vpop.f32.mrb[162].mxu1  ;;  %v8110_v39 = vpop.f32.mrb[207].mxu0  ;;  %v3438_v30 = vmul.f32 %v3368_v1, %v10944_v48  ;;  %v3437_v50 = vmul.f32 %v3367_v47, %v10946_v58 }
 0x38d   :  { %v3286_v3 = vadd.f32 %v10919_v62, %v3256_v43  ;;  %v2980_v17 = vadd.f32 %v2892_v55, %v10836_v52  ;;  %v8021_v16 = vpop.f32.mrb[163].mxu1  ;;  %v10953_v29 = vsel %vm3306_vm15, %v3285_v20, %v3327_v9  ;;  %v3390_v55 = vsel %vm3388_vm5, %v3368_v1, 0.0 }
 0x38e   :  { %v3369_v63 = vmul.f32 %v10953_v29, %v9241_v15  ;;  %v3459_v39 = vsel %vm3388_vm5, %v3438_v30, 0.0  ;;  %v3389_v1 = vsel %vm3388_vm5, %v3367_v47, 0.0 }
 0x38f   :  { %v3328_v45 = vmul.f32 0.0, %v3286_v3  ;;  %v3257_v42 = vadd.f32 %v10878_v2, %v2980_v17  ;;  %vm3307_vm1 = vcmp.ge.f32.partialorder %v3286_v3, 0.0  ;;  %v10949_v21 = vpop.f32.mrb[208].mxu0 }
 0x390   :  { %v2897_v41 = vpop.f32.mrb[164].mxu1  ;;  %v8113_v5 = vpop.f32.mrb[209].mxu0  ;;  %v3439_v9 = vmul.f32 %v3369_v63, %v10953_v29 }
 0x391   :  { %v3287_v52 = vadd.f32 %v10919_v62, %v3257_v42  ;;  %v2981_v13 = vadd.f32 %v2897_v41, %v10839_v53  ;;  %v8024_v27 = vpop.f32.mrb[165].mxu1  ;;  %v10959_v23 = vsel %vm3307_vm1, %v3286_v3, %v3328_v45  ;;  %v12932_v3 = vld [vmem:[#allocation8_spill] sm:$0xff]  ;;  %v12933_v5 = vld [vmem:[#allocation9_spill] sm:$0xff] }
 0x393   :  { %vm3308_vm2 = vcmp.ge.f32.partialorder %v3287_v52, 0.0  ;;  %v3329_v2 = vmul.f32 0.0, %v3287_v52  ;;  %v3258_v56 = vadd.f32 %v10883_v4, %v2981_v13  ;;  %v10964_v10 = vpop.f32.mrb[210].mxu0  ;;  %v3370_v4 = vmul.f32 %v10959_v23, %v9258_v28 }
 0x394   :  { %v2902_v35 = vpop.f32.mrb[166].mxu1  ;;  %v8116_v11 = vpop.f32.mrb[211].mxu0  ;;  %v3458_v13 = vsel %vm3388_vm5, %v3437_v50, 0.0 }
 0x395   :  { %v10967_v53 = vsel %vm3308_vm2, %v3287_v52, %v3329_v2  ;;  %v3288_v20 = vadd.f32 %v10919_v62, %v3258_v56  ;;  %v2982_v54 = vadd.f32 %v2902_v35, %v10842_v36  ;;  %v8027_v31 = vpop.f32.mrb[167].mxu1  ;;  %v3440_v27 = vmul.f32 %v3370_v4, %v10959_v23 }
 0x396   :  { %v3371_v17 = vmul.f32 %v10967_v53, %v12932_v3  ;;  %v3392_v56 = vsel %vm3388_vm5, %v3369_v63, 0.0  ;;  %v3394_v50 = vsel %vm3388_vm5, %v3370_v4, 0.0 }
 0x397   :  { %vm3309_vm3 = vcmp.ge.f32.partialorder %v3288_v20, 0.0  ;;  %v3330_v44 = vmul.f32 0.0, %v3288_v20  ;;  %v3259_v43 = vadd.f32 %v10888_v6, %v2982_v54  ;;  %v10979_v36 = vpop.f32.mrb[212].mxu0  ;;  %v3460_v54 = vadd.f32 %v3459_v39, %v3458_v13  ;;  %v12934_v39 = vld [vmem:[#allocation10_spill] sm:$0xff] }
 0x398   :  { %v2907_v16 = vpop.f32.mrb[168].mxu1  ;;  %v8119_v6 = vpop.f32.mrb[213].mxu0  ;;  %v3441_v31 = vmul.f32 %v3371_v17, %v10967_v53 }
 0x399   :  { %v10982_v45 = vsel %vm3309_vm3, %v3288_v20, %v3330_v44  ;;  %v3289_v42 = vadd.f32 %v10919_v62, %v3259_v43  ;;  %v2983_v41 = vadd.f32 %v2907_v16, %v10845_v12  ;;  %v8030_v52 = vpop.f32.mrb[169].mxu1  ;;  %v3391_v20 = vadd.f32 %v3390_v55, %v3389_v1 }
 0x39a   :  { %v3372_v2 = vmul.f32 %v10982_v45, %v12933_v5  ;;  %v3461_v12 = vsel %vm3388_vm5, %v3439_v9, 0.0  ;;  %v3463_v55 = vsel %vm3388_vm5, %v3440_v27, 0.0  ;;  %v3396_v6 = vsel %vm3388_vm5, %v3371_v17, 0.0 }
 0x39b   :  { %vm3310_vm4 = vcmp.ge.f32.partialorder %v3289_v42, 0.0  ;;  %v3331_v35 = vmul.f32 0.0, %v3289_v42  ;;  %v3260_v30 = vadd.f32 %v10893_v60, %v2983_v41  ;;  %v10995_v11 = vpop.f32.mrb[214].mxu0  ;;  %v3393_v60 = vadd.f32 %v3392_v56, %v3391_v20 }
 0x39c   :  { %v2912_v47 = vpop.f32.mrb[170].mxu1  ;;  %v8122_v52 = vpop.f32.mrb[215].mxu0  ;;  %v3442_v9 = vmul.f32 %v3372_v2, %v10982_v45  ;;  %v3462_v1 = vadd.f32 %v3461_v12, %v3460_v54 }
 0x39d   :  { %v10998_v44 = vsel %vm3310_vm4, %v3289_v42, %v3331_v35  ;;  %v3290_v43 = vadd.f32 %v10919_v62, %v3260_v30  ;;  %v2984_v63 = vadd.f32 %v2912_v47, %v10848_v40  ;;  %v8033_v16 = vpop.f32.mrb[171].mxu1  ;;  %v3395_v13 = vadd.f32 %v3394_v50, %v3393_v60 }
 0x39e   :  { %v3373_v41 = vmul.f32 %v10998_v44, %v12934_v39  ;;  %v3465_v40 = vsel %vm3388_vm5, %v3441_v31, 0.0  ;;  %v3398_v35 = vsel %vm3388_vm5, %v3372_v2, 0.0  ;;  %v3467_v12 = vsel %vm3388_vm5, %v3442_v9, 0.0  ;;  %v12935_v31 = vld [vmem:[#allocation11_spill] sm:$0xff] }
 0x39f   :  { %vm3311_vm6 = vcmp.ge.f32.partialorder %v3290_v43, 0.0  ;;  %v3332_v4 = vmul.f32 0.0, %v3290_v43  ;;  %v3261_v42 = vadd.f32 %v10898_v46, %v2984_v63  ;;  %v11010_v30 = vpop.f32.mrb[216].mxu0  ;;  %v3464_v46 = vadd.f32 %v3463_v55, %v3462_v1 }
 0x3a0   :  { %v2917_v56 = vpop.f32.mrb[172].mxu1  ;;  %v3443_v27 = vmul.f32 %v3373_v41, %v10998_v44  ;;  %v8125_v52 = vpop.f32.mrb[217].mxu0  ;;  %v3397_v54 = vadd.f32 %v3396_v6, %v3395_v13  ;;  %v3400_v50 = vsel %vm3388_vm5, %v3373_v41, 0.0 }
 0x3a1   :  { %v11013_v20 = vsel %vm3311_vm6, %v3290_v43, %v3332_v4  ;;  %v3291_v47 = vadd.f32 %v10919_v62, %v3261_v42  ;;  %v2985_v17 = vadd.f32 %v2917_v56, %v10851_v51  ;;  %v8036_v16 = vpop.f32.mrb[173].mxu1  ;;  %v3466_v60 = vadd.f32 %v3465_v40, %v3464_v46  ;;  %v12936_v40 = vld [vmem:[#allocation12_spill] sm:$0xff] }
 0x3a2   :  { %v3374_v2 = vmul.f32 %v11013_v20, %v12935_v31  ;;  %v3399_v4 = vadd.f32 %v3398_v35, %v3397_v54  ;;  %v3469_v55 = vsel %vm3388_vm5, %v3443_v27, 0.0 }
 0x3a3   :  { %vm3312_vm7 = vcmp.ge.f32.partialorder %v3291_v47, 0.0  ;;  %v3333_v63 = vmul.f32 0.0, %v3291_v47  ;;  %v3262_v43 = vadd.f32 %v10901_v61, %v2985_v17  ;;  %v11023_v56 = vpop.f32.mrb[218].mxu0  ;;  %v3468_v16 = vadd.f32 %v3467_v12, %v3466_v60 }
 0x3a4   :  { %v3444_v42 = vmul.f32 %v3374_v2, %v11013_v20  ;;  %v2922_v51 = vpop.f32.mrb[174].mxu1  ;;  %v8128_v13 = vpop.f32.mrb[219].mxu0  ;;  %v3401_v52 = vadd.f32 %v3400_v50, %v3399_v4  ;;  %v3402_v61 = vsel %vm3388_vm5, %v3374_v2, 0.0 }
 0x3a5   :  { %v11026_v6 = vsel %vm3312_vm7, %v3291_v47, %v3333_v63  ;;  %v3292_v9 = vadd.f32 %v10919_v62, %v3262_v43  ;;  %v2986_v1 = vadd.f32 %v2922_v51, %v10854_v8  ;;  %v8039_v41 = vpop.f32.mrb[175].mxu1  ;;  %v3470_v47 = vadd.f32 %v3469_v55, %v3468_v16  ;;  %v12937_v55 = vld [vmem:[#allocation13_spill] sm:$0xff] }
 0x3a6   :  { %v3375_v35 = vmul.f32 %v11026_v6, %v12936_v40  ;;  %v3471_v17 = vsel %vm3388_vm5, %v3444_v42, 0.0  ;;  %v3403_v12 = vadd.f32 %v3402_v61, %v3401_v52 }
 0x3a7   :  { %vm3313_vm8 = vcmp.ge.f32.partialorder %v3292_v9, 0.0  ;;  %v3334_v46 = vmul.f32 0.0, %v3292_v9  ;;  %v3263_v27 = vadd.f32 %v10921_v33, %v2986_v1  ;;  %v11037_v43 = vpop.f32.mrb[220].mxu0  ;;  %v3472_v51 = vadd.f32 %v3471_v17, %v3470_v47 }
 0x3a8   :  { %v3404_v54 = vsel %vm3388_vm5, %v3375_v35, 0.0  ;;  %v3445_v8 = vmul.f32 %v3375_v35, %v11026_v6  ;;  %v2927_v63 = vpop.f32.mrb[176].mxu1  ;;  %v8131_v42 = vpop.f32.mrb[221].mxu0 }
 0x3a9   :  { %v11039_v50 = vsel %vm3313_vm8, %v3292_v9, %v3334_v46  ;;  %v3293_v2 = vadd.f32 %v10919_v62, %v3263_v27  ;;  %v2987_v60 = vadd.f32 %v2927_v63, %v10857_v59  ;;  %v8042_v4 = vpop.f32.mrb[177].mxu1  ;;  %v3405_v41 = vadd.f32 %v3404_v54, %v3403_v12 }
 0x3aa   :  { %v3473_v33 = vsel %vm3388_vm5, %v3445_v8, 0.0  ;;  %v3376_v1 = vmul.f32 %v11039_v50, %v12937_v55 }
 0x3ab   :  { %vm3314_vm9 = vcmp.ge.f32.partialorder %v3293_v2, 0.0  ;;  %v3335_v13 = vmul.f32 0.0, %v3293_v2  ;;  %v3264_v16 = vadd.f32 %v10929_v0, %v2987_v60  ;;  %v3474_v52 = vadd.f32 %v3473_v33, %v3472_v51  ;;  %v11049_v59 = vpop.f32.mrb[222].mxu0  ;;  %v12938_v0 = vld [vmem:[#allocation14_spill] sm:$0xff] }
 0x3ac   :  { %v3406_v9 = vsel %vm3388_vm5, %v3376_v1, 0.0  ;;  %v3446_v61 = vmul.f32 %v3376_v1, %v11039_v50  ;;  %v2932_v35 = vpop.f32.mrb[178].mxu1  ;;  %v8134_v8 = vpop.f32.mrb[223].mxu0 }
 0x3ad   :  { %v3407_v46 = vadd.f32 %v3406_v9, %v3405_v41  ;;  %v11051_v17 = vsel %vm3314_vm9, %v3293_v2, %v3335_v13  ;;  %v3294_v27 = vadd.f32 %v10919_v62, %v3264_v16  ;;  %v2988_v47 = vadd.f32 %v2932_v35, %v10860_v57  ;;  %v8045_v54 = vpop.f32.mrb[179].mxu1  ;;  %v6865_v2 = vld [vmem:[%s12847_s9 + $0x20] sm:$0xff]  ;;  %v6866_v57 = vld [vmem:[%s12847_s9 + $0x28] sm:$0xff]  ;;  %v12939_v35 = vld [vmem:[#allocation15_spill] sm:$0xff] }
 0x3ae   :  { %v3475_v63 = vsel %vm3388_vm5, %v3446_v61, 0.0  ;;  %v3377_v12 = vmul.f32 %v11051_v17, %v12938_v0  ;;  %v8761_v41 = vpack.c.bf16 %v6866_v57, %v6865_v2 }
 0x3af   :  { %v3476_v60 = vadd.f32 %v3475_v63, %v3474_v52  ;;  %vm3315_vm10 = vcmp.ge.f32.partialorder %v3294_v27, 0.0  ;;  %v3336_v4 = vmul.f32 0.0, %v3294_v27  ;;  %v3265_v42 = vadd.f32 %v10940_v49, %v2988_v47 }
 0x3b0   :  { %v3408_v51 = vsel %vm3388_vm5, %v3377_v12, 0.0  ;;  %v3447_v33 = vmul.f32 %v3377_v12, %v11051_v17  ;;  %v2937_v1 = vpop.f32.mrb[180].mxu1  ;;  %8762 = vmatpush3.bf16.msra.mxu1 %v8761_v41 }
 0x3b1   :  { %v3409_v13 = vadd.f32 %v3408_v51, %v3407_v46  ;;  %v11067_v16 = vsel %vm3315_vm10, %v3294_v27, %v3336_v4  ;;  %v3295_v52 = vadd.f32 %v10919_v62, %v3265_v42  ;;  %v2989_v49 = vadd.f32 %v2937_v1, %v10863_v26  ;;  %v8048_v9 = vpop.f32.mrb[181].mxu1  ;;  %8766 = vmatprep.subr.bf16.mxu1 %v12931_v22  ;;  %v12940_v51 = vld [vmem:[#allocation16_spill] sm:$0xff] }
 0x3b2   :  { %v3477_v61 = vsel %vm3388_vm5, %v3447_v33, 0.0  ;;  %v3378_v47 = vmul.f32 %v11067_v16, %v12939_v35  ;;  %vm6246_vm10 = vcmask 39936  }
 0x3b3   :  { %v3478_v54 = vadd.f32 %v3477_v61, %v3476_v60  ;;  %vm3316_vm11 = vcmp.ge.f32.partialorder %v3295_v52, 0.0  ;;  %v3337_v8 = vmul.f32 0.0, %v3295_v52  ;;  %v3266_v63 = vadd.f32 %v10949_v21, %v2989_v49 }
 0x3b4   :  { %v3410_v46 = vsel %vm3388_vm5, %v3378_v47, 0.0  ;;  %v3448_v27 = vmul.f32 %v3378_v47, %v11067_v16  ;;  %v2942_v12 = vpop.f32.mrb[182].mxu1 }
 0x3b5   :  { %v3411_v26 = vadd.f32 %v3410_v46, %v3409_v13  ;;  %v11078_v4 = vsel %vm3316_vm11, %v3295_v52, %v3337_v8  ;;  %v3296_v42 = vadd.f32 %v10919_v62, %v3266_v63  ;;  %v2990_v2 = vadd.f32 %v2942_v12, %v10866_v32  ;;  %v8051_v57 = vpop.f32.mrb[183].mxu1 }
 0x3b6   :  { %v3479_v60 = vsel %vm3388_vm5, %v3448_v27, 0.0  ;;  %v3379_v21 = vmul.f32 %v11078_v4, %v12940_v51 }
 0x3b7   :  { %v3480_v33 = vadd.f32 %v3479_v60, %v3478_v54  ;;  %vm3317_vm12 = vcmp.ge.f32.partialorder %v3296_v42, 0.0  ;;  %v3338_v1 = vmul.f32 0.0, %v3296_v42  ;;  %v3267_v41 = vadd.f32 %v10964_v10, %v2990_v2  ;;  %v12941_v54 = vld [vmem:[#allocation17_spill] sm:$0xff] }
 0x3b8   :  { %v3412_v49 = vsel %vm3388_vm5, %v3379_v21, 0.0  ;;  %v3449_v13 = vmul.f32 %v3379_v21, %v11078_v4  ;;  %v2947_v52 = vpop.f32.mrb[184].mxu1 }
 0x3b9   :  { %v3413_v9 = vadd.f32 %v3412_v49, %v3411_v26  ;;  %v11088_v61 = vsel %vm3317_vm12, %v3296_v42, %v3338_v1  ;;  %v3297_v32 = vadd.f32 %v10919_v62, %v3267_v41  ;;  %v2991_v47 = vadd.f32 %v2947_v52, %v10871_v34  ;;  %v8054_v8 = vpop.f32.mrb[185].mxu1 }
 0x3ba   :  { %v3481_v63 = vsel %vm3388_vm5, %v3449_v13, 0.0  ;;  %v3380_v46 = vmul.f32 %v11088_v61, %v12941_v54 }
 0x3bb   :  { %v3482_v27 = vadd.f32 %v3481_v63, %v3480_v33  ;;  %vm3318_vm13 = vcmp.ge.f32.partialorder %v3297_v32, 0.0  ;;  %v3339_v10 = vmul.f32 0.0, %v3297_v32  ;;  %v3268_v12 = vadd.f32 %v10979_v36, %v2991_v47  ;;  %v12942_v33 = vld [vmem:[#allocation18_spill] sm:$0xff] }
 0x3bc   :  { %v3414_v2 = vsel %vm3388_vm5, %v3380_v46, 0.0  ;;  %v3450_v26 = vmul.f32 %v3380_v46, %v11088_v61  ;;  %v2952_v42 = vpop.f32.mrb[186].mxu1 }
 0x3bd   :  { %v3415_v57 = vadd.f32 %v3414_v2, %v3413_v9  ;;  %v11098_v60 = vsel %vm3318_vm13, %v3297_v32, %v3339_v10  ;;  %v3298_v34 = vadd.f32 %v10919_v62, %v3268_v12  ;;  %v2992_v21 = vadd.f32 %v2952_v42, %v10876_v14  ;;  %v8057_v1 = vpop.f32.mrb[187].mxu1 }
 0x3be   :  { %v3483_v41 = vsel %vm3388_vm5, %v3450_v26, 0.0  ;;  %v3381_v49 = vmul.f32 %v11098_v60, %v12942_v33 }
 0x3bf   :  { %v3484_v13 = vadd.f32 %v3483_v41, %v3482_v27  ;;  %vm3319_vm14 = vcmp.ge.f32.partialorder %v3298_v34, 0.0  ;;  %v3340_v36 = vmul.f32 0.0, %v3298_v34  ;;  %v3269_v52 = vadd.f32 %v10995_v11, %v2992_v21  ;;  %v12943_v27 = vld [vmem:[#allocation19_spill] sm:$0xff] }
 0x3c0   :  { %v3416_v47 = vsel %vm3388_vm5, %v3381_v49, 0.0  ;;  %v3451_v9 = vmul.f32 %v3381_v49, %v11098_v60  ;;  %v2957_v32 = vpop.f32.mrb[188].mxu1 }
 0x3c1   :  { %v3417_v8 = vadd.f32 %v3416_v47, %v3415_v57  ;;  %v11108_v63 = vsel %vm3319_vm14, %v3298_v34, %v3340_v36  ;;  %v3299_v14 = vadd.f32 %v10919_v62, %v3269_v52  ;;  %v2993_v46 = vadd.f32 %v2957_v32, %v10881_v24  ;;  %v8060_v10 = vpop.f32.mrb[189].mxu1 }
 0x3c2   :  { %v3485_v12 = vsel %vm3388_vm5, %v3451_v9, 0.0  ;;  %v3382_v2 = vmul.f32 %v11108_v63, %v12943_v27 }
 0x3c3   :  { %v3486_v26 = vadd.f32 %v3485_v12, %v3484_v13  ;;  %vm3320_vm15 = vcmp.ge.f32.partialorder %v3299_v14, 0.0  ;;  %v3341_v11 = vmul.f32 0.0, %v3299_v14  ;;  %v3270_v42 = vadd.f32 %v11010_v30, %v2993_v46  ;;  %v12944_v13 = vld [vmem:[#allocation20_spill] sm:$0xff] }
 0x3c4   :  { %v3418_v21 = vsel %vm3388_vm5, %v3382_v2, 0.0  ;;  %v3452_v57 = vmul.f32 %v3382_v2, %v11108_v63  ;;  %v2962_v34 = vpop.f32.mrb[190].mxu1 }
 0x3c5   :  { %v3419_v1 = vadd.f32 %v3418_v21, %v3417_v8  ;;  %v11118_v41 = vsel %vm3320_vm15, %v3299_v14, %v3341_v11  ;;  %v3300_v24 = vadd.f32 %v10919_v62, %v3270_v42  ;;  %v2994_v49 = vadd.f32 %v2962_v34, %v10886_v38  ;;  %v8063_v36 = vpop.f32.mrb[191].mxu1 }
 0x3c6   :  { %v3487_v52 = vsel %vm3388_vm5, %v3452_v57, 0.0  ;;  %v3383_v47 = vmul.f32 %v11118_v41, %v12944_v13 }
 0x3c7   :  { %v3488_v9 = vadd.f32 %v3487_v52, %v3486_v26  ;;  %vm3321_vm1 = vcmp.ge.f32.partialorder %v3300_v24, 0.0  ;;  %v3342_v30 = vmul.f32 0.0, %v3300_v24  ;;  %v3271_v32 = vadd.f32 %v11023_v56, %v2994_v49  ;;  %v12945_v26 = vld [vmem:[#allocation21_spill] sm:$0xff] }
 0x3c8   :  { %v3420_v46 = vsel %vm3388_vm5, %v3383_v47, 0.0  ;;  %v3453_v8 = vmul.f32 %v3383_v47, %v11118_v41  ;;  %v2967_v14 = vpop.f32.mrb[192].mxu1 }
 0x3c9   :  { %v3421_v10 = vadd.f32 %v3420_v46, %v3419_v1  ;;  %v11128_v12 = vsel %vm3321_vm1, %v3300_v24, %v3342_v30  ;;  %v3301_v38 = vadd.f32 %v10919_v62, %v3271_v32  ;;  %v2995_v2 = vadd.f32 %v2967_v14, %v10891_v19  ;;  %v8066_v11 = vpop.f32.mrb[193].mxu1 }
 0x3ca   :  { %v3489_v42 = vsel %vm3388_vm5, %v3453_v8, 0.0  ;;  %v3384_v21 = vmul.f32 %v11128_v12, %v12945_v26  ;;  %vm6496_vm1 = vcmask 326656  }
 0x3cb   :  { %v3490_v57 = vadd.f32 %v3489_v42, %v3488_v9  ;;  %vm3322_vm2 = vcmp.ge.f32.partialorder %v3301_v38, 0.0  ;;  %v3343_v56 = vmul.f32 0.0, %v3301_v38  ;;  %v3272_v34 = vadd.f32 %v11037_v43, %v2995_v2  ;;  %v12946_v9 = vld [vmem:[#allocation22_spill] sm:$0xff] }
 0x3cc   :  { %v3422_v49 = vsel %vm3388_vm5, %v3384_v21, 0.0  ;;  %v3454_v1 = vmul.f32 %v3384_v21, %v11128_v12  ;;  %v2972_v24 = vpop.f32.mrb[194].mxu1  ;;  %v12947_v21 = vld [vmem:[#allocation23_spill] sm:$0xff] }
 0x3cd   :  { %v3423_v36 = vadd.f32 %v3422_v49, %v3421_v10  ;;  %v11138_v52 = vsel %vm3322_vm2, %v3301_v38, %v3343_v56  ;;  %v3302_v19 = vadd.f32 %v10919_v62, %v3272_v34  ;;  %v2996_v47 = vadd.f32 %v2972_v24, %v10896_v37  ;;  %v8069_v30 = vpop.f32.mrb[195].mxu1 }
 0x3ce   :  { %v3491_v32 = vsel %vm3388_vm5, %v3454_v1, 0.0  ;;  %v3385_v46 = vmul.f32 %v11138_v52, %v12946_v9  ;;  %v6889_v30 = vld [vmem:[%s12847_s9 + $0x38] sm:$0xff] }
 0x3cf   :  { %v3492_v8 = vadd.f32 %v3491_v32, %v3490_v57  ;;  %vm3323_vm3 = vcmp.ge.f32.partialorder %v3302_v19, 0.0  ;;  %v3344_v43 = vmul.f32 0.0, %v3302_v19  ;;  %v3273_v14 = vadd.f32 %v11049_v59, %v2996_v47 }
 0x3d0   :  { %v3424_v2 = vsel %vm3388_vm5, %v3385_v46, 0.0  ;;  %v3455_v10 = vmul.f32 %v3385_v46, %v11138_v52 }
 0x3d1   :  { %v3425_v38 = vadd.f32 %v3424_v2, %v3423_v36  ;;  %v11148_v11 = vsel %vm3323_vm3, %v3302_v19, %v3344_v43  ;;  %v3303_v37 = vadd.f32 %v10919_v62, %v3273_v14  ;;  %v12948_v19 = vld [vmem:[#allocation24_spill] sm:$0xff]  ;;  %v6888_v62 = vld [vmem:[%s12847_s9 + $0x30] sm:$0xff] }
 0x3d2   :  { %v3493_v42 = vsel %vm3388_vm5, %v3455_v10, 0.0  ;;  %v3386_v56 = vmul.f32 %v11148_v11, %v12947_v21  ;;  %v8764_v46 = vpack.c.bf16 %v6889_v30, %v6888_v62 }
 0x3d3   :  { %v3494_v34 = vadd.f32 %v3493_v42, %v3492_v8  ;;  %vm3324_vm4 = vcmp.ge.f32.partialorder %v3303_v37, 0.0  ;;  %v3345_v57 = vmul.f32 0.0, %v3303_v37 }
 0x3d4   :  { %v3426_v49 = vsel %vm3388_vm5, %v3386_v56, 0.0  ;;  %v3456_v59 = vmul.f32 %v3386_v56, %v11148_v11  ;;  %8765 = vmatpush3.bf16.msra.mxu0 %v8764_v46 }
 0x3d5   :  { %v3366_v1 = vsel %vm3324_vm4, %v3303_v37, %v3345_v57  ;;  %v3427_v24 = vadd.f32 %v3426_v49, %v3425_v38  ;;  %8769 = vmatprep.subr.bf16.mxu0 %v12931_v22 }
 0x3d6   :  { %v3495_v36 = vsel %vm3388_vm5, %v3456_v59, 0.0  ;;  %v3387_v47 = vmul.f32 %v3366_v1, %v12948_v19 }
 0x3d7   :  { %v3496_v32 = vadd.f32 %v3495_v36, %v3494_v34 }
 0x3d8   :  { %v3428_v8 = vsel %vm3388_vm5, %v3387_v47, 0.0  ;;  %v3457_v43 = vmul.f32 %v3387_v47, %v3366_v1 }
 0x3d9   :  { %v3429_v14 = vadd.f32 %v3428_v8, %v3427_v24 }
 0x3da   :  { %v3497_v2 = vsel %vm3388_vm5, %v3457_v43, 0.0 }
 0x3db   :  { %v3430_v10 = vrot.slane %v3429_v14, 4  ;;  %v3498_v38 = vadd.f32 %v3497_v2, %v3496_v32 }
 0x3dd   :  { %v3431_v37 = vadd.f32 %v3430_v10, %v3429_v14  ;;  %v3499_v42 = vrot.slane %v3498_v38, 4 }
 0x3df   :  { %v3432_v56 = vrot.slane %v3431_v37, 2  ;;  %v3500_v57 = vadd.f32 %v3499_v42, %v3498_v38 }
 0x3e1   :  { %v3433_v49 = vadd.f32 %v3432_v56, %v3431_v37  ;;  %v3501_v59 = vrot.slane %v3500_v57, 2 }
 0x3e3   :  { %v3434_v21 = vrot.slane %v3433_v49, 1  ;;  %v3502_v34 = vadd.f32 %v3501_v59, %v3500_v57 }
 0x3e5   :  { %v3435_v36 = vadd.f32 %v3434_v21, %v3433_v49  ;;  %v3503_v62 = vrot.slane %v3502_v34, 1 }
 0x3e7   :  { %v11167_v30 = vmul.f32 0.010204081, %v3435_v36  ;;  %v3504_v24 = vadd.f32 %v3503_v62, %v3502_v34  ;;  %v11209_v62 = vld [vmem:[%s12845_s7] ss:$0 sm:$0xff] }
 0x3e9   :  { %v3505_v47 = vmul.f32 0.010204081, %v3504_v24  ;;  %v3506_v46 = vmul.f32 %v11167_v30, %v11167_v30  ;;  %v3528_v8 = vsub.f32 %v3366_v1, %v11167_v30  ;;  %v3514_v43 = vsub.f32 %v10998_v44, %v11167_v30 }
 0x3ea   :  { %v3517_v14 = vsub.f32 %v11039_v50, %v11167_v30  ;;  %v3518_v21 = vsub.f32 %v11051_v17, %v11167_v30  ;;  %v3519_v2 = vsub.f32 %v11067_v16, %v11167_v30  ;;  %v3520_v38 = vsub.f32 %v11078_v4, %v11167_v30 }
 0x3eb   :  { %v3507_v32 = vsub.f32 %v3505_v47, %v3506_v46  ;;  %v3521_v1 = vsub.f32 %v11088_v61, %v11167_v30  ;;  %v3522_v37 = vsub.f32 %v11098_v60, %v11167_v30  ;;  %v3523_v44 = vsub.f32 %v11108_v63, %v11167_v30 }
 0x3ec   :  { %v3524_v50 = vsub.f32 %v11118_v41, %v11167_v30  ;;  %v3525_v17 = vsub.f32 %v11128_v12, %v11167_v30  ;;  %v3508_v57 = vsub.f32 %v10946_v58, %v11167_v30  ;;  %v3509_v49 = vsub.f32 %v10944_v48, %v11167_v30 }
 0x3ed   :  { %v3529_v10 = vadd.f32 1e-05, %v3507_v32  ;;  %v3510_v59 = vsub.f32 %v10953_v29, %v11167_v30  ;;  %v3511_v34 = vsub.f32 %v10959_v23, %v11167_v30  ;;  %v3512_v24 = vsub.f32 %v10967_v53, %v11167_v30  ;;  %v11226_v53 = vld [vmem:[%s12846_s8] ss:$0 sm:$0xff] }
 0x3ee   :  { %v3513_v58 = vsub.f32 %v10982_v45, %v11167_v30  ;;  %v3515_v48 = vsub.f32 %v11013_v20, %v11167_v30  ;;  %v3516_v29 = vsub.f32 %v11026_v6, %v11167_v30  ;;  %v12949_v63 = vsub.f32 %v11138_v52, %v11167_v30 }
 0x3ef   :  { %8823 = vrsqrt.f32 %v3529_v10  ;;  %v12950_v12 = vsub.f32 %v11148_v11, %v11167_v30 }
 0x3f9   :  { %v11204_v36 = vpop.eup %8823 }
 0x3fa   :  { %v3551_v23 = vmul.f32 %v11204_v36, %v3528_v8  ;;  %v3531_v47 = vmul.f32 %v11204_v36, %v3508_v57  ;;  %v3532_v46 = vmul.f32 %v11204_v36, %v3509_v49  ;;  %v3533_v32 = vmul.f32 %v11204_v36, %v3510_v59 }
 0x3fb   :  { %v3534_v45 = vmul.f32 %v11204_v36, %v3511_v34  ;;  %v3535_v20 = vmul.f32 %v11204_v36, %v3512_v24  ;;  %v3536_v10 = vmul.f32 %v11204_v36, %v3513_v58  ;;  %v3537_v6 = vmul.f32 %v11204_v36, %v3514_v43 }
 0x3fc   :  { %v3578_v8 = vmul.f32 %v11209_v62, %v3551_v23  ;;  %v3558_v57 = vmul.f32 %v11209_v62, %v3531_v47  ;;  %v3559_v49 = vmul.f32 %v11209_v62, %v3532_v46  ;;  %v3560_v59 = vmul.f32 %v11209_v62, %v3533_v32 }
 0x3fd   :  { %v3561_v56 = vmul.f32 %v11209_v62, %v3534_v45  ;;  %v3562_v42 = vmul.f32 %v11209_v62, %v3535_v20  ;;  %v3563_v34 = vmul.f32 %v11209_v62, %v3536_v10  ;;  %v3564_v24 = vmul.f32 %v11209_v62, %v3537_v6 }
 0x3fe   :  { %v3605_v58 = vadd.f32 %v11226_v53, %v3578_v8  ;;  %v3585_v43 = vadd.f32 %v11226_v53, %v3558_v57  ;;  %v3586_v23 = vadd.f32 %v11226_v53, %v3559_v49  ;;  %v3587_v47 = vadd.f32 %v11226_v53, %v3560_v59 }
 0x3ff   :  { %v3588_v46 = vadd.f32 %v11226_v53, %v3561_v56  ;;  %v3589_v32 = vadd.f32 %v11226_v53, %v3562_v42  ;;  %v3590_v45 = vadd.f32 %v11226_v53, %v3563_v34  ;;  %v3591_v20 = vadd.f32 %v11226_v53, %v3564_v24 }
 0x400   :  { %v3626_v10 = vmul.f32 %v3605_v58, %v12948_v19  ;;  %v3606_v6 = vmul.f32 %v3585_v43, %v9236_v7  ;;  %v3607_v8 = vmul.f32 %v3586_v23, %v9245_v18  ;;  %v3608_v57 = vmul.f32 %v3587_v47, %v9241_v15 }
 0x401   :  { %v3609_v49 = vmul.f32 %v3588_v46, %v9258_v28  ;;  %v3610_v59 = vmul.f32 %v3589_v32, %v12932_v3  ;;  %v3611_v56 = vmul.f32 %v3590_v45, %v12933_v5  ;;  %v3612_v42 = vmul.f32 %v3591_v20, %v12934_v39 }
 0x402   :  { %3672 = vst.msk [vmem:[#allocation3 + $0xb0] sm:$0xff] %vm3388_vm5, %v3626_v10  ;;  %3652 = vst.msk [vmem:[#allocation3 + $0x10] sm:$0xff] %vm3388_vm5, %v3606_v6  ;;  %v3538_v34 = vmul.f32 %v11204_v36, %v3515_v48  ;;  %v3539_v24 = vmul.f32 %v11204_v36, %v3516_v29  ;;  %v3540_v58 = vmul.f32 %v11204_v36, %v3517_v14 }
 0x403   :  { %3653 = vst.msk [vmem:[#allocation3 + $0x18] sm:$0xff] %vm3388_vm5, %v3607_v8  ;;  %3654 = vst.msk [vmem:[#allocation3 + $0x20] sm:$0xff] %vm3388_vm5, %v3608_v57  ;;  %v3541_v43 = vmul.f32 %v11204_v36, %v3518_v21  ;;  %v3542_v23 = vmul.f32 %v11204_v36, %v3519_v2  ;;  %v3543_v14 = vmul.f32 %v11204_v36, %v3520_v38 }
 0x404   :  { %3655 = vst.msk [vmem:[#allocation3 + $0x28] sm:$0xff] %vm3388_vm5, %v3609_v49  ;;  %3656 = vst.msk [vmem:[#allocation3 + $0x30] sm:$0xff] %vm3388_vm5, %v3610_v59  ;;  %v3544_v21 = vmul.f32 %v11204_v36, %v3521_v1  ;;  %v3545_v48 = vmul.f32 %v11204_v36, %v3522_v37  ;;  %v3565_v29 = vmul.f32 %v11209_v62, %v3538_v34 }
 0x405   :  { %3657 = vst.msk [vmem:[#allocation3 + $0x38] sm:$0xff] %vm3388_vm5, %v3611_v56  ;;  %3658 = vst.msk [vmem:[#allocation3 + $0x40] sm:$0xff] %vm3388_vm5, %v3612_v42  ;;  %v3566_v16 = vmul.f32 %v11209_v62, %v3539_v24  ;;  %v3567_v2 = vmul.f32 %v11209_v62, %v3540_v58  ;;  %v3568_v4 = vmul.f32 %v11209_v62, %v3541_v43 }
 0x406   :  { %v3569_v38 = vmul.f32 %v11209_v62, %v3542_v23  ;;  %v3570_v47 = vmul.f32 %v11209_v62, %v3543_v14  ;;  %v3571_v61 = vmul.f32 %v11209_v62, %v3544_v21  ;;  %v3572_v1 = vmul.f32 %v11209_v62, %v3545_v48 }
 0x407   :  { %v3592_v60 = vadd.f32 %v11226_v53, %v3565_v29  ;;  %v3593_v37 = vadd.f32 %v11226_v53, %v3566_v16  ;;  %v3594_v46 = vadd.f32 %v11226_v53, %v3567_v2  ;;  %v3595_v32 = vadd.f32 %v11226_v53, %v3568_v4 }
 0x408   :  { %v3596_v45 = vadd.f32 %v11226_v53, %v3569_v38  ;;  %v3597_v20 = vadd.f32 %v11226_v53, %v3570_v47  ;;  %v3598_v10 = vadd.f32 %v11226_v53, %v3571_v61  ;;  %v3599_v6 = vadd.f32 %v11226_v53, %v3572_v1 }
 0x409   :  { %v3613_v8 = vmul.f32 %v3592_v60, %v12935_v31  ;;  %v3614_v57 = vmul.f32 %v3593_v37, %v12936_v40  ;;  %v3615_v49 = vmul.f32 %v3594_v46, %v12937_v55  ;;  %v3616_v59 = vmul.f32 %v3595_v32, %v12938_v0  ;;  %v11304_v56 = vld [vmem:[#allocation3 + $0xf] sm:$0xff] }
 0x40a   :  { %v3674_v42 = vld [vmem:[#allocation3 + $0xe] sm:$0xff]  ;;  %v3617_v34 = vmul.f32 %v3596_v45, %v12939_v35  ;;  %v3618_v24 = vmul.f32 %v3597_v20, %v12940_v51  ;;  %v3619_v58 = vmul.f32 %v3598_v10, %v12941_v54  ;;  %v3620_v43 = vmul.f32 %v3599_v6, %v12942_v33  ;;  %8143 = vmatmul.mubr.msk.f32.gmra.mrb[198].mxu1 %vm3388_vm5, %v11304_v56  ;;  %v11348_v29 = vld [vmem:[#allocation3 + $0x17] sm:$0xff]  ;;  %v11367_v1 = vld [vmem:[#allocation3 + $0x1f] sm:$0xff] }
 0x40b   :  { %8210 = vmatmul.mubr.msk.f32.gmra.mrb[226].mxu0 %vm3388_vm5, %v3674_v42  ;;  %3659 = vst.msk [vmem:[#allocation3 + $0x48] sm:$0xff] %vm3388_vm5, %v3613_v8  ;;  %3660 = vst.msk [vmem:[#allocation3 + $0x50] sm:$0xff] %vm3388_vm5, %v3614_v57  ;;  %v3546_v23 = vmul.f32 %v11204_v36, %v3523_v44  ;;  %v3547_v14 = vmul.f32 %v11204_v36, %v3524_v50  ;;  %v3548_v21 = vmul.f32 %v11204_v36, %v3525_v17  ;;  %v3675_v16 = vld [vmem:[#allocation3 + $0x16] sm:$0xff]  ;;  %v3676_v60 = vld [vmem:[#allocation3 + $0x1e] sm:$0xff] }
 0x40c   :  { %3661 = vst.msk [vmem:[#allocation3 + $0x58] sm:$0xff] %vm3388_vm5, %v3615_v49  ;;  %3662 = vst.msk [vmem:[#allocation3 + $0x60] sm:$0xff] %vm3388_vm5, %v3616_v59  ;;  %8145 = vmatprep.mubr.msk.f32.mxu1 %vm8856_vm0, %v12930_v25  ;;  %8212 = vmatprep.mubr.msk.f32.mxu0 %vm8856_vm0, %v12930_v25  ;;  %v3549_v41 = vmul.f32 %v11204_v36, %v12949_v63  ;;  %v3550_v44 = vmul.f32 %v11204_v36, %v12950_v12  ;;  %v12951_v46 = vld [vmem:[#allocation23_spill] sm:$0xff]  ;;  %v11401_v6 = vld [vmem:[#allocation3 + $0x37] sm:$0xff] }
 0x40d   :  { %3663 = vst.msk [vmem:[#allocation3 + $0x68] sm:$0xff] %vm3388_vm5, %v3617_v34  ;;  %3664 = vst.msk [vmem:[#allocation3 + $0x70] sm:$0xff] %vm3388_vm5, %v3618_v24  ;;  %v3573_v50 = vmul.f32 %v11209_v62, %v3546_v23  ;;  %v3574_v17 = vmul.f32 %v11209_v62, %v3547_v14  ;;  %v3575_v48 = vmul.f32 %v11209_v62, %v3548_v21  ;;  %v3677_v45 = vld [vmem:[#allocation3 + $0x26] sm:$0xff]  ;;  %v11392_v20 = vld [vmem:[#allocation3 + $0x2f] sm:$0xff] }
 0x40e   :  { %3665 = vst.msk [vmem:[#allocation3 + $0x78] sm:$0xff] %vm3388_vm5, %v3619_v58  ;;  %3666 = vst.msk [vmem:[#allocation3 + $0x80] sm:$0xff] %vm3388_vm5, %v3620_v43  ;;  %v3576_v2 = vmul.f32 %v11209_v62, %v3549_v41  ;;  %v3577_v52 = vmul.f32 %v11209_v62, %v3550_v44  ;;  %8146 = vmatmul.mubr.msk.f32.gmra.mrb[200].mxu1 %vm3388_vm5, %v11348_v29  ;;  %v3678_v10 = vld [vmem:[#allocation3 + $0x2e] sm:$0xff]  ;;  %v3679_v8 = vld [vmem:[#allocation3 + $0x36] sm:$0xff] }
 0x40f   :  { %8213 = vmatmul.mubr.msk.f32.gmra.mrb[228].mxu0 %vm3388_vm5, %v3675_v16  ;;  %v3600_v11 = vadd.f32 %v11226_v53, %v3573_v50  ;;  %v3601_v30 = vadd.f32 %v11226_v53, %v3574_v17  ;;  %v3602_v36 = vadd.f32 %v11226_v53, %v3575_v48  ;;  %8148 = vmatprep.mubr.msk.f32.mxu1 %vm8856_vm0, %v12930_v25  ;;  %v11410_v57 = vld [vmem:[#allocation3 + $0x3f] sm:$0xff] }
 0x410   :  { %8215 = vmatprep.mubr.msk.f32.mxu0 %vm8856_vm0, %v12930_v25  ;;  %v3603_v4 = vadd.f32 %v11226_v53, %v3576_v2  ;;  %v3604_v62 = vadd.f32 %v11226_v53, %v3577_v52  ;;  %v11383_v53 = vld [vmem:[#allocation3 + $0x27] sm:$0xff]  ;;  %v3680_v49 = vld [vmem:[#allocation3 + $0x3e] sm:$0xff] }
 0x411   :  { %v3621_v38 = vmul.f32 %v3600_v11, %v12943_v27  ;;  %v3622_v47 = vmul.f32 %v3601_v30, %v12944_v13  ;;  %v3623_v61 = vmul.f32 %v3602_v36, %v12945_v26 }
 0x412   :  { %v3624_v37 = vmul.f32 %v3603_v4, %v12946_v9  ;;  %v3625_v32 = vmul.f32 %v3604_v62, %v12951_v46  ;;  %8149 = vmatmul.mubr.msk.f32.gmra.mrb[202].mxu1 %vm3388_vm5, %v11367_v1  ;;  %v11419_v59 = vld [vmem:[#allocation3 + $0x47] sm:$0xff]  ;;  %v11428_v34 = vld [vmem:[#allocation3 + $0x4f] sm:$0xff] }
 0x413   :  { %8216 = vmatmul.mubr.msk.f32.gmra.mrb[230].mxu0 %vm3388_vm5, %v3676_v60  ;;  %3667 = vst.msk [vmem:[#allocation3 + $0x88] sm:$0xff] %vm3388_vm5, %v3621_v38  ;;  %3668 = vst.msk [vmem:[#allocation3 + $0x90] sm:$0xff] %vm3388_vm5, %v3622_v47  ;;  %8151 = vmatprep.mubr.msk.f32.mxu1 %vm8856_vm0, %v12930_v25  ;;  %v3681_v42 = vld [vmem:[#allocation3 + $0x46] sm:$0xff]  ;;  %v3682_v24 = vld [vmem:[#allocation3 + $0x4e] sm:$0xff] }
 0x414   :  { %3669 = vst.msk [vmem:[#allocation3 + $0x98] sm:$0xff] %vm3388_vm5, %v3623_v61  ;;  %8218 = vmatprep.mubr.msk.f32.mxu0 %vm8856_vm0, %v12930_v25  ;;  %3670 = vst.msk [vmem:[#allocation3 + $0xa0] sm:$0xff] %vm3388_vm5, %v3624_v37  ;;  %v11437_v58 = vld [vmem:[#allocation3 + $0x57] sm:$0xff]  ;;  %v11446_v23 = vld [vmem:[#allocation3 + $0x5f] sm:$0xff] }
 0x415   :  { %3671 = vst.msk [vmem:[#allocation3 + $0xa8] sm:$0xff] %vm3388_vm5, %v3625_v32  ;;  %v3683_v43 = vld [vmem:[#allocation3 + $0x56] sm:$0xff]  ;;  %v3684_v14 = vld [vmem:[#allocation3 + $0x5e] sm:$0xff]  ;;  %v11455_v21 = vld [vmem:[#allocation3 + $0x67] sm:$0xff] }
 0x416   :  { %8152 = vmatmul.mubr.msk.f32.gmra.mrb[204].mxu1 %vm3388_vm5, %v11383_v53  ;;  %v3685_v63 = vld [vmem:[#allocation3 + $0x66] sm:$0xff]  ;;  %v11464_v41 = vld [vmem:[#allocation3 + $0x6f] sm:$0xff]  ;;  %v11473_v44 = vld [vmem:[#allocation3 + $0x77] sm:$0xff] }
 0x417   :  { %8219 = vmatmul.mubr.msk.f32.gmra.mrb[232].mxu0 %vm3388_vm5, %v3677_v45  ;;  %8154 = vmatprep.mubr.msk.f32.mxu1 %vm8856_vm0, %v12930_v25  ;;  %v3686_v12 = vld [vmem:[#allocation3 + $0x6e] sm:$0xff]  ;;  %v3687_v50 = vld [vmem:[#allocation3 + $0x76] sm:$0xff]  ;;  %v11482_v17 = vld [vmem:[#allocation3 + $0x7f] sm:$0xff] }
 0x418   :  { %8221 = vmatprep.mubr.msk.f32.mxu0 %vm8856_vm0, %v12930_v25  ;;  %v3688_v48 = vld [vmem:[#allocation3 + $0x7e] sm:$0xff]  ;;  %v6934_v37 = vld [vmem:[%s12847_s9 + $0x50] sm:$0xff]  ;;  %v6935_v32 = vld [vmem:[%s12847_s9 + $0x58] sm:$0xff] }
 0x419   :  { %v6911_v47 = vld [vmem:[%s12847_s9 + $0x40] sm:$0xff]  ;;  %v6912_v61 = vld [vmem:[%s12847_s9 + $0x48] sm:$0xff]  ;;  %v4186_v45 = vld [vmem:[#allocation3 + $0x8] sm:$0xff] }
 0x41a   :  { %8155 = vmatmul.mubr.msk.f32.gmra.mrb[206].mxu1 %vm3388_vm5, %v11392_v20  ;;  %v11491_v16 = vld [vmem:[#allocation3 + $0x87] sm:$0xff]  ;;  %v11500_v52 = vld [vmem:[#allocation3 + $0x8f] sm:$0xff] }
 0x41b   :  { %8222 = vmatmul.mubr.msk.f32.gmra.mrb[234].mxu0 %vm3388_vm5, %v3678_v10  ;;  %8157 = vmatprep.mubr.msk.f32.mxu1 %vm8856_vm0, %v12930_v25  ;;  %v3689_v2 = vld [vmem:[#allocation3 + $0x86] sm:$0xff]  ;;  %v3690_v11 = vld [vmem:[#allocation3 + $0x8e] sm:$0xff]  ;;  %v11509_v30 = vld [vmem:[#allocation3 + $0x97] sm:$0xff]  ;;  %v8767_v10 = vpack.c.bf16 %v6912_v61, %v6911_v47 }
 0x41c   :  { %8224 = vmatprep.mubr.msk.f32.mxu0 %vm8856_vm0, %v12930_v25  ;;  %v3691_v36 = vld [vmem:[#allocation3 + $0x96] sm:$0xff]  ;;  %v11518_v4 = vld [vmem:[#allocation3 + $0x9f] sm:$0xff]  ;;  %v11527_v38 = vld [vmem:[#allocation3 + $0xa7] sm:$0xff] }
 0x41d   :  { %v3692_v62 = vld [vmem:[#allocation3 + $0x9e] sm:$0xff]  ;;  %v3693_v60 = vld [vmem:[#allocation3 + $0xa6] sm:$0xff]  ;;  %v11937_v26 = vld [vmem:[#allocation3 + $0x91] sm:$0xff] }
 0x41e   :  { %8158 = vmatmul.mubr.msk.f32.gmra.mrb[208].mxu1 %vm3388_vm5, %v11401_v6  ;;  %v11777_v47 = vld [vmem:[#allocation3 + $0x19] sm:$0xff]  ;;  %v11789_v61 = vld [vmem:[#allocation3 + $0x21] sm:$0xff]  ;;  %v11925_v46 = vld [vmem:[#allocation3 + $0x89] sm:$0xff] }
 0x41f   :  { %8225 = vmatmul.mubr.msk.f32.gmra.mrb[236].mxu0 %vm3388_vm5, %v3679_v8  ;;  %8160 = vmatprep.mubr.msk.f32.mxu1 %vm8856_vm0, %v12930_v25  ;;  %v8770_v8 = vpack.c.bf16 %v6935_v32, %v6934_v37  ;;  %v11809_v37 = vld [vmem:[#allocation3 + $0x31] sm:$0xff]  ;;  %v11819_v32 = vld [vmem:[#allocation3 + $0x39] sm:$0xff]  ;;  %v11961_v54 = vld [vmem:[#allocation3 + $0xa1] sm:$0xff] }
 0x420   :  { %8227 = vmatprep.mubr.msk.f32.mxu0 %vm8856_vm0, %v12930_v25  ;;  %v11949_v27 = vld [vmem:[#allocation3 + $0x99] sm:$0xff]  ;;  %v11973_v35 = vld [vmem:[#allocation3 + $0xa9] sm:$0xff] }
 0x422   :  { %8161 = vmatmul.mubr.msk.f32.gmra.mrb[210].mxu1 %vm3388_vm5, %v11410_v57 }
 0x423   :  { %8228 = vmatmul.mubr.msk.f32.gmra.mrb[238].mxu0 %vm3388_vm5, %v3680_v49  ;;  %8163 = vmatprep.mubr.msk.f32.mxu1 %vm8856_vm0, %v12930_v25 }
 0x424   :  { %8230 = vmatprep.mubr.msk.f32.mxu0 %vm8856_vm0, %v12930_v25 }
 0x426   :  { %8164 = vmatmul.mubr.msk.f32.gmra.mrb[212].mxu1 %vm3388_vm5, %v11419_v59 }
 0x427   :  { %8231 = vmatmul.mubr.msk.f32.gmra.mrb[240].mxu0 %vm3388_vm5, %v3681_v42  ;;  %8166 = vmatprep.mubr.msk.f32.mxu1 %vm8856_vm0, %v12930_v25 }
 0x428   :  { %8233 = vmatprep.mubr.msk.f32.mxu0 %vm8856_vm0, %v12930_v25 }
 0x42a   :  { %8167 = vmatmul.mubr.msk.f32.gmra.mrb[214].mxu1 %vm3388_vm5, %v11428_v34 }
 0x42b   :  { %8234 = vmatmul.mubr.msk.f32.gmra.mrb[242].mxu0 %vm3388_vm5, %v3682_v24  ;;  %8169 = vmatprep.mubr.msk.f32.mxu1 %vm8856_vm0, %v12930_v25 }
 0x42c   :  { %8236 = vmatprep.mubr.msk.f32.mxu0 %vm8856_vm0, %v12930_v25 }
 0x42e   :  { %8170 = vmatmul.mubr.msk.f32.gmra.mrb[216].mxu1 %vm3388_vm5, %v11437_v58 }
 0x42f   :  { %8237 = vmatmul.mubr.msk.f32.gmra.mrb[244].mxu0 %vm3388_vm5, %v3683_v43  ;;  %8172 = vmatprep.mubr.msk.f32.mxu1 %vm8856_vm0, %v12930_v25  ;;  %v11555_v43 = vld [vmem:[#allocation3 + $0x10] sm:$0xff] }
 0x430   :  { %8239 = vmatprep.mubr.msk.f32.mxu0 %vm8856_vm0, %v12930_v25 }
 0x432   :  { %8173 = vmatmul.mubr.msk.f32.gmra.mrb[218].mxu1 %vm3388_vm5, %v11446_v23 }
 0x433   :  { %8240 = vmatmul.mubr.msk.f32.gmra.mrb[246].mxu0 %vm3388_vm5, %v3684_v14  ;;  %8175 = vmatprep.mubr.msk.f32.mxu1 %vm8856_vm0, %v12930_v25 }
 0x434   :  { %8242 = vmatprep.mubr.msk.f32.mxu0 %vm8856_vm0, %v12930_v25 }
 0x436   :  { %8176 = vmatmul.mubr.msk.f32.gmra.mrb[220].mxu1 %vm3388_vm5, %v11455_v21 }
 0x437   :  { %8243 = vmatmul.mubr.msk.f32.gmra.mrb[248].mxu0 %vm3388_vm5, %v3685_v63  ;;  %8178 = vmatprep.mubr.msk.f32.mxu1 %vm8856_vm0, %v12930_v25 }
 0x438   :  { %8245 = vmatprep.mubr.msk.f32.mxu0 %vm8856_vm0, %v12930_v25 }
 0x43a   :  { %8179 = vmatmul.mubr.msk.f32.gmra.mrb[222].mxu1 %vm3388_vm5, %v11464_v41 }
 0x43b   :  { %8246 = vmatmul.mubr.msk.f32.gmra.mrb[250].mxu0 %vm3388_vm5, %v3686_v12  ;;  %8181 = vmatprep.mubr.msk.f32.mxu1 %vm8856_vm0, %v12930_v25  ;;  %v11699_v12 = vld [vmem:[#allocation3 + $0x80] sm:$0xff] }
 0x43c   :  { %8248 = vmatprep.mubr.msk.f32.mxu0 %vm8856_vm0, %v12930_v25 }
 0x43e   :  { %8182 = vmatmul.mubr.msk.f32.gmra.mrb[224].mxu1 %vm3388_vm5, %v11473_v44 }
 0x43f   :  { %8249 = vmatmul.mubr.msk.f32.gmra.mrb[252].mxu0 %vm3388_vm5, %v3687_v50  ;;  %8184 = vmatprep.mubr.msk.f32.mxu1 %vm8856_vm0, %v12930_v25  ;;  %v11719_v50 = vld [vmem:[#allocation3 + $0x90] sm:$0xff] }
 0x440   :  { %8251 = vmatprep.mubr.msk.f32.mxu0 %vm8856_vm0, %v12930_v25 }
 0x442   :  { %8185 = vmatmul.mubr.msk.f32.gmra.mrb[226].mxu1 %vm3388_vm5, %v11482_v17 }
 0x443   :  { %8252 = vmatmul.mubr.msk.f32.gmra.mrb[254].mxu0 %vm3388_vm5, %v3688_v48  ;;  %8187 = vmatprep.mubr.msk.f32.mxu1 %vm8856_vm0, %v12930_v25  ;;  %v11739_v48 = vld [vmem:[#allocation3 + $0xa0] sm:$0xff] }
 0x444   :  { %8254 = vmatprep.mubr.msk.f32.mxu0 %vm8856_vm0, %v12930_v25 }
 0x446   :  { %8188 = vmatmul.mubr.msk.f32.gmra.mrb[228].mxu1 %vm3388_vm5, %v11491_v16 }
 0x447   :  { %8255 = vmatmul.mubr.msk.f32.gmra.mrb[0].mxu0 %vm3388_vm5, %v3689_v2  ;;  %8190 = vmatprep.mubr.msk.f32.mxu1 %vm8856_vm0, %v12930_v25  ;;  %v4484_v2 = vld [vmem:[#allocation3 + $0xaf] sm:$0xff] }
 0x448   :  { %8257 = vmatprep.mubr.msk.f32.mxu0 %vm8856_vm0, %v12930_v25 }
 0x44a   :  { %8191 = vmatmul.mubr.msk.f32.gmra.mrb[230].mxu1 %vm3388_vm5, %v11500_v52 }
 0x44b   :  { %8258 = vmatmul.mubr.msk.f32.gmra.mrb[2].mxu0 %vm3388_vm5, %v3690_v11  ;;  %8193 = vmatprep.mubr.msk.f32.mxu1 %vm8856_vm0, %v12930_v25  ;;  %v6958_v11 = vld [vmem:[%s12847_s9 + $0x68] sm:$0xff] }
 0x44c   :  { %8260 = vmatprep.mubr.msk.f32.mxu0 %vm8856_vm0, %v12930_v25 }
 0x44e   :  { %8194 = vmatmul.mubr.msk.f32.gmra.mrb[232].mxu1 %vm3388_vm5, %v11509_v30 }
 0x44f   :  { %8261 = vmatmul.mubr.msk.f32.gmra.mrb[4].mxu0 %vm3388_vm5, %v3691_v36  ;;  %8196 = vmatprep.mubr.msk.f32.mxu1 %vm8856_vm0, %v12930_v25  ;;  %v6981_v36 = vld [vmem:[%s12847_s9 + $0x78] sm:$0xff] }
 0x450   :  { %8263 = vmatprep.mubr.msk.f32.mxu0 %vm8856_vm0, %v12930_v25 }
 0x452   :  { %8197 = vmatmul.mubr.msk.f32.gmra.mrb[234].mxu1 %vm3388_vm5, %v11518_v4 }
 0x453   :  { %8264 = vmatmul.mubr.msk.f32.gmra.mrb[6].mxu0 %vm3388_vm5, %v3692_v62  ;;  %8199 = vmatprep.mubr.msk.f32.mxu1 %vm8856_vm0, %v12930_v25 }
 0x454   :  { %8266 = vmatprep.mubr.msk.f32.mxu0 %vm8856_vm0, %v12930_v25 }
 0x456   :  { %8200 = vmatmul.mubr.msk.f32.gmra.mrb[236].mxu1 %vm3388_vm5, %v11527_v38 }
 0x457   :  { %8267 = vmatmul.mubr.msk.f32.gmra.mrb[8].mxu0 %vm3388_vm5, %v3693_v60  ;;  %8273 = vmatprep.mubr.msk.f32.mxu1 %vm8856_vm0, %v12930_v25  ;;  %v3849_v49 = vpop.f32.mrb[196].mxu1  ;;  %v11799_v60 = vld [vmem:[#allocation3 + $0x29] sm:$0xff] }
 0x458   :  { %8340 = vmatprep.mubr.msk.f32.mxu0 %vm8856_vm0, %v12930_v25  ;;  %v8141_v42 = vpop.f32.mrb[197].mxu1 }
 0x459   :  { %v11869_v42 = vld [vmem:[#allocation3 + $0x61] sm:$0xff] }
 0x45a   :  { %8274 = vmatmul.mubr.msk.f32.vlgmr.msra.gmra.mrb[238].mxu1 %vm3388_vm5, %v4186_v45  ;;  %v4082_v24 = vpop.f32.mrb[224].mxu0  ;;  %v11829_v45 = vld [vmem:[#allocation3 + $0x41] sm:$0xff] }
 0x45b   :  { %8341 = vmatmul.mubr.msk.f32.vlgmr.msra.gmra.mrb[10].mxu0 %vm3388_vm5, %v11304_v56  ;;  %8276 = vmatprep.mubr.msk.f32.mxu1 %vm8856_vm0, %v12930_v25  ;;  %v11558_v14 = vadd.f32 %v4082_v24, %v3849_v49  ;;  %v8208_v63 = vpop.f32.mrb[225].mxu0  ;;  %v11569_v56 = vld [vmem:[#allocation3 + $0x18] sm:$0xff]  ;;  %v11879_v24 = vld [vmem:[#allocation3 + $0x69] sm:$0xff] }
 0x45c   :  { %8343 = vmatprep.mubr.msk.f32.mxu0 %vm8856_vm0, %v12930_v25  ;;  %8768 = vmatpush3.bf16.msra.mxu1 %v8767_v10  ;;  %v11839_v10 = vld [vmem:[#allocation3 + $0x49] sm:$0xff]  ;;  %v11859_v49 = vld [vmem:[#allocation3 + $0x59] sm:$0xff] }
 0x45d   :  { %8771 = vmatpush3.bf16.msra.mxu0 %v8770_v8  ;;  %8772 = vmatprep.subr.bf16.mxu1 %v12931_v22  ;;  %v11849_v8 = vld [vmem:[#allocation3 + $0x51] sm:$0xff] }
 0x45e   :  { %8775 = vmatprep.subr.bf16.mxu0 %v12931_v22  ;;  %8277 = vmatmul.mubr.msk.f32.gmra.mrb[240].mxu1 %vm3388_vm5, %v11555_v43 }
 0x45f   :  { %8344 = vmatmul.mubr.msk.f32.gmra.mrb[12].mxu0 %vm3388_vm5, %v11348_v29  ;;  %8279 = vmatprep.mubr.msk.f32.mxu1 %vm8856_vm0, %v12930_v25  ;;  %v11579_v29 = vld [vmem:[#allocation3 + $0x20] sm:$0xff] }
 0x460   :  { %8346 = vmatprep.mubr.msk.f32.mxu0 %vm8856_vm0, %v12930_v25 }
 0x462   :  { %8280 = vmatmul.mubr.msk.f32.gmra.mrb[242].mxu1 %vm3388_vm5, %v11569_v56 }
 0x463   :  { %8347 = vmatmul.mubr.msk.f32.gmra.mrb[14].mxu0 %vm3388_vm5, %v11367_v1  ;;  %8282 = vmatprep.mubr.msk.f32.mxu1 %vm8856_vm0, %v12930_v25  ;;  %v11589_v1 = vld [vmem:[#allocation3 + $0x28] sm:$0xff] }
 0x464   :  { %8349 = vmatprep.mubr.msk.f32.mxu0 %vm8856_vm0, %v12930_v25 }
 0x466   :  { %8283 = vmatmul.mubr.msk.f32.gmra.mrb[244].mxu1 %vm3388_vm5, %v11579_v29 }
 0x467   :  { %8350 = vmatmul.mubr.msk.f32.gmra.mrb[16].mxu0 %vm3388_vm5, %v11383_v53  ;;  %8285 = vmatprep.mubr.msk.f32.mxu1 %vm8856_vm0, %v12930_v25  ;;  %v11599_v53 = vld [vmem:[#allocation3 + $0x30] sm:$0xff] }
 0x468   :  { %8352 = vmatprep.mubr.msk.f32.mxu0 %vm8856_vm0, %v12930_v25 }
 0x46a   :  { %8286 = vmatmul.mubr.msk.f32.gmra.mrb[246].mxu1 %vm3388_vm5, %v11589_v1 }
 0x46b   :  { %8353 = vmatmul.mubr.msk.f32.gmra.mrb[18].mxu0 %vm3388_vm5, %v11392_v20  ;;  %8288 = vmatprep.mubr.msk.f32.mxu1 %vm8856_vm0, %v12930_v25  ;;  %v11609_v20 = vld [vmem:[#allocation3 + $0x38] sm:$0xff] }
 0x46c   :  { %8355 = vmatprep.mubr.msk.f32.mxu0 %vm8856_vm0, %v12930_v25 }
 0x46e   :  { %8289 = vmatmul.mubr.msk.f32.gmra.mrb[248].mxu1 %vm3388_vm5, %v11599_v53 }
 0x46f   :  { %8356 = vmatmul.mubr.msk.f32.gmra.mrb[20].mxu0 %vm3388_vm5, %v11401_v6  ;;  %8291 = vmatprep.mubr.msk.f32.mxu1 %vm8856_vm0, %v12930_v25  ;;  %v11619_v6 = vld [vmem:[#allocation3 + $0x40] sm:$0xff] }
 0x470   :  { %8358 = vmatprep.mubr.msk.f32.mxu0 %vm8856_vm0, %v12930_v25 }
 0x472   :  { %8292 = vmatmul.mubr.msk.f32.gmra.mrb[250].mxu1 %vm3388_vm5, %v11609_v20 }
 0x473   :  { %8359 = vmatmul.mubr.msk.f32.gmra.mrb[22].mxu0 %vm3388_vm5, %v11410_v57  ;;  %8294 = vmatprep.mubr.msk.f32.mxu1 %vm8856_vm0, %v12930_v25  ;;  %v11629_v57 = vld [vmem:[#allocation3 + $0x48] sm:$0xff] }
 0x474   :  { %8361 = vmatprep.mubr.msk.f32.mxu0 %vm8856_vm0, %v12930_v25 }
 0x476   :  { %8295 = vmatmul.mubr.msk.f32.gmra.mrb[252].mxu1 %vm3388_vm5, %v11619_v6 }
 0x477   :  { %8362 = vmatmul.mubr.msk.f32.gmra.mrb[24].mxu0 %vm3388_vm5, %v11419_v59  ;;  %8297 = vmatprep.mubr.msk.f32.mxu1 %vm8856_vm0, %v12930_v25  ;;  %v11639_v59 = vld [vmem:[#allocation3 + $0x50] sm:$0xff] }
 0x478   :  { %8364 = vmatprep.mubr.msk.f32.mxu0 %vm8856_vm0, %v12930_v25 }
 0x47a   :  { %8298 = vmatmul.mubr.msk.f32.gmra.mrb[254].mxu1 %vm3388_vm5, %v11629_v57 }
 0x47b   :  { %8365 = vmatmul.mubr.msk.f32.gmra.mrb[26].mxu0 %vm3388_vm5, %v11428_v34  ;;  %8300 = vmatprep.mubr.msk.f32.mxu1 %vm8856_vm0, %v12930_v25  ;;  %v11649_v34 = vld [vmem:[#allocation3 + $0x58] sm:$0xff] }
 0x47c   :  { %8367 = vmatprep.mubr.msk.f32.mxu0 %vm8856_vm0, %v12930_v25 }
 0x47e   :  { %8301 = vmatmul.mubr.msk.f32.gmra.mrb[0].mxu1 %vm3388_vm5, %v11639_v59 }
 0x47f   :  { %8368 = vmatmul.mubr.msk.f32.gmra.mrb[28].mxu0 %vm3388_vm5, %v11437_v58  ;;  %8303 = vmatprep.mubr.msk.f32.mxu1 %vm8856_vm0, %v12930_v25  ;;  %v11659_v58 = vld [vmem:[#allocation3 + $0x60] sm:$0xff] }
 0x480   :  { %8370 = vmatprep.mubr.msk.f32.mxu0 %vm8856_vm0, %v12930_v25 }
 0x482   :  { %8304 = vmatmul.mubr.msk.f32.gmra.mrb[2].mxu1 %vm3388_vm5, %v11649_v34 }
 0x483   :  { %8371 = vmatmul.mubr.msk.f32.gmra.mrb[30].mxu0 %vm3388_vm5, %v11446_v23  ;;  %8306 = vmatprep.mubr.msk.f32.mxu1 %vm8856_vm0, %v12930_v25  ;;  %v11669_v23 = vld [vmem:[#allocation3 + $0x68] sm:$0xff] }
 0x484   :  { %8373 = vmatprep.mubr.msk.f32.mxu0 %vm8856_vm0, %v12930_v25 }
 0x486   :  { %8307 = vmatmul.mubr.msk.f32.gmra.mrb[4].mxu1 %vm3388_vm5, %v11659_v58 }
 0x487   :  { %8374 = vmatmul.mubr.msk.f32.gmra.mrb[32].mxu0 %vm3388_vm5, %v11455_v21  ;;  %8309 = vmatprep.mubr.msk.f32.mxu1 %vm8856_vm0, %v12930_v25  ;;  %v11679_v21 = vld [vmem:[#allocation3 + $0x70] sm:$0xff] }
 0x488   :  { %8376 = vmatprep.mubr.msk.f32.mxu0 %vm8856_vm0, %v12930_v25 }
 0x48a   :  { %8310 = vmatmul.mubr.msk.f32.gmra.mrb[6].mxu1 %vm3388_vm5, %v11669_v23 }
 0x48b   :  { %8377 = vmatmul.mubr.msk.f32.gmra.mrb[34].mxu0 %vm3388_vm5, %v11464_v41  ;;  %8312 = vmatprep.mubr.msk.f32.mxu1 %vm8856_vm0, %v12930_v25  ;;  %v11689_v41 = vld [vmem:[#allocation3 + $0x78] sm:$0xff] }
 0x48c   :  { %8379 = vmatprep.mubr.msk.f32.mxu0 %vm8856_vm0, %v12930_v25 }
 0x48e   :  { %8313 = vmatmul.mubr.msk.f32.gmra.mrb[8].mxu1 %vm3388_vm5, %v11679_v21 }
 0x48f   :  { %8380 = vmatmul.mubr.msk.f32.gmra.mrb[36].mxu0 %vm3388_vm5, %v11473_v44  ;;  %8315 = vmatprep.mubr.msk.f32.mxu1 %vm8856_vm0, %v12930_v25  ;;  %v11709_v44 = vld [vmem:[#allocation3 + $0x88] sm:$0xff] }
 0x490   :  { %8382 = vmatprep.mubr.msk.f32.mxu0 %vm8856_vm0, %v12930_v25 }
 0x492   :  { %8316 = vmatmul.mubr.msk.f32.gmra.mrb[10].mxu1 %vm3388_vm5, %v11689_v41 }
 0x493   :  { %8383 = vmatmul.mubr.msk.f32.gmra.mrb[38].mxu0 %vm3388_vm5, %v11482_v17  ;;  %8318 = vmatprep.mubr.msk.f32.mxu1 %vm8856_vm0, %v12930_v25  ;;  %v11729_v17 = vld [vmem:[#allocation3 + $0x98] sm:$0xff] }
 0x494   :  { %8385 = vmatprep.mubr.msk.f32.mxu0 %vm8856_vm0, %v12930_v25 }
 0x496   :  { %8319 = vmatmul.mubr.msk.f32.gmra.mrb[12].mxu1 %vm3388_vm5, %v11699_v12 }
 0x497   :  { %8386 = vmatmul.mubr.msk.f32.gmra.mrb[40].mxu0 %vm3388_vm5, %v11491_v16  ;;  %8321 = vmatprep.mubr.msk.f32.mxu1 %vm8856_vm0, %v12930_v25  ;;  %v11749_v16 = vld [vmem:[#allocation3 + $0xa8] sm:$0xff] }
 0x498   :  { %8388 = vmatprep.mubr.msk.f32.mxu0 %vm8856_vm0, %v12930_v25 }
 0x49a   :  { %8322 = vmatmul.mubr.msk.f32.gmra.mrb[14].mxu1 %vm3388_vm5, %v11709_v44 }
 0x49b   :  { %8389 = vmatmul.mubr.msk.f32.gmra.mrb[42].mxu0 %vm3388_vm5, %v11500_v52  ;;  %8324 = vmatprep.mubr.msk.f32.mxu1 %vm8856_vm0, %v12930_v25  ;;  %v6957_v52 = vld [vmem:[%s12847_s9 + $0x60] sm:$0xff] }
 0x49c   :  { %8391 = vmatprep.mubr.msk.f32.mxu0 %vm8856_vm0, %v12930_v25 }
 0x49e   :  { %8325 = vmatmul.mubr.msk.f32.gmra.mrb[16].mxu1 %vm3388_vm5, %v11719_v50 }
 0x49f   :  { %8392 = vmatmul.mubr.msk.f32.gmra.mrb[44].mxu0 %vm3388_vm5, %v11509_v30  ;;  %8327 = vmatprep.mubr.msk.f32.mxu1 %vm8856_vm0, %v12930_v25  ;;  %v6980_v30 = vld [vmem:[%s12847_s9 + $0x70] sm:$0xff] }
 0x4a0   :  { %8394 = vmatprep.mubr.msk.f32.mxu0 %vm8856_vm0, %v12930_v25  ;;  %v8776_v62 = vpack.c.bf16 %v6981_v36, %v6980_v30 }
 0x4a2   :  { %8328 = vmatmul.mubr.msk.f32.gmra.mrb[18].mxu1 %vm3388_vm5, %v11729_v17 }
 0x4a3   :  { %8395 = vmatmul.mubr.msk.f32.gmra.mrb[46].mxu0 %vm3388_vm5, %v11518_v4  ;;  %8330 = vmatprep.mubr.msk.f32.mxu1 %vm8856_vm0, %v12930_v25  ;;  %v8773_v4 = vpack.c.bf16 %v6958_v11, %v6957_v52 }
 0x4a4   :  { %8397 = vmatprep.mubr.msk.f32.mxu0 %vm8856_vm0, %v12930_v25 }
 0x4a6   :  { %8331 = vmatmul.mubr.msk.f32.gmra.mrb[20].mxu1 %vm3388_vm5, %v11739_v48 }
 0x4a7   :  { %8398 = vmatmul.mubr.msk.f32.gmra.mrb[48].mxu0 %vm3388_vm5, %v11527_v38  ;;  %8333 = vmatprep.mubr.msk.f32.mxu1 %vm8856_vm0, %v12930_v25  ;;  %v5020_v38 = vld [vmem:[#allocation3 + $0x11] sm:$0xff] }
 0x4a8   :  { %8400 = vmatprep.mubr.msk.f32.mxu0 %vm8856_vm0, %v12930_v25 }
 0x4aa   :  { %8334 = vmatmul.mubr.msk.f32.gmra.mrb[22].mxu1 %vm3388_vm5, %v11749_v16 }
 0x4ab   :  { %8401 = vmatmul.mubr.msk.f32.gmra.mrb[50].mxu0 %vm3388_vm5, %v4484_v2  ;;  %8407 = vmatprep.mubr.msk.f32.mxu1 %vm8856_vm0, %v12930_v25  ;;  %v11889_v2 = vld [vmem:[#allocation3 + $0x71] sm:$0xff] }
 0x4ac   :  { %8474 = vmatprep.mubr.msk.f32.mxu0 %vm8856_vm0, %v12930_v25 }
 0x4ae   :  { %8408 = vmatmul.mubr.msk.f32.vlgmr.msra.gmra.mrb[24].mxu1 %vm3388_vm5, %v11555_v43 }
 0x4af   :  { %8475 = vmatmul.mubr.msk.f32.vlgmr.msra.gmra.mrb[52].mxu0 %vm3388_vm5, %v5020_v38  ;;  %8410 = vmatprep.mubr.msk.f32.mxu1 %vm8856_vm0, %v12930_v25 }
 0x4b0   :  { %8477 = vmatprep.mubr.msk.f32.mxu0 %vm8856_vm0, %v12930_v25  ;;  %8774 = vmatpush3.bf16.msra.mxu1 %v8773_v4 }
 0x4b1   :  { %8777 = vmatpush3.bf16.msra.mxu0 %v8776_v62  ;;  %8778 = vmatprep.subr.bf16.mxu1 %v12931_v22  ;;  %v11901_v62 = vld [vmem:[#allocation3 + $0x79] sm:$0xff] }
 0x4b2   :  { %8781 = vmatprep.subr.bf16.mxu0 %v12931_v22  ;;  %8411 = vmatmul.mubr.msk.f32.gmra.mrb[26].mxu1 %vm3388_vm5, %v11569_v56  ;;  %v11913_v22 = vld [vmem:[#allocation3 + $0x81] sm:$0xff] }
 0x4b3   :  { %8478 = vmatmul.mubr.msk.f32.gmra.mrb[54].mxu0 %vm3388_vm5, %v11777_v47  ;;  %8413 = vmatprep.mubr.msk.f32.mxu1 %vm8856_vm0, %v12930_v25 }
 0x4b4   :  { %8480 = vmatprep.mubr.msk.f32.mxu0 %vm8856_vm0, %v12930_v25 }
 0x4b6   :  { %8414 = vmatmul.mubr.msk.f32.gmra.mrb[28].mxu1 %vm3388_vm5, %v11579_v29 }
 0x4b7   :  { %8481 = vmatmul.mubr.msk.f32.gmra.mrb[56].mxu0 %vm3388_vm5, %v11789_v61  ;;  %8416 = vmatprep.mubr.msk.f32.mxu1 %vm8856_vm0, %v12930_v25 }
 0x4b8   :  { %8483 = vmatprep.mubr.msk.f32.mxu0 %vm8856_vm0, %v12930_v25 }
 0x4ba   :  { %8417 = vmatmul.mubr.msk.f32.gmra.mrb[30].mxu1 %vm3388_vm5, %v11589_v1 }
 0x4bb   :  { %8484 = vmatmul.mubr.msk.f32.gmra.mrb[58].mxu0 %vm3388_vm5, %v11799_v60  ;;  %8419 = vmatprep.mubr.msk.f32.mxu1 %vm8856_vm0, %v12930_v25 }
 0x4bc   :  { %8486 = vmatprep.mubr.msk.f32.mxu0 %vm8856_vm0, %v12930_v25 }
 0x4be   :  { %8420 = vmatmul.mubr.msk.f32.gmra.mrb[32].mxu1 %vm3388_vm5, %v11599_v53 }
 0x4bf   :  { %8487 = vmatmul.mubr.msk.f32.gmra.mrb[60].mxu0 %vm3388_vm5, %v11809_v37  ;;  %8422 = vmatprep.mubr.msk.f32.mxu1 %vm8856_vm0, %v12930_v25 }
 0x4c0   :  { %8489 = vmatprep.mubr.msk.f32.mxu0 %vm8856_vm0, %v12930_v25 }
 0x4c2   :  { %8423 = vmatmul.mubr.msk.f32.gmra.mrb[34].mxu1 %vm3388_vm5, %v11609_v20 }
 0x4c3   :  { %8490 = vmatmul.mubr.msk.f32.gmra.mrb[62].mxu0 %vm3388_vm5, %v11819_v32  ;;  %8425 = vmatprep.mubr.msk.f32.mxu1 %vm8856_vm0, %v12930_v25 }
 0x4c4   :  { %8492 = vmatprep.mubr.msk.f32.mxu0 %vm8856_vm0, %v12930_v25 }
 0x4c6   :  { %8426 = vmatmul.mubr.msk.f32.gmra.mrb[36].mxu1 %vm3388_vm5, %v11619_v6 }
 0x4c7   :  { %8493 = vmatmul.mubr.msk.f32.gmra.mrb[64].mxu0 %vm3388_vm5, %v11829_v45  ;;  %8428 = vmatprep.mubr.msk.f32.mxu1 %vm8856_vm0, %v12930_v25 }
 0x4c8   :  { %8495 = vmatprep.mubr.msk.f32.mxu0 %vm8856_vm0, %v12930_v25 }
 0x4ca   :  { %8429 = vmatmul.mubr.msk.f32.gmra.mrb[38].mxu1 %vm3388_vm5, %v11629_v57 }
 0x4cb   :  { %8496 = vmatmul.mubr.msk.f32.gmra.mrb[66].mxu0 %vm3388_vm5, %v11839_v10  ;;  %8431 = vmatprep.mubr.msk.f32.mxu1 %vm8856_vm0, %v12930_v25 }
 0x4cc   :  { %8498 = vmatprep.mubr.msk.f32.mxu0 %vm8856_vm0, %v12930_v25 }
 0x4ce   :  { %8432 = vmatmul.mubr.msk.f32.gmra.mrb[40].mxu1 %vm3388_vm5, %v11639_v59 }
 0x4cf   :  { %8499 = vmatmul.mubr.msk.f32.gmra.mrb[68].mxu0 %vm3388_vm5, %v11849_v8  ;;  %8434 = vmatprep.mubr.msk.f32.mxu1 %vm8856_vm0, %v12930_v25 }
 0x4d0   :  { %8501 = vmatprep.mubr.msk.f32.mxu0 %vm8856_vm0, %v12930_v25 }
 0x4d2   :  { %8435 = vmatmul.mubr.msk.f32.gmra.mrb[42].mxu1 %vm3388_vm5, %v11649_v34 }
 0x4d3   :  { %8502 = vmatmul.mubr.msk.f32.gmra.mrb[70].mxu0 %vm3388_vm5, %v11859_v49  ;;  %8437 = vmatprep.mubr.msk.f32.mxu1 %vm8856_vm0, %v12930_v25 }
 0x4d4   :  { %8504 = vmatprep.mubr.msk.f32.mxu0 %vm8856_vm0, %v12930_v25 }
 0x4d6   :  { %8438 = vmatmul.mubr.msk.f32.gmra.mrb[44].mxu1 %vm3388_vm5, %v11659_v58 }
 0x4d7   :  { %8505 = vmatmul.mubr.msk.f32.gmra.mrb[72].mxu0 %vm3388_vm5, %v11869_v42  ;;  %8440 = vmatprep.mubr.msk.f32.mxu1 %vm8856_vm0, %v12930_v25 }
 0x4d8   :  { %8507 = vmatprep.mubr.msk.f32.mxu0 %vm8856_vm0, %v12930_v25 }
 0x4da   :  { %8441 = vmatmul.mubr.msk.f32.gmra.mrb[46].mxu1 %vm3388_vm5, %v11669_v23 }
 0x4db   :  { %8508 = vmatmul.mubr.msk.f32.gmra.mrb[74].mxu0 %vm3388_vm5, %v11879_v24  ;;  %8443 = vmatprep.mubr.msk.f32.mxu1 %vm8856_vm0, %v12930_v25 }
 0x4dc   :  { %8510 = vmatprep.mubr.msk.f32.mxu0 %vm8856_vm0, %v12930_v25 }
 0x4dd   :  { %v3854_v43 = vpop.f32.mrb[198].mxu1 }
 0x4de   :  { %v4087_v63 = vpop.f32.mrb[226].mxu0  ;;  %v8144_v11 = vpop.f32.mrb[199].mxu1  ;;  %8444 = vmatmul.mubr.msk.f32.gmra.mrb[48].mxu1 %vm3388_vm5, %v11679_v21 }
 0x4df   :  { %v11891_v52 = vadd.f32 %v4087_v63, %v3854_v43  ;;  %v8211_v30 = vpop.f32.mrb[227].mxu0  ;;  %8511 = vmatmul.mubr.msk.f32.gmra.mrb[76].mxu0 %vm3388_vm5, %v11889_v2  ;;  %8446 = vmatprep.mubr.msk.f32.mxu1 %vm8856_vm0, %v12930_v25 }
 0x4e0   :  { %8513 = vmatprep.mubr.msk.f32.mxu0 %vm8856_vm0, %v12930_v25 }
 0x4e1   :  { %v3859_v36 = vpop.f32.mrb[200].mxu1 }
 0x4e2   :  { %v4092_v4 = vpop.f32.mrb[228].mxu0  ;;  %v8147_v43 = vpop.f32.mrb[201].mxu1  ;;  %8447 = vmatmul.mubr.msk.f32.gmra.mrb[50].mxu1 %vm3388_vm5, %v11689_v41 }
 0x4e3   :  { %v11903_v38 = vadd.f32 %v4092_v4, %v3859_v36  ;;  %v8214_v63 = vpop.f32.mrb[229].mxu0  ;;  %8514 = vmatmul.mubr.msk.f32.gmra.mrb[78].mxu0 %vm3388_vm5, %v11901_v62  ;;  %8449 = vmatprep.mubr.msk.f32.mxu1 %vm8856_vm0, %v12930_v25 }
 0x4e4   :  { %8516 = vmatprep.mubr.msk.f32.mxu0 %vm8856_vm0, %v12930_v25 }
 0x4e5   :  { %v3864_v11 = vpop.f32.mrb[202].mxu1 }
 0x4e6   :  { %v4097_v30 = vpop.f32.mrb[230].mxu0  ;;  %v8150_v4 = vpop.f32.mrb[203].mxu1  ;;  %8450 = vmatmul.mubr.msk.f32.gmra.mrb[52].mxu1 %vm3388_vm5, %v11699_v12 }
 0x4e7   :  { %v11915_v36 = vadd.f32 %v4097_v30, %v3864_v11  ;;  %v8217_v43 = vpop.f32.mrb[231].mxu0  ;;  %8517 = vmatmul.mubr.msk.f32.gmra.mrb[80].mxu0 %vm3388_vm5, %v11913_v22  ;;  %8452 = vmatprep.mubr.msk.f32.mxu1 %vm8856_vm0, %v12930_v25 }
 0x4e8   :  { %8519 = vmatprep.mubr.msk.f32.mxu0 %vm8856_vm0, %v12930_v25 }
 0x4e9   :  { %v3869_v63 = vpop.f32.mrb[204].mxu1 }
 0x4ea   :  { %v4102_v19 = vpop.f32.mrb[232].mxu0  ;;  %v8153_v30 = vpop.f32.mrb[205].mxu1  ;;  %8453 = vmatmul.mubr.msk.f32.gmra.mrb[54].mxu1 %vm3388_vm5, %v11709_v44 }
 0x4eb   :  { %v11927_v11 = vadd.f32 %v4102_v19, %v3869_v63  ;;  %v8220_v4 = vpop.f32.mrb[233].mxu0  ;;  %8520 = vmatmul.mubr.msk.f32.gmra.mrb[82].mxu0 %vm3388_vm5, %v11925_v46  ;;  %8455 = vmatprep.mubr.msk.f32.mxu1 %vm8856_vm0, %v12930_v25 }
 0x4ec   :  { %8522 = vmatprep.mubr.msk.f32.mxu0 %vm8856_vm0, %v12930_v25 }
 0x4ed   :  { %v3874_v43 = vpop.f32.mrb[206].mxu1 }
 0x4ee   :  { %v4107_v9 = vpop.f32.mrb[234].mxu0  ;;  %v8156_v63 = vpop.f32.mrb[207].mxu1  ;;  %8456 = vmatmul.mubr.msk.f32.gmra.mrb[56].mxu1 %vm3388_vm5, %v11719_v50 }
 0x4ef   :  { %v11939_v19 = vadd.f32 %v4107_v9, %v3874_v43  ;;  %v8223_v30 = vpop.f32.mrb[235].mxu0  ;;  %8523 = vmatmul.mubr.msk.f32.gmra.mrb[84].mxu0 %vm3388_vm5, %v11937_v26  ;;  %8458 = vmatprep.mubr.msk.f32.mxu1 %vm8856_vm0, %v12930_v25 }
 0x4f0   :  { %8525 = vmatprep.mubr.msk.f32.mxu0 %vm8856_vm0, %v12930_v25 }
 0x4f1   :  { %v3879_v4 = vpop.f32.mrb[208].mxu1 }
 0x4f2   :  { %v4112_v13 = vpop.f32.mrb[236].mxu0  ;;  %v8159_v43 = vpop.f32.mrb[209].mxu1  ;;  %8459 = vmatmul.mubr.msk.f32.gmra.mrb[58].mxu1 %vm3388_vm5, %v11729_v17 }
 0x4f3   :  { %v11951_v9 = vadd.f32 %v4112_v13, %v3879_v4  ;;  %v8226_v63 = vpop.f32.mrb[237].mxu0  ;;  %8526 = vmatmul.mubr.msk.f32.gmra.mrb[86].mxu0 %vm3388_vm5, %v11949_v27  ;;  %8461 = vmatprep.mubr.msk.f32.mxu1 %vm8856_vm0, %v12930_v25 }
 0x4f4   :  { %8528 = vmatprep.mubr.msk.f32.mxu0 %vm8856_vm0, %v12930_v25 }
 0x4f5   :  { %v3884_v30 = vpop.f32.mrb[210].mxu1 }
 0x4f6   :  { %v4117_v33 = vpop.f32.mrb[238].mxu0  ;;  %v8162_v4 = vpop.f32.mrb[211].mxu1  ;;  %8462 = vmatmul.mubr.msk.f32.gmra.mrb[60].mxu1 %vm3388_vm5, %v11739_v48 }
 0x4f7   :  { %v11963_v13 = vadd.f32 %v4117_v33, %v3884_v30  ;;  %v8229_v43 = vpop.f32.mrb[239].mxu0  ;;  %8529 = vmatmul.mubr.msk.f32.gmra.mrb[88].mxu0 %vm3388_vm5, %v11961_v54  ;;  %8464 = vmatprep.mubr.msk.f32.mxu1 %vm8856_vm0, %v12930_v25 }
 0x4f8   :  { %8531 = vmatprep.mubr.msk.f32.mxu0 %vm8856_vm0, %v12930_v25  ;;  %v11985_v43 = vld [vmem:[#allocation3 + $0xb0] sm:$0xff] }
 0x4f9   :  { %v3889_v63 = vpop.f32.mrb[212].mxu1 }
 0x4fa   :  { %v4122_v51 = vpop.f32.mrb[240].mxu0  ;;  %v8165_v30 = vpop.f32.mrb[213].mxu1  ;;  %8465 = vmatmul.mubr.msk.f32.gmra.mrb[62].mxu1 %vm3388_vm5, %v11749_v16 }
 0x4fb   :  { %v11975_v33 = vadd.f32 %v4122_v51, %v3889_v63  ;;  %v8232_v4 = vpop.f32.mrb[241].mxu0  ;;  %8532 = vmatmul.mubr.msk.f32.gmra.mrb[90].mxu0 %vm3388_vm5, %v11973_v35  ;;  %8467 = vmatprep.mubr.msk.f32.mxu1 %vm8856_vm0, %v12930_v25  ;;  %v11987_v51 = vld [vmem:[#allocation3 + $0xb1] sm:$0xff]  ;;  %v7004_v30 = vld [vmem:[%s12847_s9 + $0x88] sm:$0xff] }
 0x4fc   :  { %8534 = vmatprep.mubr.msk.f32.mxu0 %vm8856_vm0, %v12930_v25  ;;  %v7003_v63 = vld [vmem:[%s12847_s9 + $0x80] sm:$0xff] }
 0x4fd   :  { %v3894_v0 = vpop.f32.mrb[214].mxu1  ;;  %v8779_v39 = vpack.c.bf16 %v7004_v30, %v7003_v63 }
 0x4fe   :  { %v4127_v55 = vpop.f32.mrb[242].mxu0  ;;  %v8168_v40 = vpop.f32.mrb[215].mxu1  ;;  %8468 = vmatmul.mubr.msk.f32.gmra.mrb[64].mxu1 %vm3388_vm5, %v11985_v43 }
 0x4ff   :  { %v11995_v4 = vadd.f32 %v4127_v55, %v3894_v0  ;;  %v8235_v31 = vpop.f32.mrb[243].mxu0  ;;  %8535 = vmatmul.mubr.msk.f32.gmra.mrb[92].mxu0 %vm3388_vm5, %v11987_v51  ;;  %8541 = vmatprep.mubr.msk.f32.mxu1 %vm8856_vm0, %v12930_v25 }
 0x500   :  { %8608 = vmatprep.mubr.msk.f32.mxu0 %vm8856_vm0, %v12930_v25 }
 0x501   :  { %v3899_v5 = vpop.f32.mrb[216].mxu1 }
 0x502   :  { %v4132_v3 = vpop.f32.mrb[244].mxu0  ;;  %v8171_v55 = vpop.f32.mrb[217].mxu1  ;;  %8542 = vmatmul.mubr.msk.f32.vlgmr.msra.gmra.mrb[66].mxu1 %vm3388_vm5, %v11569_v56 }
 0x503   :  { %v12005_v28 = vadd.f32 %v4132_v3, %v3899_v5  ;;  %v8238_v40 = vpop.f32.mrb[245].mxu0  ;;  %8609 = vmatmul.mubr.msk.f32.vlgmr.msra.gmra.mrb[94].mxu0 %vm3388_vm5, %v11777_v47  ;;  %8544 = vmatprep.mubr.msk.f32.mxu1 %vm8856_vm0, %v12930_v25 }
 0x504   :  { %8611 = vmatprep.mubr.msk.f32.mxu0 %vm8856_vm0, %v12930_v25  ;;  %8780 = vmatpush3.bf16.msra.mxu1 %v8779_v39 }
 0x505   :  { %v3904_v31 = vpop.f32.mrb[218].mxu1 }
 0x506   :  { %v4137_v0 = vpop.f32.mrb[246].mxu0  ;;  %v8174_v3 = vpop.f32.mrb[219].mxu1  ;;  %8545 = vmatmul.mubr.msk.f32.gmra.mrb[68].mxu1 %vm3388_vm5, %v11579_v29 }
 0x507   :  { %v12015_v63 = vadd.f32 %v4137_v0, %v3904_v31  ;;  %v8241_v5 = vpop.f32.mrb[247].mxu0  ;;  %8612 = vmatmul.mubr.msk.f32.gmra.mrb[96].mxu0 %vm3388_vm5, %v11789_v61  ;;  %8547 = vmatprep.mubr.msk.f32.mxu1 %vm8856_vm0, %v12930_v25 }
 0x508   :  { %8614 = vmatprep.mubr.msk.f32.mxu0 %vm8856_vm0, %v12930_v25 }
 0x509   :  { %v3909_v56 = vpop.f32.mrb[220].mxu1 }
 0x50a   :  { %v4142_v39 = vpop.f32.mrb[248].mxu0  ;;  %v8177_v30 = vpop.f32.mrb[221].mxu1  ;;  %8548 = vmatmul.mubr.msk.f32.gmra.mrb[70].mxu1 %vm3388_vm5, %v11589_v1 }
 0x50b   :  { %v12025_v47 = vadd.f32 %v4142_v39, %v3909_v56  ;;  %v8244_v55 = vpop.f32.mrb[249].mxu0  ;;  %8615 = vmatmul.mubr.msk.f32.gmra.mrb[98].mxu0 %vm3388_vm5, %v11799_v60  ;;  %8550 = vmatprep.mubr.msk.f32.mxu1 %vm8856_vm0, %v12930_v25 }
 0x50c   :  { %8617 = vmatprep.mubr.msk.f32.mxu0 %vm8856_vm0, %v12930_v25 }
 0x50d   :  { %v3914_v29 = vpop.f32.mrb[222].mxu1 }
 0x50e   :  { %v4147_v61 = vpop.f32.mrb[250].mxu0  ;;  %v8180_v31 = vpop.f32.mrb[223].mxu1  ;;  %8551 = vmatmul.mubr.msk.f32.gmra.mrb[72].mxu1 %vm3388_vm5, %v11599_v53 }
 0x50f   :  { %v12035_v40 = vadd.f32 %v4147_v61, %v3914_v29  ;;  %v8247_v0 = vpop.f32.mrb[251].mxu0  ;;  %8618 = vmatmul.mubr.msk.f32.gmra.mrb[100].mxu0 %vm3388_vm5, %v11809_v37  ;;  %8553 = vmatprep.mubr.msk.f32.mxu1 %vm8856_vm0, %v12930_v25 }
 0x510   :  { %8620 = vmatprep.mubr.msk.f32.mxu0 %vm8856_vm0, %v12930_v25 }
 0x511   :  { %v3919_v1 = vpop.f32.mrb[224].mxu1 }
 0x512   :  { %v4152_v60 = vpop.f32.mrb[252].mxu0  ;;  %v8183_v5 = vpop.f32.mrb[225].mxu1  ;;  %8554 = vmatmul.mubr.msk.f32.gmra.mrb[74].mxu1 %vm3388_vm5, %v11609_v20 }
 0x513   :  { %v12045_v3 = vadd.f32 %v4152_v60, %v3919_v1  ;;  %v8250_v56 = vpop.f32.mrb[253].mxu0  ;;  %8621 = vmatmul.mubr.msk.f32.gmra.mrb[102].mxu0 %vm3388_vm5, %v11819_v32  ;;  %8556 = vmatprep.mubr.msk.f32.mxu1 %vm8856_vm0, %v12930_v25 }
 0x514   :  { %8623 = vmatprep.mubr.msk.f32.mxu0 %vm8856_vm0, %v12930_v25 }
 0x515   :  { %v3924_v53 = vpop.f32.mrb[226].mxu1 }
 0x516   :  { %v4157_v37 = vpop.f32.mrb[254].mxu0  ;;  %v8186_v30 = vpop.f32.mrb[227].mxu1  ;;  %8557 = vmatmul.mubr.msk.f32.gmra.mrb[76].mxu1 %vm3388_vm5, %v11619_v6 }
 0x517   :  { %v12055_v39 = vadd.f32 %v4157_v37, %v3924_v53  ;;  %v8253_v55 = vpop.f32.mrb[255].mxu0  ;;  %8624 = vmatmul.mubr.msk.f32.gmra.mrb[104].mxu0 %vm3388_vm5, %v11829_v45  ;;  %8559 = vmatprep.mubr.msk.f32.mxu1 %vm8856_vm0, %v12930_v25 }
 0x518   :  { %8626 = vmatprep.mubr.msk.f32.mxu0 %vm8856_vm0, %v12930_v25 }
 0x519   :  { %v3929_v20 = vpop.f32.mrb[228].mxu1 }
 0x51a   :  { %v4162_v32 = vpop.f32.mrb[0].mxu0  ;;  %v8189_v61 = vpop.f32.mrb[229].mxu1  ;;  %8560 = vmatmul.mubr.msk.f32.gmra.mrb[78].mxu1 %vm3388_vm5, %v11629_v57 }
 0x51b   :  { %v12065_v29 = vadd.f32 %v4162_v32, %v3929_v20  ;;  %v8256_v31 = vpop.f32.mrb[1].mxu0  ;;  %8627 = vmatmul.mubr.msk.f32.gmra.mrb[106].mxu0 %vm3388_vm5, %v11839_v10  ;;  %8562 = vmatprep.mubr.msk.f32.mxu1 %vm8856_vm0, %v12930_v25 }
 0x51c   :  { %8629 = vmatprep.mubr.msk.f32.mxu0 %vm8856_vm0, %v12930_v25 }
 0x51d   :  { %v3934_v6 = vpop.f32.mrb[230].mxu1 }
 0x51e   :  { %v4167_v45 = vpop.f32.mrb[2].mxu0  ;;  %v8192_v1 = vpop.f32.mrb[231].mxu1  ;;  %8563 = vmatmul.mubr.msk.f32.gmra.mrb[80].mxu1 %vm3388_vm5, %v11639_v59 }
 0x51f   :  { %v12075_v0 = vadd.f32 %v4167_v45, %v3934_v6  ;;  %v8259_v60 = vpop.f32.mrb[3].mxu0  ;;  %8630 = vmatmul.mubr.msk.f32.gmra.mrb[108].mxu0 %vm3388_vm5, %v11849_v8  ;;  %8565 = vmatprep.mubr.msk.f32.mxu1 %vm8856_vm0, %v12930_v25 }
 0x520   :  { %8632 = vmatprep.mubr.msk.f32.mxu0 %vm8856_vm0, %v12930_v25 }
 0x521   :  { %v3939_v57 = vpop.f32.mrb[232].mxu1 }
 0x522   :  { %v4172_v10 = vpop.f32.mrb[4].mxu0  ;;  %v8195_v56 = vpop.f32.mrb[233].mxu1  ;;  %8566 = vmatmul.mubr.msk.f32.gmra.mrb[82].mxu1 %vm3388_vm5, %v11649_v34 }
 0x523   :  { %v12085_v5 = vadd.f32 %v4172_v10, %v3939_v57  ;;  %v8262_v53 = vpop.f32.mrb[5].mxu0  ;;  %8633 = vmatmul.mubr.msk.f32.gmra.mrb[110].mxu0 %vm3388_vm5, %v11859_v49  ;;  %8568 = vmatprep.mubr.msk.f32.mxu1 %vm8856_vm0, %v12930_v25 }
 0x524   :  { %8635 = vmatprep.mubr.msk.f32.mxu0 %vm8856_vm0, %v12930_v25 }
 0x525   :  { %v3944_v59 = vpop.f32.mrb[234].mxu1 }
 0x526   :  { %v4177_v8 = vpop.f32.mrb[6].mxu0  ;;  %v8198_v30 = vpop.f32.mrb[235].mxu1  ;;  %8569 = vmatmul.mubr.msk.f32.gmra.mrb[84].mxu1 %vm3388_vm5, %v11659_v58 }
 0x527   :  { %v12095_v37 = vadd.f32 %v4177_v8, %v3944_v59  ;;  %v8265_v55 = vpop.f32.mrb[7].mxu0  ;;  %8636 = vmatmul.mubr.msk.f32.gmra.mrb[112].mxu0 %vm3388_vm5, %v11869_v42  ;;  %8571 = vmatprep.mubr.msk.f32.mxu1 %vm8856_vm0, %v12930_v25 }
 0x528   :  { %8638 = vmatprep.mubr.msk.f32.mxu0 %vm8856_vm0, %v12930_v25 }
 0x529   :  { %v3949_v34 = vpop.f32.mrb[236].mxu1 }
 0x52a   :  { %v4182_v49 = vpop.f32.mrb[8].mxu0  ;;  %v8201_v32 = vpop.f32.mrb[237].mxu1  ;;  %8572 = vmatmul.mubr.msk.f32.gmra.mrb[86].mxu1 %vm3388_vm5, %v11669_v23 }
 0x52b   :  { %v12105_v20 = vadd.f32 %v4182_v49, %v3949_v34  ;;  %v8268_v61 = vpop.f32.mrb[9].mxu0  ;;  %8639 = vmatmul.mubr.msk.f32.gmra.mrb[114].mxu0 %vm3388_vm5, %v11879_v24  ;;  %8574 = vmatprep.mubr.msk.f32.mxu1 %vm8856_vm0, %v12930_v25 }
 0x52c   :  { %8641 = vmatprep.mubr.msk.f32.mxu0 %vm8856_vm0, %v12930_v25 }
 0x52d   :  { %v4339_v58 = vpop.f32.mrb[238].mxu1 }
 0x52e   :  { %v4617_v42 = vpop.f32.mrb[10].mxu0  ;;  %v4443_v31 = vadd.f32 %v4339_v58, %v11558_v14  ;;  %v8275_v6 = vpop.f32.mrb[239].mxu1  ;;  %8575 = vmatmul.mubr.msk.f32.gmra.mrb[88].mxu1 %vm3388_vm5, %v11679_v21 }
 0x52f   :  { %v8342_v45 = vpop.f32.mrb[11].mxu0  ;;  %8642 = vmatmul.mubr.msk.f32.gmra.mrb[116].mxu0 %vm3388_vm5, %v11889_v2  ;;  %8577 = vmatprep.mubr.msk.f32.mxu1 %vm8856_vm0, %v12930_v25 }
 0x530   :  { %8644 = vmatprep.mubr.msk.f32.mxu0 %vm8856_vm0, %v12930_v25  ;;  %v12124_v23 = vadd.f32 %v4617_v42, %v4443_v31 }
 0x531   :  { %v4344_v24 = vpop.f32.mrb[240].mxu1 }
 0x532   :  { %v4622_v1 = vpop.f32.mrb[12].mxu0  ;;  %v4444_v14 = vadd.f32 %v4344_v24, %v11891_v52  ;;  %v8278_v60 = vpop.f32.mrb[241].mxu1  ;;  %8578 = vmatmul.mubr.msk.f32.gmra.mrb[90].mxu1 %vm3388_vm5, %v11689_v41 }
 0x533   :  { %v8345_v57 = vpop.f32.mrb[13].mxu0  ;;  %8645 = vmatmul.mubr.msk.f32.gmra.mrb[118].mxu0 %vm3388_vm5, %v11901_v62  ;;  %8580 = vmatprep.mubr.msk.f32.mxu1 %vm8856_vm0, %v12930_v25 }
 0x534   :  { %8647 = vmatprep.mubr.msk.f32.mxu0 %vm8856_vm0, %v12930_v25  ;;  %v12135_v21 = vadd.f32 %v4622_v1, %v4444_v14 }
 0x535   :  { %v4349_v2 = vpop.f32.mrb[242].mxu1 }
 0x536   :  { %v4627_v10 = vpop.f32.mrb[14].mxu0  ;;  %v4445_v52 = vadd.f32 %v4349_v2, %v11903_v38  ;;  %v8281_v56 = vpop.f32.mrb[243].mxu1  ;;  %8581 = vmatmul.mubr.msk.f32.gmra.mrb[92].mxu1 %vm3388_vm5, %v11699_v12 }
 0x537   :  { %v8348_v53 = vpop.f32.mrb[15].mxu0  ;;  %8648 = vmatmul.mubr.msk.f32.gmra.mrb[120].mxu0 %vm3388_vm5, %v11913_v22  ;;  %8583 = vmatprep.mubr.msk.f32.mxu1 %vm8856_vm0, %v12930_v25 }
 0x538   :  { %8650 = vmatprep.mubr.msk.f32.mxu0 %vm8856_vm0, %v12930_v25  ;;  %v12146_v41 = vadd.f32 %v4627_v10, %v4445_v52 }
 0x539   :  { %v4354_v62 = vpop.f32.mrb[244].mxu1 }
 0x53a   :  { %v4632_v59 = vpop.f32.mrb[16].mxu0  ;;  %v4446_v38 = vadd.f32 %v4354_v62, %v11915_v36  ;;  %v8284_v8 = vpop.f32.mrb[245].mxu1  ;;  %8584 = vmatmul.mubr.msk.f32.gmra.mrb[94].mxu1 %vm3388_vm5, %v11709_v44 }
 0x53b   :  { %v8351_v30 = vpop.f32.mrb[17].mxu0  ;;  %8651 = vmatmul.mubr.msk.f32.gmra.mrb[122].mxu0 %vm3388_vm5, %v11925_v46  ;;  %8586 = vmatprep.mubr.msk.f32.mxu1 %vm8856_vm0, %v12930_v25 }
 0x53c   :  { %8653 = vmatprep.mubr.msk.f32.mxu0 %vm8856_vm0, %v12930_v25  ;;  %v12157_v22 = vadd.f32 %v4632_v59, %v4446_v38  ;;  %v5854_v59 = vld [vmem:[#allocation3 + $0x1a] sm:$0xff] }
 0x53d   :  { %v4359_v12 = vpop.f32.mrb[246].mxu1 }
 0x53e   :  { %v4637_v55 = vpop.f32.mrb[18].mxu0  ;;  %v4447_v36 = vadd.f32 %v4359_v12, %v11927_v11  ;;  %v8287_v34 = vpop.f32.mrb[247].mxu1  ;;  %8587 = vmatmul.mubr.msk.f32.gmra.mrb[96].mxu1 %vm3388_vm5, %v11719_v50 }
 0x53f   :  { %v8354_v49 = vpop.f32.mrb[19].mxu0  ;;  %8654 = vmatmul.mubr.msk.f32.gmra.mrb[124].mxu0 %vm3388_vm5, %v11937_v26  ;;  %8589 = vmatprep.mubr.msk.f32.mxu1 %vm8856_vm0, %v12930_v25 }
 0x540   :  { %8656 = vmatprep.mubr.msk.f32.mxu0 %vm8856_vm0, %v12930_v25  ;;  %v12168_v46 = vadd.f32 %v4637_v55, %v4447_v36  ;;  %v5855_v36 = vld [vmem:[#allocation3 + $0x22] sm:$0xff] }
 0x541   :  { %v4364_v44 = vpop.f32.mrb[248].mxu1 }
 0x542   :  { %v4642_v32 = vpop.f32.mrb[20].mxu0  ;;  %v4448_v11 = vadd.f32 %v4364_v44, %v11939_v19  ;;  %v8290_v61 = vpop.f32.mrb[249].mxu1  ;;  %8590 = vmatmul.mubr.msk.f32.gmra.mrb[98].mxu1 %vm3388_vm5, %v11729_v17 }
 0x543   :  { %v8357_v58 = vpop.f32.mrb[21].mxu0  ;;  %8657 = vmatmul.mubr.msk.f32.gmra.mrb[126].mxu0 %vm3388_vm5, %v11949_v27  ;;  %8592 = vmatprep.mubr.msk.f32.mxu1 %vm8856_vm0, %v12930_v25  ;;  %v5856_v61 = vld [vmem:[#allocation3 + $0x2a] sm:$0xff] }
 0x544   :  { %8659 = vmatprep.mubr.msk.f32.mxu0 %vm8856_vm0, %v12930_v25  ;;  %v12179_v26 = vadd.f32 %v4642_v32, %v4448_v11 }
 0x545   :  { %v4369_v50 = vpop.f32.mrb[250].mxu1 }
 0x546   :  { %v4647_v42 = vpop.f32.mrb[22].mxu0  ;;  %v4449_v19 = vadd.f32 %v4369_v50, %v11951_v9  ;;  %v8293_v31 = vpop.f32.mrb[251].mxu1  ;;  %8593 = vmatmul.mubr.msk.f32.gmra.mrb[100].mxu1 %vm3388_vm5, %v11739_v48 }
 0x547   :  { %v8360_v6 = vpop.f32.mrb[23].mxu0  ;;  %8660 = vmatmul.mubr.msk.f32.gmra.mrb[128].mxu0 %vm3388_vm5, %v11961_v54  ;;  %8595 = vmatprep.mubr.msk.f32.mxu1 %vm8856_vm0, %v12930_v25 }
 0x548   :  { %8662 = vmatprep.mubr.msk.f32.mxu0 %vm8856_vm0, %v12930_v25  ;;  %v12190_v27 = vadd.f32 %v4647_v42, %v4449_v19  ;;  %v5857_v6 = vld [vmem:[#allocation3 + $0x32] sm:$0xff] }
 0x549   :  { %v4374_v17 = vpop.f32.mrb[252].mxu1 }
 0x54a   :  { %v4652_v45 = vpop.f32.mrb[24].mxu0  ;;  %v4450_v9 = vadd.f32 %v4374_v17, %v11963_v13  ;;  %v8296_v24 = vpop.f32.mrb[253].mxu1  ;;  %8596 = vmatmul.mubr.msk.f32.gmra.mrb[102].mxu1 %vm3388_vm5, %v11749_v16  ;;  %v5596_v16 = vld [vmem:[#allocation3 + $0xb9] sm:$0xff] }
 0x54b   :  { %v8363_v1 = vpop.f32.mrb[25].mxu0  ;;  %8663 = vmatmul.mubr.msk.f32.gmra.mrb[130].mxu0 %vm3388_vm5, %v11973_v35  ;;  %8598 = vmatprep.mubr.msk.f32.mxu1 %vm8856_vm0, %v12930_v25  ;;  %v5318_v35 = vld [vmem:[#allocation3 + $0xb8] sm:$0xff] }
 0x54c   :  { %8665 = vmatprep.mubr.msk.f32.mxu0 %vm8856_vm0, %v12930_v25  ;;  %v12201_v54 = vadd.f32 %v4652_v45, %v4450_v9 }
 0x54d   :  { %v4379_v48 = vpop.f32.mrb[254].mxu1 }
 0x54e   :  { %v4657_v14 = vpop.f32.mrb[26].mxu0  ;;  %v4451_v13 = vadd.f32 %v4379_v48, %v11975_v33  ;;  %v8299_v60 = vpop.f32.mrb[255].mxu1  ;;  %8599 = vmatmul.mubr.msk.f32.gmra.mrb[104].mxu1 %vm3388_vm5, %v11985_v43  ;;  %v5858_v48 = vld [vmem:[#allocation3 + $0x3a] sm:$0xff] }
 0x54f   :  { %v8366_v57 = vpop.f32.mrb[27].mxu0  ;;  %8666 = vmatmul.mubr.msk.f32.gmra.mrb[132].mxu0 %vm3388_vm5, %v11987_v51  ;;  %8601 = vmatprep.mubr.msk.f32.mxu1 %vm8856_vm0, %v12930_v25 }
 0x550   :  { %8668 = vmatprep.mubr.msk.f32.mxu0 %vm8856_vm0, %v12930_v25  ;;  %v12212_v2 = vadd.f32 %v4657_v14, %v4451_v13 }
 0x551   :  { %v4384_v10 = vpop.f32.mrb[0].mxu1 }
 0x552   :  { %v4662_v33 = vpop.f32.mrb[28].mxu0  ;;  %v4452_v52 = vadd.f32 %v4384_v10, %v11995_v4  ;;  %v8302_v56 = vpop.f32.mrb[1].mxu1  ;;  %8602 = vmatmul.mubr.msk.f32.gmra.mrb[106].mxu1 %vm3388_vm5, %v5318_v35 }
 0x553   :  { %v8369_v53 = vpop.f32.mrb[29].mxu0  ;;  %8669 = vmatmul.mubr.msk.f32.gmra.mrb[134].mxu0 %vm3388_vm5, %v5596_v16  ;;  %8675 = vmatprep.mubr.msk.f32.mxu1 %vm8856_vm0, %v12930_v25  ;;  %v5859_v16 = vld [vmem:[#allocation3 + $0x42] sm:$0xff] }
 0x554   :  { %v12219_v43 = vadd.f32 %v4662_v33, %v4452_v52 }
 0x555   :  { %v4389_v51 = vpop.f32.mrb[2].mxu1 }
 0x556   :  { %v4667_v62 = vpop.f32.mrb[30].mxu0  ;;  %v4453_v38 = vadd.f32 %v4389_v51, %v12005_v28  ;;  %v8305_v8 = vpop.f32.mrb[3].mxu1  ;;  %8676 = vmatmul.mubr.msk.f32.vlgmr.msra.gmra.mrb[108].mxu1 %vm3388_vm5, %v5854_v59  ;;  %v5860_v51 = vld [vmem:[#allocation3 + $0x4a] sm:$0xff] }
 0x557   :  { %v8372_v30 = vpop.f32.mrb[31].mxu0  ;;  %8678 = vmatprep.mubr.msk.f32.mxu1 %vm8856_vm0, %v12930_v25 }
 0x558   :  { %v12225_v4 = vadd.f32 %v4667_v62, %v4453_v38 }
 0x559   :  { %v4394_v12 = vpop.f32.mrb[4].mxu1 }
 0x55a   :  { %v4672_v55 = vpop.f32.mrb[32].mxu0  ;;  %v4454_v34 = vadd.f32 %v4394_v12, %v12015_v63  ;;  %v8308_v49 = vpop.f32.mrb[5].mxu1  ;;  %8679 = vmatmul.mubr.msk.f32.gmra.mrb[110].mxu1 %vm3388_vm5, %v5855_v36  ;;  %v5861_v12 = vld [vmem:[#allocation3 + $0x52] sm:$0xff] }
 0x55b   :  { %v8375_v44 = vpop.f32.mrb[33].mxu0  ;;  %8681 = vmatprep.mubr.msk.f32.mxu1 %vm8856_vm0, %v12930_v25 }
 0x55c   :  { %v12231_v28 = vadd.f32 %v4672_v55, %v4454_v34 }
 0x55d   :  { %v4399_v32 = vpop.f32.mrb[6].mxu1 }
 0x55e   :  { %v4677_v11 = vpop.f32.mrb[34].mxu0  ;;  %v4455_v58 = vadd.f32 %v4399_v32, %v12025_v47  ;;  %v8311_v50 = vpop.f32.mrb[7].mxu1  ;;  %8682 = vmatmul.mubr.msk.f32.gmra.mrb[112].mxu1 %vm3388_vm5, %v5856_v61  ;;  %v5862_v32 = vld [vmem:[#allocation3 + $0x5a] sm:$0xff] }
 0x55f   :  { %v8378_v42 = vpop.f32.mrb[35].mxu0  ;;  %8684 = vmatprep.mubr.msk.f32.mxu1 %vm8856_vm0, %v12930_v25 }
 0x560   :  { %v12237_v63 = vadd.f32 %v4677_v11, %v4455_v58 }
 0x561   :  { %v4404_v19 = vpop.f32.mrb[8].mxu1 }
 0x562   :  { %v4682_v31 = vpop.f32.mrb[36].mxu0  ;;  %v4456_v17 = vadd.f32 %v4404_v19, %v12035_v40  ;;  %v8314_v45 = vpop.f32.mrb[9].mxu1  ;;  %8685 = vmatmul.mubr.msk.f32.gmra.mrb[114].mxu1 %vm3388_vm5, %v5857_v6  ;;  %v5863_v19 = vld [vmem:[#allocation3 + $0x62] sm:$0xff] }
 0x563   :  { %v8381_v9 = vpop.f32.mrb[37].mxu0  ;;  %8687 = vmatprep.mubr.msk.f32.mxu1 %vm8856_vm0, %v12930_v25 }
 0x564   :  { %v12243_v47 = vadd.f32 %v4682_v31, %v4456_v17 }
 0x565   :  { %v4409_v24 = vpop.f32.mrb[10].mxu1 }
 0x566   :  { %v4687_v1 = vpop.f32.mrb[38].mxu0  ;;  %v4457_v14 = vadd.f32 %v4409_v24, %v12045_v3  ;;  %v8317_v13 = vpop.f32.mrb[11].mxu1  ;;  %8688 = vmatmul.mubr.msk.f32.gmra.mrb[116].mxu1 %vm3388_vm5, %v5858_v48  ;;  %v5864_v24 = vld [vmem:[#allocation3 + $0x6a] sm:$0xff] }
 0x567   :  { %v8384_v60 = vpop.f32.mrb[39].mxu0  ;;  %8690 = vmatprep.mubr.msk.f32.mxu1 %vm8856_vm0, %v12930_v25 }
 0x568   :  { %v12249_v40 = vadd.f32 %v4687_v1, %v4457_v14 }
 0x569   :  { %v4414_v57 = vpop.f32.mrb[12].mxu1 }
 0x56a   :  { %v4692_v35 = vpop.f32.mrb[40].mxu0  ;;  %v4458_v10 = vadd.f32 %v4414_v57, %v12055_v39  ;;  %v8320_v33 = vpop.f32.mrb[13].mxu1  ;;  %8691 = vmatmul.mubr.msk.f32.gmra.mrb[118].mxu1 %vm3388_vm5, %v5859_v16  ;;  %v5865_v57 = vld [vmem:[#allocation3 + $0x72] sm:$0xff] }
 0x56b   :  { %v8387_v52 = vpop.f32.mrb[41].mxu0  ;;  %8693 = vmatprep.mubr.msk.f32.mxu1 %vm8856_vm0, %v12930_v25 }
 0x56c   :  { %v12255_v3 = vadd.f32 %v4692_v35, %v4458_v10 }
 0x56d   :  { %v4419_v56 = vpop.f32.mrb[14].mxu1 }
 0x56e   :  { %v4697_v53 = vpop.f32.mrb[42].mxu0  ;;  %v4459_v62 = vadd.f32 %v4419_v56, %v12065_v29  ;;  %v8323_v59 = vpop.f32.mrb[15].mxu1  ;;  %8694 = vmatmul.mubr.msk.f32.gmra.mrb[120].mxu1 %vm3388_vm5, %v5860_v51  ;;  %v5866_v56 = vld [vmem:[#allocation3 + $0x7a] sm:$0xff] }
 0x56f   :  { %v8390_v38 = vpop.f32.mrb[43].mxu0  ;;  %8696 = vmatprep.mubr.msk.f32.mxu1 %vm8856_vm0, %v12930_v25 }
 0x570   :  { %v12261_v39 = vadd.f32 %v4697_v53, %v4459_v62 }
 0x571   :  { %v4424_v8 = vpop.f32.mrb[16].mxu1 }
 0x572   :  { %v4702_v30 = vpop.f32.mrb[44].mxu0  ;;  %v4460_v55 = vadd.f32 %v4424_v8, %v12075_v0  ;;  %v8326_v36 = vpop.f32.mrb[17].mxu1  ;;  %8697 = vmatmul.mubr.msk.f32.gmra.mrb[122].mxu1 %vm3388_vm5, %v5861_v12  ;;  %v5867_v8 = vld [vmem:[#allocation3 + $0x82] sm:$0xff] }
 0x573   :  { %v8393_v34 = vpop.f32.mrb[45].mxu0  ;;  %8699 = vmatprep.mubr.msk.f32.mxu1 %vm8856_vm0, %v12930_v25 }
 0x574   :  { %v12267_v29 = vadd.f32 %v4702_v30, %v4460_v55 }
 0x575   :  { %v4429_v49 = vpop.f32.mrb[18].mxu1 }
 0x576   :  { %v4707_v44 = vpop.f32.mrb[46].mxu0  ;;  %v4461_v11 = vadd.f32 %v4429_v49, %v12085_v5  ;;  %v8329_v61 = vpop.f32.mrb[19].mxu1  ;;  %8700 = vmatmul.mubr.msk.f32.gmra.mrb[124].mxu1 %vm3388_vm5, %v5862_v32  ;;  %v5868_v49 = vld [vmem:[#allocation3 + $0x8a] sm:$0xff] }
 0x577   :  { %v8396_v58 = vpop.f32.mrb[47].mxu0  ;;  %8702 = vmatprep.mubr.msk.f32.mxu1 %vm8856_vm0, %v12930_v25 }
 0x578   :  { %v12273_v0 = vadd.f32 %v4707_v44, %v4461_v11 }
 0x579   :  { %v4434_v50 = vpop.f32.mrb[20].mxu1 }
 0x57a   :  { %v4712_v42 = vpop.f32.mrb[48].mxu0  ;;  %v4462_v31 = vadd.f32 %v4434_v50, %v12095_v37  ;;  %v8332_v6 = vpop.f32.mrb[21].mxu1  ;;  %8703 = vmatmul.mubr.msk.f32.gmra.mrb[126].mxu1 %vm3388_vm5, %v5863_v19  ;;  %v5869_v50 = vld [vmem:[#allocation3 + $0x92] sm:$0xff] }
 0x57b   :  { %v8399_v17 = vpop.f32.mrb[49].mxu0  ;;  %8705 = vmatprep.mubr.msk.f32.mxu1 %vm8856_vm0, %v12930_v25 }
 0x57c   :  { %v12279_v5 = vadd.f32 %v4712_v42, %v4462_v31 }
 0x57d   :  { %v4439_v45 = vpop.f32.mrb[22].mxu1 }
 0x57e   :  { %v4717_v9 = vpop.f32.mrb[50].mxu0  ;;  %v4463_v1 = vadd.f32 %v4439_v45, %v12105_v20  ;;  %v8335_v48 = vpop.f32.mrb[23].mxu1  ;;  %8706 = vmatmul.mubr.msk.f32.gmra.mrb[128].mxu1 %vm3388_vm5, %v5864_v24  ;;  %v5870_v45 = vld [vmem:[#allocation3 + $0x9a] sm:$0xff] }
 0x57f   :  { %v8402_v14 = vpop.f32.mrb[51].mxu0  ;;  %8708 = vmatprep.mubr.msk.f32.mxu1 %vm8856_vm0, %v12930_v25 }
 0x580   :  { %v12285_v37 = vadd.f32 %v4717_v9, %v4463_v1 }
 0x581   :  { %v4895_v13 = vpop.f32.mrb[24].mxu1 }
 0x582   :  { %v5173_v60 = vpop.f32.mrb[52].mxu0  ;;  %v4999_v35 = vadd.f32 %v4895_v13, %v12124_v23  ;;  %v8409_v16 = vpop.f32.mrb[25].mxu1  ;;  %8709 = vmatmul.mubr.msk.f32.gmra.mrb[130].mxu1 %vm3388_vm5, %v5865_v57  ;;  %v5871_v13 = vld [vmem:[#allocation3 + $0xa2] sm:$0xff] }
 0x583   :  { %v8476_v10 = vpop.f32.mrb[53].mxu0  ;;  %8711 = vmatprep.mubr.msk.f32.mxu1 %vm8856_vm0, %v12930_v25 }
 0x584   :  { %v12291_v20 = vadd.f32 %v5173_v60, %v4999_v35 }
 0x585   :  { %v4900_v33 = vpop.f32.mrb[26].mxu1 }
 0x586   :  { %v5178_v52 = vpop.f32.mrb[54].mxu0  ;;  %v5000_v53 = vadd.f32 %v4900_v33, %v12135_v21  ;;  %v8412_v51 = vpop.f32.mrb[27].mxu1  ;;  %8712 = vmatmul.mubr.msk.f32.gmra.mrb[132].mxu1 %vm3388_vm5, %v5866_v56  ;;  %v5872_v33 = vld [vmem:[#allocation3 + $0xaa] sm:$0xff] }
 0x587   :  { %v8479_v62 = vpop.f32.mrb[55].mxu0  ;;  %8714 = vmatprep.mubr.msk.f32.mxu1 %vm8856_vm0, %v12930_v25 }
 0x588   :  { %v12297_v23 = vadd.f32 %v5178_v52, %v5000_v53 }
 0x589   :  { %v4905_v59 = vpop.f32.mrb[28].mxu1 }
 0x58a   :  { %v5183_v38 = vpop.f32.mrb[56].mxu0  ;;  %v5001_v30 = vadd.f32 %v4905_v59, %v12146_v41  ;;  %v8415_v12 = vpop.f32.mrb[29].mxu1  ;;  %8715 = vmatmul.mubr.msk.f32.gmra.mrb[134].mxu1 %vm3388_vm5, %v5867_v8  ;;  %v5873_v59 = vld [vmem:[#allocation3 + $0xb2] sm:$0xff] }
 0x58b   :  { %v8482_v55 = vpop.f32.mrb[57].mxu0  ;;  %8717 = vmatprep.mubr.msk.f32.mxu1 %vm8856_vm0, %v12930_v25 }
 0x58c   :  { %v12303_v21 = vadd.f32 %v5183_v38, %v5001_v30 }
 0x58d   :  { %v4910_v36 = vpop.f32.mrb[30].mxu1 }
 0x58e   :  { %v5188_v34 = vpop.f32.mrb[58].mxu0  ;;  %v5002_v44 = vadd.f32 %v4910_v36, %v12157_v22  ;;  %v8418_v32 = vpop.f32.mrb[31].mxu1  ;;  %8718 = vmatmul.mubr.msk.f32.gmra.mrb[136].mxu1 %vm3388_vm5, %v5868_v49 }
 0x58f   :  { %v8485_v11 = vpop.f32.mrb[59].mxu0  ;;  %8720 = vmatprep.mubr.msk.f32.mxu1 %vm8856_vm0, %v12930_v25 }
 0x590   :  { %v12309_v41 = vadd.f32 %v5188_v34, %v5002_v44 }
 0x591   :  { %v4915_v61 = vpop.f32.mrb[32].mxu1 }
 0x592   :  { %v5193_v58 = vpop.f32.mrb[60].mxu0  ;;  %v5003_v42 = vadd.f32 %v4915_v61, %v12168_v46  ;;  %v8421_v19 = vpop.f32.mrb[33].mxu1  ;;  %8721 = vmatmul.mubr.msk.f32.gmra.mrb[138].mxu1 %vm3388_vm5, %v5869_v50 }
 0x593   :  { %v8488_v31 = vpop.f32.mrb[61].mxu0  ;;  %8723 = vmatprep.mubr.msk.f32.mxu1 %vm8856_vm0, %v12930_v25 }
 0x594   :  { %v12315_v22 = vadd.f32 %v5193_v58, %v5003_v42 }
 0x595   :  { %v4920_v6 = vpop.f32.mrb[34].mxu1 }
 0x596   :  { %v5198_v17 = vpop.f32.mrb[62].mxu0  ;;  %v5004_v9 = vadd.f32 %v4920_v6, %v12179_v26  ;;  %v8424_v24 = vpop.f32.mrb[35].mxu1  ;;  %8724 = vmatmul.mubr.msk.f32.gmra.mrb[140].mxu1 %vm3388_vm5, %v5870_v45 }
 0x597   :  { %v8491_v1 = vpop.f32.mrb[63].mxu0  ;;  %8726 = vmatprep.mubr.msk.f32.mxu1 %vm8856_vm0, %v12930_v25 }
 0x598   :  { %v12321_v46 = vadd.f32 %v5198_v17, %v5004_v9 }
 0x599   :  { %v4925_v48 = vpop.f32.mrb[36].mxu1 }
 0x59a   :  { %v5203_v14 = vpop.f32.mrb[64].mxu0  ;;  %v5005_v60 = vadd.f32 %v4925_v48, %v12190_v27  ;;  %v8427_v57 = vpop.f32.mrb[37].mxu1  ;;  %8727 = vmatmul.mubr.msk.f32.gmra.mrb[142].mxu1 %vm3388_vm5, %v5871_v13 }
 0x59b   :  { %v8494_v35 = vpop.f32.mrb[65].mxu0  ;;  %8729 = vmatprep.mubr.msk.f32.mxu1 %vm8856_vm0, %v12930_v25 }
 0x59c   :  { %v12327_v26 = vadd.f32 %v5203_v14, %v5005_v60 }
 0x59d   :  { %v4930_v16 = vpop.f32.mrb[38].mxu1 }
 0x59e   :  { %v5208_v10 = vpop.f32.mrb[66].mxu0  ;;  %v5006_v52 = vadd.f32 %v4930_v16, %v12201_v54  ;;  %v8430_v56 = vpop.f32.mrb[39].mxu1  ;;  %8730 = vmatmul.mubr.msk.f32.gmra.mrb[144].mxu1 %vm3388_vm5, %v5872_v33  ;;  %v5874_v54 = vld [vmem:[#allocation3 + $0xba] sm:$0xff] }
 0x59f   :  { %v8497_v53 = vpop.f32.mrb[67].mxu0  ;;  %8732 = vmatprep.mubr.msk.f32.mxu1 %vm8856_vm0, %v12930_v25 }
 0x5a0   :  { %v12333_v27 = vadd.f32 %v5208_v10, %v5006_v52 }
 0x5a1   :  { %v4935_v51 = vpop.f32.mrb[40].mxu1 }
 0x5a2   :  { %v5213_v62 = vpop.f32.mrb[68].mxu0  ;;  %v5007_v38 = vadd.f32 %v4935_v51, %v12212_v2  ;;  %v8433_v8 = vpop.f32.mrb[41].mxu1  ;;  %8733 = vmatmul.mubr.msk.f32.gmra.mrb[146].mxu1 %vm3388_vm5, %v5873_v59 }
 0x5a3   :  { %v8500_v30 = vpop.f32.mrb[69].mxu0  ;;  %8735 = vmatprep.mubr.msk.f32.mxu1 %vm8856_vm0, %v12930_v25 }
 0x5a4   :  { %v12339_v12 = vadd.f32 %v5213_v62, %v5007_v38 }
 0x5a5   :  { %v4940_v55 = vpop.f32.mrb[42].mxu1 }
 0x5a6   :  { %v5218_v36 = vpop.f32.mrb[70].mxu0  ;;  %v5008_v34 = vadd.f32 %v4940_v55, %v12219_v43  ;;  %v8436_v49 = vpop.f32.mrb[43].mxu1  ;;  %8736 = vmatmul.mubr.msk.f32.gmra.mrb[148].mxu1 %vm3388_vm5, %v5874_v54 }
 0x5a7   :  { %v8503_v44 = vpop.f32.mrb[71].mxu0 }
 0x5a8   :  { %v12343_v32 = vadd.f32 %v5218_v36, %v5008_v34 }
 0x5a9   :  { %v4945_v2 = vpop.f32.mrb[44].mxu1 }
 0x5aa   :  { %v5223_v11 = vpop.f32.mrb[72].mxu0  ;;  %v5009_v61 = vadd.f32 %v4945_v2, %v12225_v4  ;;  %v8439_v58 = vpop.f32.mrb[45].mxu1 }
 0x5ab   :  { %v8506_v50 = vpop.f32.mrb[73].mxu0 }
 0x5ac   :  { %v12346_v42 = vadd.f32 %v5223_v11, %v5009_v61 }
 0x5ad   :  { %v4950_v19 = vpop.f32.mrb[46].mxu1 }
 0x5ae   :  { %v5228_v31 = vpop.f32.mrb[74].mxu0  ;;  %v5010_v6 = vadd.f32 %v4950_v19, %v12231_v28  ;;  %v8442_v17 = vpop.f32.mrb[47].mxu1 }
 0x5af   :  { %v8509_v43 = vpop.f32.mrb[75].mxu0 }
 0x5b0   :  { %v12349_v45 = vadd.f32 %v5228_v31, %v5010_v6 }
 0x5b1   :  { %v4955_v9 = vpop.f32.mrb[48].mxu1 }
 0x5b2   :  { %v5233_v24 = vpop.f32.mrb[76].mxu0  ;;  %v5011_v1 = vadd.f32 %v4955_v9, %v12237_v63  ;;  %v8445_v48 = vpop.f32.mrb[49].mxu1 }
 0x5b3   :  { %v8512_v14 = vpop.f32.mrb[77].mxu0 }
 0x5b4   :  { %v12352_v13 = vadd.f32 %v5233_v24, %v5011_v1 }
 0x5b5   :  { %v4960_v4 = vpop.f32.mrb[50].mxu1 }
 0x5b6   :  { %v5238_v60 = vpop.f32.mrb[78].mxu0  ;;  %v5012_v57 = vadd.f32 %v4960_v4, %v12243_v47  ;;  %v8448_v35 = vpop.f32.mrb[51].mxu1 }
 0x5b7   :  { %v8515_v16 = vpop.f32.mrb[79].mxu0 }
 0x5b8   :  { %v12355_v10 = vadd.f32 %v5238_v60, %v5012_v57 }
 0x5b9   :  { %v4965_v28 = vpop.f32.mrb[52].mxu1 }
 0x5ba   :  { %v5243_v33 = vpop.f32.mrb[80].mxu0  ;;  %v5013_v52 = vadd.f32 %v4965_v28, %v12249_v40  ;;  %v8451_v56 = vpop.f32.mrb[53].mxu1 }
 0x5bb   :  { %v8518_v53 = vpop.f32.mrb[81].mxu0 }
 0x5bc   :  { %v12358_v51 = vadd.f32 %v5243_v33, %v5013_v52 }
 0x5bd   :  { %v4970_v63 = vpop.f32.mrb[54].mxu1 }
 0x5be   :  { %v5248_v62 = vpop.f32.mrb[82].mxu0  ;;  %v5014_v59 = vadd.f32 %v4970_v63, %v12255_v3  ;;  %v8454_v38 = vpop.f32.mrb[55].mxu1 }
 0x5bf   :  { %v8521_v8 = vpop.f32.mrb[83].mxu0 }
 0x5c0   :  { %v12361_v30 = vadd.f32 %v5248_v62, %v5014_v59 }
 0x5c1   :  { %v4975_v47 = vpop.f32.mrb[56].mxu1 }
 0x5c2   :  { %v5253_v54 = vpop.f32.mrb[84].mxu0  ;;  %v5015_v55 = vadd.f32 %v4975_v47, %v12261_v39  ;;  %v8457_v36 = vpop.f32.mrb[57].mxu1 }
 0x5c3   :  { %v8524_v34 = vpop.f32.mrb[85].mxu0 }
 0x5c4   :  { %v12364_v49 = vadd.f32 %v5253_v54, %v5015_v55 }
 0x5c5   :  { %v4980_v40 = vpop.f32.mrb[58].mxu1 }
 0x5c6   :  { %v5258_v44 = vpop.f32.mrb[86].mxu0  ;;  %v5016_v2 = vadd.f32 %v4980_v40, %v12267_v29  ;;  %v8460_v11 = vpop.f32.mrb[59].mxu1 }
 0x5c7   :  { %v8527_v61 = vpop.f32.mrb[87].mxu0 }
 0x5c8   :  { %v12367_v58 = vadd.f32 %v5258_v44, %v5016_v2 }
 0x5c9   :  { %v4985_v3 = vpop.f32.mrb[60].mxu1 }
 0x5ca   :  { %v5263_v50 = vpop.f32.mrb[88].mxu0  ;;  %v5017_v19 = vadd.f32 %v4985_v3, %v12273_v0  ;;  %v8463_v31 = vpop.f32.mrb[61].mxu1 }
 0x5cb   :  { %v8530_v6 = vpop.f32.mrb[89].mxu0 }
 0x5cc   :  { %v12370_v17 = vadd.f32 %v5263_v50, %v5017_v19 }
 0x5cd   :  { %v4990_v39 = vpop.f32.mrb[62].mxu1 }
 0x5ce   :  { %v5268_v43 = vpop.f32.mrb[90].mxu0  ;;  %v5018_v9 = vadd.f32 %v4990_v39, %v12279_v5  ;;  %v8466_v24 = vpop.f32.mrb[63].mxu1 }
 0x5cf   :  { %v8533_v1 = vpop.f32.mrb[91].mxu0 }
 0x5d0   :  { %v12373_v48 = vadd.f32 %v5268_v43, %v5018_v9 }
 0x5d1   :  { %v4995_v29 = vpop.f32.mrb[64].mxu1 }
 0x5d2   :  { %v5273_v14 = vpop.f32.mrb[92].mxu0  ;;  %v5019_v4 = vadd.f32 %v4995_v29, %v12285_v37  ;;  %v8469_v60 = vpop.f32.mrb[65].mxu1 }
 0x5d3   :  { %v8536_v57 = vpop.f32.mrb[93].mxu0 }
 0x5d4   :  { %v12376_v35 = vadd.f32 %v5273_v14, %v5019_v4 }
 0x5d5   :  { %v5451_v0 = vpop.f32.mrb[66].mxu1 }
 0x5d6   :  { %v5729_v16 = vpop.f32.mrb[94].mxu0  ;;  %v5555_v28 = vadd.f32 %v5451_v0, %v12291_v20  ;;  %v8543_v33 = vpop.f32.mrb[67].mxu1 }
 0x5d7   :  { %v8610_v52 = vpop.f32.mrb[95].mxu0 }
 0x5d8   :  { %v12379_v56 = vadd.f32 %v5729_v16, %v5555_v28 }
 0x5d9   :  { %v5456_v5 = vpop.f32.mrb[68].mxu1 }
 0x5da   :  { %v5734_v53 = vpop.f32.mrb[96].mxu0  ;;  %v5556_v63 = vadd.f32 %v5456_v5, %v12297_v23  ;;  %v8546_v62 = vpop.f32.mrb[69].mxu1 }
 0x5db   :  { %v8613_v59 = vpop.f32.mrb[97].mxu0 }
 0x5dc   :  { %v12382_v38 = vadd.f32 %v5734_v53, %v5556_v63 }
 0x5dd   :  { %v5461_v37 = vpop.f32.mrb[70].mxu1 }
 0x5de   :  { %v5739_v8 = vpop.f32.mrb[98].mxu0  ;;  %v5557_v47 = vadd.f32 %v5461_v37, %v12303_v21  ;;  %v8549_v54 = vpop.f32.mrb[71].mxu1 }
 0x5df   :  { %v8616_v55 = vpop.f32.mrb[99].mxu0 }
 0x5e0   :  { %v12385_v36 = vadd.f32 %v5739_v8, %v5557_v47 }
 0x5e1   :  { %v5466_v20 = vpop.f32.mrb[72].mxu1 }
 0x5e2   :  { %v5744_v34 = vpop.f32.mrb[100].mxu0  ;;  %v5558_v40 = vadd.f32 %v5466_v20, %v12309_v41  ;;  %v8552_v44 = vpop.f32.mrb[73].mxu1 }
 0x5e3   :  { %v8619_v2 = vpop.f32.mrb[101].mxu0 }
 0x5e4   :  { %v12388_v11 = vadd.f32 %v5744_v34, %v5558_v40 }
 0x5e5   :  { %v5471_v23 = vpop.f32.mrb[74].mxu1 }
 0x5e6   :  { %v5749_v61 = vpop.f32.mrb[102].mxu0  ;;  %v5559_v3 = vadd.f32 %v5471_v23, %v12315_v22  ;;  %v8555_v50 = vpop.f32.mrb[75].mxu1 }
 0x5e7   :  { %v8622_v19 = vpop.f32.mrb[103].mxu0 }
 0x5e8   :  { %v12391_v31 = vadd.f32 %v5749_v61, %v5559_v3 }
 0x5e9   :  { %v5476_v21 = vpop.f32.mrb[76].mxu1 }
 0x5ea   :  { %v5754_v6 = vpop.f32.mrb[104].mxu0  ;;  %v5560_v39 = vadd.f32 %v5476_v21, %v12321_v46  ;;  %v8558_v43 = vpop.f32.mrb[77].mxu1 }
 0x5eb   :  { %v8625_v9 = vpop.f32.mrb[105].mxu0 }
 0x5ec   :  { %v12394_v24 = vadd.f32 %v5754_v6, %v5560_v39 }
 0x5ed   :  { %v5481_v41 = vpop.f32.mrb[78].mxu1 }
 0x5ee   :  { %v5759_v1 = vpop.f32.mrb[106].mxu0  ;;  %v5561_v29 = vadd.f32 %v5481_v41, %v12327_v26  ;;  %v8561_v14 = vpop.f32.mrb[79].mxu1 }
 0x5ef   :  { %v8628_v4 = vpop.f32.mrb[107].mxu0 }
 0x5f0   :  { %v12397_v60 = vadd.f32 %v5759_v1, %v5561_v29 }
 0x5f1   :  { %v5486_v22 = vpop.f32.mrb[80].mxu1 }
 0x5f2   :  { %v5764_v57 = vpop.f32.mrb[108].mxu0  ;;  %v5562_v0 = vadd.f32 %v5486_v22, %v12333_v27  ;;  %v8564_v16 = vpop.f32.mrb[81].mxu1 }
 0x5f3   :  { %v8631_v28 = vpop.f32.mrb[109].mxu0 }
 0x5f4   :  { %v12400_v33 = vadd.f32 %v5764_v57, %v5562_v0 }
 0x5f5   :  { %v5491_v46 = vpop.f32.mrb[82].mxu1 }
 0x5f6   :  { %v5769_v52 = vpop.f32.mrb[110].mxu0  ;;  %v5563_v5 = vadd.f32 %v5491_v46, %v12339_v12  ;;  %v8567_v53 = vpop.f32.mrb[83].mxu1 }
 0x5f7   :  { %v8634_v63 = vpop.f32.mrb[111].mxu0 }
 0x5f8   :  { %v12403_v62 = vadd.f32 %v5769_v52, %v5563_v5 }
 0x5f9   :  { %v5496_v26 = vpop.f32.mrb[84].mxu1 }
 0x5fa   :  { %v5774_v59 = vpop.f32.mrb[112].mxu0  ;;  %v5564_v37 = vadd.f32 %v5496_v26, %v12343_v32  ;;  %v8570_v8 = vpop.f32.mrb[85].mxu1 }
 0x5fb   :  { %v8637_v47 = vpop.f32.mrb[113].mxu0 }
 0x5fc   :  { %v12406_v54 = vadd.f32 %v5774_v59, %v5564_v37 }
 0x5fd   :  { %v5501_v27 = vpop.f32.mrb[86].mxu1 }
 0x5fe   :  { %v5779_v55 = vpop.f32.mrb[114].mxu0  ;;  %v5565_v20 = vadd.f32 %v5501_v27, %v12346_v42  ;;  %v8573_v34 = vpop.f32.mrb[87].mxu1 }
 0x5ff   :  { %v8640_v40 = vpop.f32.mrb[115].mxu0 }
 0x600   :  { %v12409_v44 = vadd.f32 %v5779_v55, %v5565_v20 }
 0x601   :  { %v5506_v12 = vpop.f32.mrb[88].mxu1 }
 0x602   :  { %v5784_v2 = vpop.f32.mrb[116].mxu0  ;;  %v5566_v23 = vadd.f32 %v5506_v12, %v12349_v45  ;;  %v8576_v61 = vpop.f32.mrb[89].mxu1 }
 0x603   :  { %v8643_v3 = vpop.f32.mrb[117].mxu0 }
 0x604   :  { %v12412_v50 = vadd.f32 %v5784_v2, %v5566_v23 }
 0x605   :  { %v5511_v32 = vpop.f32.mrb[90].mxu1 }
 0x606   :  { %v5789_v19 = vpop.f32.mrb[118].mxu0  ;;  %v5567_v21 = vadd.f32 %v5511_v32, %v12352_v13  ;;  %v8579_v6 = vpop.f32.mrb[91].mxu1 }
 0x607   :  { %v8646_v39 = vpop.f32.mrb[119].mxu0 }
 0x608   :  { %v12415_v43 = vadd.f32 %v5789_v19, %v5567_v21 }
 0x609   :  { %v5516_v42 = vpop.f32.mrb[92].mxu1 }
 0x60a   :  { %v5794_v9 = vpop.f32.mrb[120].mxu0  ;;  %v5568_v41 = vadd.f32 %v5516_v42, %v12355_v10  ;;  %v8582_v1 = vpop.f32.mrb[93].mxu1 }
 0x60b   :  { %v8649_v29 = vpop.f32.mrb[121].mxu0 }
 0x60c   :  { %v12418_v14 = vadd.f32 %v5794_v9, %v5568_v41 }
 0x60d   :  { %v5521_v45 = vpop.f32.mrb[94].mxu1 }
 0x60e   :  { %v5799_v4 = vpop.f32.mrb[122].mxu0  ;;  %v5569_v22 = vadd.f32 %v5521_v45, %v12358_v51  ;;  %v8585_v57 = vpop.f32.mrb[95].mxu1 }
 0x60f   :  { %v8652_v0 = vpop.f32.mrb[123].mxu0 }
 0x610   :  { %v12421_v16 = vadd.f32 %v5799_v4, %v5569_v22 }
 0x611   :  { %v5526_v13 = vpop.f32.mrb[96].mxu1 }
 0x612   :  { %v5804_v28 = vpop.f32.mrb[124].mxu0  ;;  %v5570_v46 = vadd.f32 %v5526_v13, %v12361_v30  ;;  %v8588_v52 = vpop.f32.mrb[97].mxu1 }
 0x613   :  { %v8655_v5 = vpop.f32.mrb[125].mxu0 }
 0x614   :  { %v12424_v53 = vadd.f32 %v5804_v28, %v5570_v46 }
 0x615   :  { %v5531_v10 = vpop.f32.mrb[98].mxu1 }
 0x616   :  { %v5809_v63 = vpop.f32.mrb[126].mxu0  ;;  %v5571_v26 = vadd.f32 %v5531_v10, %v12364_v49  ;;  %v8591_v59 = vpop.f32.mrb[99].mxu1 }
 0x617   :  { %v8658_v37 = vpop.f32.mrb[127].mxu0 }
 0x618   :  { %v12427_v8 = vadd.f32 %v5809_v63, %v5571_v26 }
 0x619   :  { %v5536_v51 = vpop.f32.mrb[100].mxu1 }
 0x61a   :  { %v5814_v47 = vpop.f32.mrb[128].mxu0  ;;  %v5572_v27 = vadd.f32 %v5536_v51, %v12367_v58  ;;  %v8594_v55 = vpop.f32.mrb[101].mxu1 }
 0x61b   :  { %v8661_v20 = vpop.f32.mrb[129].mxu0 }
 0x61c   :  { %v12430_v34 = vadd.f32 %v5814_v47, %v5572_v27 }
 0x61d   :  { %v5541_v30 = vpop.f32.mrb[102].mxu1 }
 0x61e   :  { %v5819_v40 = vpop.f32.mrb[130].mxu0  ;;  %v5573_v12 = vadd.f32 %v5541_v30, %v12370_v17  ;;  %v8597_v2 = vpop.f32.mrb[103].mxu1 }
 0x61f   :  { %v8664_v23 = vpop.f32.mrb[131].mxu0 }
 0x620   :  { %v12433_v61 = vadd.f32 %v5819_v40, %v5573_v12 }
 0x621   :  { %v5546_v49 = vpop.f32.mrb[104].mxu1 }
 0x622   :  { %v5824_v3 = vpop.f32.mrb[132].mxu0  ;;  %v5574_v32 = vadd.f32 %v5546_v49, %v12373_v48  ;;  %v8600_v19 = vpop.f32.mrb[105].mxu1 }
 0x623   :  { %v8667_v21 = vpop.f32.mrb[133].mxu0 }
 0x624   :  { %v12436_v6 = vadd.f32 %v5824_v3, %v5574_v32 }
 0x625   :  { %v5551_v58 = vpop.f32.mrb[106].mxu1 }
 0x626   :  { %v5829_v39 = vpop.f32.mrb[134].mxu0  ;;  %v5575_v42 = vadd.f32 %v5551_v58, %v12376_v35  ;;  %v8603_v9 = vpop.f32.mrb[107].mxu1  ;;  %v12447_v35 = vld [vmem:[%s12848_s10] ss:$0 sm:$0xff] }
 0x627   :  { %v8670_v41 = vpop.f32.mrb[135].mxu0 }
 0x628   :  { %v12439_v1 = vadd.f32 %v5829_v39, %v5575_v42  ;;  %v12952_v42 = vld [vmem:[#allocation7_spill] sm:$0xff] }
 0x629   :  { %v6007_v17 = vpop.f32.mrb[108].mxu1 }
 0x62a   :  { %v6111_v29 = vadd.f32 %v6007_v17, %v12379_v56  ;;  %v8677_v45 = vpop.f32.mrb[109].mxu1 }
 0x62c   :  { %v6141_v52 = vadd.f32 %v12447_v35, %v6111_v29 }
 0x62d   :  { %v6012_v4 = vpop.f32.mrb[110].mxu1 }
 0x62e   :  { %v6112_v22 = vadd.f32 %v6012_v4, %v12382_v38  ;;  %v8680_v48 = vpop.f32.mrb[111].mxu1  ;;  %v6183_v26 = vmul.f32 0.0, %v6141_v52  ;;  %vm6162_vm5 = vcmp.ge.f32.partialorder %v6141_v52, 0.0 }
 0x630   :  { %v6142_v28 = vadd.f32 %v12447_v35, %v6112_v22 }
 0x631   :  { %v6017_v57 = vpop.f32.mrb[112].mxu1 }
 0x632   :  { %v6113_v0 = vadd.f32 %v6017_v57, %v12385_v36  ;;  %v8683_v13 = vpop.f32.mrb[113].mxu1  ;;  %v6184_v10 = vmul.f32 0.0, %v6142_v28  ;;  %vm6163_vm0 = vcmp.ge.f32.partialorder %v6142_v28, 0.0 }
 0x634   :  { %v6143_v56 = vadd.f32 %v12447_v35, %v6113_v0  ;;  %v12455_v47 = vsel %vm6163_vm0, %v6142_v28, %v6184_v10 }
 0x635   :  { %v6022_v46 = vpop.f32.mrb[114].mxu1 }
 0x636   :  { %v6114_v5 = vadd.f32 %v6022_v46, %v12388_v11  ;;  %v8686_v38 = vpop.f32.mrb[115].mxu1  ;;  %v6185_v59 = vmul.f32 0.0, %v6143_v56  ;;  %vm6164_vm6 = vcmp.ge.f32.partialorder %v6143_v56, 0.0  ;;  %v12458_v11 = vsel %vm6162_vm5, %v6141_v52, %v6183_v26  ;;  %v12953_v46 = vld [vmem:[#allocation8_spill] sm:$0xff] }
 0x637   :  { %v6225_v23 = vmul.f32 %v12458_v11, %v9236_v7 }
 0x638   :  { %v6144_v36 = vadd.f32 %v12447_v35, %v6114_v5  ;;  %v12460_v30 = vsel %vm6164_vm6, %v6143_v56, %v6185_v59 }
 0x639   :  { %v6027_v63 = vpop.f32.mrb[116].mxu1  ;;  %v6227_v49 = vmul.f32 %v12460_v30, %v9241_v15  ;;  %v6295_v17 = vmul.f32 %v6225_v23, %v12458_v11  ;;  %v6247_v38 = vsel %vm6246_vm10, %v6225_v23, 0.0 }
 0x63a   :  { %v6115_v37 = vadd.f32 %v6027_v63, %v12391_v31  ;;  %v8689_v51 = vpop.f32.mrb[117].mxu1  ;;  %v6186_v27 = vmul.f32 0.0, %v6144_v36  ;;  %vm6165_vm7 = vcmp.ge.f32.partialorder %v6144_v36, 0.0  ;;  %v6226_v31 = vmul.f32 %v12455_v47, %v9245_v18 }
 0x63b   :  { %v6297_v29 = vmul.f32 %v6227_v49, %v12460_v30  ;;  %v6316_v10 = vsel %vm6246_vm10, %v6295_v17, 0.0 }
 0x63c   :  { %v6145_v55 = vadd.f32 %v12447_v35, %v6115_v37  ;;  %v12470_v3 = vsel %vm6165_vm7, %v6144_v36, %v6186_v27  ;;  %v6296_v39 = vmul.f32 %v6226_v31, %v12455_v47  ;;  %v6248_v0 = vsel %vm6246_vm10, %v6226_v31, 0.0  ;;  %v12954_v36 = vld [vmem:[#allocation9_spill] sm:$0xff] }
 0x63d   :  { %v6032_v20 = vpop.f32.mrb[118].mxu1  ;;  %v6228_v9 = vmul.f32 %v12470_v3, %v12952_v42  ;;  %v6319_v59 = vsel %vm6246_vm10, %v6297_v29, 0.0 }
 0x63e   :  { %v6116_v40 = vadd.f32 %v6032_v20, %v12394_v24  ;;  %v8692_v12 = vpop.f32.mrb[119].mxu1  ;;  %v6187_v32 = vmul.f32 0.0, %v6145_v55  ;;  %vm6166_vm8 = vcmp.ge.f32.partialorder %v6145_v55, 0.0  ;;  %v6317_v13 = vsel %vm6246_vm10, %v6296_v39, 0.0 }
 0x63f   :  { %v6298_v28 = vmul.f32 %v6228_v9, %v12470_v3  ;;  %v6318_v20 = vadd.f32 %v6317_v13, %v6316_v10  ;;  %v12955_v12 = vld [vmem:[#allocation10_spill] sm:$0xff]  ;;  %v12957_v10 = vld [vmem:[#allocation12_spill] sm:$0xff] }
 0x640   :  { %v6146_v2 = vadd.f32 %v12447_v35, %v6116_v40  ;;  %v12479_v45 = vsel %vm6166_vm8, %v6145_v55, %v6187_v32  ;;  %v6249_v55 = vadd.f32 %v6248_v0, %v6247_v38  ;;  %v6252_v40 = vsel %vm6246_vm10, %v6228_v9, 0.0 }
 0x641   :  { %v6037_v19 = vpop.f32.mrb[120].mxu1  ;;  %v6229_v52 = vmul.f32 %v12479_v45, %v12953_v46 }
 0x642   :  { %v6188_v21 = vmul.f32 0.0, %v6146_v2  ;;  %v6117_v24 = vadd.f32 %v6037_v19, %v12397_v60  ;;  %v8695_v58 = vpop.f32.mrb[121].mxu1  ;;  %vm6167_vm9 = vcmp.ge.f32.partialorder %v6146_v2, 0.0 }
 0x643   :  { %v6299_v23 = vmul.f32 %v6229_v52, %v12479_v45  ;;  %v6254_v9 = vsel %vm6246_vm10, %v6229_v52, 0.0 }
 0x644   :  { %v6147_v41 = vadd.f32 %v12447_v35, %v6117_v24  ;;  %v12481_v22 = vsel %vm6167_vm9, %v6146_v2, %v6188_v21  ;;  %v6321_v2 = vsel %vm6246_vm10, %v6298_v28, 0.0  ;;  %v6320_v21 = vadd.f32 %v6319_v59, %v6318_v20  ;;  %v12956_v24 = vld [vmem:[#allocation11_spill] sm:$0xff] }
 0x645   :  { %v6042_v4 = vpop.f32.mrb[122].mxu1  ;;  %v6230_v63 = vmul.f32 %v12481_v22, %v12954_v36 }
 0x646   :  { %vm6168_vm11 = vcmp.ge.f32.partialorder %v6147_v41, 0.0  ;;  %v6189_v60 = vmul.f32 0.0, %v6147_v41  ;;  %v6118_v48 = vadd.f32 %v6042_v4, %v12400_v33  ;;  %v8698_v57 = vpop.f32.mrb[123].mxu1  ;;  %v6250_v33 = vsel %vm6246_vm10, %v6227_v49, 0.0 }
 0x647   :  { %v6251_v19 = vadd.f32 %v6250_v33, %v6249_v55  ;;  %v6323_v57 = vsel %vm6246_vm10, %v6299_v23, 0.0  ;;  %v6256_v0 = vsel %vm6246_vm10, %v6230_v63, 0.0 }
 0x648   :  { %v12489_v56 = vsel %vm6168_vm11, %v6147_v41, %v6189_v60  ;;  %v6148_v5 = vadd.f32 %v12447_v35, %v6118_v48  ;;  %v6322_v60 = vadd.f32 %v6321_v2, %v6320_v21  ;;  %v12958_v21 = vld [vmem:[#allocation13_spill] sm:$0xff] }
 0x649   :  { %v6047_v26 = vpop.f32.mrb[124].mxu1  ;;  %v6231_v31 = vmul.f32 %v12489_v56, %v12955_v12  ;;  %v6253_v4 = vadd.f32 %v6252_v40, %v6251_v19 }
 0x64a   :  { %vm6169_vm12 = vcmp.ge.f32.partialorder %v6148_v5, 0.0  ;;  %v6190_v37 = vmul.f32 0.0, %v6148_v5  ;;  %v6119_v51 = vadd.f32 %v6047_v26, %v12403_v62  ;;  %v8701_v27 = vpop.f32.mrb[125].mxu1  ;;  %v6300_v62 = vmul.f32 %v6230_v63, %v12481_v22 }
 0x64b   :  { %v6301_v48 = vmul.f32 %v6231_v31, %v12489_v56  ;;  %v6258_v26 = vsel %vm6246_vm10, %v6231_v31, 0.0 }
 0x64c   :  { %v12504_v49 = vsel %vm6169_vm12, %v6148_v5, %v6190_v37  ;;  %v6149_v32 = vadd.f32 %v12447_v35, %v6119_v51  ;;  %v6255_v5 = vadd.f32 %v6254_v9, %v6253_v4  ;;  %v6325_v52 = vsel %vm6246_vm10, %v6300_v62, 0.0 }
 0x64d   :  { %v6232_v58 = vmul.f32 %v12504_v49, %v12956_v24  ;;  %v6052_v39 = vpop.f32.mrb[126].mxu1  ;;  %v6324_v51 = vadd.f32 %v6323_v57, %v6322_v60  ;;  %v6327_v55 = vsel %vm6246_vm10, %v6301_v48, 0.0  ;;  %v12539_v60 = vld.sshfl [vmem:[%s12852_s14] sm:$0x33 pattern:$0x76325410] }
 0x64e   :  { %vm6170_vm13 = vcmp.ge.f32.partialorder %v6149_v32, 0.0  ;;  %v6191_v41 = vmul.f32 0.0, %v6149_v32  ;;  %v6120_v17 = vadd.f32 %v6052_v39, %v12406_v54  ;;  %v8704_v29 = vpop.f32.mrb[127].mxu1  ;;  %v6257_v27 = vadd.f32 %v6256_v0, %v6255_v5  ;;  %12959 = vst [vmem:[#allocation7_spill] sm:$0xff] %v12539_v60 }
 0x64f   :  { %v6302_v38 = vmul.f32 %v6232_v58, %v12504_v49  ;;  %v6260_v20 = vsel %vm6246_vm10, %v6232_v58, 0.0 }
 0x650   :  { %v12515_v13 = vsel %vm6170_vm13, %v6149_v32, %v6191_v41  ;;  %v6150_v28 = vadd.f32 %v12447_v35, %v6120_v17  ;;  %v6326_v32 = vadd.f32 %v6325_v52, %v6324_v51  ;;  %v6259_v19 = vadd.f32 %v6258_v26, %v6257_v27 }
 0x651   :  { %v6233_v54 = vmul.f32 %v12515_v13, %v12957_v10  ;;  %v6057_v33 = vpop.f32.mrb[128].mxu1  ;;  %v6329_v31 = vsel %vm6246_vm10, %v6302_v38, 0.0  ;;  %v12960_v38 = vld [vmem:[#allocation14_spill] sm:$0xff] }
 0x652   :  { %vm6171_vm14 = vcmp.ge.f32.partialorder %v6150_v28, 0.0  ;;  %v6192_v59 = vmul.f32 0.0, %v6150_v28  ;;  %v6121_v37 = vadd.f32 %v6057_v33, %v12409_v44  ;;  %v8707_v63 = vpop.f32.mrb[129].mxu1  ;;  %v6328_v17 = vadd.f32 %v6327_v55, %v6326_v32 }
 0x653   :  { %v6303_v40 = vmul.f32 %v6233_v54, %v12515_v13  ;;  %v6262_v39 = vsel %vm6246_vm10, %v6233_v54, 0.0  ;;  %v6261_v29 = vadd.f32 %v6260_v20, %v6259_v19 }
 0x654   :  { %v12527_v2 = vsel %vm6171_vm14, %v6150_v28, %v6192_v59  ;;  %v6151_v23 = vadd.f32 %v12447_v35, %v6121_v37  ;;  %v6330_v28 = vadd.f32 %v6329_v31, %v6328_v17  ;;  %v12961_v31 = vld [vmem:[#allocation15_spill] sm:$0xff] }
 0x655   :  { %v6234_v44 = vmul.f32 %v12527_v2, %v12958_v21  ;;  %v6062_v62 = vpop.f32.mrb[130].mxu1  ;;  %v6331_v48 = vsel %vm6246_vm10, %v6303_v40, 0.0  ;;  %v6263_v5 = vadd.f32 %v6262_v39, %v6261_v29 }
 0x656   :  { %vm6172_vm15 = vcmp.ge.f32.partialorder %v6151_v23, 0.0  ;;  %v6193_v9 = vmul.f32 0.0, %v6151_v23  ;;  %v6122_v58 = vadd.f32 %v6062_v62, %v12412_v50  ;;  %v8710_v41 = vpop.f32.mrb[131].mxu1  ;;  %v6494_v50 = vcombine.high %v12539_v60, %v12539_v60 }
 0x657   :  { %v6304_v4 = vmul.f32 %v6234_v44, %v12527_v2  ;;  %v6264_v52 = vsel %vm6246_vm10, %v6234_v44, 0.0  ;;  %v6332_v51 = vadd.f32 %v6331_v48, %v6330_v28  ;;  %v12962_v28 = vld [vmem:[#allocation16_spill] sm:$0xff] }
 0x658   :  { %v12542_v57 = vsel %vm6172_vm15, %v6151_v23, %v6193_v9  ;;  %v6152_v0 = vadd.f32 %v12447_v35, %v6122_v58  ;;  %7030 = vmatprep.mubr.msk.f32.mxu0 %vm6496_vm1, %v6494_v50  ;;  %v6265_v20 = vadd.f32 %v6264_v52, %v6263_v5 }
 0x659   :  { %v6235_v54 = vmul.f32 %v12542_v57, %v12960_v38  ;;  %v6067_v33 = vpop.f32.mrb[132].mxu1  ;;  %v6333_v26 = vsel %vm6246_vm10, %v6304_v4, 0.0 }
 0x65a   :  { %vm6173_vm2 = vcmp.ge.f32.partialorder %v6152_v0, 0.0  ;;  %v6194_v59 = vmul.f32 0.0, %v6152_v0  ;;  %v6123_v37 = vadd.f32 %v6067_v33, %v12415_v43  ;;  %v8713_v63 = vpop.f32.mrb[133].mxu1  ;;  %v6334_v32 = vadd.f32 %v6333_v26, %v6332_v51 }
 0x65b   :  { %v6266_v27 = vsel %vm6246_vm10, %v6235_v54, 0.0  ;;  %v6305_v55 = vmul.f32 %v6235_v54, %v12542_v57 }
 0x65c   :  { %v12554_v40 = vsel %vm6173_vm2, %v6152_v0, %v6194_v59  ;;  %v6153_v23 = vadd.f32 %v12447_v35, %v6123_v37  ;;  %v6267_v43 = vadd.f32 %v6266_v27, %v6265_v20  ;;  %v12963_v20 = vld [vmem:[#allocation17_spill] sm:$0xff] }
 0x65d   :  { %v6335_v19 = vsel %vm6246_vm10, %v6305_v55, 0.0  ;;  %v6236_v44 = vmul.f32 %v12554_v40, %v12961_v31  ;;  %v6072_v62 = vpop.f32.mrb[134].mxu1 }
 0x65e   :  { %vm6174_vm3 = vcmp.ge.f32.partialorder %v6153_v23, 0.0  ;;  %v6195_v39 = vmul.f32 0.0, %v6153_v23  ;;  %v6124_v9 = vadd.f32 %v6072_v62, %v12418_v14  ;;  %v8716_v58 = vpop.f32.mrb[135].mxu1  ;;  %v6336_v29 = vadd.f32 %v6335_v19, %v6334_v32 }
 0x65f   :  { %v6268_v41 = vsel %vm6246_vm10, %v6236_v44, 0.0  ;;  %v6306_v17 = vmul.f32 %v6236_v44, %v12554_v40 }
 0x660   :  { %v6269_v4 = vadd.f32 %v6268_v41, %v6267_v43  ;;  %v12563_v48 = vsel %vm6174_vm3, %v6153_v23, %v6195_v39  ;;  %v6154_v0 = vadd.f32 %v12447_v35, %v6124_v9 }
 0x661   :  { %v6337_v50 = vsel %vm6246_vm10, %v6306_v17, 0.0  ;;  %v6237_v5 = vmul.f32 %v12563_v48, %v12962_v28  ;;  %v6077_v52 = vpop.f32.mrb[136].mxu1 }
 0x662   :  { %v6338_v54 = vadd.f32 %v6337_v50, %v6336_v29  ;;  %vm6175_vm4 = vcmp.ge.f32.partialorder %v6154_v0, 0.0  ;;  %v6196_v14 = vmul.f32 0.0, %v6154_v0  ;;  %v6125_v33 = vadd.f32 %v6077_v52, %v12421_v16  ;;  %v8719_v26 = vpop.f32.mrb[137].mxu1  ;;  %v12964_v29 = vld [vmem:[#allocation18_spill] sm:$0xff] }
 0x663   :  { %v6270_v59 = vsel %vm6246_vm10, %v6237_v5, 0.0  ;;  %v6307_v37 = vmul.f32 %v6237_v5, %v12563_v48 }
 0x664   :  { %v6271_v63 = vadd.f32 %v6270_v59, %v6269_v4  ;;  %v12572_v51 = vsel %vm6175_vm4, %v6154_v0, %v6196_v14  ;;  %v6155_v27 = vadd.f32 %v12447_v35, %v6125_v33 }
 0x665   :  { %v6339_v55 = vsel %vm6246_vm10, %v6307_v37, 0.0  ;;  %v6238_v23 = vmul.f32 %v12572_v51, %v12963_v20  ;;  %v6082_v32 = vpop.f32.mrb[138].mxu1 }
 0x666   :  { %v6340_v19 = vadd.f32 %v6339_v55, %v6338_v54  ;;  %vm6176_vm0 = vcmp.ge.f32.partialorder %v6155_v27, 0.0  ;;  %v6197_v44 = vmul.f32 0.0, %v6155_v27  ;;  %v6126_v16 = vadd.f32 %v6082_v32, %v12424_v53  ;;  %v8722_v62 = vpop.f32.mrb[139].mxu1 }
 0x667   :  { %v6272_v43 = vsel %vm6246_vm10, %v6238_v23, 0.0  ;;  %v6308_v39 = vmul.f32 %v6238_v23, %v12572_v51 }
 0x668   :  { %v6273_v9 = vadd.f32 %v6272_v43, %v6271_v63  ;;  %v12581_v58 = vsel %vm6176_vm0, %v6155_v27, %v6197_v44  ;;  %v6156_v41 = vadd.f32 %v12447_v35, %v6126_v16  ;;  %v12965_v63 = vld [vmem:[#allocation19_spill] sm:$0xff] }
 0x669   :  { %v6341_v17 = vsel %vm6246_vm10, %v6308_v39, 0.0  ;;  %v6239_v4 = vmul.f32 %v12581_v58, %v12964_v29  ;;  %v6087_v0 = vpop.f32.mrb[140].mxu1 }
 0x66a   :  { %v6342_v50 = vadd.f32 %v6341_v17, %v6340_v19  ;;  %vm6177_vm5 = vcmp.ge.f32.partialorder %v6156_v41, 0.0  ;;  %v6198_v5 = vmul.f32 0.0, %v6156_v41  ;;  %v6127_v53 = vadd.f32 %v6087_v0, %v12427_v8  ;;  %v8725_v52 = vpop.f32.mrb[141].mxu1 }
 0x66b   :  { %v6274_v54 = vsel %vm6246_vm10, %v6239_v4, 0.0  ;;  %v6309_v14 = vmul.f32 %v6239_v4, %v12581_v58 }
 0x66c   :  { %v6275_v33 = vadd.f32 %v6274_v54, %v6273_v9  ;;  %v12590_v26 = vsel %vm6177_vm5, %v6156_v41, %v6198_v5  ;;  %v6157_v59 = vadd.f32 %v12447_v35, %v6127_v53  ;;  %v12966_v41 = vld [vmem:[#allocation20_spill] sm:$0xff] }
 0x66d   :  { %v6343_v37 = vsel %vm6246_vm10, %v6309_v14, 0.0  ;;  %v6240_v27 = vmul.f32 %v12590_v26, %v12965_v63  ;;  %v6092_v55 = vpop.f32.mrb[142].mxu1 }
 0x66e   :  { %v6344_v23 = vadd.f32 %v6343_v37, %v6342_v50  ;;  %vm6178_vm6 = vcmp.ge.f32.partialorder %v6157_v59, 0.0  ;;  %v6199_v32 = vmul.f32 0.0, %v6157_v59  ;;  %v6128_v8 = vadd.f32 %v6092_v55, %v12430_v34  ;;  %v8728_v19 = vpop.f32.mrb[143].mxu1  ;;  %v12967_v37 = vld [vmem:[#allocation21_spill] sm:$0xff] }
 0x66f   :  { %v6276_v44 = vsel %vm6246_vm10, %v6240_v27, 0.0  ;;  %v6310_v16 = vmul.f32 %v6240_v27, %v12590_v26 }
 0x670   :  { %v6277_v62 = vadd.f32 %v6276_v44, %v6275_v33  ;;  %v12599_v43 = vsel %vm6178_vm6, %v6157_v59, %v6199_v32  ;;  %v6158_v39 = vadd.f32 %v12447_v35, %v6128_v8 }
 0x671   :  { %v6345_v9 = vsel %vm6246_vm10, %v6310_v16, 0.0  ;;  %v6241_v17 = vmul.f32 %v12599_v43, %v12966_v41  ;;  %v6097_v4 = vpop.f32.mrb[144].mxu1 }
 0x672   :  { %v6346_v0 = vadd.f32 %v6345_v9, %v6344_v23  ;;  %vm6179_vm7 = vcmp.ge.f32.partialorder %v6158_v39, 0.0  ;;  %v6200_v50 = vmul.f32 0.0, %v6158_v39  ;;  %v6129_v34 = vadd.f32 %v6097_v4, %v12433_v61  ;;  %v8731_v5 = vpop.f32.mrb[145].mxu1 }
 0x673   :  { %v6278_v53 = vsel %vm6246_vm10, %v6241_v17, 0.0  ;;  %v6311_v52 = vmul.f32 %v6241_v17, %v12599_v43  ;;  %v12968_v17 = vld [vmem:[#allocation22_spill] sm:$0xff] }
 0x674   :  { %v6279_v54 = vadd.f32 %v6278_v53, %v6277_v62  ;;  %v12608_v14 = vsel %vm6179_vm7, %v6158_v39, %v6200_v50  ;;  %v6159_v33 = vadd.f32 %v12447_v35, %v6129_v34 }
 0x675   :  { %v6347_v59 = vsel %vm6246_vm10, %v6311_v52, 0.0  ;;  %v6242_v27 = vmul.f32 %v12608_v14, %v12967_v37  ;;  %v6102_v55 = vpop.f32.mrb[146].mxu1 }
 0x676   :  { %v6348_v23 = vadd.f32 %v6347_v59, %v6346_v0  ;;  %vm6180_vm8 = vcmp.ge.f32.partialorder %v6159_v33, 0.0  ;;  %v6201_v32 = vmul.f32 0.0, %v6159_v33  ;;  %v6130_v61 = vadd.f32 %v6102_v55, %v12436_v6  ;;  %v8734_v8 = vpop.f32.mrb[147].mxu1  ;;  %v12969_v55 = vld [vmem:[#allocation23_spill] sm:$0xff] }
 0x677   :  { %v6280_v19 = vsel %vm6246_vm10, %v6242_v27, 0.0  ;;  %v6312_v44 = vmul.f32 %v6242_v27, %v12608_v14 }
 0x678   :  { %v6281_v16 = vadd.f32 %v6280_v19, %v6279_v54  ;;  %v12617_v62 = vsel %vm6180_vm8, %v6159_v33, %v6201_v32  ;;  %v6160_v39 = vadd.f32 %v12447_v35, %v6130_v61 }
 0x679   :  { %v6349_v9 = vsel %vm6246_vm10, %v6312_v44, 0.0  ;;  %v6243_v4 = vmul.f32 %v12617_v62, %v12968_v17  ;;  %v6107_v0 = vpop.f32.mrb[148].mxu1 }
 0x67a   :  { %v6350_v50 = vadd.f32 %v6349_v9, %v6348_v23  ;;  %vm6181_vm9 = vcmp.ge.f32.partialorder %v6160_v39, 0.0  ;;  %v6202_v34 = vmul.f32 0.0, %v6160_v39  ;;  %v6131_v6 = vadd.f32 %v6107_v0, %v12439_v1  ;;  %v8737_v5 = vpop.f32.mrb[149].mxu1 }
 0x67b   :  { %v6282_v53 = vsel %vm6246_vm10, %v6243_v4, 0.0  ;;  %v6313_v52 = vmul.f32 %v6243_v4, %v12617_v62 }
 0x67c   :  { %v6283_v54 = vadd.f32 %v6282_v53, %v6281_v16  ;;  %v12626_v33 = vsel %vm6181_vm9, %v6160_v39, %v6202_v34  ;;  %v6161_v59 = vadd.f32 %v12447_v35, %v6131_v6  ;;  %v12970_v39 = vld [vmem:[#allocation24_spill] sm:$0xff] }
 0x67d   :  { %v6351_v27 = vsel %vm6246_vm10, %v6313_v52, 0.0  ;;  %v6244_v32 = vmul.f32 %v12626_v33, %v12969_v55 }
 0x67e   :  { %v6352_v23 = vadd.f32 %v6351_v27, %v6350_v50  ;;  %vm6182_vm11 = vcmp.ge.f32.partialorder %v6161_v59, 0.0  ;;  %v6203_v61 = vmul.f32 0.0, %v6161_v59 }
 0x67f   :  { %v6284_v1 = vsel %vm6246_vm10, %v6244_v32, 0.0  ;;  %v6314_v8 = vmul.f32 %v6244_v32, %v12626_v33 }
 0x680   :  { %v6285_v19 = vadd.f32 %v6284_v1, %v6283_v54  ;;  %v6224_v44 = vsel %vm6182_vm11, %v6161_v59, %v6203_v61 }
 0x681   :  { %v6353_v16 = vsel %vm6246_vm10, %v6314_v8, 0.0  ;;  %v6245_v9 = vmul.f32 %v6224_v44, %v12970_v39 }
 0x682   :  { %v6354_v4 = vadd.f32 %v6353_v16, %v6352_v23 }
 0x683   :  { %v6286_v35 = vsel %vm6246_vm10, %v6245_v9, 0.0  ;;  %v6315_v0 = vmul.f32 %v6245_v9, %v6224_v44 }
 0x684   :  { %v6287_v34 = vadd.f32 %v6286_v35, %v6285_v19 }
 0x685   :  { %v6355_v6 = vsel %vm6246_vm10, %v6315_v0, 0.0  ;;  %vm6569_vm10 = vcmask 33792  }
 0x686   :  { %v6288_v50 = vrot.slane %v6287_v34, 4  ;;  %v6356_v5 = vadd.f32 %v6355_v6, %v6354_v4 }
 0x688   :  { %v6289_v53 = vadd.f32 %v6288_v50, %v6287_v34  ;;  %v6357_v52 = vrot.slane %v6356_v5, 4 }
 0x68a   :  { %v6290_v27 = vrot.slane %v6289_v53, 2  ;;  %v6358_v60 = vadd.f32 %v6357_v52, %v6356_v5 }
 0x68c   :  { %v6291_v32 = vadd.f32 %v6290_v27, %v6289_v53  ;;  %v6359_v54 = vrot.slane %v6358_v60, 2 }
 0x68e   :  { %v6292_v59 = vrot.slane %v6291_v32, 1  ;;  %v6360_v61 = vadd.f32 %v6359_v54, %v6358_v60 }
 0x690   :  { %v6293_v1 = vadd.f32 %v6292_v59, %v6291_v32  ;;  %v6361_v8 = vrot.slane %v6360_v61, 1 }
 0x692   :  { %v12638_v39 = vmul.f32 0.010204081, %v6293_v1  ;;  %v6362_v23 = vadd.f32 %v6361_v8, %v6360_v61 }
 0x694   :  { %v6363_v16 = vmul.f32 0.010204081, %v6362_v23  ;;  %v6364_v19 = vmul.f32 %v12638_v39, %v12638_v39  ;;  %v6386_v9 = vsub.f32 %v6224_v44, %v12638_v39  ;;  %v6376_v35 = vsub.f32 %v12542_v57, %v12638_v39 }
 0x695   :  { %v6377_v0 = vsub.f32 %v12554_v40, %v12638_v39  ;;  %v6378_v60 = vsub.f32 %v12563_v48, %v12638_v39  ;;  %v6379_v6 = vsub.f32 %v12572_v51, %v12638_v39  ;;  %v6380_v50 = vsub.f32 %v12581_v58, %v12638_v39 }
 0x696   :  { %v6365_v4 = vsub.f32 %v6363_v16, %v6364_v19  ;;  %v6381_v44 = vsub.f32 %v12590_v26, %v12638_v39  ;;  %v6382_v5 = vsub.f32 %v12599_v43, %v12638_v39  ;;  %v6366_v32 = vsub.f32 %v12458_v11, %v12638_v39  ;;  %v12680_v11 = vld [vmem:[%s12849_s11] ss:$0 sm:$0xff] }
 0x697   :  { %v6367_v54 = vsub.f32 %v12455_v47, %v12638_v39  ;;  %v6368_v59 = vsub.f32 %v12460_v30, %v12638_v39  ;;  %v6369_v61 = vsub.f32 %v12470_v3, %v12638_v39  ;;  %v6370_v1 = vsub.f32 %v12479_v45, %v12638_v39 }
 0x698   :  { %v6387_v34 = vadd.f32 1e-05, %v6365_v4  ;;  %v6371_v8 = vsub.f32 %v12481_v22, %v12638_v39  ;;  %v6372_v47 = vsub.f32 %v12489_v56, %v12638_v39  ;;  %v6373_v30 = vsub.f32 %v12504_v49, %v12638_v39  ;;  %v12699_v56 = vld [vmem:[%s12850_s12] ss:$0 sm:$0xff]  ;;  %s8860_s12 = smov [#allocation4]  }
 0x699   :  { %v6374_v3 = vsub.f32 %v12515_v13, %v12638_v39  ;;  %v6375_v45 = vsub.f32 %v12527_v2, %v12638_v39  ;;  %v12973_v43 = vsub.f32 %v12617_v62, %v12638_v39  ;;  %s6588_s0 = sshll.u32 %s8860_s12, 4  ;;  %s6589_s0 = int_to_ptr.vmem [resolvable:$true] %s6588_s0 }
 0x69a   :  { %8825 = vrsqrt.f32 %v6387_v34  ;;  %s8831_s8 = scalar_lea.vmem %s6589_s0, 32  ;;  %p8836_p1 = scmp.lt.s32.totalorder %s6589_s0, %s6589_s0 }
 0x69b   :  { %p8832_p0 = scmp.ne.s32.totalorder %s6589_s0, %s8831_s8  ;;  %p8837_p2 = scmp.lt.s32.totalorder %s8831_s8, %s8831_s8 }
 0x69d   :  { %p8838_p3 = por %p8837_p2, %p8836_p1 }
 0x69f   :  { %p8839_p4 = pnand %p8838_p3, %p8832_p0 }
 0x6a4   :  { %v12675_v23 = vpop.eup %8825 }
 0x6a5   :  { %v12691_v22 = vmul.f32 %v12675_v23, %v6386_v9  ;;  %v6389_v16 = vmul.f32 %v12675_v23, %v6366_v32  ;;  %v6390_v19 = vmul.f32 %v12675_v23, %v6367_v54  ;;  %v6391_v4 = vmul.f32 %v12675_v23, %v6368_v59 }
 0x6a6   :  { %v6392_v49 = vmul.f32 %v12675_v23, %v6369_v61  ;;  %v6393_v13 = vmul.f32 %v12675_v23, %v6370_v1  ;;  %v6394_v2 = vmul.f32 %v12675_v23, %v6371_v8  ;;  %v6395_v9 = vmul.f32 %v12675_v23, %v6372_v47 }
 0x6a7   :  { %v6416_v34 = vmul.f32 %v12680_v11, %v6389_v16  ;;  %v6417_v32 = vmul.f32 %v12680_v11, %v6390_v19  ;;  %v6418_v54 = vmul.f32 %v12680_v11, %v6391_v4  ;;  %v6396_v59 = vmul.f32 %v12675_v23, %v6373_v30 }
 0x6a8   :  { %v6419_v27 = vmul.f32 %v12680_v11, %v6392_v49  ;;  %v6420_v52 = vmul.f32 %v12680_v11, %v6393_v13  ;;  %v6421_v61 = vmul.f32 %v12680_v11, %v6394_v2  ;;  %v6422_v1 = vmul.f32 %v12680_v11, %v6395_v9 }
 0x6a9   :  { %v6443_v8 = vadd.f32 %v12699_v56, %v6416_v34  ;;  %v6444_v47 = vadd.f32 %v12699_v56, %v6417_v32  ;;  %v6445_v16 = vadd.f32 %v12699_v56, %v6418_v54  ;;  %v6423_v19 = vmul.f32 %v12680_v11, %v6396_v59 }
 0x6aa   :  { %v6446_v4 = vadd.f32 %v12699_v56, %v6419_v27  ;;  %v6447_v30 = vadd.f32 %v12699_v56, %v6420_v52  ;;  %v6448_v49 = vadd.f32 %v12699_v56, %v6421_v61  ;;  %v6449_v13 = vadd.f32 %v12699_v56, %v6422_v1 }
 0x6ab   :  { %v6464_v2 = vmul.f32 %v6443_v8, %v9236_v7  ;;  %v6465_v9 = vmul.f32 %v6444_v47, %v9245_v18  ;;  %v6466_v34 = vmul.f32 %v6445_v16, %v9241_v15  ;;  %v6450_v32 = vadd.f32 %v12699_v56, %v6423_v19 }
 0x6ac   :  { %v6467_v54 = vmul.f32 %v6446_v4, %v12952_v42  ;;  %v6468_v59 = vmul.f32 %v6447_v30, %v12953_v46  ;;  %v6469_v27 = vmul.f32 %v6448_v49, %v12954_v36  ;;  %v6470_v52 = vmul.f32 %v6449_v13, %v12955_v12 }
 0x6ad   :  { %v8782_v53 = vpack.c.bf16 %v6465_v9, %v6464_v2  ;;  %v6471_v61 = vmul.f32 %v6450_v32, %v12956_v24  ;;  %v6397_v1 = vmul.f32 %v12675_v23, %v6374_v3  ;;  %v6398_v7 = vmul.f32 %v12675_v23, %v6375_v45 }
 0x6ae   :  { %v8785_v18 = vpack.c.bf16 %v6467_v54, %v6466_v34  ;;  %v8788_v8 = vpack.c.bf16 %v6469_v27, %v6468_v59  ;;  %v6399_v15 = vmul.f32 %v12675_v23, %v6376_v35  ;;  %v6400_v42 = vmul.f32 %v12675_v23, %v6377_v0 }
 0x6af   :  { %8783 = vmatpush1.bf16.msra.mxu0 %v8782_v53  ;;  %v8791_v46 = vpack.c.bf16 %v6471_v61, %v6470_v52  ;;  %v6424_v36 = vmul.f32 %v12680_v11, %v6397_v1  ;;  %v6425_v12 = vmul.f32 %v12680_v11, %v6398_v7  ;;  %v6401_v24 = vmul.f32 %v12675_v23, %v6378_v60 }
 0x6b0   :  { %v12971_v3 = vmov 0.0|0.0   ;;  %v6426_v57 = vmul.f32 %v12680_v11, %v6399_v15  ;;  %v6427_v35 = vmul.f32 %v12680_v11, %v6400_v42  ;;  %v6402_v40 = vmul.f32 %v12675_v23, %v6379_v6  ;;  %v12976_v42 = vld [vmem:[#allocation7_spill] sm:$0xff] }
 0x6b1   :  { %8784 = vmatprep.subr.bf16.mxu0 %v12971_v3  ;;  %v6403_v0 = vmul.f32 %v12675_v23, %v6380_v50  ;;  %v6451_v48 = vadd.f32 %v12699_v56, %v6424_v36  ;;  %v6452_v60 = vadd.f32 %v12699_v56, %v6425_v12  ;;  %v6428_v53 = vmul.f32 %v12680_v11, %v6401_v24 }
 0x6b2   :  { %v6404_v45 = vmul.f32 %v12675_v23, %v6381_v44  ;;  %v6453_v51 = vadd.f32 %v12699_v56, %v6426_v57  ;;  %v6454_v6 = vadd.f32 %v12699_v56, %v6427_v35  ;;  %v6429_v47 = vmul.f32 %v12680_v11, %v6402_v40 }
 0x6b3   :  { %v6430_v58 = vmul.f32 %v12680_v11, %v6403_v0  ;;  %8786 = vmatpush1.bf16.msra.mxu0 %v8785_v18  ;;  %v6472_v50 = vmul.f32 %v6451_v48, %v12957_v10  ;;  %v6473_v16 = vmul.f32 %v6452_v60, %v12958_v21  ;;  %v6455_v19 = vadd.f32 %v12699_v56, %v6428_v53 }
 0x6b4   :  { %v6431_v4 = vmul.f32 %v12680_v11, %v6404_v45  ;;  %8787 = vmatprep.subr.bf16.mxu0 %v12971_v3  ;;  %v6474_v26 = vmul.f32 %v6453_v51, %v12960_v38  ;;  %v6475_v44 = vmul.f32 %v6454_v6, %v12961_v31  ;;  %v6456_v30 = vadd.f32 %v12699_v56, %v6429_v47 }
 0x6b5   :  { %v6457_v49 = vadd.f32 %v12699_v56, %v6430_v58  ;;  %v8794_v13 = vpack.c.bf16 %v6473_v16, %v6472_v50  ;;  %v6476_v2 = vmul.f32 %v6455_v19, %v12962_v28  ;;  %v6405_v21 = vmul.f32 %v12675_v23, %v6382_v5 }
 0x6b6   :  { %v6458_v10 = vadd.f32 %v12699_v56, %v6431_v4  ;;  %v8797_v9 = vpack.c.bf16 %v6475_v44, %v6474_v26  ;;  %v6477_v34 = vmul.f32 %v6456_v30, %v12963_v20  ;;  %v12972_v31 = vsub.f32 %v12608_v14, %v12638_v39 }
 0x6b7   :  { %v6478_v38 = vmul.f32 %v6457_v49, %v12964_v29  ;;  %8789 = vmatpush1.bf16.msra.mxu0 %v8788_v8  ;;  %v6432_v54 = vmul.f32 %v12680_v11, %v6405_v21  ;;  %v6407_v5 = vmul.f32 %v12675_v23, %v12973_v43  ;;  %v12974_v20 = vsub.f32 %v12626_v33, %v12638_v39 }
 0x6b8   :  { %v6406_v32 = vmul.f32 %v12675_v23, %v12972_v31  ;;  %v6479_v28 = vmul.f32 %v6458_v10, %v12965_v63  ;;  %8790 = vmatprep.subr.bf16.mxu0 %v12971_v3  ;;  %v8800_v14 = vpack.c.bf16 %v6477_v34, %v6476_v2 }
 0x6b9   :  { %v6408_v29 = vmul.f32 %v12675_v23, %v12974_v20  ;;  %v6459_v63 = vadd.f32 %v12699_v56, %v6432_v54  ;;  %v6434_v52 = vmul.f32 %v12680_v11, %v6407_v5 }
 0x6ba   :  { %v6433_v59 = vmul.f32 %v12680_v11, %v6406_v32  ;;  %v8803_v27 = vpack.c.bf16 %v6479_v28, %v6478_v38 }
 0x6bb   :  { %v6435_v61 = vmul.f32 %v12680_v11, %v6408_v29  ;;  %8792 = vmatpush1.bf16.msra.mxu0 %v8791_v46  ;;  %v6480_v1 = vmul.f32 %v6459_v63, %v12966_v41  ;;  %v6461_v33 = vadd.f32 %v12699_v56, %v6434_v52  ;;  %v6436_v41 = vmul.f32 %v12680_v11, %v12691_v22 }
 0x6bc   :  { %v6460_v62 = vadd.f32 %v12699_v56, %v6433_v59  ;;  %8793 = vmatprep.subr.bf16.mxu0 %v12971_v3 }
 0x6bd   :  { %v6462_v39 = vadd.f32 %v12699_v56, %v6435_v61  ;;  %v6482_v7 = vmul.f32 %v6461_v33, %v12968_v17  ;;  %v12975_v17 = vld [vmem:[#allocation24_spill] sm:$0xff] }
 0x6be   :  { %v6481_v23 = vmul.f32 %v6460_v62, %v12967_v37  ;;  %v6463_v37 = vadd.f32 %v12699_v56, %v6436_v41 }
 0x6bf   :  { %v6483_v18 = vmul.f32 %v6462_v39, %v12969_v55  ;;  %8795 = vmatpush1.bf16.msra.mxu0 %v8794_v13 }
 0x6c0   :  { %v8806_v8 = vpack.c.bf16 %v6481_v23, %v6480_v1  ;;  %8796 = vmatprep.subr.bf16.mxu0 %v12971_v3  ;;  %v6484_v55 = vmul.f32 %v6463_v37, %v12975_v17 }
 0x6c1   :  { %v8809_v15 = vpack.c.bf16 %v6483_v18, %v6482_v7 }
 0x6c3   :  { %8798 = vmatpush1.bf16.msra.mxu0 %v8797_v9 }
 0x6c4   :  { %8799 = vmatprep.subr.bf16.mxu0 %v12971_v3 }
 0x6c7   :  { %8801 = vmatpush1.bf16.msra.mxu0 %v8800_v14 }
 0x6c8   :  { %8802 = vmatprep.subr.bf16.mxu0 %v12971_v3 }
 0x6cb   :  { %8804 = vmatpush1.bf16.msra.mxu0 %v8803_v27 }
 0x6cc   :  { %8805 = vmatprep.subr.bf16.mxu0 %v12971_v3 }
 0x6cf   :  { %8807 = vmatpush1.bf16.msra.mxu0 %v8806_v8 }
 0x6d0   :  { %8808 = vmatprep.subr.bf16.mxu0 %v12971_v3 }
 0x6d3   :  { %8810 = vmatpush1.bf16.msra.mxu0 %v8809_v15 }
 0x6d4   :  { %6539 = vmatprep.subr.mxu0 %v12930_v25 }
 0x6d7   :  { %6540 = vmatpush1.msra.mxu0 %v6484_v55 }
 0x6d8   :  { %6564 = vmatmul.mubr.f32.vlgmr.msra.gmra.mrb[136].mxu0 %v12976_v42 }
 0x7ab   :  { %v6565_v46 = vpop.f32.mrb[136].mxu0 }
 0x7ac   :  { %v6570_v36 = vsel %vm6569_vm10, %v6565_v46, -inf  ;;  %v6567_v12 = vpop.f32.mrb[137].mxu0 }
 0x7ad   :  { %6571 = vmax.xlane.f32.xlu1 %v6570_v36 }
 0x83a   :  { %v6572_v11 = vpop.xlane.xlu1 %6571 }
 0x83b   :  { %v6573_v22 = vsub.f32 %v6565_v46, %v6572_v11 }
 0x83d   :  { %v6574_v24 = vmul.f32 1.442695, %v6573_v22 }
 0x83f   :  { %8827 = vpow2.f32 %v6574_v24 }
 0x849   :  { %v8828_v3 = vpop.eup %8827 }
 0x84a   :  { %v6576_v56 = vsel %vm6569_vm10, %v8828_v3, 0.0 }
 0x84b   :  { %6577 = vadd.xlane.f32.xlu0 %v6576_v56 }
 0x8d8   :  { %v6578_v25 = vpop.xlane.xlu0 %6577 }
 0x8d9   :  { %8829 = vrcp.f32 %v6578_v25 }
 0x8e3   :  { %v8830_v57 = vpop.eup %8829 }
 0x8e4   :  { %v6580_v35 = vmul.f32 %v8830_v57, %v8828_v3 }
 0x8e6   :  { %6581 = vst.msk [vmem:[#allocation4] sm:$0x3] %vm6569_vm10, %v6580_v35 }
 0x8e7   :  { %8842 = shalt.err (!%p8839_p4)
}
 0x8e8   :  { %s8843_s5 = scalar_lea.hbm %s12853_s15, 32 }
 0x8e9   :  { %p8844_p5 = scmp.ne.s32.totalorder %s12853_s15, %s8843_s5  ;;  %p8847_p6 = scmp.lt.u32.totalorder %s8843_s5, %s12853_s15 }
 0x8eb   :  { %p8849_p7 = pnand %p8847_p6, %p8844_p5 }
 0x8ed   :  { %8852 = shalt.err (!%p8849_p7)
}
 0x8ee   :  { %6591 = dma.vmem_to_hbm [thread:$0]  %s6589_s0, 32, %s12853_s15, [#allocation5]  }
 0x8ef   :  { %8853 = dma.done.wait [#allocation5], 32  }
 0x8f0   :  { %8854 = vsyncadd [#allocation5], 4294967264 }
 0x8f1   :  { %6595 = vsyncpa [#allocation5], 1 }

</bundles_post_ra>
